<compile_context>
chip_gen: v7x
topology: tpu7x:2x2x1
jax: 0.10.0
libtpu: 0.0.40
codegen_flags: <defaults>
</compile_context>

<pallas_src>
import functools
import math

import jax
import jax.numpy as jnp
from jax.experimental import pallas as pl
from jax.experimental.pallas import tpu as pltpu


def _exp_dtype():
    """bf16 EUP/VPU exist on v6e and later; keep the softmax exp in f32 on older gens."""
    try:
        kind = jax.devices()[0].device_kind.lower()
    except Exception:
        return jnp.float32
    if any(tag in kind for tag in ("v2", "v3", "v4", "v5")):
        return jnp.float32
    return jnp.bfloat16


def _flash_attn_kernel(q_ref, k_ref, v_ref, o_ref, m_ref, l_ref, acc_ref, *, exp_dtype):
    """One (batch, q-tile, kv-tile) grid step of online-softmax attention.

    q_ref : (1, H, tq, d) bf16   (attention scale already folded into q)
    k_ref : (1, H, tk, d) bf16
    v_ref : (1, H, tk, d) bf16
    o_ref : (1, tq, H*d) bf16    lane-dense, token-major output tile
    m/l   : (H, tq, 1) f32 scratch (running max / denominator)
    acc   : (H, tq, d) f32 scratch (running numerator)
    """
    ki = pl.program_id(2)

    @pl.when(ki == 0)
    def _init():
        m_ref[...] = jnp.full(m_ref.shape, -jnp.inf, m_ref.dtype)
        l_ref[...] = jnp.zeros_like(l_ref)
        acc_ref[...] = jnp.zeros_like(acc_ref)

    q = q_ref[0]                                   # (H, tq, d) bf16
    k = k_ref[0]                                   # (H, tk, d) bf16
    v = v_ref[0]                                   # (H, tk, d) bf16

    # Batched NT matmul (contract on d) -> no explicit K transpose; f32 acc on MXU.
    s = jnp.einsum('hqd,hkd->hqk', q, k,
                   preferred_element_type=jnp.float32)            # (H, tq, tk) f32

    m_prev = m_ref[...]                                           # (H, tq, 1)
    m_new = jnp.maximum(m_prev, jnp.max(s, axis=-1, keepdims=True))
    alpha = jnp.exp(m_prev - m_new)                               # (H, tq, 1) f32

    # exp in bf16 on v6e/v7x (EUP bf16 ~2x), f32 on v5e; denominator summed in f32.
    p = jnp.exp((s - m_new).astype(exp_dtype))                    # (H, tq, tk)

    l_ref[...] = alpha * l_ref[...] + jnp.sum(
        p, axis=-1, keepdims=True, dtype=jnp.float32)
    acc_ref[...] = alpha * acc_ref[...] + jnp.einsum(
        'hqk,hkd->hqd', p.astype(jnp.bfloat16), v,
        preferred_element_type=jnp.float32)
    m_ref[...] = m_new

    @pl.when(ki == pl.num_programs(2) - 1)
    def _finalize():
        num_heads = acc_ref.shape[0]
        inv_l = pl.reciprocal(l_ref[...], approx=True)            # EUP slot
        out = (acc_ref[...] * inv_l).astype(o_ref.dtype)          # (H, tq, d) bf16
        # Merge heads along lanes -> one dense (tq, H*d) = (tq, 128) store.
        o_ref[0] = jnp.concatenate([out[hh] for hh in range(num_heads)], axis=-1)


def _pick_tile(n, prefs):
    for t in prefs:
        if t <= n and n % t == 0:
            return t
    return n


def _flash_attention(q, k, v):
    """q, k, v: (B, H, N, d) bf16 -> (B, N, H*d) bf16 (token-major, head-major channels)."""
    b, heads, n, d = q.shape
    hidden = heads * d

    # Small q tile to keep the (H, tq, tk) score/prob working set close to the
    # vreg file (spill pressure dominates, not VMEM capacity); moderate kv tile
    # to amortize the ~0.35us per-step overhead.
    tq = _pick_tile(n, (128, 256, 64, 32, 16, 8))
    tk = _pick_tile(n, (256, 128, 512, 64, 32, 16, 8))

    grid = (b, n // tq, n // tk)
    q_tiles = n // tq

    cost = pl.CostEstimate(
        flops=4 * b * heads * n * n * d,                       # QK^T + PV
        transcendentals=b * heads * n * n,                     # exp
        bytes_accessed=(b * heads * n * d * 2                  # Q read (bf16)
                        + 2 * b * heads * n * d * 2 * q_tiles  # K,V re-read per q tile
                        + b * n * hidden * 2),                 # output write (bf16)
    )

    kernel = functools.partial(_flash_attn_kernel, exp_dtype=_exp_dtype())

    return pl.pallas_call(
        kernel,
        out_shape=jax.ShapeDtypeStruct((b, n, hidden), jnp.bfloat16),
        grid_spec=pltpu.PrefetchScalarGridSpec(
            num_scalar_prefetch=0,
            grid=grid,
            in_specs=[
                pl.BlockSpec((1, heads, tq, d), lambda bi, qi, ki: (bi, 0, qi, 0)),
                pl.BlockSpec((1, heads, tk, d), lambda bi, qi, ki: (bi, 0, ki, 0)),
                pl.BlockSpec((1, heads, tk, d), lambda bi, qi, ki: (bi, 0, ki, 0)),
            ],
            out_specs=pl.BlockSpec((1, tq, hidden), lambda bi, qi, ki: (bi, qi, 0)),
            scratch_shapes=[
                pltpu.VMEM((heads, tq, 1), jnp.float32),   # running max m
                pltpu.VMEM((heads, tq, 1), jnp.float32),   # running denom l
                pltpu.VMEM((heads, tq, d), jnp.float32),   # running numerator acc
            ],
        ),
        compiler_params=pltpu.CompilerParams(
            dimension_semantics=("parallel", "parallel", "arbitrary")),
        cost_estimate=cost,
    )(q, k, v)


def attention_forward(x_nchw, w_qkv, w_out, b_out, *, heads, dim_head):
    """Forward pass matching torch Attention.forward.

    x_nchw : (b, C, H, W)
    w_qkv  : (3*heads*dim_head, C, 1, 1)   Conv2d weight, no bias
    w_out  : (C, heads*dim_head, 1, 1)     Conv2d weight
    b_out  : (C,)                          Conv2d bias
    returns (b, C, H, W)
    """
    b, c, h, w = x_nchw.shape
    hidden = heads * dim_head
    n = h * w
    scale = dim_head ** (-0.5)

    # qkv 1x1-conv as one GEMM with the q/k/v + head split fused into the
    # contraction (no standalone NCHW->token transpose). Conv out-channel
    # layout is [q | k | v], each head-major, so the reshape below is exact.
    w3 = w_qkv.reshape(3, heads, dim_head, c)
    # Fold the attention scale into the q weights (constant fold).
    w3 = w3 * jnp.array([scale, 1.0, 1.0], w3.dtype).reshape(3, 1, 1, 1)
    qkv = jnp.einsum('bcxy,ghdc->gbhxyd', x_nchw, w3)              # (3,b,H,x,y,d)
    qkv = qkv.reshape(3, b, heads, n, dim_head).astype(jnp.bfloat16)
    q, k, v = qkv[0], qkv[1], qkv[2]

    # Flash attention: emits token-major, head-major-channel (b, N, hidden) bf16.
    out = _flash_attention(q, k, v)

    # Output 1x1-conv (with bias) as a GEMM that emits channel-first directly,
    # so the final NCHW layout needs no extra transpose.
    wout = w_out.reshape(c, hidden)                                # (C, hidden)
    y = jnp.einsum('bnh,ch->bcn', out, wout,
                   preferred_element_type=jnp.float32)             # (b, C, N)
    return y.reshape(b, c, h, w) + b_out.reshape(1, c, 1, 1)


def attention_reference(x, w_qkv, w_out, b_out, *, heads, dim_head):
    """Pure-JAX f32 reference mirroring the PyTorch module exactly."""
    b, c, h, w = x.shape
    hidden = heads * dim_head
    scale = dim_head ** (-0.5)

    qkv = jnp.einsum('bchw,oc->bohw', x, w_qkv.reshape(3 * hidden, c))
    q, k, v = jnp.split(qkv, 3, axis=1)
    rs = lambda t: t.reshape(b, heads, dim_head, h * w)
    q, k, v = rs(q), rs(k), rs(v)
    q = q * scale
    sim = jnp.einsum('bhdi,bhdj->bhij', q, k)
    sim = sim - jnp.max(sim, axis=-1, keepdims=True)
    attn = jax.nn.softmax(sim, axis=-1)
    out = jnp.einsum('bhij,bhdj->bhid', attn, v)                    # (b, h, N, d)
    out = jnp.transpose(out, (0, 1, 3, 2)).reshape(b, hidden, h, w)
    y = jnp.einsum('bchw,oc->bohw', out, w_out.reshape(c, hidden))
    return y + b_out.reshape(1, c, 1, 1)


if __name__ == "__main__":
    heads, dim_head = 4, 32
    hidden = heads * dim_head

    key = jax.random.PRNGKey(0)

    configs = [
        (2, 8, 16),   # N = 256  -> tq=128, single kv step
        (2, 8, 32),   # N = 1024 -> multiple q/kv tiles, exercises online softmax
    ]

    for batch, dim, spatial in configs:
        kx, kq, ko, kb, key = jax.random.split(key, 5)

        x = jax.random.normal(kx, (batch, dim, spatial, spatial), jnp.float32)
        w_qkv = jax.random.normal(kq, (3 * hidden, dim, 1, 1), jnp.float32) / math.sqrt(dim)
        w_out = jax.random.normal(ko, (dim, hidden, 1, 1), jnp.float32) / math.sqrt(hidden)
        b_out = jax.random.normal(kb, (dim,), jnp.float32) * 0.1

        fwd = jax.jit(functools.partial(attention_forward,
                                        heads=heads, dim_head=dim_head))
        out = jax.block_until_ready(fwd(x, w_qkv, w_out, b_out))

        ref = attention_reference(x, w_qkv, w_out, b_out,
                                  heads=heads, dim_head=dim_head)
        assert out.shape == ref.shape
        # bf16 MXU inputs/probs, (possibly) bf16 exp, bf16 kernel output and the
        # approx reciprocal -> slightly loose tolerance (accumulation stays f32).
        err = float(jnp.max(jnp.abs(out - ref)))
        assert jnp.allclose(out, ref, atol=6e-2, rtol=6e-2), (
            f"mismatch vs reference at spatial={spatial}, max abs err={err}")

    print("KERNEL_OK")
</pallas_src>

<mosaic_0001>
module attributes {stable_mosaic.version = 11 : i64} {
  func.func @_flash_attn_kernel(%arg0: i32, %arg1: i32, %arg2: i32, %arg3: memref<1x4x128x32xbf16, #tpu.memory_space<vmem>>, %arg4: memref<1x4x256x32xbf16, #tpu.memory_space<vmem>>, %arg5: memref<1x4x256x32xbf16, #tpu.memory_space<vmem>>, %arg6: memref<1x128x128xbf16, #tpu.memory_space<vmem>>, %arg7: memref<4x128x1xf32, #tpu.memory_space<vmem>>, %arg8: memref<4x128x1xf32, #tpu.memory_space<vmem>>, %arg9: memref<4x128x32xf32, #tpu.memory_space<vmem>>) attributes {dimension_semantics = [#tpu.dimension_semantics<parallel>, #tpu.dimension_semantics<parallel>, #tpu.dimension_semantics<arbitrary>], iteration_bounds = array<i64: 2, 2, 1>, scalar_prefetch = 0 : i64, scratch_operands = 3 : i64, tpu.core_type = #tpu.core_type<tc>, window_params = [{transform_indices = @transform_0, window_bounds = array<i64: 1, 4, 128, 32>}, {transform_indices = @transform_1, window_bounds = array<i64: 1, 4, 256, 32>}, {transform_indices = @transform_2, window_bounds = array<i64: 1, 4, 256, 32>}, {transform_indices = @transform_3, window_bounds = array<i64: 1, 128, 128>}]} {
    %c0_i32 = arith.constant 0 : i32
    %0 = arith.cmpi eq, %arg2, %c0_i32 : i32
    %1 = arith.extui %0 : i1 to i32
    %c0_i32_0 = arith.constant 0 : i32
    %2 = arith.cmpi ne, %1, %c0_i32_0 : i32
    scf.if %2 {
      %cst_35 = arith.constant 0xFF800000 : f32
      %37 = vector.broadcast %cst_35 : f32 to vector<4x128x1xf32>
      %c0_36 = arith.constant 0 : index
      %c0_37 = arith.constant 0 : index
      %c0_38 = arith.constant 0 : index
      %38 = vector.load %arg7[%c0_36, %c0_37, %c0_38] : memref<4x128x1xf32, #tpu.memory_space<vmem>>, vector<4x128x1xf32>
      tpu.vector_store %arg7[%c0_36, %c0_37, %c0_38], %37 {strides = array<i32>} : memref<4x128x1xf32, #tpu.memory_space<vmem>>, vector<4x128x1xf32>,
      %cst_39 = arith.constant 0.000000e+00 : f32
      %39 = vector.broadcast %cst_39 : f32 to vector<4x128x1xf32>
      %c0_40 = arith.constant 0 : index
      %c0_41 = arith.constant 0 : index
      %c0_42 = arith.constant 0 : index
      %40 = vector.load %arg8[%c0_40, %c0_41, %c0_42] : memref<4x128x1xf32, #tpu.memory_space<vmem>>, vector<4x128x1xf32>
      tpu.vector_store %arg8[%c0_40, %c0_41, %c0_42], %39 {strides = array<i32>} : memref<4x128x1xf32, #tpu.memory_space<vmem>>, vector<4x128x1xf32>,
      %cst_43 = arith.constant 0.000000e+00 : f32
      %41 = vector.broadcast %cst_43 : f32 to vector<4x128x32xf32>
      %c0_44 = arith.constant 0 : index
      %c0_45 = arith.constant 0 : index
      %c0_46 = arith.constant 0 : index
      %42 = vector.load %arg9[%c0_44, %c0_45, %c0_46] : memref<4x128x32xf32, #tpu.memory_space<vmem>>, vector<4x128x32xf32>
      tpu.vector_store %arg9[%c0_44, %c0_45, %c0_46], %41 {strides = array<i32>} : memref<4x128x32xf32, #tpu.memory_space<vmem>>, vector<4x128x32xf32>,
    } else {
    }
    %c0 = arith.constant 0 : index
    %c0_1 = arith.constant 0 : index
    %c0_2 = arith.constant 0 : index
    %c0_3 = arith.constant 0 : index
    %3 = vector.load %arg3[%c0, %c0_1, %c0_2, %c0_3] : memref<1x4x128x32xbf16, #tpu.memory_space<vmem>>, vector<1x4x128x32xbf16>
    %4 = vector.shape_cast %3 : vector<1x4x128x32xbf16> to vector<4x128x32xbf16>
    %c0_4 = arith.constant 0 : index
    %c0_5 = arith.constant 0 : index
    %c0_6 = arith.constant 0 : index
    %c0_7 = arith.constant 0 : index
    %5 = vector.load %arg4[%c0_4, %c0_5, %c0_6, %c0_7] : memref<1x4x256x32xbf16, #tpu.memory_space<vmem>>, vector<1x4x256x32xbf16>
    %6 = vector.shape_cast %5 : vector<1x4x256x32xbf16> to vector<4x256x32xbf16>
    %c0_8 = arith.constant 0 : index
    %c0_9 = arith.constant 0 : index
    %c0_10 = arith.constant 0 : index
    %c0_11 = arith.constant 0 : index
    %7 = vector.load %arg5[%c0_8, %c0_9, %c0_10, %c0_11] : memref<1x4x256x32xbf16, #tpu.memory_space<vmem>>, vector<1x4x256x32xbf16>
    %8 = vector.shape_cast %7 : vector<1x4x256x32xbf16> to vector<4x256x32xbf16>
    "tpu.trace_start"() <{level = 10 : i32, message = "hqd,hkd->hqk"}> : () -> ()
    %cst = arith.constant dense<0.000000e+00> : vector<4x128x256xf32>
    %9 = tpu.matmul %4, %6, %cst {dimension_numbers = #tpu.dot_dimension_numbers<[2], [2], [1], [1], [0, 0, 0, 1, 1, 1], [0], [0]>} : vector<4x128x32xbf16>, vector<4x256x32xbf16>, vector<4x128x256xf32> -> vector<4x128x256xf32>
    "tpu.trace_stop"() : () -> ()
    %c0_12 = arith.constant 0 : index
    %c0_13 = arith.constant 0 : index
    %c0_14 = arith.constant 0 : index
    %10 = vector.load %arg7[%c0_12, %c0_13, %c0_14] : memref<4x128x1xf32, #tpu.memory_space<vmem>>, vector<4x128x1xf32>
    %cst_15 = arith.constant dense<0xFF800000> : vector<4x128xf32>
    %11 = vector.multi_reduction <maximumf>, %9, %cst_15 [2] : vector<4x128x256xf32> to vector<4x128xf32>
    %12 = vector.shape_cast %11 : vector<4x128xf32> to vector<4x128x1xf32>
    %13 = arith.maximumf %10, %12 : vector<4x128x1xf32>
    %14 = arith.subf %10, %13 : vector<4x128x1xf32>
    %15 = math.exp %14 : vector<4x128x1xf32>
    %16 = vector.broadcast %13 : vector<4x128x1xf32> to vector<4x128x256xf32>
    %17 = arith.subf %9, %16 : vector<4x128x256xf32>
    %18 = arith.truncf %17 : vector<4x128x256xf32> to vector<4x128x256xbf16>
    %19 = math.exp %18 : vector<4x128x256xbf16>
    %c0_16 = arith.constant 0 : index
    %c0_17 = arith.constant 0 : index
    %c0_18 = arith.constant 0 : index
    %20 = vector.load %arg8[%c0_16, %c0_17, %c0_18] : memref<4x128x1xf32, #tpu.memory_space<vmem>>, vector<4x128x1xf32>
    %21 = arith.mulf %15, %20 : vector<4x128x1xf32>
    %22 = arith.extf %19 : vector<4x128x256xbf16> to vector<4x128x256xf32>
    %cst_19 = arith.constant dense<0.000000e+00> : vector<4x128xf32>
    %23 = vector.multi_reduction <add>, %22, %cst_19 [2] : vector<4x128x256xf32> to vector<4x128xf32>
    %24 = vector.shape_cast %23 : vector<4x128xf32> to vector<4x128x1xf32>
    %25 = arith.addf %21, %24 : vector<4x128x1xf32>
    %c0_20 = arith.constant 0 : index
    %c0_21 = arith.constant 0 : index
    %c0_22 = arith.constant 0 : index
    %26 = vector.load %arg8[%c0_20, %c0_21, %c0_22] : memref<4x128x1xf32, #tpu.memory_space<vmem>>, vector<4x128x1xf32>
    tpu.vector_store %arg8[%c0_20, %c0_21, %c0_22], %25 {strides = array<i32>} : memref<4x128x1xf32, #tpu.memory_space<vmem>>, vector<4x128x1xf32>,
    %c0_23 = arith.constant 0 : index
    %c0_24 = arith.constant 0 : index
    %c0_25 = arith.constant 0 : index
    %27 = vector.load %arg9[%c0_23, %c0_24, %c0_25] : memref<4x128x32xf32, #tpu.memory_space<vmem>>, vector<4x128x32xf32>
    %28 = vector.broadcast %15 : vector<4x128x1xf32> to vector<4x128x32xf32>
    %29 = arith.mulf %28, %27 : vector<4x128x32xf32>
    "tpu.trace_start"() <{level = 10 : i32, message = "hqk,hkd->hqd"}> : () -> ()
    %cst_26 = arith.constant dense<0.000000e+00> : vector<4x128x32xf32>
    %30 = tpu.matmul %19, %8, %cst_26 {dimension_numbers = #tpu.dot_dimension_numbers<[2], [1], [1], [2], [0, 0, 0, 1, 1, 2], [0], [0]>} : vector<4x128x256xbf16>, vector<4x256x32xbf16>, vector<4x128x32xf32> -> vector<4x128x32xf32>
    "tpu.trace_stop"() : () -> ()
    %31 = arith.addf %29, %30 : vector<4x128x32xf32>
    %c0_27 = arith.constant 0 : index
    %c0_28 = arith.constant 0 : index
    %c0_29 = arith.constant 0 : index
    %32 = vector.load %arg9[%c0_27, %c0_28, %c0_29] : memref<4x128x32xf32, #tpu.memory_space<vmem>>, vector<4x128x32xf32>
    tpu.vector_store %arg9[%c0_27, %c0_28, %c0_29], %31 {strides = array<i32>} : memref<4x128x32xf32, #tpu.memory_space<vmem>>, vector<4x128x32xf32>,
    %c0_30 = arith.constant 0 : index
    %c0_31 = arith.constant 0 : index
    %c0_32 = arith.constant 0 : index
    %33 = vector.load %arg7[%c0_30, %c0_31, %c0_32] : memref<4x128x1xf32, #tpu.memory_space<vmem>>, vector<4x128x1xf32>
    tpu.vector_store %arg7[%c0_30, %c0_31, %c0_32], %13 {strides = array<i32>} : memref<4x128x1xf32, #tpu.memory_space<vmem>>, vector<4x128x1xf32>,
    %c0_i32_33 = arith.constant 0 : i32
    %34 = arith.cmpi eq, %arg2, %c0_i32_33 : i32
    %35 = arith.extui %34 : i1 to i32
    %c0_i32_34 = arith.constant 0 : i32
    %36 = arith.cmpi ne, %35, %c0_i32_34 : i32
    scf.if %36 {
      %c0_35 = arith.constant 0 : index
      %c0_36 = arith.constant 0 : index
      %c0_37 = arith.constant 0 : index
      %37 = vector.load %arg8[%c0_35, %c0_36, %c0_37] : memref<4x128x1xf32, #tpu.memory_space<vmem>>, vector<4x128x1xf32>
      %38 = tpu.reciprocal %37 {approx = true} : vector<4x128x1xf32> -> vector<4x128x1xf32>
      %c0_38 = arith.constant 0 : index
      %c0_39 = arith.constant 0 : index
      %c0_40 = arith.constant 0 : index
      %39 = vector.load %arg9[%c0_38, %c0_39, %c0_40] : memref<4x128x32xf32, #tpu.memory_space<vmem>>, vector<4x128x32xf32>
      %40 = vector.broadcast %38 : vector<4x128x1xf32> to vector<4x128x32xf32>
      %41 = arith.mulf %39, %40 : vector<4x128x32xf32>
      %42 = arith.truncf %41 : vector<4x128x32xf32> to vector<4x128x32xbf16>
      %43 = vector.extract_strided_slice %42 {offsets = [0, 0, 0], sizes = [1, 128, 32], strides = [1, 1, 1]} : vector<4x128x32xbf16> to vector<1x128x32xbf16>
      %44 = vector.shape_cast %43 : vector<1x128x32xbf16> to vector<128x32xbf16>
      %45 = vector.extract_strided_slice %42 {offsets = [1, 0, 0], sizes = [1, 128, 32], strides = [1, 1, 1]} : vector<4x128x32xbf16> to vector<1x128x32xbf16>
      %46 = vector.shape_cast %45 : vector<1x128x32xbf16> to vector<128x32xbf16>
      %47 = vector.extract_strided_slice %42 {offsets = [2, 0, 0], sizes = [1, 128, 32], strides = [1, 1, 1]} : vector<4x128x32xbf16> to vector<1x128x32xbf16>
      %48 = vector.shape_cast %47 : vector<1x128x32xbf16> to vector<128x32xbf16>
      %49 = vector.extract_strided_slice %42 {offsets = [3, 0, 0], sizes = [1, 128, 32], strides = [1, 1, 1]} : vector<4x128x32xbf16> to vector<1x128x32xbf16>
      %50 = vector.shape_cast %49 : vector<1x128x32xbf16> to vector<128x32xbf16>
      %51 = tpu.concatenate %44, %46, %48, %50 in 1 : vector<128x32xbf16>, vector<128x32xbf16>, vector<128x32xbf16>, vector<128x32xbf16> -> vector<128x128xbf16>
      %c0_41 = arith.constant 0 : index
      %c0_42 = arith.constant 0 : index
      %c0_43 = arith.constant 0 : index
      %52 = vector.load %arg6[%c0_41, %c0_42, %c0_43] : memref<1x128x128xbf16, #tpu.memory_space<vmem>>, vector<1x128x128xbf16>
      %53 = vector.shape_cast %52 : vector<1x128x128xbf16> to vector<128x128xbf16>
      %54 = vector.shape_cast %51 : vector<128x128xbf16> to vector<1x128x128xbf16>
      tpu.vector_store %arg6[%c0_41, %c0_42, %c0_43], %54 {strides = array<i32>} : memref<1x128x128xbf16, #tpu.memory_space<vmem>>, vector<1x128x128xbf16>,
    } else {
    }
    return
  }
  func.func @transform_0(%arg0: i32, %arg1: i32, %arg2: i32) -> (i32, i32, i32, i32) {
    %c0_i32 = arith.constant 0 : i32
    %c0_i32_0 = arith.constant 0 : i32
    %c0_i32_1 = arith.constant 0 : i32
    return %arg0, %c0_i32, %arg1, %c0_i32_0 : i32, i32, i32, i32
  }
  func.func @transform_1(%arg0: i32, %arg1: i32, %arg2: i32) -> (i32, i32, i32, i32) {
    %c0_i32 = arith.constant 0 : i32
    %c0_i32_0 = arith.constant 0 : i32
    %c0_i32_1 = arith.constant 0 : i32
    return %arg0, %c0_i32, %arg2, %c0_i32_0 : i32, i32, i32, i32
  }
  func.func @transform_2(%arg0: i32, %arg1: i32, %arg2: i32) -> (i32, i32, i32, i32) {
    %c0_i32 = arith.constant 0 : i32
    %c0_i32_0 = arith.constant 0 : i32
    %c0_i32_1 = arith.constant 0 : i32
    return %arg0, %c0_i32, %arg2, %c0_i32_0 : i32, i32, i32, i32
  }
  func.func @transform_3(%arg0: i32, %arg1: i32, %arg2: i32) -> (i32, i32, i32) {
    %c0_i32 = arith.constant 0 : i32
    %c0_i32_0 = arith.constant 0 : i32
    return %arg0, %arg1, %c0_i32 : i32, i32, i32
  }
}

</mosaic_0001>

<bundles_post_ra>
// kernel: attention_forward.1
= control target key start
LH: loop header
LB: loop body
LE: loop exit
PB: predicated region body
PF: predicated region fallthrough
CT: control target
= control target key end

     0   :  { %s7725_s12 = smov 0   ;;  %s7727_s13 = smov 0   ;;  %s10700_s0 = inlined_call_operand.vmem [shape: bf16[2,4,256,32], index: 0, kind: input, shape index: {}]   ;;  %s10701_s1 = inlined_call_operand.vmem [shape: bf16[2,4,256,32], index: 1, kind: input, shape index: {}]   ;;  %s10702_s2 = inlined_call_operand.vmem [shape: bf16[2,4,256,32], index: 2, kind: input, shape index: {}]   ;;  %s10703_s3 = inlined_call_operand.vmem [shape: bf16[2,256,128], index: 3, kind: output, shape index: {}]  }
   0x1   :  { %s7729_s14 = smov 0   ;;  %s7731_s15 = smov 0  }
   0x2   :  { %s7733_s16 = smov 0   ;;  %s7735_s17 = smov 0  }
   0x3   :  { %s7737_s18 = smov 0  }
   0x4 LB: > { %s28_s19 = sadd.s32 1, %s7689_s16  ;;  %s32_s20 = sadd.s32 1, %s7693_s17  ;;  %s7697_s18 = sphi %s7737_s18, %s13_s18   ;;  %s7693_s17 = sphi %s7735_s17, %s11410_s17   ;;  %s7689_s16 = sphi %s7733_s16, %s11409_s16   ;;  %s7685_s15 = sphi %s7731_s15, %s11408_s15   ;;  %s7681_s14 = sphi %s7729_s14, %s11407_s14   ;;  %s7677_s13 = sphi %s7727_s13, %s11406_s13   ;;  %s7673_s12 = sphi %s7725_s12, %s11405_s12  }
   0x5   : > { %p30_p0 = scmp.ge.s32.totalorder %s28_s19, 2  ;;  %p48_p1 = scmp.ne.s32.totalorder %s7677_s13, %s7673_s12 }
   0x6   : > { %p49_p2 = scmp.eq.s32.totalorder %s7697_s18, 0  ;;  %s41_s24 = sadd.s32 1, %s7677_s13 }
   0x7   : > { %s11412_s19 = smov (%p30_p0, %s28_s19), 0  ;;  %s11414_s20 = smov (!%p30_p0, %s32_s20), %s7693_s17 }
   0x8   : > { %p50_p3 = por %p49_p2, %p48_p1  ;;  %p34_p4 = scmp.ge.s32.totalorder %s11414_s20, 2 }
   0x9   : > { %s37_s21 = ssub.s32 %s7689_s16, %s11412_s19  ;;  %p6409_p6 = scmp.ge.s32.totalorder %s7697_s18, 4 }
   0xa   : > { %s11416_s20 = smov (%p34_p4, %s11414_s20), 0 }
   0xb   : > { %s36_s22 = ssub.s32 %s7693_s17, %s11416_s20  ;;  %158 = sbr.rel (%p6409_p6) target bundleno = 41 (0x29), region = 16 }
   0xc   : > { %s38_s23 = sor.u32 %s37_s21, %s36_s22 }
   0xd   : > { %p39_p5 = scmp.eq.s32.totalorder %s38_s23, 0 }
   0xf   : > { %s7776_s25 = scalar_select %p39_p5, %s7677_s13, %s41_s24  }
  0x12   : > { %161 = sbr.rel (!%p50_p3) target bundleno = 41 (0x29), region = 20  ;;  %s163_s26 = sand.u32 (%p50_p3), 1, %s7677_s13  }
  0x13   : > { %s6411_s27 = sshll.u32 (%p50_p3), %s7689_s16, 4  ;;  %s6410_s28 = sshll.u32 (%p50_p3), %s163_s26, 8 }
  0x14   : > { %s6412_s29 = sshll.u32 (%p50_p3), %s7693_s17, 7  ;;  %s7790_s8 = scalar_lea.vmem (%p50_p3), [#allocation5], %s6410_s28 }
  0x15   : > { %s168_s30 = sadd.s32 (%p50_p3), %s6412_s29, %s6411_s27 }
  0x16   : > { %s6413_s4 = sshll.u32 (%p50_p3), %s168_s30, 2 }
  0x17   : > { %s7785_s7 = scalar_lea.vmem (%p50_p3), %s10700_s0, %s6413_s4 }
  0x18   : > { %v186_v0 = vld [vmem:[%s7785_s7] sm:$0xff] (%p50_p3)   ;;  %v190_v1 = vld [vmem:[%s7785_s7 + $0x8] sm:$0xff] (%p50_p3)   ;;  %v194_v2 = vld [vmem:[%s7785_s7 + $0x10] sm:$0xff] (%p50_p3)  }
  0x19   : > { %187 = vst [vmem:[%s7790_s8] sm:$0xff] %v186_v0   ;;  %191 = vst [vmem:[%s7790_s8 + $0x8] sm:$0xff] %v190_v1   ;;  %v198_v3 = vld [vmem:[%s7785_s7 + $0x18] sm:$0xff]   ;;  %v202_v4 = vld [vmem:[%s7785_s7 + $0x20] sm:$0xff]  }
  0x1a   : > { %195 = vst [vmem:[%s7790_s8 + $0x10] sm:$0xff] %v194_v2   ;;  %v206_v5 = vld [vmem:[%s7785_s7 + $0x28] sm:$0xff]   ;;  %199 = vst [vmem:[%s7790_s8 + $0x18] sm:$0xff] %v198_v3   ;;  %v210_v6 = vld [vmem:[%s7785_s7 + $0x30] sm:$0xff]  }
  0x1b   : > { %203 = vst [vmem:[%s7790_s8 + $0x20] sm:$0xff] %v202_v4   ;;  %207 = vst [vmem:[%s7790_s8 + $0x28] sm:$0xff] %v206_v5   ;;  %v214_v7 = vld [vmem:[%s7785_s7 + $0x38] sm:$0xff]   ;;  %v218_v8 = vld [vmem:[%s7785_s7 + $0x80] sm:$0xff]  }
  0x1c   : > { %211 = vst [vmem:[%s7790_s8 + $0x30] sm:$0xff] %v210_v6   ;;  %215 = vst [vmem:[%s7790_s8 + $0x38] sm:$0xff] %v214_v7   ;;  %v222_v9 = vld [vmem:[%s7785_s7 + $0x88] sm:$0xff]   ;;  %v226_v10 = vld [vmem:[%s7785_s7 + $0x90] sm:$0xff]  }
  0x1d   : > { %219 = vst [vmem:[%s7790_s8 + $0x40] sm:$0xff] %v218_v8   ;;  %v230_v11 = vld [vmem:[%s7785_s7 + $0x98] sm:$0xff]   ;;  %223 = vst [vmem:[%s7790_s8 + $0x48] sm:$0xff] %v222_v9   ;;  %v234_v12 = vld [vmem:[%s7785_s7 + $0xa0] sm:$0xff]  }
  0x1e   : > { %227 = vst [vmem:[%s7790_s8 + $0x50] sm:$0xff] %v226_v10   ;;  %231 = vst [vmem:[%s7790_s8 + $0x58] sm:$0xff] %v230_v11   ;;  %v238_v13 = vld [vmem:[%s7785_s7 + $0xa8] sm:$0xff]   ;;  %v242_v14 = vld [vmem:[%s7785_s7 + $0xb0] sm:$0xff]  }
  0x1f   : > { %235 = vst [vmem:[%s7790_s8 + $0x60] sm:$0xff] %v234_v12   ;;  %239 = vst [vmem:[%s7790_s8 + $0x68] sm:$0xff] %v238_v13   ;;  %v246_v15 = vld [vmem:[%s7785_s7 + $0xb8] sm:$0xff]   ;;  %v250_v16 = vld [vmem:[%s7785_s7 + $0x100] sm:$0xff]  }
  0x20   : > { %243 = vst [vmem:[%s7790_s8 + $0x70] sm:$0xff] %v242_v14   ;;  %v254_v17 = vld [vmem:[%s7785_s7 + $0x108] sm:$0xff]   ;;  %247 = vst [vmem:[%s7790_s8 + $0x78] sm:$0xff] %v246_v15   ;;  %v258_v18 = vld [vmem:[%s7785_s7 + $0x110] sm:$0xff]  }
  0x21   : > { %251 = vst [vmem:[%s7790_s8 + $0x80] sm:$0xff] %v250_v16   ;;  %255 = vst [vmem:[%s7790_s8 + $0x88] sm:$0xff] %v254_v17   ;;  %v262_v19 = vld [vmem:[%s7785_s7 + $0x118] sm:$0xff]   ;;  %v266_v20 = vld [vmem:[%s7785_s7 + $0x120] sm:$0xff]  }
  0x22   : > { %259 = vst [vmem:[%s7790_s8 + $0x90] sm:$0xff] %v258_v18   ;;  %263 = vst [vmem:[%s7790_s8 + $0x98] sm:$0xff] %v262_v19   ;;  %v270_v21 = vld [vmem:[%s7785_s7 + $0x128] sm:$0xff]   ;;  %v274_v22 = vld [vmem:[%s7785_s7 + $0x130] sm:$0xff]  }
  0x23   : > { %267 = vst [vmem:[%s7790_s8 + $0xa0] sm:$0xff] %v266_v20   ;;  %v278_v23 = vld [vmem:[%s7785_s7 + $0x138] sm:$0xff]   ;;  %271 = vst [vmem:[%s7790_s8 + $0xa8] sm:$0xff] %v270_v21   ;;  %v282_v24 = vld [vmem:[%s7785_s7 + $0x180] sm:$0xff]  }
  0x24   : > { %275 = vst [vmem:[%s7790_s8 + $0xb0] sm:$0xff] %v274_v22   ;;  %279 = vst [vmem:[%s7790_s8 + $0xb8] sm:$0xff] %v278_v23   ;;  %v286_v25 = vld [vmem:[%s7785_s7 + $0x188] sm:$0xff]   ;;  %v290_v26 = vld [vmem:[%s7785_s7 + $0x190] sm:$0xff]  }
  0x25   : > { %283 = vst [vmem:[%s7790_s8 + $0xc0] sm:$0xff] %v282_v24   ;;  %287 = vst [vmem:[%s7790_s8 + $0xc8] sm:$0xff] %v286_v25   ;;  %v294_v27 = vld [vmem:[%s7785_s7 + $0x198] sm:$0xff]   ;;  %v298_v28 = vld [vmem:[%s7785_s7 + $0x1a0] sm:$0xff]  }
  0x26   : > { %291 = vst [vmem:[%s7790_s8 + $0xd0] sm:$0xff] %v290_v26   ;;  %v302_v29 = vld [vmem:[%s7785_s7 + $0x1a8] sm:$0xff]   ;;  %295 = vst [vmem:[%s7790_s8 + $0xd8] sm:$0xff] %v294_v27   ;;  %v306_v30 = vld [vmem:[%s7785_s7 + $0x1b0] sm:$0xff]  }
  0x27   : > { %299 = vst [vmem:[%s7790_s8 + $0xe0] sm:$0xff] %v298_v28   ;;  %303 = vst [vmem:[%s7790_s8 + $0xe8] sm:$0xff] %v302_v29   ;;  %v310_v31 = vld [vmem:[%s7785_s7 + $0x1b8] sm:$0xff]  }
  0x28   : > { %307 = vst [vmem:[%s7790_s8 + $0xf0] sm:$0xff] %v306_v30   ;;  %311 = vst [vmem:[%s7790_s8 + $0xf8] sm:$0xff] %v310_v31  }
  0x29 PF: > { %p6414_p7 = scmp.ge.s32.totalorder %s7697_s18, 1  ;;  %p489_p8 = scmp.lt.s32.totalorder %s7697_s18, 5 }
  0x2b   : > { %p490_p9 = pnand %p6414_p7, %p489_p8 }
  0x2d   : > { %493 = sbr.rel (%p490_p9) target bundleno = 1327 (0x52f), region = 69 }
  0x34   : > { %p543_p10 = scmp.lt.s32.totalorder %s7685_s15, 1  ;;  %s496_s9 = sand.u32 1, %s7673_s12   ;;  %vm706_vm0 = vcmask 261120   ;;  %vm577_vm1 = vcmask 7168   ;;  %vm6224_vm2 = vcmask 523264   ;;  %vm6241_vm3 = vcmask 785408  }
  0x35   : > { %s6415_s10 = sshll.u32 %s496_s9, 8  ;;  %s7702_s28 = smov 32  }
  0x36   : > { %s11418_s15 = smov (!%p543_p10, %s7685_s15), 1  ;;  %s7861_s21 = scalar_lea.vmem [#allocation5], %s6415_s10 }
  0x37   : > { %s6617_s11 = sshll.u32 %s11418_s15, 9  ;;  %v7864_v32 = vld [vmem:[%s7861_s21] sm:$0xff]   ;;  %v7137_v22 = vld [vmem:[%s7861_s21 + $0x8] sm:$0xff]   ;;  %v7143_v30 = vld [vmem:[%s7861_s21 + $0x10] sm:$0xff]   ;;  %s7703_s29 = smov 64  }
  0x38   : > { %s7871_s24 = scalar_lea.vmem %s10701_s1, %s6617_s11  ;;  %v7874_v33 = vld [vmem:[%s7861_s21 + $0x40] sm:$0xff]   ;;  %6635 = vmatprep.mubr.msk.bf16.mxu0 %vm706_vm0, %v7864_v32  ;;  %v7140_v25 = vld [vmem:[%s7861_s21 + $0x48] sm:$0xff]   ;;  %s8021_s27 = scalar_lea.vmem %s10702_s2, %s6617_s11 }
  0x39   : > { %v7099_v34 = vld [vmem:[%s7871_s24 + $0x40] sm:$0xff]   ;;  %6667 = vmatprep.mubr.msk.bf16.mxu1 %vm706_vm0, %v7874_v33  ;;  %v7103_v39 = vld [vmem:[%s7871_s24 + $0x48] sm:$0xff]   ;;  %v7107_v45 = vld [vmem:[%s7871_s24 + $0x50] sm:$0xff]   ;;  %s7704_s30 = smov 96   ;;  %s6420_s4 = sshll.u32 %s7681_s14, 3 }
  0x3a   : > { %v7100_v35 = vld [vmem:[%s7871_s24] sm:$0xff]   ;;  %7003 = vmatprep.subr.msk.bf16.mxu0 %vm706_vm0, %v7099_v34  ;;  %v7104_v41 = vld [vmem:[%s7871_s24 + $0x8] sm:$0xff]   ;;  %v7109_v47 = vld [vmem:[%s7871_s24 + $0xd0] sm:$0xff]   ;;  %p565_p11 = scmp.lt.s32.totalorder %s6420_s4, 15  ;;  %s6421_s5 = sshll.u32 %s11418_s15, 4 }
  0x3b   : > { %v7101_v36 = vld [vmem:[%s7871_s24 + $0xc0] sm:$0xff]   ;;  %v1237_v37 = vsel %vm706_vm0, %v7100_v35, 0  ;;  %v7105_v42 = vld [vmem:[%s7871_s24 + $0xc8] sm:$0xff]   ;;  %v1240_v44 = vsel %vm706_vm0, %v7104_v41, 0  ;;  %v7108_v48 = vld [vmem:[%s7871_s24 + $0x10] sm:$0xff]  }
  0x3c   : > { %v7102_v38 = vld [vmem:[%s7871_s24 + $0x80] sm:$0xff]   ;;  %6620 = vmatpush3.bf16.xpose.msra.mxu0 %v1237_v37  ;;  %7011 = vmatprep.subr.msk.bf16.mxu1 %vm706_vm0, %v7101_v36  ;;  %v7106_v43 = vld [vmem:[%s7871_s24 + $0x88] sm:$0xff]   ;;  %v7110_v49 = vld [vmem:[%s7871_s24 + $0x90] sm:$0xff]   ;;  %v1243_v50 = vsel %vm706_vm0, %v7108_v48, 0  ;;  %s11420_s4 = smov (!%p565_p11, %s6420_s4), 15 }
  0x3d   : > { %v1542_v40 = vsel %vm706_vm0, %v7102_v38, 0  ;;  %7004 = vmatprep.subr.msk.bf16.mxu0 %vm706_vm0, %v7103_v39  ;;  %v1545_v46 = vsel %vm706_vm0, %v7106_v43, 0  ;;  %v7111_v51 = vld [vmem:[%s7871_s24 + $0x58] sm:$0xff]   ;;  %v1548_v52 = vsel %vm706_vm0, %v7110_v49, 0  ;;  %v7115_v57 = vld [vmem:[%s7871_s24 + $0x60] sm:$0xff]   ;;  %v7119_v63 = vld [vmem:[%s7871_s24 + $0x68] sm:$0xff]   ;;  %s568_s6 = sadd.s32 %s6421_s5, %s11420_s4 }
  0x3e   : > { %6652 = vmatpush3.bf16.xpose.msra.mxu1 %v1542_v40  ;;  %v7113_v53 = vld [vmem:[%s7871_s24 + $0xd8] sm:$0xff]   ;;  %v7117_v59 = vld [vmem:[%s7871_s24 + $0xe0] sm:$0xff]   ;;  %v7121_v1 = vld [vmem:[%s7871_s24 + $0xe8] sm:$0xff]   ;;  %s6422_s7 = sshll.u32 %s568_s6, 3 }
  0x3f   : > { %7012 = vmatprep.subr.msk.bf16.mxu1 %vm706_vm0, %v7105_v42  ;;  %v7112_v54 = vld [vmem:[%s7871_s24 + $0x18] sm:$0xff]   ;;  %v7116_v60 = vld [vmem:[%s7871_s24 + $0x20] sm:$0xff]   ;;  %v7120_v2 = vld [vmem:[%s7871_s24 + $0x28] sm:$0xff]   ;;  %s10625_s9 = scalar_lea.vmem %s10703_s3, %s6422_s7 }
  0x40   : > { %v7114_v55 = vld [vmem:[%s7871_s24 + $0x98] sm:$0xff]   ;;  %v1246_v56 = vsel %vm706_vm0, %v7112_v54, 0  ;;  %v7118_v61 = vld [vmem:[%s7871_s24 + $0xa0] sm:$0xff]   ;;  %v1249_v62 = vsel %vm706_vm0, %v7116_v60, 0  ;;  %v7122_v3 = vld [vmem:[%s7871_s24 + $0xa8] sm:$0xff]   ;;  %v1252_v4 = vsel %vm706_vm0, %v7120_v2, 0 }
  0x41   : > { %v1551_v58 = vsel %vm706_vm0, %v7114_v55, 0  ;;  %v1554_v0 = vsel %vm706_vm0, %v7118_v61, 0  ;;  %v7123_v5 = vld [vmem:[%s7871_s24 + $0x70] sm:$0xff]   ;;  %v1557_v6 = vsel %vm706_vm0, %v7122_v3, 0  ;;  %v7127_v11 = vld [vmem:[%s7871_s24 + $0x78] sm:$0xff]   ;;  %v7133_v17 = vld [vmem:[%s7871_s24 + $0x140] sm:$0xff]  }
  0x42   : > { %v7125_v7 = vld [vmem:[%s7871_s24 + $0xf0] sm:$0xff]   ;;  %v7129_v13 = vld [vmem:[%s7871_s24 + $0xf8] sm:$0xff]   ;;  %v7135_v19 = vld [vmem:[%s7871_s24 + $0x1c0] sm:$0xff]  }
  0x43   : > { %v7124_v8 = vld [vmem:[%s7871_s24 + $0x30] sm:$0xff]   ;;  %v7128_v14 = vld [vmem:[%s7871_s24 + $0x38] sm:$0xff]   ;;  %v7134_v20 = vld [vmem:[%s7871_s24 + $0x100] sm:$0xff]  }
  0x44   : > { %6622 = vmatpush3.bf16.xpose.msra.mxu0 %v1240_v44  ;;  %v7126_v9 = vld [vmem:[%s7871_s24 + $0xb0] sm:$0xff]   ;;  %v1255_v10 = vsel %vm706_vm0, %v7124_v8, 0  ;;  %v7130_v15 = vld [vmem:[%s7871_s24 + $0xb8] sm:$0xff]   ;;  %v1258_v16 = vsel %vm706_vm0, %v7128_v14, 0  ;;  %v7136_v21 = vld [vmem:[%s7871_s24 + $0x180] sm:$0xff]   ;;  %v1847_v23 = vsel %vm706_vm0, %v7134_v20, 0 }
  0x45   : > { %7005 = vmatprep.subr.msk.bf16.mxu0 %vm706_vm0, %v7107_v45  ;;  %v1560_v12 = vsel %vm706_vm0, %v7126_v9, 0  ;;  %v1563_v18 = vsel %vm706_vm0, %v7130_v15, 0  ;;  %v7138_v24 = vld [vmem:[%s7871_s24 + $0x148] sm:$0xff]   ;;  %v2152_v26 = vsel %vm706_vm0, %v7136_v21, 0  ;;  %v7146_v34 = vld [vmem:[%s7861_s21 + $0x50] sm:$0xff]   ;;  %v7149_v38 = vld [vmem:[%s7861_s21 + $0x18] sm:$0xff]  }
  0x46   : > { %6654 = vmatpush3.bf16.xpose.msra.mxu1 %v1545_v46  ;;  %v7141_v27 = vld [vmem:[%s7871_s24 + $0x1c8] sm:$0xff]   ;;  %v7147_v35 = vld [vmem:[%s7871_s24 + $0x1d0] sm:$0xff]   ;;  %v7150_v39 = vld [vmem:[%s7871_s24 + $0x158] sm:$0xff]  }
  0x47   : > { %7013 = vmatprep.subr.msk.bf16.mxu1 %vm706_vm0, %v7109_v47  ;;  %v7139_v28 = vld [vmem:[%s7871_s24 + $0x108] sm:$0xff]   ;;  %v7145_v36 = vld [vmem:[%s7871_s24 + $0x110] sm:$0xff]   ;;  %v7152_v40 = vld [vmem:[%s7861_s21 + $0x58] sm:$0xff]  }
  0x48   : > { %v7142_v29 = vld [vmem:[%s7871_s24 + $0x188] sm:$0xff]   ;;  %v1850_v31 = vsel %vm706_vm0, %v7139_v28, 0  ;;  %v7148_v37 = vld [vmem:[%s7871_s24 + $0x190] sm:$0xff]   ;;  %v1853_v41 = vsel %vm706_vm0, %v7145_v36, 0  ;;  %v7151_v42 = vld [vmem:[%s7871_s24 + $0x118] sm:$0xff]  }
  0x49   : > { %v7153_v43 = vld [vmem:[%s7871_s24 + $0x1d8] sm:$0xff]   ;;  %v2158_v45 = vsel %vm706_vm0, %v7148_v37, 0  ;;  %v7157_v46 = vld [vmem:[%s7871_s24 + $0x120] sm:$0xff]   ;;  %v7163_v48 = vld [vmem:[%s7871_s24 + $0x128] sm:$0xff]  }
  0x4a   : > { %v7154_v44 = vld [vmem:[%s7871_s24 + $0x198] sm:$0xff]   ;;  %v7160_v47 = vld [vmem:[%s7871_s24 + $0x1a0] sm:$0xff]   ;;  %v7166_v49 = vld [vmem:[%s7871_s24 + $0x1a8] sm:$0xff]  }
  0x4b   : > { %v7172_v54 = vld [vmem:[%s7871_s24 + $0x1b0] sm:$0xff]   ;;  %v2161_v55 = vsel %vm706_vm0, %v7154_v44, 0  ;;  %v7159_v60 = vld [vmem:[%s7871_s24 + $0x1e0] sm:$0xff]   ;;  %v2164_v61 = vsel %vm706_vm0, %v7160_v47, 0  ;;  %v7176_v14 = vld [vmem:[%s7861_s21 + $0x78] sm:$0xff]  }
  0x4c   : > { %6624 = vmatpush3.bf16.xpose.msra.mxu0 %v1243_v50  ;;  %v7155_v50 = vld [vmem:[%s7861_s21 + $0x20] sm:$0xff]   ;;  %v7167_v8 = vld [vmem:[%s7861_s21 + $0x30] sm:$0xff]   ;;  %v7177_v15 = vld [vmem:[%s7871_s24 + $0x1f8] sm:$0xff]  }
  0x4d   : > { %7006 = vmatprep.subr.msk.bf16.mxu0 %vm706_vm0, %v7111_v51  ;;  %v7169_v51 = vld [vmem:[%s7871_s24 + $0x130] sm:$0xff]  }
  0x4e   : > { %6656 = vmatpush3.bf16.xpose.msra.mxu1 %v1548_v52  ;;  %v1856_v52 = vsel %vm706_vm0, %v7151_v42, 0  ;;  %v7168_v9 = vld [vmem:[%s7871_s24 + $0x170] sm:$0xff]  }
  0x4f   : > { %7014 = vmatprep.subr.msk.bf16.mxu1 %vm706_vm0, %v7113_v53  ;;  %v7156_v53 = vld [vmem:[%s7871_s24 + $0x160] sm:$0xff]   ;;  %v7183_v20 = vld [vmem:[%s7861_s21 + $0x90] sm:$0xff]  }
  0x50   : > { %v7184_v21 = vld [vmem:[%s7861_s21 + $0xd0] sm:$0xff]  }
  0x51   : > { %v7191_v28 = vld [vmem:[%s7861_s21 + $0xb0] sm:$0xff]  }
  0x54   : > { %6626 = vmatpush3.bf16.xpose.msra.mxu0 %v1246_v56  ;;  %v7158_v56 = vld [vmem:[%s7861_s21 + $0x60] sm:$0xff]  }
  0x55   : > { %7007 = vmatprep.subr.msk.bf16.mxu0 %vm706_vm0, %v7115_v57  ;;  %v7175_v57 = vld [vmem:[%s7871_s24 + $0x138] sm:$0xff]  }
  0x56   : > { %6658 = vmatpush3.bf16.xpose.msra.mxu1 %v1551_v58  ;;  %v1859_v58 = vsel %vm706_vm0, %v7157_v46, 0  ;;  %v1868_v2 = vsel %vm706_vm0, %v7175_v57, 0 }
  0x57   : > { %7015 = vmatprep.subr.msk.bf16.mxu1 %vm706_vm0, %v7117_v59  ;;  %v7178_v59 = vld [vmem:[%s7871_s24 + $0x1b8] sm:$0xff]  }
  0x58   : > { %v2173_v3 = vsel %vm706_vm0, %v7178_v59, 0 }
  0x5c   : > { %6628 = vmatpush3.bf16.xpose.msra.mxu0 %v1249_v62  ;;  %v1862_v62 = vsel %vm706_vm0, %v7163_v48, 0 }
  0x5d   : > { %7008 = vmatprep.subr.msk.bf16.mxu0 %vm706_vm0, %v7119_v63  ;;  %v2167_v63 = vsel %vm706_vm0, %v7166_v49, 0 }
  0x5e   : > { %6660 = vmatpush3.bf16.xpose.msra.mxu1 %v1554_v0  ;;  %v1865_v0 = vsel %vm706_vm0, %v7169_v51, 0 }
  0x5f   : > { %7016 = vmatprep.subr.msk.bf16.mxu1 %vm706_vm0, %v7121_v1  ;;  %v2170_v1 = vsel %vm706_vm0, %v7172_v54, 0 }
  0x64   : > { %6630 = vmatpush3.bf16.xpose.msra.mxu0 %v1252_v4  ;;  %v7161_v4 = vld [vmem:[%s7861_s21 + $0x28] sm:$0xff]  }
  0x65   : > { %7009 = vmatprep.subr.msk.bf16.mxu0 %vm706_vm0, %v7123_v5  ;;  %v7162_v5 = vld [vmem:[%s7871_s24 + $0x168] sm:$0xff]  }
  0x66   : > { %6662 = vmatpush3.bf16.xpose.msra.mxu1 %v1557_v6  ;;  %v7164_v6 = vld [vmem:[%s7861_s21 + $0x68] sm:$0xff]  }
  0x67   : > { %7017 = vmatprep.subr.msk.bf16.mxu1 %vm706_vm0, %v7125_v7  ;;  %v7165_v7 = vld [vmem:[%s7871_s24 + $0x1e8] sm:$0xff]  }
  0x6c   : > { %6632 = vmatpush3.bf16.xpose.msra.mxu0 %v1255_v10  ;;  %v7170_v10 = vld [vmem:[%s7861_s21 + $0x70] sm:$0xff]  }
  0x6d   : > { %7010 = vmatprep.subr.msk.bf16.mxu0 %vm706_vm0, %v7127_v11  ;;  %v7171_v11 = vld [vmem:[%s7871_s24 + $0x1f0] sm:$0xff]  }
  0x6e   : > { %6664 = vmatpush3.bf16.xpose.msra.mxu1 %v1560_v12  ;;  %v7173_v12 = vld [vmem:[%s7861_s21 + $0x38] sm:$0xff]  }
  0x6f   : > { %7018 = vmatprep.subr.msk.bf16.mxu1 %vm706_vm0, %v7129_v13  ;;  %v7174_v13 = vld [vmem:[%s7871_s24 + $0x178] sm:$0xff]  }
  0x74   : > { %6634 = vmatpush3.bf16.xpose.msra.mxu0 %v1258_v16  ;;  %v7179_v16 = vld [vmem:[%s7861_s21 + $0x80] sm:$0xff]  }
  0x75   : > { %7019 = vmatprep.subr.msk.bf16.mxu0 %vm706_vm0, %v7133_v17  ;;  %v7180_v17 = vld [vmem:[%s7861_s21 + $0xc0] sm:$0xff]  }
  0x76   : > { %6666 = vmatpush3.bf16.xpose.msra.mxu1 %v1563_v18  ;;  %v7181_v18 = vld [vmem:[%s7861_s21 + $0x88] sm:$0xff]  }
  0x77   : > { %7027 = vmatprep.subr.msk.bf16.mxu1 %vm706_vm0, %v7135_v19  ;;  %v7182_v19 = vld [vmem:[%s7861_s21 + $0xc8] sm:$0xff]  }
  0x7b   : > { %6636 = vmatmul.mubr.msk.bf16.vlgmr.msra.gmra.mrb[0].mxu0 %vm706_vm0, %v7864_v32  ;;  %v7144_v32 = vld [vmem:[%s7871_s24 + $0x150] sm:$0xff]  }
  0x7c   : > { %6684 = vmatpush3.bf16.xpose.msra.mxu0 %v1847_v23  ;;  %6637 = vmatprep.mubr.msk.bf16.mxu0 %vm706_vm0, %v7137_v22  ;;  %v7186_v23 = vld [vmem:[%s7861_s21 + $0xd8] sm:$0xff]  }
  0x7d   : > { %6668 = vmatmul.mubr.msk.bf16.vlgmr.msra.gmra.mrb[0].mxu1 %vm706_vm0, %v7874_v33  ;;  %7020 = vmatprep.subr.msk.bf16.mxu0 %vm706_vm0, %v7138_v24  ;;  %v2155_v33 = vsel %vm706_vm0, %v7142_v29, 0  ;;  %v7187_v24 = vld [vmem:[%s7861_s21 + $0xa0] sm:$0xff]   ;;  %v7192_v29 = vld [vmem:[%s7861_s21 + $0xf0] sm:$0xff]  }
  0x7e   : > { %6716 = vmatpush3.bf16.xpose.msra.mxu1 %v2152_v26  ;;  %6669 = vmatprep.mubr.msk.bf16.mxu1 %vm706_vm0, %v7140_v25  ;;  %v7189_v26 = vld [vmem:[%s7861_s21 + $0xa8] sm:$0xff]  }
  0x7f   : > { %7028 = vmatprep.subr.msk.bf16.mxu1 %vm706_vm0, %v7141_v27  ;;  %v7190_v27 = vld [vmem:[%s7861_s21 + $0xe8] sm:$0xff]  }
  0x83   : > { %6638 = vmatmul.mubr.msk.bf16.gmra.mrb[4].mxu0 %vm706_vm0, %v7137_v22  ;;  %v7185_v22 = vld [vmem:[%s7861_s21 + $0x98] sm:$0xff]  }
  0x84   : > { %6686 = vmatpush3.bf16.xpose.msra.mxu0 %v1850_v31  ;;  %6639 = vmatprep.mubr.msk.bf16.mxu0 %vm706_vm0, %v7143_v30  ;;  %v7194_v31 = vld [vmem:[%s7861_s21 + $0xf8] sm:$0xff]  }
  0x85   : > { %6670 = vmatmul.mubr.msk.bf16.gmra.mrb[4].mxu1 %vm706_vm0, %v7140_v25  ;;  %7021 = vmatprep.subr.msk.bf16.mxu0 %vm706_vm0, %v7144_v32  ;;  %v7188_v25 = vld [vmem:[%s7861_s21 + $0xe0] sm:$0xff]  }
  0x86   : > { %6718 = vmatpush3.bf16.xpose.msra.mxu1 %v2155_v33  ;;  %6671 = vmatprep.mubr.msk.bf16.mxu1 %vm706_vm0, %v7146_v34 }
  0x87   : > { %7029 = vmatprep.subr.msk.bf16.mxu1 %vm706_vm0, %v7147_v35 }
  0x8b   : > { %6640 = vmatmul.mubr.msk.bf16.gmra.mrb[8].mxu0 %vm706_vm0, %v7143_v30  ;;  %v7193_v30 = vld [vmem:[%s7861_s21 + $0xb8] sm:$0xff]  }
  0x8c   : > { %6688 = vmatpush3.bf16.xpose.msra.mxu0 %v1853_v41  ;;  %6641 = vmatprep.mubr.msk.bf16.mxu0 %vm706_vm0, %v7149_v38 }
  0x8d   : > { %6672 = vmatmul.mubr.msk.bf16.gmra.mrb[8].mxu1 %vm706_vm0, %v7146_v34  ;;  %7022 = vmatprep.subr.msk.bf16.mxu0 %vm706_vm0, %v7150_v39 }
  0x8e   : > { %6720 = vmatpush3.bf16.xpose.msra.mxu1 %v2158_v45  ;;  %6673 = vmatprep.mubr.msk.bf16.mxu1 %vm706_vm0, %v7152_v40 }
  0x8f   : > { %7030 = vmatprep.subr.msk.bf16.mxu1 %vm706_vm0, %v7153_v43  ;;  %v7699_v43 = vmov -inf  }
  0x90   : > { %578 = vst.msk [vmem:[#allocation2] sm:$0xff] %vm577_vm1, %v7699_v43  ;;  %579 = vst.msk [vmem:[#allocation2 + $0x8] sm:$0xff] %vm577_vm1, %v7699_v43 }
  0x91   : > { %580 = vst.msk [vmem:[#allocation2 + $0x10] sm:$0xff] %vm577_vm1, %v7699_v43  ;;  %581 = vst.msk [vmem:[#allocation2 + $0x18] sm:$0xff] %vm577_vm1, %v7699_v43 }
  0x92   : > { %582 = vst.msk [vmem:[#allocation2 + $0x20] sm:$0xff] %vm577_vm1, %v7699_v43  ;;  %583 = vst.msk [vmem:[#allocation2 + $0x28] sm:$0xff] %vm577_vm1, %v7699_v43 }
  0x93   : > { %6642 = vmatmul.mubr.msk.bf16.gmra.mrb[12].mxu0 %vm706_vm0, %v7149_v38  ;;  %584 = vst.msk [vmem:[#allocation2 + $0x30] sm:$0xff] %vm577_vm1, %v7699_v43  ;;  %585 = vst.msk [vmem:[#allocation2 + $0x38] sm:$0xff] %vm577_vm1, %v7699_v43 }
  0x94   : > { %6690 = vmatpush3.bf16.xpose.msra.mxu0 %v1856_v52  ;;  %6643 = vmatprep.mubr.msk.bf16.mxu0 %vm706_vm0, %v7155_v50  ;;  %586 = vst.msk [vmem:[#allocation2 + $0x40] sm:$0xff] %vm577_vm1, %v7699_v43  ;;  %587 = vst.msk [vmem:[#allocation2 + $0x48] sm:$0xff] %vm577_vm1, %v7699_v43 }
  0x95   : > { %6674 = vmatmul.mubr.msk.bf16.gmra.mrb[12].mxu1 %vm706_vm0, %v7152_v40  ;;  %7023 = vmatprep.subr.msk.bf16.mxu0 %vm706_vm0, %v7156_v53  ;;  %588 = vst.msk [vmem:[#allocation2 + $0x50] sm:$0xff] %vm577_vm1, %v7699_v43  ;;  %589 = vst.msk [vmem:[#allocation2 + $0x58] sm:$0xff] %vm577_vm1, %v7699_v43 }
  0x96   : > { %6722 = vmatpush3.bf16.xpose.msra.mxu1 %v2161_v55  ;;  %6675 = vmatprep.mubr.msk.bf16.mxu1 %vm706_vm0, %v7158_v56  ;;  %590 = vst.msk [vmem:[#allocation2 + $0x60] sm:$0xff] %vm577_vm1, %v7699_v43  ;;  %591 = vst.msk [vmem:[#allocation2 + $0x68] sm:$0xff] %vm577_vm1, %v7699_v43 }
  0x97   : > { %7031 = vmatprep.subr.msk.bf16.mxu1 %vm706_vm0, %v7159_v60  ;;  %592 = vst.msk [vmem:[#allocation2 + $0x70] sm:$0xff] %vm577_vm1, %v7699_v43  ;;  %593 = vst.msk [vmem:[#allocation2 + $0x78] sm:$0xff] %vm577_vm1, %v7699_v43 }
  0x98   : > { %594 = vst.msk [vmem:[#allocation2 + $0x80] sm:$0xff] %vm577_vm1, %v7699_v43  ;;  %595 = vst.msk [vmem:[#allocation2 + $0x88] sm:$0xff] %vm577_vm1, %v7699_v43 }
  0x99   : > { %596 = vst.msk [vmem:[#allocation2 + $0x90] sm:$0xff] %vm577_vm1, %v7699_v43  ;;  %597 = vst.msk [vmem:[#allocation2 + $0x98] sm:$0xff] %vm577_vm1, %v7699_v43 }
  0x9a   : > { %598 = vst.msk [vmem:[#allocation2 + $0xa0] sm:$0xff] %vm577_vm1, %v7699_v43  ;;  %599 = vst.msk [vmem:[#allocation2 + $0xa8] sm:$0xff] %vm577_vm1, %v7699_v43 }
  0x9b   : > { %6644 = vmatmul.mubr.msk.bf16.gmra.mrb[16].mxu0 %vm706_vm0, %v7155_v50  ;;  %600 = vst.msk [vmem:[#allocation2 + $0xb0] sm:$0xff] %vm577_vm1, %v7699_v43  ;;  %601 = vst.msk [vmem:[#allocation2 + $0xb8] sm:$0xff] %vm577_vm1, %v7699_v43 }
  0x9c   : > { %6692 = vmatpush3.bf16.xpose.msra.mxu0 %v1859_v58  ;;  %6645 = vmatprep.mubr.msk.bf16.mxu0 %vm706_vm0, %v7161_v4  ;;  %602 = vst.msk [vmem:[#allocation2 + $0xc0] sm:$0xff] %vm577_vm1, %v7699_v43  ;;  %603 = vst.msk [vmem:[#allocation2 + $0xc8] sm:$0xff] %vm577_vm1, %v7699_v43 }
  0x9d   : > { %6676 = vmatmul.mubr.msk.bf16.gmra.mrb[16].mxu1 %vm706_vm0, %v7158_v56  ;;  %7024 = vmatprep.subr.msk.bf16.mxu0 %vm706_vm0, %v7162_v5  ;;  %604 = vst.msk [vmem:[#allocation2 + $0xd0] sm:$0xff] %vm577_vm1, %v7699_v43  ;;  %605 = vst.msk [vmem:[#allocation2 + $0xd8] sm:$0xff] %vm577_vm1, %v7699_v43  ;;  %v7700_v5 = vmov 0  }
  0x9e   : > { %6724 = vmatpush3.bf16.xpose.msra.mxu1 %v2164_v61  ;;  %6677 = vmatprep.mubr.msk.bf16.mxu1 %vm706_vm0, %v7164_v6  ;;  %606 = vst.msk [vmem:[#allocation2 + $0xe0] sm:$0xff] %vm577_vm1, %v7699_v43  ;;  %607 = vst.msk [vmem:[#allocation2 + $0xe8] sm:$0xff] %vm577_vm1, %v7699_v43 }
  0x9f   : > { %7032 = vmatprep.subr.msk.bf16.mxu1 %vm706_vm0, %v7165_v7  ;;  %608 = vst.msk [vmem:[#allocation2 + $0xf0] sm:$0xff] %vm577_vm1, %v7699_v43  ;;  %609 = vst.msk [vmem:[#allocation2 + $0xf8] sm:$0xff] %vm577_vm1, %v7699_v43  ;;  %7097 = vset.pattern.permute.xlu0 %v7700_v5 }
  0xa0   : > { %610 = vst.msk [vmem:[#allocation2 + $0x100] sm:$0xff] %vm577_vm1, %v7699_v43  ;;  %611 = vst.msk [vmem:[#allocation2 + $0x108] sm:$0xff] %vm577_vm1, %v7699_v43  ;;  %7098 = vset.pattern.permute.xlu1 %v7700_v5 }
  0xa1   : > { %612 = vst.msk [vmem:[#allocation2 + $0x110] sm:$0xff] %vm577_vm1, %v7699_v43  ;;  %613 = vst.msk [vmem:[#allocation2 + $0x118] sm:$0xff] %vm577_vm1, %v7699_v43 }
  0xa2   : > { %614 = vst.msk [vmem:[#allocation2 + $0x120] sm:$0xff] %vm577_vm1, %v7699_v43  ;;  %615 = vst.msk [vmem:[#allocation2 + $0x128] sm:$0xff] %vm577_vm1, %v7699_v43 }
  0xa3   : > { %6646 = vmatmul.mubr.msk.bf16.gmra.mrb[20].mxu0 %vm706_vm0, %v7161_v4  ;;  %616 = vst.msk [vmem:[#allocation2 + $0x130] sm:$0xff] %vm577_vm1, %v7699_v43  ;;  %617 = vst.msk [vmem:[#allocation2 + $0x138] sm:$0xff] %vm577_vm1, %v7699_v43 }
  0xa4   : > { %6694 = vmatpush3.bf16.xpose.msra.mxu0 %v1862_v62  ;;  %6647 = vmatprep.mubr.msk.bf16.mxu0 %vm706_vm0, %v7167_v8  ;;  %618 = vst.msk [vmem:[#allocation2 + $0x140] sm:$0xff] %vm577_vm1, %v7699_v43  ;;  %619 = vst.msk [vmem:[#allocation2 + $0x148] sm:$0xff] %vm577_vm1, %v7699_v43 }
  0xa5   : > { %6678 = vmatmul.mubr.msk.bf16.gmra.mrb[20].mxu1 %vm706_vm0, %v7164_v6  ;;  %7025 = vmatprep.subr.msk.bf16.mxu0 %vm706_vm0, %v7168_v9  ;;  %620 = vst.msk [vmem:[#allocation2 + $0x150] sm:$0xff] %vm577_vm1, %v7699_v43  ;;  %621 = vst.msk [vmem:[#allocation2 + $0x158] sm:$0xff] %vm577_vm1, %v7699_v43 }
  0xa6   : > { %6726 = vmatpush3.bf16.xpose.msra.mxu1 %v2167_v63  ;;  %6679 = vmatprep.mubr.msk.bf16.mxu1 %vm706_vm0, %v7170_v10  ;;  %622 = vst.msk [vmem:[#allocation2 + $0x160] sm:$0xff] %vm577_vm1, %v7699_v43  ;;  %623 = vst.msk [vmem:[#allocation2 + $0x168] sm:$0xff] %vm577_vm1, %v7699_v43 }
  0xa7   : > { %7033 = vmatprep.subr.msk.bf16.mxu1 %vm706_vm0, %v7171_v11  ;;  %624 = vst.msk [vmem:[#allocation2 + $0x170] sm:$0xff] %vm577_vm1, %v7699_v43  ;;  %625 = vst.msk [vmem:[#allocation2 + $0x178] sm:$0xff] %vm577_vm1, %v7699_v43 }
  0xa8   : > { %626 = vst.msk [vmem:[#allocation2 + $0x180] sm:$0xff] %vm577_vm1, %v7699_v43  ;;  %627 = vst.msk [vmem:[#allocation2 + $0x188] sm:$0xff] %vm577_vm1, %v7699_v43 }
  0xa9   : > { %628 = vst.msk [vmem:[#allocation2 + $0x190] sm:$0xff] %vm577_vm1, %v7699_v43  ;;  %629 = vst.msk [vmem:[#allocation2 + $0x198] sm:$0xff] %vm577_vm1, %v7699_v43 }
  0xaa   : > { %630 = vst.msk [vmem:[#allocation2 + $0x1a0] sm:$0xff] %vm577_vm1, %v7699_v43  ;;  %631 = vst.msk [vmem:[#allocation2 + $0x1a8] sm:$0xff] %vm577_vm1, %v7699_v43 }
  0xab   : > { %6648 = vmatmul.mubr.msk.bf16.gmra.mrb[24].mxu0 %vm706_vm0, %v7167_v8  ;;  %632 = vst.msk [vmem:[#allocation2 + $0x1b0] sm:$0xff] %vm577_vm1, %v7699_v43  ;;  %633 = vst.msk [vmem:[#allocation2 + $0x1b8] sm:$0xff] %vm577_vm1, %v7699_v43 }
  0xac   : > { %6696 = vmatpush3.bf16.xpose.msra.mxu0 %v1865_v0  ;;  %6649 = vmatprep.mubr.msk.bf16.mxu0 %vm706_vm0, %v7173_v12  ;;  %634 = vst.msk [vmem:[#allocation2 + $0x1c0] sm:$0xff] %vm577_vm1, %v7699_v43  ;;  %635 = vst.msk [vmem:[#allocation2 + $0x1c8] sm:$0xff] %vm577_vm1, %v7699_v43 }
  0xad   : > { %6680 = vmatmul.mubr.msk.bf16.gmra.mrb[24].mxu1 %vm706_vm0, %v7170_v10  ;;  %7026 = vmatprep.subr.msk.bf16.mxu0 %vm706_vm0, %v7174_v13  ;;  %636 = vst.msk [vmem:[#allocation2 + $0x1d0] sm:$0xff] %vm577_vm1, %v7699_v43  ;;  %637 = vst.msk [vmem:[#allocation2 + $0x1d8] sm:$0xff] %vm577_vm1, %v7699_v43 }
  0xae   : > { %6728 = vmatpush3.bf16.xpose.msra.mxu1 %v2170_v1  ;;  %6681 = vmatprep.mubr.msk.bf16.mxu1 %vm706_vm0, %v7176_v14  ;;  %638 = vst.msk [vmem:[#allocation2 + $0x1e0] sm:$0xff] %vm577_vm1, %v7699_v43  ;;  %639 = vst.msk [vmem:[#allocation2 + $0x1e8] sm:$0xff] %vm577_vm1, %v7699_v43 }
  0xaf   : > { %7034 = vmatprep.subr.msk.bf16.mxu1 %vm706_vm0, %v7177_v15  ;;  %640 = vst.msk [vmem:[#allocation2 + $0x1f0] sm:$0xff] %vm577_vm1, %v7699_v43  ;;  %641 = vst.msk [vmem:[#allocation2 + $0x1f8] sm:$0xff] %vm577_vm1, %v7699_v43 }
  0xb3   : > { %6650 = vmatmul.mubr.msk.bf16.gmra.mrb[28].mxu0 %vm706_vm0, %v7173_v12 }
  0xb4   : > { %6698 = vmatpush3.bf16.xpose.msra.mxu0 %v1868_v2  ;;  %6699 = vmatprep.mubr.msk.bf16.mxu0 %vm706_vm0, %v7179_v16 }
  0xb5   : > { %6682 = vmatmul.mubr.msk.bf16.gmra.mrb[28].mxu1 %vm706_vm0, %v7176_v14 }
  0xb6   : > { %6730 = vmatpush3.bf16.xpose.msra.mxu1 %v2173_v3  ;;  %6731 = vmatprep.mubr.msk.bf16.mxu1 %vm706_vm0, %v7180_v17 }
  0xbb   : > { %6700 = vmatmul.mubr.msk.bf16.vlgmr.msra.gmra.mrb[32].mxu0 %vm706_vm0, %v7179_v16  ;;  %v7701_v16 = vmov 0.0  }
  0xbc   : > { %6701 = vmatprep.mubr.msk.bf16.mxu0 %vm706_vm0, %v7181_v18  ;;  %707 = vst.msk [vmem:[#allocation4] sm:$0xff] %vm706_vm0, %v7701_v16  ;;  %708 = vst.msk [vmem:[#allocation4 + $0x8] sm:$0xff] %vm706_vm0, %v7701_v16 }
  0xbd   : > { %6732 = vmatmul.mubr.msk.bf16.vlgmr.msra.gmra.mrb[32].mxu1 %vm706_vm0, %v7180_v17  ;;  %642 = vst.msk [vmem:[#allocation3] sm:$0xff] %vm577_vm1, %v7701_v16  ;;  %643 = vst.msk [vmem:[#allocation3 + $0x8] sm:$0xff] %vm577_vm1, %v7701_v16 }
  0xbe   : > { %6733 = vmatprep.mubr.msk.bf16.mxu1 %vm706_vm0, %v7182_v19  ;;  %644 = vst.msk [vmem:[#allocation3 + $0x10] sm:$0xff] %vm577_vm1, %v7701_v16  ;;  %645 = vst.msk [vmem:[#allocation3 + $0x18] sm:$0xff] %vm577_vm1, %v7701_v16 }
  0xbf   : > { %646 = vst.msk [vmem:[#allocation3 + $0x20] sm:$0xff] %vm577_vm1, %v7701_v16  ;;  %647 = vst.msk [vmem:[#allocation3 + $0x28] sm:$0xff] %vm577_vm1, %v7701_v16 }
  0xc0   : > { %648 = vst.msk [vmem:[#allocation3 + $0x30] sm:$0xff] %vm577_vm1, %v7701_v16  ;;  %649 = vst.msk [vmem:[#allocation3 + $0x38] sm:$0xff] %vm577_vm1, %v7701_v16 }
  0xc1   : > { %650 = vst.msk [vmem:[#allocation3 + $0x40] sm:$0xff] %vm577_vm1, %v7701_v16  ;;  %651 = vst.msk [vmem:[#allocation3 + $0x48] sm:$0xff] %vm577_vm1, %v7701_v16 }
  0xc2   : > { %652 = vst.msk [vmem:[#allocation3 + $0x50] sm:$0xff] %vm577_vm1, %v7701_v16  ;;  %653 = vst.msk [vmem:[#allocation3 + $0x58] sm:$0xff] %vm577_vm1, %v7701_v16 }
  0xc3   : > { %6702 = vmatmul.mubr.msk.bf16.gmra.mrb[36].mxu0 %vm706_vm0, %v7181_v18  ;;  %654 = vst.msk [vmem:[#allocation3 + $0x60] sm:$0xff] %vm577_vm1, %v7701_v16  ;;  %655 = vst.msk [vmem:[#allocation3 + $0x68] sm:$0xff] %vm577_vm1, %v7701_v16 }
  0xc4   : > { %6703 = vmatprep.mubr.msk.bf16.mxu0 %vm706_vm0, %v7183_v20  ;;  %656 = vst.msk [vmem:[#allocation3 + $0x70] sm:$0xff] %vm577_vm1, %v7701_v16  ;;  %657 = vst.msk [vmem:[#allocation3 + $0x78] sm:$0xff] %vm577_vm1, %v7701_v16 }
  0xc5   : > { %6734 = vmatmul.mubr.msk.bf16.gmra.mrb[36].mxu1 %vm706_vm0, %v7182_v19  ;;  %658 = vst.msk [vmem:[#allocation3 + $0x80] sm:$0xff] %vm577_vm1, %v7701_v16  ;;  %659 = vst.msk [vmem:[#allocation3 + $0x88] sm:$0xff] %vm577_vm1, %v7701_v16 }
  0xc6   : > { %6735 = vmatprep.mubr.msk.bf16.mxu1 %vm706_vm0, %v7184_v21  ;;  %660 = vst.msk [vmem:[#allocation3 + $0x90] sm:$0xff] %vm577_vm1, %v7701_v16  ;;  %661 = vst.msk [vmem:[#allocation3 + $0x98] sm:$0xff] %vm577_vm1, %v7701_v16 }
  0xc7   : > { %662 = vst.msk [vmem:[#allocation3 + $0xa0] sm:$0xff] %vm577_vm1, %v7701_v16  ;;  %663 = vst.msk [vmem:[#allocation3 + $0xa8] sm:$0xff] %vm577_vm1, %v7701_v16 }
  0xc8   : > { %664 = vst.msk [vmem:[#allocation3 + $0xb0] sm:$0xff] %vm577_vm1, %v7701_v16  ;;  %665 = vst.msk [vmem:[#allocation3 + $0xb8] sm:$0xff] %vm577_vm1, %v7701_v16 }
  0xc9   : > { %666 = vst.msk [vmem:[#allocation3 + $0xc0] sm:$0xff] %vm577_vm1, %v7701_v16  ;;  %667 = vst.msk [vmem:[#allocation3 + $0xc8] sm:$0xff] %vm577_vm1, %v7701_v16 }
  0xca   : > { %668 = vst.msk [vmem:[#allocation3 + $0xd0] sm:$0xff] %vm577_vm1, %v7701_v16  ;;  %669 = vst.msk [vmem:[#allocation3 + $0xd8] sm:$0xff] %vm577_vm1, %v7701_v16 }
  0xcb   : > { %6704 = vmatmul.mubr.msk.bf16.gmra.mrb[40].mxu0 %vm706_vm0, %v7183_v20  ;;  %670 = vst.msk [vmem:[#allocation3 + $0xe0] sm:$0xff] %vm577_vm1, %v7701_v16  ;;  %671 = vst.msk [vmem:[#allocation3 + $0xe8] sm:$0xff] %vm577_vm1, %v7701_v16 }
  0xcc   : > { %6705 = vmatprep.mubr.msk.bf16.mxu0 %vm706_vm0, %v7185_v22  ;;  %672 = vst.msk [vmem:[#allocation3 + $0xf0] sm:$0xff] %vm577_vm1, %v7701_v16  ;;  %673 = vst.msk [vmem:[#allocation3 + $0xf8] sm:$0xff] %vm577_vm1, %v7701_v16 }
  0xcd   : > { %6736 = vmatmul.mubr.msk.bf16.gmra.mrb[40].mxu1 %vm706_vm0, %v7184_v21  ;;  %674 = vst.msk [vmem:[#allocation3 + $0x100] sm:$0xff] %vm577_vm1, %v7701_v16  ;;  %675 = vst.msk [vmem:[#allocation3 + $0x108] sm:$0xff] %vm577_vm1, %v7701_v16 }
  0xce   : > { %6737 = vmatprep.mubr.msk.bf16.mxu1 %vm706_vm0, %v7186_v23  ;;  %676 = vst.msk [vmem:[#allocation3 + $0x110] sm:$0xff] %vm577_vm1, %v7701_v16  ;;  %677 = vst.msk [vmem:[#allocation3 + $0x118] sm:$0xff] %vm577_vm1, %v7701_v16 }
  0xcf   : > { %678 = vst.msk [vmem:[#allocation3 + $0x120] sm:$0xff] %vm577_vm1, %v7701_v16  ;;  %679 = vst.msk [vmem:[#allocation3 + $0x128] sm:$0xff] %vm577_vm1, %v7701_v16 }
  0xd0   : > { %680 = vst.msk [vmem:[#allocation3 + $0x130] sm:$0xff] %vm577_vm1, %v7701_v16  ;;  %681 = vst.msk [vmem:[#allocation3 + $0x138] sm:$0xff] %vm577_vm1, %v7701_v16 }
  0xd1   : > { %682 = vst.msk [vmem:[#allocation3 + $0x140] sm:$0xff] %vm577_vm1, %v7701_v16  ;;  %683 = vst.msk [vmem:[#allocation3 + $0x148] sm:$0xff] %vm577_vm1, %v7701_v16 }
  0xd2   : > { %684 = vst.msk [vmem:[#allocation3 + $0x150] sm:$0xff] %vm577_vm1, %v7701_v16  ;;  %685 = vst.msk [vmem:[#allocation3 + $0x158] sm:$0xff] %vm577_vm1, %v7701_v16 }
  0xd3   : > { %6706 = vmatmul.mubr.msk.bf16.gmra.mrb[44].mxu0 %vm706_vm0, %v7185_v22  ;;  %686 = vst.msk [vmem:[#allocation3 + $0x160] sm:$0xff] %vm577_vm1, %v7701_v16  ;;  %687 = vst.msk [vmem:[#allocation3 + $0x168] sm:$0xff] %vm577_vm1, %v7701_v16 }
  0xd4   : > { %6707 = vmatprep.mubr.msk.bf16.mxu0 %vm706_vm0, %v7187_v24  ;;  %688 = vst.msk [vmem:[#allocation3 + $0x170] sm:$0xff] %vm577_vm1, %v7701_v16  ;;  %689 = vst.msk [vmem:[#allocation3 + $0x178] sm:$0xff] %vm577_vm1, %v7701_v16 }
  0xd5   : > { %6738 = vmatmul.mubr.msk.bf16.gmra.mrb[44].mxu1 %vm706_vm0, %v7186_v23  ;;  %690 = vst.msk [vmem:[#allocation3 + $0x180] sm:$0xff] %vm577_vm1, %v7701_v16  ;;  %691 = vst.msk [vmem:[#allocation3 + $0x188] sm:$0xff] %vm577_vm1, %v7701_v16 }
  0xd6   : > { %6739 = vmatprep.mubr.msk.bf16.mxu1 %vm706_vm0, %v7188_v25  ;;  %692 = vst.msk [vmem:[#allocation3 + $0x190] sm:$0xff] %vm577_vm1, %v7701_v16  ;;  %693 = vst.msk [vmem:[#allocation3 + $0x198] sm:$0xff] %vm577_vm1, %v7701_v16 }
  0xd7   : > { %694 = vst.msk [vmem:[#allocation3 + $0x1a0] sm:$0xff] %vm577_vm1, %v7701_v16  ;;  %695 = vst.msk [vmem:[#allocation3 + $0x1a8] sm:$0xff] %vm577_vm1, %v7701_v16 }
  0xd8   : > { %696 = vst.msk [vmem:[#allocation3 + $0x1b0] sm:$0xff] %vm577_vm1, %v7701_v16  ;;  %697 = vst.msk [vmem:[#allocation3 + $0x1b8] sm:$0xff] %vm577_vm1, %v7701_v16 }
  0xd9   : > { %698 = vst.msk [vmem:[#allocation3 + $0x1c0] sm:$0xff] %vm577_vm1, %v7701_v16  ;;  %699 = vst.msk [vmem:[#allocation3 + $0x1c8] sm:$0xff] %vm577_vm1, %v7701_v16 }
  0xda   : > { %700 = vst.msk [vmem:[#allocation3 + $0x1d0] sm:$0xff] %vm577_vm1, %v7701_v16  ;;  %701 = vst.msk [vmem:[#allocation3 + $0x1d8] sm:$0xff] %vm577_vm1, %v7701_v16 }
  0xdb   : > { %6708 = vmatmul.mubr.msk.bf16.gmra.mrb[48].mxu0 %vm706_vm0, %v7187_v24  ;;  %702 = vst.msk [vmem:[#allocation3 + $0x1e0] sm:$0xff] %vm577_vm1, %v7701_v16  ;;  %703 = vst.msk [vmem:[#allocation3 + $0x1e8] sm:$0xff] %vm577_vm1, %v7701_v16 }
  0xdc   : > { %6709 = vmatprep.mubr.msk.bf16.mxu0 %vm706_vm0, %v7189_v26  ;;  %704 = vst.msk [vmem:[#allocation3 + $0x1f0] sm:$0xff] %vm577_vm1, %v7701_v16  ;;  %705 = vst.msk [vmem:[#allocation3 + $0x1f8] sm:$0xff] %vm577_vm1, %v7701_v16 }
  0xdd   : > { %6740 = vmatmul.mubr.msk.bf16.gmra.mrb[48].mxu1 %vm706_vm0, %v7188_v25  ;;  %709 = vst.msk [vmem:[#allocation4 + $0x10] sm:$0xff] %vm706_vm0, %v7701_v16  ;;  %710 = vst.msk [vmem:[#allocation4 + $0x18] sm:$0xff] %vm706_vm0, %v7701_v16 }
  0xde   : > { %6741 = vmatprep.mubr.msk.bf16.mxu1 %vm706_vm0, %v7190_v27  ;;  %711 = vst.msk [vmem:[#allocation4 + $0x20] sm:$0xff] %vm706_vm0, %v7701_v16  ;;  %712 = vst.msk [vmem:[#allocation4 + $0x28] sm:$0xff] %vm706_vm0, %v7701_v16 }
  0xdf   : > { %713 = vst.msk [vmem:[#allocation4 + $0x30] sm:$0xff] %vm706_vm0, %v7701_v16  ;;  %714 = vst.msk [vmem:[#allocation4 + $0x38] sm:$0xff] %vm706_vm0, %v7701_v16 }
  0xe0   : > { %715 = vst.msk [vmem:[#allocation4 + $0x40] sm:$0xff] %vm706_vm0, %v7701_v16  ;;  %716 = vst.msk [vmem:[#allocation4 + $0x48] sm:$0xff] %vm706_vm0, %v7701_v16 }
  0xe1   : > { %717 = vst.msk [vmem:[#allocation4 + $0x50] sm:$0xff] %vm706_vm0, %v7701_v16  ;;  %718 = vst.msk [vmem:[#allocation4 + $0x58] sm:$0xff] %vm706_vm0, %v7701_v16 }
  0xe2   : > { %719 = vst.msk [vmem:[#allocation4 + $0x60] sm:$0xff] %vm706_vm0, %v7701_v16  ;;  %720 = vst.msk [vmem:[#allocation4 + $0x68] sm:$0xff] %vm706_vm0, %v7701_v16 }
  0xe3   : > { %6710 = vmatmul.mubr.msk.bf16.gmra.mrb[52].mxu0 %vm706_vm0, %v7189_v26  ;;  %721 = vst.msk [vmem:[#allocation4 + $0x70] sm:$0xff] %vm706_vm0, %v7701_v16  ;;  %722 = vst.msk [vmem:[#allocation4 + $0x78] sm:$0xff] %vm706_vm0, %v7701_v16 }
  0xe4   : > { %6711 = vmatprep.mubr.msk.bf16.mxu0 %vm706_vm0, %v7191_v28  ;;  %723 = vst.msk [vmem:[#allocation4 + $0x80] sm:$0xff] %vm706_vm0, %v7701_v16  ;;  %724 = vst.msk [vmem:[#allocation4 + $0x88] sm:$0xff] %vm706_vm0, %v7701_v16 }
  0xe5   : > { %6742 = vmatmul.mubr.msk.bf16.gmra.mrb[52].mxu1 %vm706_vm0, %v7190_v27  ;;  %725 = vst.msk [vmem:[#allocation4 + $0x90] sm:$0xff] %vm706_vm0, %v7701_v16  ;;  %726 = vst.msk [vmem:[#allocation4 + $0x98] sm:$0xff] %vm706_vm0, %v7701_v16 }
  0xe6   : > { %6743 = vmatprep.mubr.msk.bf16.mxu1 %vm706_vm0, %v7192_v29  ;;  %727 = vst.msk [vmem:[#allocation4 + $0xa0] sm:$0xff] %vm706_vm0, %v7701_v16  ;;  %728 = vst.msk [vmem:[#allocation4 + $0xa8] sm:$0xff] %vm706_vm0, %v7701_v16 }
  0xe7   : > { %729 = vst.msk [vmem:[#allocation4 + $0xb0] sm:$0xff] %vm706_vm0, %v7701_v16  ;;  %730 = vst.msk [vmem:[#allocation4 + $0xb8] sm:$0xff] %vm706_vm0, %v7701_v16 }
  0xe8   : > { %731 = vst.msk [vmem:[#allocation4 + $0xc0] sm:$0xff] %vm706_vm0, %v7701_v16  ;;  %732 = vst.msk [vmem:[#allocation4 + $0xc8] sm:$0xff] %vm706_vm0, %v7701_v16 }
  0xe9   : > { %733 = vst.msk [vmem:[#allocation4 + $0xd0] sm:$0xff] %vm706_vm0, %v7701_v16  ;;  %734 = vst.msk [vmem:[#allocation4 + $0xd8] sm:$0xff] %vm706_vm0, %v7701_v16 }
  0xea   : > { %735 = vst.msk [vmem:[#allocation4 + $0xe0] sm:$0xff] %vm706_vm0, %v7701_v16  ;;  %736 = vst.msk [vmem:[#allocation4 + $0xe8] sm:$0xff] %vm706_vm0, %v7701_v16 }
  0xeb   : > { %6712 = vmatmul.mubr.msk.bf16.gmra.mrb[56].mxu0 %vm706_vm0, %v7191_v28  ;;  %737 = vst.msk [vmem:[#allocation4 + $0xf0] sm:$0xff] %vm706_vm0, %v7701_v16  ;;  %738 = vst.msk [vmem:[#allocation4 + $0xf8] sm:$0xff] %vm706_vm0, %v7701_v16 }
  0xec   : > { %6713 = vmatprep.mubr.msk.bf16.mxu0 %vm706_vm0, %v7193_v30  ;;  %739 = vst.msk [vmem:[#allocation4 + $0x100] sm:$0xff] %vm706_vm0, %v7701_v16  ;;  %740 = vst.msk [vmem:[#allocation4 + $0x108] sm:$0xff] %vm706_vm0, %v7701_v16 }
  0xed   : > { %6744 = vmatmul.mubr.msk.bf16.gmra.mrb[56].mxu1 %vm706_vm0, %v7192_v29  ;;  %741 = vst.msk [vmem:[#allocation4 + $0x110] sm:$0xff] %vm706_vm0, %v7701_v16  ;;  %742 = vst.msk [vmem:[#allocation4 + $0x118] sm:$0xff] %vm706_vm0, %v7701_v16 }
  0xee   : > { %6745 = vmatprep.mubr.msk.bf16.mxu1 %vm706_vm0, %v7194_v31  ;;  %743 = vst.msk [vmem:[#allocation4 + $0x120] sm:$0xff] %vm706_vm0, %v7701_v16  ;;  %744 = vst.msk [vmem:[#allocation4 + $0x128] sm:$0xff] %vm706_vm0, %v7701_v16 }
  0xef   : > { %745 = vst.msk [vmem:[#allocation4 + $0x130] sm:$0xff] %vm706_vm0, %v7701_v16  ;;  %746 = vst.msk [vmem:[#allocation4 + $0x138] sm:$0xff] %vm706_vm0, %v7701_v16 }
  0xf0   : > { %747 = vst.msk [vmem:[#allocation4 + $0x140] sm:$0xff] %vm706_vm0, %v7701_v16  ;;  %748 = vst.msk [vmem:[#allocation4 + $0x148] sm:$0xff] %vm706_vm0, %v7701_v16 }
  0xf1   : > { %749 = vst.msk [vmem:[#allocation4 + $0x150] sm:$0xff] %vm706_vm0, %v7701_v16  ;;  %750 = vst.msk [vmem:[#allocation4 + $0x158] sm:$0xff] %vm706_vm0, %v7701_v16 }
  0xf2   : > { %751 = vst.msk [vmem:[#allocation4 + $0x160] sm:$0xff] %vm706_vm0, %v7701_v16  ;;  %752 = vst.msk [vmem:[#allocation4 + $0x168] sm:$0xff] %vm706_vm0, %v7701_v16 }
  0xf3   : > { %6714 = vmatmul.mubr.msk.bf16.gmra.mrb[60].mxu0 %vm706_vm0, %v7193_v30  ;;  %753 = vst.msk [vmem:[#allocation4 + $0x170] sm:$0xff] %vm706_vm0, %v7701_v16  ;;  %754 = vst.msk [vmem:[#allocation4 + $0x178] sm:$0xff] %vm706_vm0, %v7701_v16 }
  0xf4   : > { %755 = vst.msk [vmem:[#allocation4 + $0x180] sm:$0xff] %vm706_vm0, %v7701_v16  ;;  %756 = vst.msk [vmem:[#allocation4 + $0x188] sm:$0xff] %vm706_vm0, %v7701_v16 }
  0xf5   : > { %6746 = vmatmul.mubr.msk.bf16.gmra.mrb[60].mxu1 %vm706_vm0, %v7194_v31  ;;  %757 = vst.msk [vmem:[#allocation4 + $0x190] sm:$0xff] %vm706_vm0, %v7701_v16  ;;  %758 = vst.msk [vmem:[#allocation4 + $0x198] sm:$0xff] %vm706_vm0, %v7701_v16 }
  0xf6   : > { %759 = vst.msk [vmem:[#allocation4 + $0x1a0] sm:$0xff] %vm706_vm0, %v7701_v16  ;;  %760 = vst.msk [vmem:[#allocation4 + $0x1a8] sm:$0xff] %vm706_vm0, %v7701_v16 }
  0xf7   : > { %761 = vst.msk [vmem:[#allocation4 + $0x1b0] sm:$0xff] %vm706_vm0, %v7701_v16  ;;  %762 = vst.msk [vmem:[#allocation4 + $0x1b8] sm:$0xff] %vm706_vm0, %v7701_v16 }
  0xf8   : > { %763 = vst.msk [vmem:[#allocation4 + $0x1c0] sm:$0xff] %vm706_vm0, %v7701_v16  ;;  %764 = vst.msk [vmem:[#allocation4 + $0x1c8] sm:$0xff] %vm706_vm0, %v7701_v16 }
  0xf9   : > { %765 = vst.msk [vmem:[#allocation4 + $0x1d0] sm:$0xff] %vm706_vm0, %v7701_v16  ;;  %766 = vst.msk [vmem:[#allocation4 + $0x1d8] sm:$0xff] %vm706_vm0, %v7701_v16 }
  0xfa   : > { %767 = vst.msk [vmem:[#allocation4 + $0x1e0] sm:$0xff] %vm706_vm0, %v7701_v16  ;;  %768 = vst.msk [vmem:[#allocation4 + $0x1e8] sm:$0xff] %vm706_vm0, %v7701_v16 }
  0xfb   : > { %769 = vst.msk [vmem:[#allocation4 + $0x1f0] sm:$0xff] %vm706_vm0, %v7701_v16  ;;  %770 = vst.msk [vmem:[#allocation4 + $0x1f8] sm:$0xff] %vm706_vm0, %v7701_v16 }
 0x14e   : > { %v8109_v32 = vpop.f32.mrb[0].mxu0 }
 0x14f   : > { %v8111_v34 = vpop.f32.mrb[1].mxu0 }
 0x150   : > { %v8113_v33 = vpop.f32.mrb[0].mxu1  ;;  %v8115_v35 = vpop.f32.mrb[2].mxu0  ;;  %v2376_v36 = vmax.f32 %v8109_v32, %v8111_v34 }
 0x151   : > { %v8119_v37 = vpop.f32.mrb[1].mxu1  ;;  %v8121_v38 = vpop.f32.mrb[3].mxu0 }
 0x152   : > { %v8123_v39 = vpop.f32.mrb[2].mxu1  ;;  %2377 = vmax.xlane.f32.xlu0 %v2376_v36  ;;  %v2424_v40 = vmax.f32 %v8113_v33, %v8119_v37  ;;  %v2379_v41 = vmax.f32 %v8115_v35, %v8121_v38 }
 0x153   : > { %v8129_v42 = vpop.f32.mrb[3].mxu1 }
 0x154   : > { %v2427_v44 = vmax.f32 %v8123_v39, %v8129_v42 }
 0x156   : > { %2428 = vmax.xlane.f32.xlu1 %v2427_v44  ;;  %2425 = vmax.xlane.f32.xlu0 %v2424_v40  ;;  %v8264_v45 = vpop.f32.mrb[4].mxu0 }
 0x157   : > { %v8266_v46 = vpop.f32.mrb[5].mxu0 }
 0x158   : > { %v8268_v47 = vpop.f32.mrb[6].mxu0  ;;  %v8270_v48 = vpop.f32.mrb[4].mxu1  ;;  %v2382_v49 = vmax.f32 %v8264_v45, %v8266_v46 }
 0x159   : > { %v8274_v50 = vpop.f32.mrb[7].mxu0  ;;  %v8276_v51 = vpop.f32.mrb[5].mxu1 }
 0x15a   : > { %10921 = vst [vmem:[#allocation6_spill] sm:$0xff] %v8274_v50  ;;  %2380 = vmax.xlane.f32.xlu0 %v2379_v41  ;;  %2383 = vmax.xlane.f32.xlu1 %v2382_v49  ;;  %v8281_v52 = vpop.f32.mrb[6].mxu1  ;;  %v2430_v53 = vmax.f32 %v8270_v48, %v8276_v51  ;;  %v2385_v54 = vmax.f32 %v8268_v47, %v8274_v50  ;;  %v9279_v50 = vld [vmem:[#allocation2 + $0x1a0] sm:$0xff] }
 0x15b   : > { %v8287_v55 = vpop.f32.mrb[7].mxu1  ;;  %11056 = vst [vmem:[#allocation141_spill] sm:$0xff] %v9279_v50 }
 0x15c   : > { %v2433_v56 = vmax.f32 %v8281_v52, %v8287_v55 }
 0x15e   : > { %2431 = vmax.xlane.f32.xlu0 %v2430_v53  ;;  %2386 = vmax.xlane.f32.xlu1 %v2385_v54  ;;  %v8291_v57 = vpop.f32.mrb[8].mxu0 }
 0x15f   : > { %10922 = vst [vmem:[#allocation7_spill] sm:$0xff] %v8291_v57  ;;  %v8293_v58 = vpop.f32.mrb[9].mxu0 }
 0x160   : > { %10923 = vst [vmem:[#allocation8_spill] sm:$0xff] %v8293_v58  ;;  %v8295_v59 = vpop.f32.mrb[8].mxu1  ;;  %v2388_v60 = vmax.f32 %v8291_v57, %v8293_v58  ;;  %v8299_v61 = vpop.f32.mrb[10].mxu0  ;;  %v9197_v57 = vld [vmem:[#allocation2 + $0x180] sm:$0xff] }
 0x161   : > { %10924 = vst [vmem:[#allocation9_spill] sm:$0xff] %v8295_v59  ;;  %10925 = vst [vmem:[#allocation10_spill] sm:$0xff] %v8299_v61  ;;  %v8301_v62 = vpop.f32.mrb[11].mxu0  ;;  %v8303_v63 = vpop.f32.mrb[9].mxu1 }
 0x162   : > { %10926 = vst [vmem:[#allocation11_spill] sm:$0xff] %v8301_v62  ;;  %10927 = vst [vmem:[#allocation12_spill] sm:$0xff] %v8303_v63  ;;  %2434 = vmax.xlane.f32.xlu1 %v2433_v56  ;;  %2389 = vmax.xlane.f32.xlu0 %v2388_v60  ;;  %v8305_v0 = vpop.f32.mrb[10].mxu1  ;;  %v2436_v1 = vmax.f32 %v8295_v59, %v8303_v63  ;;  %v2391_v2 = vmax.f32 %v8299_v61, %v8301_v62  ;;  %v9169_v61 = vld [vmem:[#allocation2 + $0xf8] sm:$0xff] }
 0x163   : > { %10928 = vst [vmem:[#allocation13_spill] sm:$0xff] %v8305_v0  ;;  %v8311_v3 = vpop.f32.mrb[11].mxu1 }
 0x164   : > { %10929 = vst [vmem:[#allocation14_spill] sm:$0xff] %v8311_v3  ;;  %v2439_v4 = vmax.f32 %v8305_v0, %v8311_v3  ;;  %v9251_v0 = vld [vmem:[#allocation2 + $0x198] sm:$0xff] }
 0x166   : > { %2437 = vmax.xlane.f32.xlu0 %v2436_v1  ;;  %2392 = vmax.xlane.f32.xlu1 %v2391_v2  ;;  %v8315_v6 = vpop.f32.mrb[12].mxu0 }
 0x167   : > { %10930 = vst [vmem:[#allocation15_spill] sm:$0xff] %v8315_v6  ;;  %v8317_v7 = vpop.f32.mrb[13].mxu0 }
 0x168   : > { %10931 = vst [vmem:[#allocation16_spill] sm:$0xff] %v8317_v7  ;;  %v8319_v8 = vpop.f32.mrb[12].mxu1  ;;  %v2394_v9 = vmax.f32 %v8315_v6, %v8317_v7  ;;  %v8323_v10 = vpop.f32.mrb[14].mxu0 }
 0x169   : > { %10932 = vst [vmem:[#allocation17_spill] sm:$0xff] %v8319_v8  ;;  %10933 = vst [vmem:[#allocation18_spill] sm:$0xff] %v8323_v10  ;;  %v8325_v11 = vpop.f32.mrb[15].mxu0  ;;  %v8327_v12 = vpop.f32.mrb[13].mxu1 }
 0x16a   : > { %10934 = vst [vmem:[#allocation19_spill] sm:$0xff] %v8325_v11  ;;  %10935 = vst [vmem:[#allocation20_spill] sm:$0xff] %v8327_v12  ;;  %2440 = vmax.xlane.f32.xlu1 %v2439_v4  ;;  %2395 = vmax.xlane.f32.xlu0 %v2394_v9  ;;  %v8329_v13 = vpop.f32.mrb[14].mxu1  ;;  %v2442_v14 = vmax.f32 %v8319_v8, %v8327_v12  ;;  %v2397_v15 = vmax.f32 %v8323_v10, %v8325_v11  ;;  %v9085_v11 = vld [vmem:[#allocation2 + $0xd8] sm:$0xff]  ;;  %v9111_v12 = vld [vmem:[#allocation2 + $0xe0] sm:$0xff] }
 0x16b   : > { %10936 = vst [vmem:[#allocation21_spill] sm:$0xff] %v8329_v13  ;;  %v8591_v17 = vpop.f32.mrb[15].mxu1 }
 0x16c   : > { %10937 = vst [vmem:[#allocation22_spill] sm:$0xff] %v8591_v17  ;;  %v2445_v18 = vmax.f32 %v8329_v13, %v8591_v17  ;;  %v9131_v17 = vld [vmem:[#allocation2 + $0x70] sm:$0xff] }
 0x16e   : > { %2443 = vmax.xlane.f32.xlu0 %v2442_v14  ;;  %2398 = vmax.xlane.f32.xlu1 %v2397_v15  ;;  %v8601_v19 = vpop.f32.mrb[16].mxu0 }
 0x16f   : > { %10938 = vst [vmem:[#allocation23_spill] sm:$0xff] %v8601_v19  ;;  %v8603_v20 = vpop.f32.mrb[17].mxu0 }
 0x170   : > { %10939 = vst [vmem:[#allocation24_spill] sm:$0xff] %v8603_v20  ;;  %v8605_v21 = vpop.f32.mrb[16].mxu1  ;;  %v2400_v22 = vmax.f32 %v8601_v19, %v8603_v20  ;;  %v8609_v23 = vpop.f32.mrb[18].mxu0  ;;  %v9049_v20 = vld [vmem:[#allocation2 + $0x50] sm:$0xff] }
 0x171   : > { %10940 = vst [vmem:[#allocation25_spill] sm:$0xff] %v8605_v21  ;;  %10941 = vst [vmem:[#allocation26_spill] sm:$0xff] %v8609_v23  ;;  %v8611_v24 = vpop.f32.mrb[19].mxu0  ;;  %v8613_v25 = vpop.f32.mrb[17].mxu1  ;;  %v9065_v19 = vld [vmem:[#allocation2 + $0xd0] sm:$0xff] }
 0x172   : > { %10942 = vst [vmem:[#allocation27_spill] sm:$0xff] %v8611_v24  ;;  %10943 = vst [vmem:[#allocation28_spill] sm:$0xff] %v8613_v25  ;;  %2446 = vmax.xlane.f32.xlu1 %v2445_v18  ;;  %2401 = vmax.xlane.f32.xlu0 %v2400_v22  ;;  %v8615_v26 = vpop.f32.mrb[18].mxu1  ;;  %v2448_v27 = vmax.f32 %v8605_v21, %v8613_v25  ;;  %v2403_v28 = vmax.f32 %v8609_v23, %v8611_v24  ;;  %v8966_v21 = vld [vmem:[#allocation2 + $0xa8] sm:$0xff] }
 0x173   : > { %10944 = vst [vmem:[#allocation29_spill] sm:$0xff] %v8615_v26  ;;  %v8621_v29 = vpop.f32.mrb[19].mxu1 }
 0x174   : > { %10945 = vst [vmem:[#allocation30_spill] sm:$0xff] %v8621_v29  ;;  %v2451_v30 = vmax.f32 %v8615_v26, %v8621_v29  ;;  %v8987_v26 = vld [vmem:[#allocation2 + $0x38] sm:$0xff] }
 0x176   : > { %2449 = vmax.xlane.f32.xlu0 %v2448_v27  ;;  %2404 = vmax.xlane.f32.xlu1 %v2403_v28  ;;  %v8625_v31 = vpop.f32.mrb[20].mxu0 }
 0x177   : > { %10946 = vst [vmem:[#allocation31_spill] sm:$0xff] %v8625_v31  ;;  %v8627_v36 = vpop.f32.mrb[21].mxu0 }
 0x178   : > { %10947 = vst [vmem:[#allocation32_spill] sm:$0xff] %v8627_v36  ;;  %v8629_v40 = vpop.f32.mrb[20].mxu1  ;;  %v2406_v41 = vmax.f32 %v8625_v31, %v8627_v36  ;;  %v8633_v43 = vpop.f32.mrb[22].mxu0  ;;  %v8931_v36 = vld [vmem:[#allocation2 + $0x20] sm:$0xff]  ;;  %v8944_v31 = vld [vmem:[#allocation2 + $0x28] sm:$0xff] }
 0x179   : > { %10948 = vst [vmem:[#allocation33_spill] sm:$0xff] %v8629_v40  ;;  %10949 = vst [vmem:[#allocation34_spill] sm:$0xff] %v8633_v43  ;;  %v8635_v44 = vpop.f32.mrb[23].mxu0  ;;  %v8637_v49 = vpop.f32.mrb[21].mxu1 }
 0x17a   : > { %10950 = vst [vmem:[#allocation35_spill] sm:$0xff] %v8635_v44  ;;  %10951 = vst [vmem:[#allocation36_spill] sm:$0xff] %v8637_v49  ;;  %2452 = vmax.xlane.f32.xlu1 %v2451_v30  ;;  %2407 = vmax.xlane.f32.xlu0 %v2406_v41  ;;  %v8639_v53 = vpop.f32.mrb[22].mxu1  ;;  %v2454_v54 = vmax.f32 %v8629_v40, %v8637_v49  ;;  %v2409_v56 = vmax.f32 %v8633_v43, %v8635_v44  ;;  %v7206_v49 = vld [vmem:[%s8021_s27 + $0x10] sm:$0xff]   ;;  %v7209_v40 = vld [vmem:[%s8021_s27 + $0x58] sm:$0xff]  }
 0x17b   : > { %10952 = vst [vmem:[#allocation37_spill] sm:$0xff] %v8639_v53  ;;  %v8645_v60 = vpop.f32.mrb[23].mxu1  ;;  %v8946_v44 = vld [vmem:[#allocation2 + $0xa0] sm:$0xff]  ;;  %v7221_v43 = vld [vmem:[%s8021_s27 + $0x70] sm:$0xff]  }
 0x17c   : > { %10953 = vst [vmem:[#allocation38_spill] sm:$0xff] %v8645_v60  ;;  %v2457_v1 = vmax.f32 %v8639_v53, %v8645_v60  ;;  %v8917_v60 = vld [vmem:[#allocation2 + $0x90] sm:$0xff]  ;;  %v2331_v53 = vld [vmem:[#allocation2 + $0x98] sm:$0xff] }
 0x17e   : > { %2455 = vmax.xlane.f32.xlu0 %v2454_v54  ;;  %2410 = vmax.xlane.f32.xlu1 %v2409_v56  ;;  %v8649_v2 = vpop.f32.mrb[24].mxu0 }
 0x17f   : > { %10954 = vst [vmem:[#allocation39_spill] sm:$0xff] %v8649_v2  ;;  %v8651_v4 = vpop.f32.mrb[25].mxu0 }
 0x180   : > { %10955 = vst [vmem:[#allocation40_spill] sm:$0xff] %v8651_v4  ;;  %v8653_v5 = vpop.f32.mrb[24].mxu1  ;;  %v2412_v9 = vmax.f32 %v8649_v2, %v8651_v4  ;;  %v8657_v14 = vpop.f32.mrb[26].mxu0 }
 0x181   : > { %10956 = vst [vmem:[#allocation41_spill] sm:$0xff] %v8653_v5  ;;  %10957 = vst [vmem:[#allocation42_spill] sm:$0xff] %v8657_v14  ;;  %v8659_v15 = vpop.f32.mrb[27].mxu0  ;;  %v8661_v16 = vpop.f32.mrb[25].mxu1 }
 0x182   : > { %10958 = vst [vmem:[#allocation43_spill] sm:$0xff] %v8659_v15  ;;  %10959 = vst [vmem:[#allocation44_spill] sm:$0xff] %v8661_v16  ;;  %2458 = vmax.xlane.f32.xlu1 %v2457_v1  ;;  %2413 = vmax.xlane.f32.xlu0 %v2412_v9  ;;  %v8663_v18 = vpop.f32.mrb[26].mxu1  ;;  %v2460_v22 = vmax.f32 %v8653_v5, %v8661_v16  ;;  %v2415_v27 = vmax.f32 %v8657_v14, %v8659_v15  ;;  %v8901_v14 = vld [vmem:[#allocation2 + $0x8] sm:$0xff] }
 0x183   : > { %10960 = vst [vmem:[#allocation45_spill] sm:$0xff] %v8663_v18  ;;  %v8669_v28 = vpop.f32.mrb[27].mxu1 }
 0x184   : > { %10961 = vst [vmem:[#allocation46_spill] sm:$0xff] %v8669_v28  ;;  %v2463_v30 = vmax.f32 %v8663_v18, %v8669_v28 }
 0x186   : > { %2461 = vmax.xlane.f32.xlu0 %v2460_v22  ;;  %2416 = vmax.xlane.f32.xlu1 %v2415_v27  ;;  %v8673_v41 = vpop.f32.mrb[28].mxu0 }
 0x187   : > { %10962 = vst [vmem:[#allocation47_spill] sm:$0xff] %v8673_v41  ;;  %v8675_v54 = vpop.f32.mrb[29].mxu0 }
 0x188   : > { %10963 = vst [vmem:[#allocation48_spill] sm:$0xff] %v8675_v54  ;;  %v8677_v56 = vpop.f32.mrb[28].mxu1  ;;  %v2418_v1 = vmax.f32 %v8673_v41, %v8675_v54  ;;  %v8681_v9 = vpop.f32.mrb[30].mxu0 }
 0x189   : > { %10964 = vst [vmem:[#allocation49_spill] sm:$0xff] %v8677_v56  ;;  %10965 = vst [vmem:[#allocation50_spill] sm:$0xff] %v8681_v9  ;;  %v8683_v16 = vpop.f32.mrb[31].mxu0  ;;  %v8685_v5 = vpop.f32.mrb[29].mxu1 }
 0x18a   : > { %10966 = vst [vmem:[#allocation51_spill] sm:$0xff] %v8683_v16  ;;  %10967 = vst [vmem:[#allocation52_spill] sm:$0xff] %v8685_v5  ;;  %2464 = vmax.xlane.f32.xlu1 %v2463_v30  ;;  %2419 = vmax.xlane.f32.xlu0 %v2418_v1  ;;  %v8687_v28 = vpop.f32.mrb[30].mxu1  ;;  %v2466_v22 = vmax.f32 %v8677_v56, %v8685_v5  ;;  %v2421_v27 = vmax.f32 %v8681_v9, %v8683_v16 }
 0x18b   : > { %10968 = vst [vmem:[#allocation53_spill] sm:$0xff] %v8687_v28  ;;  %v8693_v18 = vpop.f32.mrb[31].mxu1 }
 0x18c   : > { %10969 = vst [vmem:[#allocation54_spill] sm:$0xff] %v8693_v18  ;;  %v2469_v54 = vmax.f32 %v8687_v28, %v8693_v18 }
 0x18e   : > { %2467 = vmax.xlane.f32.xlu0 %v2466_v22  ;;  %2422 = vmax.xlane.f32.xlu1 %v2421_v27  ;;  %v8697_v41 = vpop.f32.mrb[32].mxu0 }
 0x18f   : > { %10970 = vst [vmem:[#allocation55_spill] sm:$0xff] %v8697_v41  ;;  %v8699_v4 = vpop.f32.mrb[33].mxu0 }
 0x190   : > { %10971 = vst [vmem:[#allocation56_spill] sm:$0xff] %v8699_v4  ;;  %v8701_v30 = vpop.f32.mrb[32].mxu1  ;;  %v2472_v1 = vmax.f32 %v8697_v41, %v8699_v4  ;;  %v8705_v5 = vpop.f32.mrb[34].mxu0 }
 0x191   : > { %10972 = vst [vmem:[#allocation57_spill] sm:$0xff] %v8701_v30  ;;  %10973 = vst [vmem:[#allocation58_spill] sm:$0xff] %v8705_v5  ;;  %v8707_v56 = vpop.f32.mrb[35].mxu0  ;;  %v8709_v16 = vpop.f32.mrb[33].mxu1 }
 0x192   : > { %10974 = vst [vmem:[#allocation59_spill] sm:$0xff] %v8707_v56  ;;  %10975 = vst [vmem:[#allocation60_spill] sm:$0xff] %v8709_v16  ;;  %2470 = vmax.xlane.f32.xlu1 %v2469_v54  ;;  %2473 = vmax.xlane.f32.xlu0 %v2472_v1  ;;  %v8711_v18 = vpop.f32.mrb[34].mxu1  ;;  %v2520_v22 = vmax.f32 %v8701_v30, %v8709_v16  ;;  %v2475_v27 = vmax.f32 %v8705_v5, %v8707_v56 }
 0x193   : > { %10976 = vst [vmem:[#allocation61_spill] sm:$0xff] %v8711_v18  ;;  %v8717_v28 = vpop.f32.mrb[35].mxu1 }
 0x194   : > { %10977 = vst [vmem:[#allocation62_spill] sm:$0xff] %v8717_v28  ;;  %v2523_v4 = vmax.f32 %v8711_v18, %v8717_v28 }
 0x196   : > { %2521 = vmax.xlane.f32.xlu0 %v2520_v22  ;;  %2476 = vmax.xlane.f32.xlu1 %v2475_v27  ;;  %v8721_v41 = vpop.f32.mrb[36].mxu0 }
 0x197   : > { %10978 = vst [vmem:[#allocation63_spill] sm:$0xff] %v8721_v41  ;;  %v8723_v9 = vpop.f32.mrb[37].mxu0 }
 0x198   : > { %10979 = vst [vmem:[#allocation64_spill] sm:$0xff] %v8723_v9  ;;  %v8725_v54 = vpop.f32.mrb[36].mxu1  ;;  %v2478_v1 = vmax.f32 %v8721_v41, %v8723_v9  ;;  %v8729_v16 = vpop.f32.mrb[38].mxu0 }
 0x199   : > { %10980 = vst [vmem:[#allocation65_spill] sm:$0xff] %v8725_v54  ;;  %10981 = vst [vmem:[#allocation66_spill] sm:$0xff] %v8729_v16  ;;  %v8731_v30 = vpop.f32.mrb[39].mxu0  ;;  %v8733_v56 = vpop.f32.mrb[37].mxu1 }
 0x19a   : > { %10982 = vst [vmem:[#allocation67_spill] sm:$0xff] %v8731_v30  ;;  %10983 = vst [vmem:[#allocation68_spill] sm:$0xff] %v8733_v56  ;;  %2524 = vmax.xlane.f32.xlu1 %v2523_v4  ;;  %2479 = vmax.xlane.f32.xlu0 %v2478_v1  ;;  %v8735_v28 = vpop.f32.mrb[38].mxu1  ;;  %v2526_v22 = vmax.f32 %v8725_v54, %v8733_v56  ;;  %v2481_v27 = vmax.f32 %v8729_v16, %v8731_v30 }
 0x19b   : > { %10984 = vst [vmem:[#allocation69_spill] sm:$0xff] %v8735_v28  ;;  %v8741_v18 = vpop.f32.mrb[39].mxu1 }
 0x19c   : > { %10985 = vst [vmem:[#allocation70_spill] sm:$0xff] %v8741_v18  ;;  %v2529_v9 = vmax.f32 %v8735_v28, %v8741_v18 }
 0x19e   : > { %2527 = vmax.xlane.f32.xlu0 %v2526_v22  ;;  %2482 = vmax.xlane.f32.xlu1 %v2481_v27  ;;  %v8745_v41 = vpop.f32.mrb[40].mxu0 }
 0x19f   : > { %10986 = vst [vmem:[#allocation71_spill] sm:$0xff] %v8745_v41  ;;  %v8747_v5 = vpop.f32.mrb[41].mxu0 }
 0x1a0   : > { %10987 = vst [vmem:[#allocation72_spill] sm:$0xff] %v8747_v5  ;;  %v8749_v4 = vpop.f32.mrb[40].mxu1  ;;  %v2484_v1 = vmax.f32 %v8745_v41, %v8747_v5  ;;  %v8753_v56 = vpop.f32.mrb[42].mxu0 }
 0x1a1   : > { %10988 = vst [vmem:[#allocation73_spill] sm:$0xff] %v8749_v4  ;;  %10989 = vst [vmem:[#allocation74_spill] sm:$0xff] %v8753_v56  ;;  %v8755_v54 = vpop.f32.mrb[43].mxu0  ;;  %v8757_v30 = vpop.f32.mrb[41].mxu1 }
 0x1a2   : > { %10990 = vst [vmem:[#allocation75_spill] sm:$0xff] %v8755_v54  ;;  %10991 = vst [vmem:[#allocation76_spill] sm:$0xff] %v8757_v30  ;;  %2530 = vmax.xlane.f32.xlu1 %v2529_v9  ;;  %2485 = vmax.xlane.f32.xlu0 %v2484_v1  ;;  %v8759_v18 = vpop.f32.mrb[42].mxu1  ;;  %v2532_v22 = vmax.f32 %v8749_v4, %v8757_v30  ;;  %v2487_v27 = vmax.f32 %v8753_v56, %v8755_v54 }
 0x1a3   : > { %10992 = vst [vmem:[#allocation77_spill] sm:$0xff] %v8759_v18  ;;  %v8765_v28 = vpop.f32.mrb[43].mxu1 }
 0x1a4   : > { %10993 = vst [vmem:[#allocation78_spill] sm:$0xff] %v8765_v28  ;;  %v2535_v5 = vmax.f32 %v8759_v18, %v8765_v28 }
 0x1a6   : > { %2533 = vmax.xlane.f32.xlu0 %v2532_v22  ;;  %2488 = vmax.xlane.f32.xlu1 %v2487_v27  ;;  %v8769_v41 = vpop.f32.mrb[44].mxu0 }
 0x1a7   : > { %10994 = vst [vmem:[#allocation79_spill] sm:$0xff] %v8769_v41  ;;  %v8771_v16 = vpop.f32.mrb[45].mxu0 }
 0x1a8   : > { %10995 = vst [vmem:[#allocation80_spill] sm:$0xff] %v8771_v16  ;;  %v8773_v9 = vpop.f32.mrb[44].mxu1  ;;  %v2490_v1 = vmax.f32 %v8769_v41, %v8771_v16  ;;  %v8777_v30 = vpop.f32.mrb[46].mxu0 }
 0x1a9   : > { %10996 = vst [vmem:[#allocation81_spill] sm:$0xff] %v8773_v9  ;;  %10997 = vst [vmem:[#allocation82_spill] sm:$0xff] %v8777_v30  ;;  %v8779_v4 = vpop.f32.mrb[47].mxu0  ;;  %v8781_v54 = vpop.f32.mrb[45].mxu1 }
 0x1aa   : > { %10998 = vst [vmem:[#allocation83_spill] sm:$0xff] %v8779_v4  ;;  %10999 = vst [vmem:[#allocation84_spill] sm:$0xff] %v8781_v54  ;;  %2536 = vmax.xlane.f32.xlu1 %v2535_v5  ;;  %2491 = vmax.xlane.f32.xlu0 %v2490_v1  ;;  %v8783_v28 = vpop.f32.mrb[46].mxu1  ;;  %v2538_v22 = vmax.f32 %v8773_v9, %v8781_v54  ;;  %v2493_v27 = vmax.f32 %v8777_v30, %v8779_v4 }
 0x1ab   : > { %11000 = vst [vmem:[#allocation85_spill] sm:$0xff] %v8783_v28  ;;  %v8789_v18 = vpop.f32.mrb[47].mxu1 }
 0x1ac   : > { %11001 = vst [vmem:[#allocation86_spill] sm:$0xff] %v8789_v18  ;;  %v2541_v16 = vmax.f32 %v8783_v28, %v8789_v18 }
 0x1ae   : > { %2539 = vmax.xlane.f32.xlu0 %v2538_v22  ;;  %2494 = vmax.xlane.f32.xlu1 %v2493_v27  ;;  %v8793_v41 = vpop.f32.mrb[48].mxu0 }
 0x1af   : > { %11002 = vst [vmem:[#allocation87_spill] sm:$0xff] %v8793_v41  ;;  %v8795_v56 = vpop.f32.mrb[49].mxu0 }
 0x1b0   : > { %11003 = vst [vmem:[#allocation88_spill] sm:$0xff] %v8795_v56  ;;  %v8797_v5 = vpop.f32.mrb[48].mxu1  ;;  %v2496_v1 = vmax.f32 %v8793_v41, %v8795_v56  ;;  %v8801_v54 = vpop.f32.mrb[50].mxu0 }
 0x1b1   : > { %11004 = vst [vmem:[#allocation89_spill] sm:$0xff] %v8797_v5  ;;  %11005 = vst [vmem:[#allocation90_spill] sm:$0xff] %v8801_v54  ;;  %v8803_v9 = vpop.f32.mrb[51].mxu0  ;;  %v8805_v4 = vpop.f32.mrb[49].mxu1 }
 0x1b2   : > { %11006 = vst [vmem:[#allocation91_spill] sm:$0xff] %v8803_v9  ;;  %11007 = vst [vmem:[#allocation92_spill] sm:$0xff] %v8805_v4  ;;  %2542 = vmax.xlane.f32.xlu1 %v2541_v16  ;;  %2497 = vmax.xlane.f32.xlu0 %v2496_v1  ;;  %v8807_v18 = vpop.f32.mrb[50].mxu1  ;;  %v2544_v22 = vmax.f32 %v8797_v5, %v8805_v4  ;;  %v2499_v27 = vmax.f32 %v8801_v54, %v8803_v9 }
 0x1b3   : > { %11008 = vst [vmem:[#allocation93_spill] sm:$0xff] %v8807_v18  ;;  %v8813_v28 = vpop.f32.mrb[51].mxu1 }
 0x1b4   : > { %11009 = vst [vmem:[#allocation94_spill] sm:$0xff] %v8813_v28  ;;  %v2547_v56 = vmax.f32 %v8807_v18, %v8813_v28 }
 0x1b6   : > { %2545 = vmax.xlane.f32.xlu0 %v2544_v22  ;;  %2500 = vmax.xlane.f32.xlu1 %v2499_v27  ;;  %v8817_v41 = vpop.f32.mrb[52].mxu0 }
 0x1b7   : > { %11010 = vst [vmem:[#allocation95_spill] sm:$0xff] %v8817_v41  ;;  %v8819_v30 = vpop.f32.mrb[53].mxu0 }
 0x1b8   : > { %11011 = vst [vmem:[#allocation96_spill] sm:$0xff] %v8819_v30  ;;  %v8821_v16 = vpop.f32.mrb[52].mxu1  ;;  %v2502_v1 = vmax.f32 %v8817_v41, %v8819_v30  ;;  %v8825_v4 = vpop.f32.mrb[54].mxu0 }
 0x1b9   : > { %11012 = vst [vmem:[#allocation97_spill] sm:$0xff] %v8821_v16  ;;  %11013 = vst [vmem:[#allocation98_spill] sm:$0xff] %v8825_v4  ;;  %v8827_v5 = vpop.f32.mrb[55].mxu0  ;;  %v8829_v9 = vpop.f32.mrb[53].mxu1 }
 0x1ba   : > { %11014 = vst [vmem:[#allocation99_spill] sm:$0xff] %v8827_v5  ;;  %11015 = vst [vmem:[#allocation100_spill] sm:$0xff] %v8829_v9  ;;  %2548 = vmax.xlane.f32.xlu1 %v2547_v56  ;;  %2503 = vmax.xlane.f32.xlu0 %v2502_v1  ;;  %v8831_v28 = vpop.f32.mrb[54].mxu1  ;;  %v2550_v22 = vmax.f32 %v8821_v16, %v8829_v9  ;;  %v2505_v27 = vmax.f32 %v8825_v4, %v8827_v5 }
 0x1bb   : > { %11016 = vst [vmem:[#allocation101_spill] sm:$0xff] %v8831_v28  ;;  %v8837_v18 = vpop.f32.mrb[55].mxu1 }
 0x1bc   : > { %11017 = vst [vmem:[#allocation102_spill] sm:$0xff] %v8837_v18  ;;  %v2553_v30 = vmax.f32 %v8831_v28, %v8837_v18 }
 0x1be   : > { %2551 = vmax.xlane.f32.xlu0 %v2550_v22  ;;  %2506 = vmax.xlane.f32.xlu1 %v2505_v27  ;;  %v8841_v41 = vpop.f32.mrb[56].mxu0 }
 0x1bf   : > { %11018 = vst [vmem:[#allocation103_spill] sm:$0xff] %v8841_v41  ;;  %v8843_v54 = vpop.f32.mrb[57].mxu0 }
 0x1c0   : > { %11019 = vst [vmem:[#allocation104_spill] sm:$0xff] %v8843_v54  ;;  %v8845_v56 = vpop.f32.mrb[56].mxu1  ;;  %v2508_v1 = vmax.f32 %v8841_v41, %v8843_v54  ;;  %v8849_v9 = vpop.f32.mrb[58].mxu0 }
 0x1c1   : > { %11020 = vst [vmem:[#allocation105_spill] sm:$0xff] %v8845_v56  ;;  %11021 = vst [vmem:[#allocation106_spill] sm:$0xff] %v8849_v9  ;;  %v8851_v16 = vpop.f32.mrb[59].mxu0  ;;  %v8853_v5 = vpop.f32.mrb[57].mxu1 }
 0x1c2   : > { %11022 = vst [vmem:[#allocation107_spill] sm:$0xff] %v8851_v16  ;;  %11023 = vst [vmem:[#allocation108_spill] sm:$0xff] %v8853_v5  ;;  %2554 = vmax.xlane.f32.xlu1 %v2553_v30  ;;  %2509 = vmax.xlane.f32.xlu0 %v2508_v1  ;;  %v8855_v18 = vpop.f32.mrb[58].mxu1  ;;  %v2556_v22 = vmax.f32 %v8845_v56, %v8853_v5  ;;  %v2511_v27 = vmax.f32 %v8849_v9, %v8851_v16  ;;  %v2312_v9 = vld [vmem:[#allocation2] sm:$0xff] }
 0x1c3   : > { %11024 = vst [vmem:[#allocation109_spill] sm:$0xff] %v8855_v18  ;;  %v8861_v28 = vpop.f32.mrb[59].mxu1 }
 0x1c4   : > { %11025 = vst [vmem:[#allocation110_spill] sm:$0xff] %v8861_v28  ;;  %v2559_v54 = vmax.f32 %v8855_v18, %v8861_v28  ;;  %v7197_v18 = vld [vmem:[%s8021_s27 + $0x40] sm:$0xff]  }
 0x1c5   : > { %6747 = vmatprep.subr.bf16.mxu0 %v7197_v18 }
 0x1c6   : > { %2557 = vmax.xlane.f32.xlu0 %v2556_v22  ;;  %2512 = vmax.xlane.f32.xlu1 %v2511_v27  ;;  %v8865_v41 = vpop.f32.mrb[60].mxu0 }
 0x1c7   : > { %11026 = vst [vmem:[#allocation111_spill] sm:$0xff] %v8865_v41  ;;  %v8867_v4 = vpop.f32.mrb[61].mxu0 }
 0x1c8   : > { %11027 = vst [vmem:[#allocation112_spill] sm:$0xff] %v8867_v4  ;;  %v8869_v30 = vpop.f32.mrb[60].mxu1  ;;  %v2514_v1 = vmax.f32 %v8865_v41, %v8867_v4  ;;  %v8873_v5 = vpop.f32.mrb[62].mxu0 }
 0x1c9   : > { %11028 = vst [vmem:[#allocation113_spill] sm:$0xff] %v8869_v30  ;;  %11029 = vst [vmem:[#allocation114_spill] sm:$0xff] %v8873_v5  ;;  %v8875_v56 = vpop.f32.mrb[63].mxu0  ;;  %v8877_v16 = vpop.f32.mrb[61].mxu1 }
 0x1ca   : > { %11030 = vst [vmem:[#allocation115_spill] sm:$0xff] %v8875_v56  ;;  %11031 = vst [vmem:[#allocation116_spill] sm:$0xff] %v8877_v16  ;;  %2560 = vmax.xlane.f32.xlu1 %v2559_v54  ;;  %2515 = vmax.xlane.f32.xlu0 %v2514_v1  ;;  %v8879_v22 = vpop.f32.mrb[62].mxu1  ;;  %v2562_v27 = vmax.f32 %v8869_v30, %v8877_v16  ;;  %v2517_v28 = vmax.f32 %v8873_v5, %v8875_v56  ;;  %v7195_v54 = vld [vmem:[%s8021_s27 + $0xc0] sm:$0xff]   ;;  %v7199_v30 = vld [vmem:[%s8021_s27 + $0xc8] sm:$0xff]  }
 0x1cb   : > { %11032 = vst [vmem:[#allocation117_spill] sm:$0xff] %v8879_v22  ;;  %v8885_v4 = vpop.f32.mrb[63].mxu1  ;;  %v7196_v1 = vld [vmem:[%s8021_s27 + $0x80] sm:$0xff]   ;;  %6811 = vmatprep.subr.bf16.mxu1 %v7195_v54  ;;  %v7200_v5 = vld [vmem:[%s8021_s27 + $0x88] sm:$0xff]  }
 0x1cc   : > { %11033 = vst [vmem:[#allocation118_spill] sm:$0xff] %v8885_v4  ;;  %v2565_v41 = vmax.f32 %v8879_v22, %v8885_v4  ;;  %6812 = vmatpush3.bf16.msra.mxu1 %v7196_v1  ;;  %v7198_v16 = vld [vmem:[%s8021_s27] sm:$0xff]   ;;  %v7202_v54 = vld [vmem:[%s8021_s27 + $0x8] sm:$0xff]   ;;  %v7203_v1 = vld [vmem:[%s8021_s27 + $0xd0] sm:$0xff]  }
 0x1cd   : > { %6748 = vmatpush3.bf16.msra.mxu0 %v7198_v16  ;;  %6813 = vmatprep.subr.bf16.mxu1 %v7199_v30  ;;  %v7204_v16 = vld [vmem:[%s8021_s27 + $0x90] sm:$0xff]  }
 0x1ce   : > { %2563 = vmax.xlane.f32.xlu0 %v2562_v27  ;;  %2518 = vmax.xlane.f32.xlu1 %v2517_v28  ;;  %v7201_v28 = vld [vmem:[%s8021_s27 + $0x48] sm:$0xff]   ;;  %v7205_v30 = vld [vmem:[%s8021_s27 + $0x50] sm:$0xff]  }
 0x1cf   : > { %v2329_v27 = vld [vmem:[#allocation2 + $0x88] sm:$0xff]  ;;  %6749 = vmatprep.subr.bf16.mxu0 %v7201_v28 }
 0x1d0   : > { %6814 = vmatpush3.bf16.msra.mxu1 %v7200_v5  ;;  %v8903_v5 = vld [vmem:[#allocation2 + $0x10] sm:$0xff] }
 0x1d1   : > { %6750 = vmatpush3.bf16.msra.mxu0 %v7202_v54  ;;  %6815 = vmatprep.subr.bf16.mxu1 %v7203_v1 }
 0x1d2   : > { %2566 = vmax.xlane.f32.xlu1 %v2565_v41  ;;  %v2328_v41 = vld [vmem:[#allocation2 + $0x80] sm:$0xff]  ;;  %6751 = vmatprep.subr.bf16.mxu0 %v7205_v30  ;;  %v2315_v30 = vld [vmem:[#allocation2 + $0x18] sm:$0xff] }
 0x1d4   : > { %6816 = vmatpush3.bf16.msra.mxu1 %v7204_v16 }
 0x1d5   : > { %6752 = vmatpush3.bf16.msra.mxu0 %v7206_v49  ;;  %v7211_v49 = vld [vmem:[%s8021_s27 + $0xe0] sm:$0xff]  }
 0x1d6   : > { %6753 = vmatprep.subr.bf16.mxu0 %v7209_v40  ;;  %v7214_v40 = vld [vmem:[%s8021_s27 + $0x20] sm:$0xff]  }
 0x1df   : > { %v2378_v56 = vpop.xlane.xlu0 %2377 }
 0x1e0   : > { %v2568_v4 = vmax.f32 %v2312_v9, %v2378_v56 }
 0x1e2   : > { %5453 = vst.msk [vmem:[#allocation2] sm:$0xff] %vm577_vm1, %v2568_v4  ;;  %v2632_v22 = vsub.f32 %v2312_v9, %v2568_v4 }
 0x1e3   : > { %v2429_v18 = vpop.xlane.xlu1 %2428  ;;  %v2426_v2 = vpop.xlane.xlu0 %2425 }
 0x1e4   : > { %v2585_v15 = vmax.f32 %v2329_v27, %v2429_v18  ;;  %v2584_v56 = vmax.f32 %v2328_v41, %v2426_v2  ;;  %2826 = vperm.xlu0 %7097, %v2568_v4   ;;  %v7207_v2 = vld [vmem:[%s8021_s27 + $0xd8] sm:$0xff]   ;;  %v2696_v4 = vmul.f32 1.442695, %v2632_v22 }
 0x1e5   : > { %v7208_v18 = vld [vmem:[%s8021_s27 + $0x98] sm:$0xff]   ;;  %6817 = vmatprep.subr.bf16.mxu1 %v7207_v2 }
 0x1e6   : > { %v2649_v28 = vsub.f32 %v2329_v27, %v2585_v15  ;;  %5470 = vst.msk [vmem:[#allocation2 + $0x88] sm:$0xff] %vm577_vm1, %v2585_v15  ;;  %5469 = vst.msk [vmem:[#allocation2 + $0x80] sm:$0xff] %vm577_vm1, %v2584_v56  ;;  %2906 = vperm.xlu1 %7098, %v2584_v56   ;;  %v2648_v9 = vsub.f32 %v2328_v41, %v2584_v56  ;;  %6818 = vmatpush3.bf16.msra.mxu1 %v7208_v18  ;;  %v7210_v22 = vld [vmem:[%s8021_s27 + $0x18] sm:$0xff]   ;;  %7259 = vpow2.f32 %v2696_v4  ;;  %v7213_v18 = vld [vmem:[%s8021_s27 + $0x60] sm:$0xff]  }
 0x1e7   : > { %v2381_v54 = vpop.xlane.xlu0 %2380  ;;  %v2384_v1 = vpop.xlane.xlu1 %2383  ;;  %6754 = vmatpush3.bf16.msra.mxu0 %v7210_v22  ;;  %6819 = vmatprep.subr.bf16.mxu1 %v7211_v49  ;;  %v7215_v4 = vld [vmem:[%s8021_s27 + $0xe8] sm:$0xff]  }
 0x1e8   : > { %v8911_v16 = vmax.f32 %v8901_v14, %v2381_v54  ;;  %v8914_v27 = vmax.f32 %v8903_v5, %v2384_v1  ;;  %2911 = vperm.xlu0 %7097, %v2585_v15   ;;  %v2730_v41 = vmul.f32 1.442695, %v2649_v28  ;;  %v2728_v15 = vmul.f32 1.442695, %v2648_v9  ;;  %v7212_v54 = vld [vmem:[%s8021_s27 + $0xa0] sm:$0xff]   ;;  %6755 = vmatprep.subr.bf16.mxu0 %v7213_v18  ;;  %v7218_v18 = vld [vmem:[%s8021_s27 + $0x28] sm:$0xff]  }
 0x1ea   : > { %5454 = vst.msk [vmem:[#allocation2 + $0x8] sm:$0xff] %vm577_vm1, %v8911_v16  ;;  %5455 = vst.msk [vmem:[#allocation2 + $0x10] sm:$0xff] %vm577_vm1, %v8914_v27  ;;  %2831 = vperm.xlu1 %7098, %v8911_v16   ;;  %6820 = vmatpush3.bf16.msra.mxu1 %v7212_v54  ;;  %7261 = vpow2.f32 %v2730_v41  ;;  %v7217_v54 = vld [vmem:[%s8021_s27 + $0x68] sm:$0xff]  }
 0x1eb   : > { %v2387_v56 = vpop.xlane.xlu1 %2386  ;;  %v2432_v2 = vpop.xlane.xlu0 %2431  ;;  %7263 = vpow2.f32 %v2728_v15  ;;  %6756 = vmatpush3.bf16.msra.mxu0 %v7214_v40  ;;  %6821 = vmatprep.subr.bf16.mxu1 %v7215_v4  ;;  %v7219_v15 = vld [vmem:[%s8021_s27 + $0xf0] sm:$0xff]  }
 0x1ec   : > { %v2571_v1 = vmax.f32 %v2315_v30, %v2387_v56  ;;  %v8928_v28 = vmax.f32 %v8917_v60, %v2432_v2  ;;  %v7216_v56 = vld [vmem:[%s8021_s27 + $0xa8] sm:$0xff]   ;;  %6757 = vmatprep.subr.bf16.mxu0 %v7217_v54  ;;  %v7223_v54 = vld [vmem:[%s8021_s27 + $0xf8] sm:$0xff]  }
 0x1ee   : > { %5456 = vst.msk [vmem:[#allocation2 + $0x18] sm:$0xff] %vm577_vm1, %v2571_v1  ;;  %5471 = vst.msk [vmem:[#allocation2 + $0x90] sm:$0xff] %vm577_vm1, %v8928_v28  ;;  %2836 = vperm.xlu1 %7098, %v8914_v27   ;;  %v2635_v9 = vsub.f32 %v2315_v30, %v2571_v1  ;;  %6822 = vmatpush3.bf16.msra.mxu1 %v7216_v56  ;;  %v2633_v30 = vsub.f32 %v8901_v14, %v8911_v16  ;;  %v7220_v56 = vld [vmem:[%s8021_s27 + $0xb0] sm:$0xff]  }
 0x1ef   : > { %v2435_v22 = vpop.xlane.xlu1 %2434  ;;  %v2390_v49 = vpop.xlane.xlu0 %2389  ;;  %6758 = vmatpush3.bf16.msra.mxu0 %v7218_v18  ;;  %6823 = vmatprep.subr.bf16.mxu1 %v7219_v15 }
 0x1f0   : > { %v2587_v2 = vmax.f32 %v2331_v53, %v2435_v22  ;;  %v8941_v41 = vmax.f32 %v8931_v36, %v2390_v49  ;;  %v2702_v40 = vmul.f32 1.442695, %v2635_v9  ;;  %v8964_v25 = vpop.eup %7259  ;;  %v7222_v9 = vld [vmem:[%s8021_s27 + $0x30] sm:$0xff]   ;;  %6759 = vmatprep.subr.bf16.mxu0 %v7221_v43  ;;  %v2634_v43 = vsub.f32 %v8903_v5, %v8914_v27  ;;  %v9007_v27 = vld [vmem:[#allocation2 + $0xb8] sm:$0xff] }
 0x1f1   : > { %11034 = vst [vmem:[#allocation119_spill] sm:$0xff] %v8964_v25 }
 0x1f2   : > { %5472 = vst.msk [vmem:[#allocation2 + $0x98] sm:$0xff] %vm577_vm1, %v2587_v2  ;;  %2921 = vperm.xlu0 %7097, %v2587_v2   ;;  %2916 = vperm.xlu1 %7098, %v8928_v28   ;;  %5457 = vst.msk [vmem:[#allocation2 + $0x20] sm:$0xff] %vm577_vm1, %v8941_v41  ;;  %v2651_v4 = vsub.f32 %v2331_v53, %v2587_v2  ;;  %v8968_v53 = vld [vmem:[#allocation2 + $0x30] sm:$0xff]  ;;  %v2698_v2 = vmul.f32 1.442695, %v2633_v30  ;;  %7265 = vpow2.f32 %v2702_v40 }
 0x1f3   : > { %v2393_v22 = vpop.xlane.xlu1 %2392  ;;  %v2438_v49 = vpop.xlane.xlu0 %2437  ;;  %6824 = vmatpush3.bf16.msra.mxu1 %v7220_v56  ;;  %6760 = vmatpush3.bf16.msra.mxu0 %v7222_v9  ;;  %v8989_v40 = vld [vmem:[#allocation2 + $0xb0] sm:$0xff]  ;;  %v2636_v10 = vsub.f32 %v8931_v36, %v8941_v41 }
 0x1f4   : > { %v8958_v14 = vmax.f32 %v8944_v31, %v2393_v22  ;;  %v8961_v16 = vmax.f32 %v8946_v44, %v2438_v49  ;;  %v2734_v18 = vmul.f32 1.442695, %v2651_v4  ;;  %v7224_v49 = vld [vmem:[%s8021_s27 + $0xb8] sm:$0xff]   ;;  %v8978_v56 = vpop.eup %7261  ;;  %6825 = vmatprep.subr.bf16.mxu1 %v7223_v54  ;;  %7267 = vpow2.f32 %v2698_v2 }
 0x1f5   : > { %11035 = vst [vmem:[#allocation120_spill] sm:$0xff] %v8978_v56  ;;  %v7226_v4 = vld [vmem:[%s8021_s27 + $0x38] sm:$0xff]  }
 0x1f6   : > { %5458 = vst.msk [vmem:[#allocation2 + $0x28] sm:$0xff] %vm577_vm1, %v8958_v14  ;;  %4171 = vperm.xlu0 %7097, %v8964_v25   ;;  %2841 = vperm.xlu1 %7098, %v2571_v1   ;;  %5473 = vst.msk [vmem:[#allocation2 + $0xa0] sm:$0xff] %vm577_vm1, %v8961_v16  ;;  %v7225_v1 = vld [vmem:[%s8021_s27 + $0x78] sm:$0xff]   ;;  %v8985_v25 = vpop.eup %7263  ;;  %7269 = vpow2.f32 %v2734_v18  ;;  %v2637_v9 = vsub.f32 %v8944_v31, %v8958_v14  ;;  %v2650_v18 = vsub.f32 %v8917_v60, %v8928_v28  ;;  %v9027_v28 = vld [vmem:[#allocation2 + $0x48] sm:$0xff] }
 0x1f7   : > { %v2441_v15 = vpop.xlane.xlu1 %2440  ;;  %v2396_v22 = vpop.xlane.xlu0 %2395  ;;  %11036 = vst [vmem:[#allocation121_spill] sm:$0xff] %v8985_v25  ;;  %6826 = vmatpush3.bf16.msra.mxu1 %v7224_v49  ;;  %6761 = vmatprep.subr.bf16.mxu0 %v7225_v1  ;;  %v2700_v49 = vmul.f32 1.442695, %v2634_v43 }
 0x1f8   : > { %v2589_v30 = vmax.f32 %v8966_v21, %v2441_v15  ;;  %v8982_v29 = vmax.f32 %v8968_v53, %v2396_v22  ;;  %6762 = vmatpush3.bf16.msra.mxu0 %v7226_v4  ;;  %v9009_v22 = vld [vmem:[#allocation2 + $0x40] sm:$0xff]  ;;  %v2706_v31 = vmul.f32 1.442695, %v2637_v9 }
 0x1f9   : > { %7271 = vpow2.f32 %v2700_v49 }
 0x1fa   : > { %5474 = vst.msk [vmem:[#allocation2 + $0xa8] sm:$0xff] %vm577_vm1, %v2589_v30  ;;  %4256 = vperm.xlu0 %7097, %v8978_v56   ;;  %4251 = vperm.xlu1 %7098, %v8985_v25   ;;  %5459 = vst.msk [vmem:[#allocation2 + $0x30] sm:$0xff] %vm577_vm1, %v8982_v29  ;;  %v2653_v1 = vsub.f32 %v8966_v21, %v2589_v30  ;;  %v9029_v56 = vld [vmem:[#allocation2 + $0xc0] sm:$0xff]  ;;  %v2732_v25 = vmul.f32 1.442695, %v2650_v18  ;;  %7273 = vpow2.f32 %v2706_v31 }
 0x1fb   : > { %v2399_v54 = vpop.xlane.xlu1 %2398  ;;  %v2444_v15 = vpop.xlane.xlu0 %2443 }
 0x1fc   : > { %v9002_v2 = vmax.f32 %v8987_v26, %v2399_v54  ;;  %v9005_v5 = vmax.f32 %v8989_v40, %v2444_v15  ;;  %v9025_v60 = vpop.eup %7265  ;;  %v2738_v21 = vmul.f32 1.442695, %v2653_v1  ;;  %7275 = vpow2.f32 %v2732_v25  ;;  %v9063_v25 = vld [vmem:[#allocation2 + $0x58] sm:$0xff] }
 0x1fd   : > { %11037 = vst [vmem:[#allocation122_spill] sm:$0xff] %v9025_v60 }
 0x1fe   : > { %5460 = vst.msk [vmem:[#allocation2 + $0x38] sm:$0xff] %vm577_vm1, %v9002_v2  ;;  %2931 = vperm.xlu0 %7097, %v2589_v30   ;;  %2846 = vperm.xlu1 %7098, %v8941_v41   ;;  %5475 = vst.msk [vmem:[#allocation2 + $0xb0] sm:$0xff] %vm577_vm1, %v9005_v5  ;;  %7277 = vpow2.f32 %v2738_v21  ;;  %v2639_v21 = vsub.f32 %v8987_v26, %v9002_v2 }
 0x1ff   : > { %v2447_v4 = vpop.xlane.xlu1 %2446  ;;  %v2402_v54 = vpop.xlane.xlu0 %2401 }
 0x200   : > { %v9020_v15 = vmax.f32 %v9007_v27, %v2447_v4  ;;  %v9023_v43 = vmax.f32 %v9009_v22, %v2402_v54  ;;  %v9037_v4 = vpop.eup %7267  ;;  %v2710_v26 = vmul.f32 1.442695, %v2639_v21  ;;  %v2704_v21 = vmul.f32 1.442695, %v2636_v10 }
 0x201   : > { %11038 = vst [vmem:[#allocation123_spill] sm:$0xff] %v9037_v4  ;;  %v9045_v18 = vpop.eup %7269 }
 0x202   : > { %5476 = vst.msk [vmem:[#allocation2 + $0xb8] sm:$0xff] %vm577_vm1, %v9020_v15  ;;  %4186 = vperm.xlu0 %7097, %v9025_v60   ;;  %2926 = vperm.xlu1 %7098, %v8961_v16   ;;  %5461 = vst.msk [vmem:[#allocation2 + $0x40] sm:$0xff] %vm577_vm1, %v9023_v43  ;;  %v9047_v60 = vld [vmem:[#allocation2 + $0xc8] sm:$0xff]  ;;  %7279 = vpow2.f32 %v2710_v26 }
 0x203   : > { %v2405_v30 = vpop.xlane.xlu1 %2404  ;;  %v2450_v9 = vpop.xlane.xlu0 %2449  ;;  %11039 = vst [vmem:[#allocation124_spill] sm:$0xff] %v9045_v18  ;;  %7281 = vpow2.f32 %v2704_v21 }
 0x204   : > { %v9040_v54 = vmax.f32 %v9027_v28, %v2405_v30  ;;  %v9043_v49 = vmax.f32 %v9029_v56, %v2450_v9 }
 0x206   : > { %5462 = vst.msk [vmem:[#allocation2 + $0x48] sm:$0xff] %vm577_vm1, %v9040_v54  ;;  %4266 = vperm.xlu0 %7097, %v9045_v18   ;;  %4176 = vperm.xlu1 %7098, %v9037_v4   ;;  %5477 = vst.msk [vmem:[#allocation2 + $0xc0] sm:$0xff] %vm577_vm1, %v9043_v49  ;;  %v9075_v18 = vpop.eup %7271 }
 0x207   : > { %v2453_v31 = vpop.xlane.xlu1 %2452  ;;  %v2408_v1 = vpop.xlane.xlu0 %2407  ;;  %11040 = vst [vmem:[#allocation125_spill] sm:$0xff] %v9075_v18 }
 0x208   : > { %v9058_v30 = vmax.f32 %v9047_v60, %v2453_v31  ;;  %v9061_v9 = vmax.f32 %v9049_v20, %v2408_v1  ;;  %v9083_v23 = vpop.eup %7273 }
 0x209   : > { %11041 = vst [vmem:[#allocation126_spill] sm:$0xff] %v9083_v23  ;;  %v9099_v6 = vpop.eup %7275 }
 0x20a   : > { %5478 = vst.msk [vmem:[#allocation2 + $0xc8] sm:$0xff] %vm577_vm1, %v9058_v30  ;;  %2941 = vperm.xlu0 %7097, %v9020_v15   ;;  %2851 = vperm.xlu1 %7098, %v8958_v14   ;;  %5463 = vst.msk [vmem:[#allocation2 + $0x50] sm:$0xff] %vm577_vm1, %v9061_v9  ;;  %v9087_v14 = vld [vmem:[#allocation2 + $0x60] sm:$0xff] }
 0x20b   : > { %v2411_v31 = vpop.xlane.xlu1 %2410  ;;  %v2456_v1 = vpop.xlane.xlu0 %2455  ;;  %11042 = vst [vmem:[#allocation127_spill] sm:$0xff] %v9099_v6 }
 0x20c   : > { %v9078_v4 = vmax.f32 %v9063_v25, %v2411_v31  ;;  %v9081_v24 = vmax.f32 %v9065_v19, %v2456_v1  ;;  %v2655_v31 = vsub.f32 %v9007_v27, %v9020_v15  ;;  %v9149_v27 = vld [vmem:[#allocation2 + $0xf0] sm:$0xff] }
 0x20e   : > { %5464 = vst.msk [vmem:[#allocation2 + $0x58] sm:$0xff] %vm577_vm1, %v9078_v4  ;;  %4196 = vperm.xlu0 %7097, %v9083_v23   ;;  %4181 = vperm.xlu1 %7098, %v9075_v18   ;;  %5479 = vst.msk [vmem:[#allocation2 + $0xd0] sm:$0xff] %vm577_vm1, %v9081_v24  ;;  %v9107_v23 = vpop.eup %7277  ;;  %v9109_v18 = vld [vmem:[#allocation2 + $0x68] sm:$0xff]  ;;  %v2742_v15 = vmul.f32 1.442695, %v2655_v31 }
 0x20f   : > { %v2459_v1 = vpop.xlane.xlu1 %2458  ;;  %v2414_v7 = vpop.xlane.xlu0 %2413  ;;  %11043 = vst [vmem:[#allocation128_spill] sm:$0xff] %v9107_v23 }
 0x210   : > { %v9102_v36 = vmax.f32 %v9085_v11, %v2459_v1  ;;  %v9105_v41 = vmax.f32 %v9087_v14, %v2414_v7  ;;  %v2652_v7 = vsub.f32 %v8946_v44, %v8961_v16  ;;  %7283 = vpow2.f32 %v2742_v15  ;;  %v9167_v62 = vpop.eup %7279 }
 0x211   : > { %v2641_v15 = vsub.f32 %v9027_v28, %v9040_v54  ;;  %11044 = vst [vmem:[#allocation129_spill] sm:$0xff] %v9167_v62  ;;  %v9195_v28 = vld [vmem:[#allocation2 + $0x108] sm:$0xff] }
 0x212   : > { %5480 = vst.msk [vmem:[#allocation2 + $0xd8] sm:$0xff] %vm577_vm1, %v9102_v36  ;;  %4276 = vperm.xlu0 %7097, %v9107_v23   ;;  %4261 = vperm.xlu1 %7098, %v9099_v6   ;;  %5465 = vst.msk [vmem:[#allocation2 + $0x60] sm:$0xff] %vm577_vm1, %v9105_v41  ;;  %v9129_v6 = vld [vmem:[#allocation2 + $0xe8] sm:$0xff]  ;;  %v2736_v16 = vmul.f32 1.442695, %v2652_v7  ;;  %v9171_v7 = vld [vmem:[#allocation2 + $0x100] sm:$0xff] }
 0x213   : > { %v2417_v1 = vpop.xlane.xlu1 %2416  ;;  %v2462_v10 = vpop.xlane.xlu0 %2461 }
 0x214   : > { %v9124_v8 = vmax.f32 %v9109_v18, %v2417_v1  ;;  %v9127_v23 = vmax.f32 %v9111_v12, %v2462_v10  ;;  %v9147_v10 = vld [vmem:[#allocation2 + $0x78] sm:$0xff]  ;;  %7285 = vpow2.f32 %v2736_v16  ;;  %v2638_v16 = vsub.f32 %v8968_v53, %v8982_v29 }
 0x216   : > { %5466 = vst.msk [vmem:[#allocation2 + $0x68] sm:$0xff] %vm577_vm1, %v9124_v8  ;;  %2871 = vperm.xlu0 %7097, %v9040_v54   ;;  %2856 = vperm.xlu1 %7098, %v8982_v29   ;;  %5481 = vst.msk [vmem:[#allocation2 + $0xe0] sm:$0xff] %vm577_vm1, %v9127_v23  ;;  %v2714_v54 = vmul.f32 1.442695, %v2641_v15  ;;  %v9185_v29 = vpop.eup %7281  ;;  %v2708_v15 = vmul.f32 1.442695, %v2638_v16 }
 0x217   : > { %v2465_v26 = vpop.xlane.xlu1 %2464  ;;  %v2420_v31 = vpop.xlane.xlu0 %2419  ;;  %11045 = vst [vmem:[#allocation130_spill] sm:$0xff] %v9185_v29 }
 0x218   : > { %v9142_v1 = vmax.f32 %v9129_v6, %v2465_v26  ;;  %v9145_v21 = vmax.f32 %v9131_v17, %v2420_v31  ;;  %7287 = vpow2.f32 %v2714_v54 }
 0x219   : > { %7289 = vpow2.f32 %v2708_v15  ;;  %v9231_v15 = vld [vmem:[#allocation2 + $0x118] sm:$0xff] }
 0x21a   : > { %5482 = vst.msk [vmem:[#allocation2 + $0xe8] sm:$0xff] %vm577_vm1, %v9142_v1  ;;  %2951 = vperm.xlu0 %7097, %v9058_v30   ;;  %2936 = vperm.xlu1 %7098, %v9005_v5   ;;  %5467 = vst.msk [vmem:[#allocation2 + $0x70] sm:$0xff] %vm577_vm1, %v9145_v21 }
 0x21b   : > { %v2423_v26 = vpop.xlane.xlu1 %2422  ;;  %v2468_v31 = vpop.xlane.xlu0 %2467 }
 0x21c   : > { %v9162_v44 = vmax.f32 %v9147_v10, %v2423_v26  ;;  %v9165_v13 = vmax.f32 %v9149_v27, %v2468_v31  ;;  %v2657_v26 = vsub.f32 %v9047_v60, %v9058_v30 }
 0x21e   : > { %5468 = vst.msk [vmem:[#allocation2 + $0x78] sm:$0xff] %vm577_vm1, %v9162_v44  ;;  %4206 = vperm.xlu0 %7097, %v9167_v62   ;;  %2861 = vperm.xlu1 %7098, %v9002_v2   ;;  %5483 = vst.msk [vmem:[#allocation2 + $0xf0] sm:$0xff] %vm577_vm1, %v9165_v13  ;;  %v9193_v2 = vpop.eup %7283  ;;  %v2746_v60 = vmul.f32 1.442695, %v2657_v26 }
 0x21f   : > { %v2471_v31 = vpop.xlane.xlu1 %2470  ;;  %v2474_v58 = vpop.xlane.xlu0 %2473  ;;  %11046 = vst [vmem:[#allocation131_spill] sm:$0xff] %v9193_v2 }
 0x220   : > { %v9188_v53 = vmax.f32 %v9169_v61, %v2471_v31  ;;  %v9191_v62 = vmax.f32 %v9171_v7, %v2474_v58  ;;  %v2654_v58 = vsub.f32 %v8989_v40, %v9005_v5  ;;  %v9213_v59 = vpop.eup %7285  ;;  %7291 = vpow2.f32 %v2746_v60 }
 0x221   : > { %11047 = vst [vmem:[#allocation132_spill] sm:$0xff] %v9213_v59 }
 0x222   : > { %5484 = vst.msk [vmem:[#allocation2 + $0xf8] sm:$0xff] %vm577_vm1, %v9188_v53  ;;  %4286 = vperm.xlu0 %7097, %v9193_v2   ;;  %4191 = vperm.xlu1 %7098, %v9185_v29   ;;  %5485 = vst.msk [vmem:[#allocation2 + $0x100] sm:$0xff] %vm577_vm1, %v9191_v62  ;;  %v9215_v2 = vld [vmem:[#allocation2 + $0x188] sm:$0xff]  ;;  %v9217_v29 = vld [vmem:[#allocation2 + $0x110] sm:$0xff]  ;;  %v2740_v40 = vmul.f32 1.442695, %v2654_v58  ;;  %v2643_v58 = vsub.f32 %v9063_v25, %v9078_v4  ;;  %v9249_v3 = vpop.eup %7287 }
 0x223   : > { %v2477_v30 = vpop.xlane.xlu1 %2476  ;;  %v2522_v31 = vpop.xlane.xlu0 %2521  ;;  %11048 = vst [vmem:[#allocation133_spill] sm:$0xff] %v9217_v29  ;;  %11052 = vst [vmem:[#allocation137_spill] sm:$0xff] %v9249_v3 }
 0x224   : > { %v9208_v63 = vmax.f32 %v9195_v28, %v2477_v30  ;;  %v9211_v16 = vmax.f32 %v9197_v57, %v2522_v31  ;;  %v9233_v31 = vld [vmem:[#allocation2 + $0x190] sm:$0xff]  ;;  %7293 = vpow2.f32 %v2740_v40  ;;  %v2640_v40 = vsub.f32 %v9009_v22, %v9023_v43  ;;  %v9267_v22 = vpop.eup %7289 }
 0x225   : > { %11050 = vst [vmem:[#allocation135_spill] sm:$0xff] %v9233_v31  ;;  %v2718_v25 = vmul.f32 1.442695, %v2643_v58  ;;  %11054 = vst [vmem:[#allocation139_spill] sm:$0xff] %v9267_v22 }
 0x226   : > { %5486 = vst.msk [vmem:[#allocation2 + $0x108] sm:$0xff] %vm577_vm1, %v9208_v63  ;;  %2881 = vperm.xlu0 %7097, %v9078_v4   ;;  %4271 = vperm.xlu1 %7098, %v9213_v59   ;;  %5501 = vst.msk [vmem:[#allocation2 + $0x180] sm:$0xff] %vm577_vm1, %v9211_v16  ;;  %v2712_v58 = vmul.f32 1.442695, %v2640_v40 }
 0x227   : > { %v2525_v5 = vpop.xlane.xlu1 %2524  ;;  %v2480_v54 = vpop.xlane.xlu0 %2479  ;;  %7295 = vpow2.f32 %v2718_v25 }
 0x228   : > { %v9226_v26 = vmax.f32 %v9215_v2, %v2525_v5  ;;  %v9229_v30 = vmax.f32 %v9217_v29, %v2480_v54  ;;  %v9253_v29 = vld [vmem:[#allocation2 + $0x120] sm:$0xff]  ;;  %7297 = vpow2.f32 %v2712_v58 }
 0x229   : > { %11053 = vst [vmem:[#allocation138_spill] sm:$0xff] %v9253_v29 }
 0x22a   : > { %11049 = vst [vmem:[#allocation134_spill] sm:$0xff] %v9229_v30  ;;  %5502 = vst.msk [vmem:[#allocation2 + $0x188] sm:$0xff] %vm577_vm1, %v9226_v26  ;;  %2961 = vperm.xlu0 %7097, %v9102_v36   ;;  %2866 = vperm.xlu1 %7098, %v9023_v43  }
 0x22b   : > { %5487 = vst.msk [vmem:[#allocation2 + $0x110] sm:$0xff] %vm577_vm1, %v9229_v30  ;;  %v2483_v60 = vpop.xlane.xlu1 %2482  ;;  %v2528_v5 = vpop.xlane.xlu0 %2527  ;;  %v9277_v30 = vld [vmem:[#allocation2 + $0x128] sm:$0xff] }
 0x22c   : > { %v9244_v54 = vmax.f32 %v9231_v15, %v2483_v60  ;;  %v9247_v59 = vmax.f32 %v9233_v31, %v2528_v5  ;;  %v2659_v60 = vsub.f32 %v9085_v11, %v9102_v36  ;;  %v2656_v36 = vsub.f32 %v9029_v56, %v9043_v49  ;;  %v9319_v56 = vld [vmem:[#allocation2 + $0x1b0] sm:$0xff] }
 0x22d   : > { %11062 = vst [vmem:[#allocation147_spill] sm:$0xff] %v9319_v56 }
 0x22e   : > { %11051 = vst [vmem:[#allocation136_spill] sm:$0xff] %v9247_v59  ;;  %5488 = vst.msk [vmem:[#allocation2 + $0x118] sm:$0xff] %vm577_vm1, %v9244_v54  ;;  %4216 = vperm.xlu0 %7097, %v9249_v3   ;;  %2946 = vperm.xlu1 %7098, %v9043_v49   ;;  %v9275_v3 = vpop.eup %7291  ;;  %v2744_v49 = vmul.f32 1.442695, %v2656_v36  ;;  %v2645_v36 = vsub.f32 %v9109_v18, %v9124_v8  ;;  %v2661_v18 = vsub.f32 %v9129_v6, %v9142_v1 }
 0x22f   : > { %5503 = vst.msk [vmem:[#allocation2 + $0x190] sm:$0xff] %vm577_vm1, %v9247_v59  ;;  %v2531_v5 = vpop.xlane.xlu1 %2530  ;;  %v2486_v31 = vpop.xlane.xlu0 %2485  ;;  %11055 = vst [vmem:[#allocation140_spill] sm:$0xff] %v9275_v3  ;;  %v2658_v6 = vsub.f32 %v9065_v19, %v9081_v24 }
 0x230   : > { %v9270_v43 = vmax.f32 %v9251_v0, %v2531_v5  ;;  %v9273_v4 = vmax.f32 %v9253_v29, %v2486_v31  ;;  %v2750_v31 = vmul.f32 1.442695, %v2659_v60  ;;  %v9297_v59 = vpop.eup %7293 }
 0x231   : > { %11058 = vst [vmem:[#allocation143_spill] sm:$0xff] %v9297_v59  ;;  %v2748_v19 = vmul.f32 1.442695, %v2658_v6  ;;  %v2647_v6 = vsub.f32 %v9147_v10, %v9162_v44  ;;  %v2663_v10 = vsub.f32 %v9169_v61, %v9188_v53 }
 0x232   : > { %5504 = vst.msk [vmem:[#allocation2 + $0x198] sm:$0xff] %vm577_vm1, %v9270_v43  ;;  %4296 = vperm.xlu0 %7097, %v9275_v3   ;;  %4201 = vperm.xlu1 %7098, %v9267_v22   ;;  %5489 = vst.msk [vmem:[#allocation2 + $0x120] sm:$0xff] %vm577_vm1, %v9273_v4  ;;  %v9299_v3 = vld [vmem:[#allocation2 + $0x1a8] sm:$0xff]  ;;  %v9301_v22 = vld [vmem:[#allocation2 + $0x130] sm:$0xff]  ;;  %7299 = vpow2.f32 %v2750_v31 }
 0x233   : > { %v2489_v5 = vpop.xlane.xlu1 %2488  ;;  %v2534_v40 = vpop.xlane.xlu0 %2533  ;;  %11059 = vst [vmem:[#allocation144_spill] sm:$0xff] %v9301_v22  ;;  %7301 = vpow2.f32 %v2744_v49  ;;  %v2642_v49 = vsub.f32 %v9049_v20, %v9061_v9 }
 0x234   : > { %v9292_v29 = vmax.f32 %v9277_v30, %v2489_v5  ;;  %v9295_v11 = vmax.f32 %v9279_v50, %v2534_v40  ;;  %v9317_v40 = vld [vmem:[#allocation2 + $0x138] sm:$0xff] }
 0x235   : > { %11061 = vst [vmem:[#allocation146_spill] sm:$0xff] %v9317_v40  ;;  %v9339_v50 = vld [vmem:[#allocation2 + $0x1b8] sm:$0xff] }
 0x236   : > { %11057 = vst [vmem:[#allocation142_spill] sm:$0xff] %v9295_v11  ;;  %5490 = vst.msk [vmem:[#allocation2 + $0x128] sm:$0xff] %vm577_vm1, %v9292_v29  ;;  %2891 = vperm.xlu0 %7097, %v9124_v8   ;;  %4281 = vperm.xlu1 %7098, %v9297_v59   ;;  %v2722_v8 = vmul.f32 1.442695, %v2645_v36  ;;  %v2716_v36 = vmul.f32 1.442695, %v2642_v49 }
 0x237   : > { %5505 = vst.msk [vmem:[#allocation2 + $0x1a0] sm:$0xff] %vm577_vm1, %v9295_v11  ;;  %v2537_v25 = vpop.xlane.xlu1 %2536  ;;  %v2492_v60 = vpop.xlane.xlu0 %2491  ;;  %v9341_v11 = vld [vmem:[#allocation2 + $0x140] sm:$0xff] }
 0x238   : > { %v9312_v5 = vmax.f32 %v9299_v3, %v2537_v25  ;;  %v9315_v58 = vmax.f32 %v9301_v22, %v2492_v60  ;;  %v9337_v22 = vpop.eup %7295  ;;  %11065 = vst [vmem:[#allocation150_spill] sm:$0xff] %v9341_v11  ;;  %7303 = vpow2.f32 %v2722_v8 }
 0x239   : > { %11064 = vst [vmem:[#allocation149_spill] sm:$0xff] %v9337_v22  ;;  %7305 = vpow2.f32 %v2716_v36  ;;  %v9399_v36 = vld [vmem:[#allocation2 + $0x158] sm:$0xff] }
 0x23a   : > { %11060 = vst [vmem:[#allocation145_spill] sm:$0xff] %v9315_v58  ;;  %5506 = vst.msk [vmem:[#allocation2 + $0x1a8] sm:$0xff] %vm577_vm1, %v9312_v5  ;;  %2971 = vperm.xlu0 %7097, %v9142_v1   ;;  %2876 = vperm.xlu1 %7098, %v9061_v9   ;;  %v2754_v1 = vmul.f32 1.442695, %v2661_v18 }
 0x23b   : > { %5491 = vst.msk [vmem:[#allocation2 + $0x130] sm:$0xff] %vm577_vm1, %v9315_v58  ;;  %v2495_v31 = vpop.xlane.xlu1 %2494  ;;  %v2540_v25 = vpop.xlane.xlu0 %2539  ;;  %v9363_v58 = vld [vmem:[#allocation2 + $0x148] sm:$0xff]  ;;  %11074 = vst [vmem:[#allocation159_spill] sm:$0xff] %v9399_v36 }
 0x23c   : > { %v9332_v60 = vmax.f32 %v9317_v40, %v2495_v31  ;;  %v9335_v59 = vmax.f32 %v9319_v56, %v2540_v25  ;;  %v9353_v56 = vpop.eup %7297  ;;  %v9365_v40 = vld [vmem:[#allocation2 + $0x1c0] sm:$0xff]  ;;  %7307 = vpow2.f32 %v2754_v1 }
 0x23d   : > { %11066 = vst [vmem:[#allocation151_spill] sm:$0xff] %v9353_v56  ;;  %11069 = vst [vmem:[#allocation154_spill] sm:$0xff] %v9365_v40  ;;  %7309 = vpow2.f32 %v2748_v19 }
 0x23e   : > { %11063 = vst [vmem:[#allocation148_spill] sm:$0xff] %v9335_v59  ;;  %5492 = vst.msk [vmem:[#allocation2 + $0x138] sm:$0xff] %vm577_vm1, %v9332_v60  ;;  %4226 = vperm.xlu0 %7097, %v9337_v22   ;;  %2956 = vperm.xlu1 %7098, %v9081_v24   ;;  %v9361_v22 = vpop.eup %7299 }
 0x23f   : > { %5507 = vst.msk [vmem:[#allocation2 + $0x1b0] sm:$0xff] %vm577_vm1, %v9335_v59  ;;  %v2543_v31 = vpop.xlane.xlu1 %2542  ;;  %v2498_v25 = vpop.xlane.xlu0 %2497  ;;  %11068 = vst [vmem:[#allocation153_spill] sm:$0xff] %v9361_v22 }
 0x240   : > { %v9356_v20 = vmax.f32 %v9339_v50, %v2543_v31  ;;  %v9359_v9 = vmax.f32 %v9341_v11, %v2498_v25  ;;  %v9381_v59 = vpop.eup %7301 }
 0x241   : > { %11071 = vst [vmem:[#allocation156_spill] sm:$0xff] %v9381_v59 }
 0x242   : > { %11067 = vst [vmem:[#allocation152_spill] sm:$0xff] %v9359_v9  ;;  %5508 = vst.msk [vmem:[#allocation2 + $0x1b8] sm:$0xff] %vm577_vm1, %v9356_v20  ;;  %4306 = vperm.xlu0 %7097, %v9361_v22   ;;  %4211 = vperm.xlu1 %7098, %v9353_v56   ;;  %v9383_v22 = vld [vmem:[#allocation2 + $0x1c8] sm:$0xff]  ;;  %v9385_v56 = vld [vmem:[#allocation2 + $0x150] sm:$0xff] }
 0x243   : > { %5493 = vst.msk [vmem:[#allocation2 + $0x140] sm:$0xff] %vm577_vm1, %v9359_v9  ;;  %v2501_v31 = vpop.xlane.xlu1 %2500  ;;  %v2546_v25 = vpop.xlane.xlu0 %2545  ;;  %11072 = vst [vmem:[#allocation157_spill] sm:$0xff] %v9385_v56  ;;  %v9443_v9 = vld [vmem:[#allocation2 + $0x1e0] sm:$0xff] }
 0x244   : > { %v9376_v11 = vmax.f32 %v9363_v58, %v2501_v31  ;;  %v9379_v49 = vmax.f32 %v9365_v40, %v2546_v25  ;;  %v9401_v25 = vld [vmem:[#allocation2 + $0x1d0] sm:$0xff]  ;;  %v9419_v40 = vld [vmem:[#allocation2 + $0x1d8] sm:$0xff]  ;;  %11081 = vst [vmem:[#allocation166_spill] sm:$0xff] %v9443_v9 }
 0x245   : > { %11075 = vst [vmem:[#allocation160_spill] sm:$0xff] %v9401_v25 }
 0x246   : > { %11070 = vst [vmem:[#allocation155_spill] sm:$0xff] %v9379_v49  ;;  %5494 = vst.msk [vmem:[#allocation2 + $0x148] sm:$0xff] %vm577_vm1, %v9376_v11  ;;  %2901 = vperm.xlu0 %7097, %v9162_v44   ;;  %4291 = vperm.xlu1 %7098, %v9381_v59   ;;  %v2726_v44 = vmul.f32 1.442695, %v2647_v6  ;;  %v11082_v6 = vsub.f32 %v9087_v14, %v9105_v41 }
 0x247   : > { %5509 = vst.msk [vmem:[#allocation2 + $0x1c0] sm:$0xff] %vm577_vm1, %v9379_v49  ;;  %v2549_v24 = vpop.xlane.xlu1 %2548  ;;  %v2504_v8 = vpop.xlane.xlu0 %2503  ;;  %v9421_v49 = vld [vmem:[#allocation2 + $0x160] sm:$0xff] }
 0x248   : > { %v9394_v18 = vmax.f32 %v9383_v22, %v2549_v24  ;;  %v9397_v31 = vmax.f32 %v9385_v56, %v2504_v8  ;;  %v9417_v56 = vpop.eup %7303  ;;  %11077 = vst [vmem:[#allocation162_spill] sm:$0xff] %v9421_v49  ;;  %v2720_v61 = vmul.f32 1.442695, %v11082_v6  ;;  %7311 = vpow2.f32 %v2726_v44  ;;  %v9462_v6 = vld [vmem:[#allocation2 + $0x1e8] sm:$0xff] }
 0x249   : > { %11076 = vst [vmem:[#allocation161_spill] sm:$0xff] %v9417_v56  ;;  %v11086_v44 = vsub.f32 %v9111_v12, %v9127_v23  ;;  %v2665_v12 = vsub.f32 %v9195_v28, %v9208_v63  ;;  %v2681_v28 = vsub.f32 %v9215_v2, %v9226_v26 }
 0x24a   : > { %11073 = vst [vmem:[#allocation158_spill] sm:$0xff] %v9397_v31  ;;  %5510 = vst.msk [vmem:[#allocation2 + $0x1c8] sm:$0xff] %vm577_vm1, %v9394_v18  ;;  %2981 = vperm.xlu0 %7097, %v9188_v53   ;;  %2886 = vperm.xlu1 %7098, %v9105_v41   ;;  %v2758_v53 = vmul.f32 1.442695, %v2663_v10  ;;  %7313 = vpow2.f32 %v2720_v61 }
 0x24b   : > { %5495 = vst.msk [vmem:[#allocation2 + $0x150] sm:$0xff] %vm577_vm1, %v9397_v31  ;;  %v2507_v1 = vpop.xlane.xlu1 %2506  ;;  %v2552_v24 = vpop.xlane.xlu0 %2551  ;;  %v2752_v10 = vmul.f32 1.442695, %v11086_v44  ;;  %v2794_v2 = vmul.f32 1.442695, %v2681_v28 }
 0x24c   : > { %v9412_v8 = vmax.f32 %v9399_v36, %v2507_v1  ;;  %v9415_v59 = vmax.f32 %v9401_v25, %v2552_v24  ;;  %v9431_v24 = vpop.eup %7305  ;;  %v9441_v36 = vld [vmem:[#allocation2 + $0x168] sm:$0xff]  ;;  %7315 = vpow2.f32 %v2758_v53 }
 0x24d   : > { %11078 = vst [vmem:[#allocation163_spill] sm:$0xff] %v9431_v24  ;;  %7317 = vpow2.f32 %v2752_v10 }
 0x24e   : > { %5496 = vst.msk [vmem:[#allocation2 + $0x158] sm:$0xff] %vm577_vm1, %v9412_v8  ;;  %4236 = vperm.xlu0 %7097, %v9417_v56   ;;  %2966 = vperm.xlu1 %7098, %v9127_v23   ;;  %5511 = vst.msk [vmem:[#allocation2 + $0x1d0] sm:$0xff] %vm577_vm1, %v9415_v59  ;;  %v9439_v56 = vpop.eup %7307 }
 0x24f   : > { %v2555_v19 = vpop.xlane.xlu1 %2554  ;;  %v2510_v1 = vpop.xlane.xlu0 %2509  ;;  %11080 = vst [vmem:[#allocation165_spill] sm:$0xff] %v9439_v56 }
 0x250   : > { %v9434_v25 = vmax.f32 %v9419_v40, %v2555_v19  ;;  %v9437_v31 = vmax.f32 %v9421_v49, %v2510_v1  ;;  %v9460_v41 = vpop.eup %7309 }
 0x251   : > { %11084 = vst [vmem:[#allocation168_spill] sm:$0xff] %v9460_v41 }
 0x252   : > { %11079 = vst [vmem:[#allocation164_spill] sm:$0xff] %v9437_v31  ;;  %5512 = vst.msk [vmem:[#allocation2 + $0x1d8] sm:$0xff] %vm577_vm1, %v9434_v25  ;;  %4316 = vperm.xlu0 %7097, %v9439_v56   ;;  %4221 = vperm.xlu1 %7098, %v9431_v24   ;;  %v9464_v56 = vld [vmem:[#allocation2 + $0x170] sm:$0xff] }
 0x253   : > { %5497 = vst.msk [vmem:[#allocation2 + $0x160] sm:$0xff] %vm577_vm1, %v9437_v31  ;;  %v2513_v19 = vpop.xlane.xlu1 %2512  ;;  %v2558_v1 = vpop.xlane.xlu0 %2557  ;;  %11085 = vst [vmem:[#allocation169_spill] sm:$0xff] %v9464_v56 }
 0x254   : > { %v9455_v49 = vmax.f32 %v9441_v36, %v2513_v19  ;;  %v9458_v14 = vmax.f32 %v9443_v9, %v2558_v1  ;;  %v9481_v9 = vld [vmem:[#allocation2 + $0x178] sm:$0xff] }
 0x256   : > { %11083 = vst [vmem:[#allocation167_spill] sm:$0xff] %v9458_v14  ;;  %5498 = vst.msk [vmem:[#allocation2 + $0x168] sm:$0xff] %vm577_vm1, %v9455_v49  ;;  %2991 = vperm.xlu0 %7097, %v9208_v63   ;;  %4301 = vperm.xlu1 %7098, %v9460_v41   ;;  %v9483_v41 = vld [vmem:[#allocation2 + $0x1f0] sm:$0xff]  ;;  %v2762_v63 = vmul.f32 1.442695, %v2665_v12 }
 0x257   : > { %5513 = vst.msk [vmem:[#allocation2 + $0x1e0] sm:$0xff] %vm577_vm1, %v9458_v14  ;;  %v2561_v19 = vpop.xlane.xlu1 %2560  ;;  %v2516_v1 = vpop.xlane.xlu0 %2515  ;;  %11088 = vst [vmem:[#allocation171_spill] sm:$0xff] %v9483_v41  ;;  %v9502_v14 = vld [vmem:[#allocation2 + $0x1f8] sm:$0xff] }
 0x258   : > { %v9476_v61 = vmax.f32 %v9462_v6, %v2561_v19  ;;  %v9479_v24 = vmax.f32 %v9464_v56, %v2516_v1  ;;  %v7227_v1 = vld [vmem:[%s8021_s27 + $0x140] sm:$0xff]   ;;  %v9500_v56 = vpop.eup %7311  ;;  %7319 = vpow2.f32 %v2762_v63 }
 0x259   : > { %11090 = vst [vmem:[#allocation173_spill] sm:$0xff] %v9500_v56  ;;  %6875 = vmatprep.subr.bf16.mxu0 %v7227_v1 }
 0x25a   : > { %11087 = vst [vmem:[#allocation170_spill] sm:$0xff] %v9479_v24  ;;  %5514 = vst.msk [vmem:[#allocation2 + $0x1e8] sm:$0xff] %vm577_vm1, %v9476_v61  ;;  %3071 = vperm.xlu0 %7097, %v9226_v26   ;;  %2896 = vperm.xlu1 %7098, %v9145_v21  }
 0x25b   : > { %5499 = vst.msk [vmem:[#allocation2 + $0x170] sm:$0xff] %vm577_vm1, %v9479_v24  ;;  %v2519_v23 = vpop.xlane.xlu1 %2518  ;;  %v2564_v53 = vpop.xlane.xlu0 %2563 }
 0x25c   : > { %v9494_v44 = vmax.f32 %v9481_v9, %v2519_v23  ;;  %v9497_v19 = vmax.f32 %v9483_v41, %v2564_v53  ;;  %v9512_v23 = vpop.eup %7313  ;;  %v7229_v41 = vld [vmem:[%s8021_s27 + $0x1c0] sm:$0xff]  }
 0x25d   : > { %11091 = vst [vmem:[#allocation174_spill] sm:$0xff] %v9512_v23  ;;  %v9518_v24 = vpop.eup %7315  ;;  %6939 = vmatprep.subr.bf16.mxu1 %v7229_v41 }
 0x25e   : > { %11089 = vst [vmem:[#allocation172_spill] sm:$0xff] %v9497_v19  ;;  %5500 = vst.msk [vmem:[#allocation2 + $0x178] sm:$0xff] %vm577_vm1, %v9494_v44  ;;  %4246 = vperm.xlu0 %7097, %v9500_v56   ;;  %2976 = vperm.xlu1 %7098, %v9165_v13   ;;  %v11093_v56 = vsub.f32 %v9131_v17, %v9145_v21  ;;  %v9527_v12 = vpop.eup %7317  ;;  %v11095_v17 = vsub.f32 %v9149_v27, %v9165_v13 }
 0x25f   : > { %5515 = vst.msk [vmem:[#allocation2 + $0x1f0] sm:$0xff] %vm577_vm1, %v9497_v19  ;;  %v2567_v10 = vpop.xlane.xlu1 %2566  ;;  %11092 = vst [vmem:[#allocation175_spill] sm:$0xff] %v9518_v24 }
 0x260   : > { %v9515_v53 = vmax.f32 %v9502_v14, %v2567_v10  ;;  %v2724_v31 = vmul.f32 1.442695, %v11093_v56  ;;  %11094 = vst [vmem:[#allocation176_spill] sm:$0xff] %v9527_v12  ;;  %v2756_v21 = vmul.f32 1.442695, %v11095_v17 }
 0x262   : > { %5516 = vst.msk [vmem:[#allocation2 + $0x1f8] sm:$0xff] %vm577_vm1, %v9515_v53  ;;  %4326 = vperm.xlu0 %7097, %v9518_v24   ;;  %4231 = vperm.xlu1 %7098, %v9512_v23   ;;  %7321 = vpow2.f32 %v2724_v31 }
 0x263   : > { %v2827_v26 = vpop.permute.xlu0 %2826  ;;  %7323 = vpow2.f32 %v2794_v2  ;;  %v9544_v2 = vpop.eup %7319 }
 0x264   : > { %v3144_v31 = vsub.f32 %v8109_v32, %v2827_v26  ;;  %v3145_v24 = vsub.f32 %v8111_v34, %v2827_v26  ;;  %7325 = vpow2.f32 %v2756_v21  ;;  %11096 = vst [vmem:[#allocation177_spill] sm:$0xff] %v9544_v2  ;;  %v2664_v32 = vsub.f32 %v9171_v7, %v9191_v62 }
 0x265   : > { %v2907_v1 = vpop.permute.xlu1 %2906 }
 0x266   : > { %3001 = vperm.xlu0 %7097, %v9244_v54   ;;  %4311 = vperm.xlu1 %7098, %v9527_v12   ;;  %v3176_v10 = vsub.f32 %v8113_v33, %v2907_v1  ;;  %v3177_v63 = vsub.f32 %v8119_v37, %v2907_v1 }
 0x267   : > { %v2912_v56 = vpop.permute.xlu0 %2911 }
 0x268   : > { %v3178_v41 = vsub.f32 %v8123_v39, %v2912_v56  ;;  %v3179_v28 = vsub.f32 %v8129_v42, %v2912_v56 }
 0x269   : > { %v2832_v23 = vpop.permute.xlu1 %2831 }
 0x26a   : > { %v3288_v12 = vpack.c.bf16 %v3178_v41, %v3176_v10  ;;  %v3289_v19 = vpack.c.bf16 %v3179_v28, %v3177_v63  ;;  %v3146_v13 = vsub.f32 %v8115_v35, %v2832_v23  ;;  %v3147_v27 = vsub.f32 %v8121_v38, %v2832_v23  ;;  %3081 = vperm.xlu0 %7097, %v9270_v43  }
 0x26b   : > { %2986 = vperm.xlu1 %7098, %v9191_v62   ;;  %v2680_v62 = vsub.f32 %v9197_v57, %v9211_v16 }
 0x26c   : > { %v3385_v33 = vmul.bf16 1069105081, %v3288_v12  ;;  %v3388_v37 = vmul.bf16 1069105081, %v3289_v19  ;;  %v3272_v39 = vpack.c.bf16 %v3146_v13, %v3144_v31  ;;  %v3273_v42 = vpack.c.bf16 %v3147_v27, %v3145_v24  ;;  %v9550_v38 = vpop.eup %7321  ;;  %v11102_v31 = vld [vmem:[#allocation6_spill] sm:$0xff] }
 0x26d   : > { %v2837_v34 = vpop.permute.xlu1 %2836  ;;  %11097 = vst [vmem:[#allocation178_spill] sm:$0xff] %v9550_v38  ;;  %v11098_v19 = vsub.f32 %v9231_v15, %v9244_v54  ;;  %v9555_v23 = vpop.eup %7323  ;;  %v2760_v12 = vmul.f32 1.442695, %v2664_v32  ;;  %v11100_v15 = vsub.f32 %v9251_v0, %v9270_v43 }
 0x26e   : > { %7327 = vpow.bf16 %v3385_v33  ;;  %v3337_v26 = vmul.bf16 1069105081, %v3272_v39  ;;  %v3340_v35 = vmul.bf16 1069105081, %v3273_v42  ;;  %4336 = vperm.xlu0 %7097, %v9544_v2   ;;  %11099 = vst [vmem:[#allocation179_spill] sm:$0xff] %v9555_v23  ;;  %v9568_v63 = vpop.eup %7325  ;;  %v3149_v43 = vsub.f32 %v8266_v46, %v2837_v34  ;;  %v7232_v42 = vld [vmem:[%s8021_s27 + $0x180] sm:$0xff]  }
 0x26f   : > { %7329 = vpow.bf16 %v3388_v37  ;;  %3066 = vperm.xlu1 %7098, %v9211_v16   ;;  %v2766_v24 = vmul.f32 1.442695, %v11098_v19  ;;  %v2798_v54 = vmul.f32 1.442695, %v11100_v15  ;;  %11101 = vst [vmem:[#allocation180_spill] sm:$0xff] %v9568_v63 }
 0x270   : > { %7331 = vpow.bf16 %v3337_v26 }
 0x271   : > { %7333 = vpow.bf16 %v3340_v35  ;;  %v2922_v7 = vpop.permute.xlu0 %2921  ;;  %v2917_v1 = vpop.permute.xlu1 %2916  ;;  %v11103_v35 = vld [vmem:[#allocation134_spill] sm:$0xff] }
 0x272   : > { %v3182_v17 = vsub.f32 %v8281_v52, %v2922_v7  ;;  %v3183_v21 = vsub.f32 %v8287_v55, %v2922_v7  ;;  %v3180_v56 = vsub.f32 %v8270_v48, %v2917_v1  ;;  %v3181_v10 = vsub.f32 %v8276_v51, %v2917_v1  ;;  %4416 = vperm.xlu0 %7097, %v9555_v23   ;;  %v11104_v7 = vld [vmem:[#allocation133_spill] sm:$0xff] }
 0x273   : > { %4241 = vperm.xlu1 %7098, %v9550_v38   ;;  %7335 = vpow2.f32 %v2766_v24  ;;  %v2792_v52 = vmul.f32 1.442695, %v2680_v62  ;;  %v3148_v51 = vsub.f32 %v8264_v45, %v2837_v34  ;;  %v2666_v1 = vsub.f32 %v11104_v7, %v11103_v35 }
 0x274   : > { %v3290_v57 = vpack.c.bf16 %v3182_v17, %v3180_v56  ;;  %v3291_v16 = vpack.c.bf16 %v3183_v21, %v3181_v10  ;;  %7337 = vpow2.f32 %v2760_v12  ;;  %v7228_v17 = vld [vmem:[%s8021_s27 + $0x100] sm:$0xff]   ;;  %v7234_v21 = vld [vmem:[%s8021_s27 + $0x1c8] sm:$0xff]   ;;  %v2673_v23 = vsub.f32 %v9363_v58, %v9376_v11 }
 0x275   : > { %v9570_v55 = vpop.permute.xlu0 %4171  ;;  %v2842_v48 = vpop.permute.xlu1 %2841  ;;  %7339 = vpow2.f32 %v2798_v54  ;;  %v2689_v38 = vsub.f32 %v9383_v22, %v9394_v18 }
 0x276   : > { %v3391_v41 = vmul.bf16 1069105081, %v3290_v57  ;;  %v3394_v28 = vmul.bf16 1069105081, %v3291_v16  ;;  %v3150_v0 = vsub.f32 %v8268_v47, %v2842_v48  ;;  %3011 = vperm.xlu0 %7097, %v9292_v29   ;;  %v3151_v13 = vsub.f32 %v11102_v31, %v2842_v48  ;;  %v7230_v57 = vld [vmem:[%s8021_s27 + $0x148] sm:$0xff]  }
 0x277   : > { %4321 = vperm.xlu1 %7098, %v9568_v63   ;;  %v7236_v16 = vld [vmem:[%s8021_s27 + $0x188] sm:$0xff]   ;;  %v11144_v63 = vld [vmem:[#allocation148_spill] sm:$0xff] }
 0x278   : > { %7341 = vpow.bf16 %v3391_v41  ;;  %v3274_v27 = vpack.c.bf16 %v3150_v0, %v3148_v51  ;;  %v3275_v37 = vpack.c.bf16 %v3151_v13, %v3149_v43  ;;  %v11107_v43 = vsub.f32 %v9277_v30, %v9292_v29  ;;  %v11108_v13 = vld [vmem:[#allocation136_spill] sm:$0xff] }
 0x279   : > { %v7328_v33 = vpop.eup %7327  ;;  %7343 = vpow.bf16 %v3394_v28  ;;  %v9578_v45 = vpop.permute.xlu0 %4256  ;;  %v7238_v28 = vld [vmem:[%s8021_s27 + $0x1d0] sm:$0xff]  }
 0x27a   : > { %v9580_v39 = vpop.permute.xlu1 %4251  ;;  %v7330_v47 = vpop.eup %7329  ;;  %7345 = vpow2.f32 %v2792_v52  ;;  %v3343_v32 = vmul.bf16 1069105081, %v3274_v27  ;;  %3091 = vperm.xlu0 %7097, %v9312_v5   ;;  %v3688_v46 = vunpack.c.l.bf16 %v7328_v33  ;;  %v3346_v26 = vmul.bf16 1069105081, %v3275_v37  ;;  %v7233_v30 = vld [vmem:[%s8021_s27 + $0x150] sm:$0xff]  }
 0x27b   : > { %v7332_v34 = vpop.eup %7331  ;;  %2996 = vperm.xlu1 %7098, %v11103_v35   ;;  %4874 = vmatprep.mubr.bf16.mxu1 %v7330_v47  ;;  %v3689_v19 = vunpack.c.l.bf16 %v7330_v47  ;;  %v3690_v24 = vunpack.c.h.bf16 %v7328_v33  ;;  %v3691_v12 = vunpack.c.h.bf16 %v7330_v47  ;;  %v2770_v31 = vmul.f32 1.442695, %v11107_v43  ;;  %v11111_v35 = vld [vmem:[#allocation14_spill] sm:$0xff] }
 0x27c   : > { %v7334_v62 = vpop.eup %7333  ;;  %7347 = vpow.bf16 %v3343_v32  ;;  %4875 = vmatmul.mubr.bf16.vlgmr.msra.gmra.mrb[64].mxu1 %v7328_v33  ;;  %v3658_v56 = vunpack.c.h.bf16 %v7332_v34  ;;  %v3656_v10 = vunpack.c.l.bf16 %v7332_v34  ;;  %v2764_v32 = vmul.f32 1.442695, %v2666_v1  ;;  %v11114_v1 = vld [vmem:[#allocation135_spill] sm:$0xff] }
 0x27d   : > { %7349 = vpow.bf16 %v3346_v26  ;;  %4681 = vmatprep.mubr.bf16.mxu0 %v7334_v62  ;;  %v2932_v15 = vpop.permute.xlu0 %2931  ;;  %6940 = vmatpush3.bf16.msra.mxu1 %v7232_v42  ;;  %v3659_v52 = vunpack.c.h.bf16 %v7334_v62  ;;  %v9593_v48 = vadd.f32 %v3689_v19, %v3688_v46  ;;  %v3657_v51 = vunpack.c.l.bf16 %v7334_v62  ;;  %v9595_v41 = vpop.eup %7335  ;;  %v7231_v42 = vld [vmem:[%s8021_s27 + $0x108] sm:$0xff]   ;;  %v11112_v62 = vld [vmem:[#allocation9_spill] sm:$0xff] }
 0x27e   : > { %v9589_v54 = vpop.permute.xlu1 %2846  ;;  %11105 = vst [vmem:[#allocation6_spill] sm:$0xff] %v9595_v41  ;;  %4682 = vmatmul.mubr.bf16.vlgmr.msra.gmra.mrb[64].mxu0 %v7332_v34  ;;  %v9598_v0 = vpop.eup %7337  ;;  %4346 = vperm.xlu0 %7097, %v9595_v41   ;;  %v9609_v37 = vadd.f32 %v3691_v12, %v3690_v24  ;;  %v11110_v34 = vld [vmem:[#allocation13_spill] sm:$0xff]  ;;  %v3187_v19 = vsub.f32 %v11111_v35, %v2932_v15  ;;  %v11113_v12 = vld [vmem:[#allocation12_spill] sm:$0xff]  ;;  %7351 = vpow2.f32 %v2770_v31 }
 0x27f   : > { %11106 = vst [vmem:[#allocation134_spill] sm:$0xff] %v9598_v0  ;;  %3076 = vperm.xlu1 %7098, %v11108_v13   ;;  %v9605_v27 = vadd.f32 %v3659_v52, %v3658_v56  ;;  %v9607_v33 = vadd.f32 %v3657_v51, %v3656_v10  ;;  %6876 = vmatpush3.bf16.msra.mxu0 %v7228_v17  ;;  %v9612_v47 = vpop.eup %7339  ;;  %v7235_v51 = vld [vmem:[%s8021_s27 + $0x110] sm:$0xff]   ;;  %7353 = vpow2.f32 %v2764_v32  ;;  %v7239_v32 = vld [vmem:[%s8021_s27 + $0x118] sm:$0xff]  }
 0x280   : > { %6941 = vmatprep.subr.bf16.mxu1 %v7234_v21  ;;  %11109 = vst [vmem:[#allocation133_spill] sm:$0xff] %v9612_v47  ;;  %6877 = vmatprep.subr.bf16.mxu0 %v7230_v57  ;;  %v3186_v26 = vsub.f32 %v11110_v34, %v2932_v15  ;;  %v2682_v21 = vsub.f32 %v11114_v1, %v11108_v13 }
 0x281   : > { %v9614_v46 = vpop.permute.xlu0 %4186  ;;  %6942 = vmatpush3.bf16.msra.mxu1 %v7236_v16  ;;  %v11115_v56 = vsub.f32 %v9299_v3, %v9312_v5  ;;  %v7237_v5 = vld [vmem:[%s8021_s27 + $0x158] sm:$0xff]  }
 0x282   : > { %v2927_v29 = vpop.permute.xlu1 %2926  ;;  %6943 = vmatprep.subr.bf16.mxu1 %v7238_v28  ;;  %4426 = vperm.xlu0 %7097, %v9612_v47   ;;  %v7240_v28 = vld [vmem:[%s8021_s27 + $0x190] sm:$0xff]  }
 0x283   : > { %v3184_v24 = vsub.f32 %v11112_v62, %v2927_v29  ;;  %v3185_v7 = vsub.f32 %v11113_v12, %v2927_v29  ;;  %v7342_v17 = vpop.eup %7341  ;;  %v2802_v10 = vmul.f32 1.442695, %v11115_v56  ;;  %4331 = vperm.xlu1 %7098, %v9598_v0   ;;  %6878 = vmatpush3.bf16.msra.mxu0 %v7231_v42  ;;  %v7242_v12 = vld [vmem:[%s8021_s27 + $0x1d8] sm:$0xff]   ;;  %v11143_v0 = vld [vmem:[#allocation19_spill] sm:$0xff] }
 0x284   : > { %v7344_v15 = vpop.eup %7343  ;;  %v3692_v43 = vunpack.c.l.bf16 %v7342_v17  ;;  %v3694_v13 = vunpack.c.h.bf16 %v7342_v17  ;;  %6879 = vmatprep.subr.bf16.mxu0 %v7233_v30 }
 0x285   : > { %v9628_v57 = vpop.eup %7345  ;;  %v3292_v16 = vpack.c.bf16 %v3186_v26, %v3184_v24  ;;  %v3293_v52 = vpack.c.bf16 %v3187_v19, %v3185_v7  ;;  %4882 = vmatprep.mubr.bf16.mxu1 %v7344_v15  ;;  %v9632_v31 = vpop.permute.xlu0 %4266  ;;  %v3693_v29 = vunpack.c.l.bf16 %v7344_v15  ;;  %v3695_v34 = vunpack.c.h.bf16 %v7344_v15  ;;  %6944 = vmatpush3.bf16.msra.mxu1 %v7240_v28  ;;  %v7244_v15 = vld [vmem:[%s8021_s27 + $0x198] sm:$0xff]  }
 0x286   : > { %11116 = vst [vmem:[#allocation136_spill] sm:$0xff] %v9628_v57  ;;  %v9634_v3 = vpop.permute.xlu1 %4176  ;;  %4883 = vmatmul.mubr.bf16.gmra.mrb[68].mxu1 %v7342_v17  ;;  %7355 = vpow2.f32 %v2802_v10  ;;  %3021 = vperm.xlu0 %7097, %v9332_v60   ;;  %v2796_v24 = vmul.f32 1.442695, %v2682_v21  ;;  %v7241_v10 = vld [vmem:[%s8021_s27 + $0x160] sm:$0xff]   ;;  %v11117_v21 = vld [vmem:[#allocation7_spill] sm:$0xff] }
 0x287   : > { %v3397_v35 = vmul.bf16 1069105081, %v3292_v16  ;;  %v3400_v26 = vmul.bf16 1069105081, %v3293_v52  ;;  %v7348_v42 = vpop.eup %7347  ;;  %4411 = vperm.xlu1 %7098, %v9628_v57   ;;  %v9639_v19 = vadd.f32 %v3693_v29, %v3692_v43  ;;  %v9641_v62 = vadd.f32 %v3695_v34, %v3694_v13  ;;  %6880 = vmatpush3.bf16.msra.mxu0 %v7235_v51  ;;  %v11118_v51 = vld [vmem:[#allocation8_spill] sm:$0xff]  ;;  %v11119_v13 = vld [vmem:[#allocation10_spill] sm:$0xff] }
 0x288   : > { %v7350_v30 = vpop.eup %7349  ;;  %v3660_v7 = vunpack.c.l.bf16 %v7348_v42  ;;  %v3662_v17 = vunpack.c.h.bf16 %v7348_v42  ;;  %6881 = vmatprep.subr.bf16.mxu0 %v7237_v5  ;;  %v3152_v43 = vsub.f32 %v11117_v21, %v9589_v54  ;;  %v3153_v28 = vsub.f32 %v11118_v51, %v9589_v54  ;;  %v11120_v34 = vld [vmem:[#allocation11_spill] sm:$0xff]  ;;  %v11121_v21 = vld [vmem:[#allocation146_spill] sm:$0xff]  ;;  %6945 = vmatprep.subr.bf16.mxu1 %v7242_v12 }
 0x289   : > { %7357 = vpow.bf16 %v3397_v35  ;;  %4689 = vmatprep.mubr.bf16.mxu0 %v7350_v30  ;;  %v9645_v1 = vpop.permute.xlu0 %2941  ;;  %v3661_v16 = vunpack.c.l.bf16 %v7350_v30  ;;  %v3663_v52 = vunpack.c.h.bf16 %v7350_v30  ;;  %v2671_v54 = vsub.f32 %v11121_v21, %v9332_v60  ;;  %6946 = vmatpush3.bf16.msra.mxu1 %v7244_v15  ;;  %v7250_v60 = vld [vmem:[%s8021_s27 + $0x1e8] sm:$0xff]   ;;  %v11125_v12 = vld [vmem:[#allocation142_spill] sm:$0xff] }
 0x28a   : > { %7359 = vpow.bf16 %v3400_v26  ;;  %v2852_v56 = vpop.permute.xlu1 %2851  ;;  %4690 = vmatmul.mubr.bf16.gmra.mrb[68].mxu0 %v7348_v42  ;;  %v7246_v26 = vld [vmem:[%s8021_s27 + $0x1e0] sm:$0xff]   ;;  %3101 = vperm.xlu0 %7097, %v9356_v20   ;;  %v7247_v15 = vld [vmem:[%s8021_s27 + $0x128] sm:$0xff]  }
 0x28b   : > { %v3154_v29 = vsub.f32 %v11119_v13, %v2852_v56  ;;  %v3155_v35 = vsub.f32 %v11120_v34, %v2852_v56  ;;  %3006 = vperm.xlu1 %7098, %v9273_v4   ;;  %v9658_v5 = vadd.f32 %v3661_v16, %v3660_v7  ;;  %v9660_v30 = vadd.f32 %v3663_v52, %v3662_v17  ;;  %v7243_v56 = vld [vmem:[%s8021_s27 + $0x120] sm:$0xff]   ;;  %v9665_v13 = vpop.eup %7351  ;;  %v7245_v7 = vld [vmem:[%s8021_s27 + $0x168] sm:$0xff]  }
 0x28c   : > { %7361 = vpow2.f32 %v2796_v24  ;;  %6882 = vmatpush3.bf16.msra.mxu0 %v7239_v32  ;;  %11122 = vst [vmem:[#allocation13_spill] sm:$0xff] %v9665_v13  ;;  %v7248_v24 = vld [vmem:[%s8021_s27 + $0x1a0] sm:$0xff]   ;;  %6947 = vmatprep.subr.bf16.mxu1 %v7246_v26  ;;  %v7249_v26 = vld [vmem:[%s8021_s27 + $0x170] sm:$0xff]  }
 0x28d   : > { %v3276_v42 = vpack.c.bf16 %v3154_v29, %v3152_v43  ;;  %v3277_v51 = vpack.c.bf16 %v3155_v35, %v3153_v28  ;;  %v9667_v34 = vpop.permute.xlu0 %4196  ;;  %6883 = vmatprep.subr.bf16.mxu0 %v7241_v10  ;;  %v11124_v52 = vld [vmem:[#allocation138_spill] sm:$0xff]  ;;  %v9678_v43 = vpop.eup %7353  ;;  %v2774_v28 = vmul.f32 1.442695, %v2671_v54  ;;  %v2687_v10 = vsub.f32 %v9339_v50, %v9356_v20  ;;  %6948 = vmatpush3.bf16.msra.mxu1 %v7248_v24  ;;  %v11130_v50 = vld [vmem:[#allocation141_spill] sm:$0xff] }
 0x28e   : > { %11123 = vst [vmem:[#allocation14_spill] sm:$0xff] %v9667_v34  ;;  %v9669_v47 = vpop.permute.xlu1 %4181  ;;  %v2668_v32 = vsub.f32 %v11124_v52, %v9273_v4  ;;  %4356 = vperm.xlu0 %7097, %v9665_v13   ;;  %11126 = vst [vmem:[#allocation9_spill] sm:$0xff] %v9678_v43  ;;  %6949 = vmatprep.subr.bf16.mxu1 %v7250_v60  ;;  %v2684_v20 = vsub.f32 %v11130_v50, %v11125_v12  ;;  %v7253_v52 = vld [vmem:[%s8021_s27 + $0x178] sm:$0xff]   ;;  %v7256_v13 = vld [vmem:[%s8021_s27 + $0x1b0] sm:$0xff]  }
 0x28f   : > { %v3349_v17 = vmul.bf16 1069105081, %v3276_v42  ;;  %v3352_v16 = vmul.bf16 1069105081, %v3277_v51  ;;  %3086 = vperm.xlu1 %7098, %v11125_v12   ;;  %v2806_v51 = vmul.f32 1.442695, %v2687_v10 }
 0x290   : > { %6884 = vmatpush3.bf16.msra.mxu0 %v7243_v56  ;;  %v9683_v29 = vpop.eup %7355  ;;  %v2768_v54 = vmul.f32 1.442695, %v2668_v32  ;;  %v7251_v56 = vld [vmem:[%s8021_s27 + $0x130] sm:$0xff]  }
 0x291   : > { %7363 = vpow.bf16 %v3349_v17  ;;  %11127 = vst [vmem:[#allocation12_spill] sm:$0xff] %v9683_v29  ;;  %v9685_v35 = vpop.permute.xlu0 %4276  ;;  %6885 = vmatprep.subr.bf16.mxu0 %v7245_v7  ;;  %v7252_v7 = vld [vmem:[%s8021_s27 + $0x1a8] sm:$0xff]   ;;  %v7254_v32 = vld [vmem:[%s8021_s27 + $0x1f0] sm:$0xff]  }
 0x292   : > { %7365 = vpow.bf16 %v3352_v16  ;;  %11128 = vst [vmem:[#allocation135_spill] sm:$0xff] %v9685_v35  ;;  %v9687_v4 = vpop.permute.xlu1 %4261  ;;  %4436 = vperm.xlu0 %7097, %v9683_v29   ;;  %6950 = vmatpush3.bf16.msra.mxu1 %v7252_v7 }
 0x293   : > { %11129 = vst [vmem:[#allocation7_spill] sm:$0xff] %v9687_v4  ;;  %4341 = vperm.xlu1 %7098, %v9678_v43   ;;  %7367 = vpow2.f32 %v2774_v28  ;;  %v2800_v28 = vmul.f32 1.442695, %v2684_v20  ;;  %6951 = vmatprep.subr.bf16.mxu1 %v7254_v32 }
 0x294   : > { %v7358_v21 = vpop.eup %7357  ;;  %6886 = vmatpush3.bf16.msra.mxu0 %v7247_v15  ;;  %7369 = vpow2.f32 %v2768_v54  ;;  %v11132_v54 = vld [vmem:[#allocation21_spill] sm:$0xff] }
 0x295   : > { %v7360_v42 = vpop.eup %7359  ;;  %v3696_v24 = vunpack.c.l.bf16 %v7358_v21  ;;  %v3698_v17 = vunpack.c.h.bf16 %v7358_v21  ;;  %v9696_v16 = vpop.permute.xlu0 %2871  ;;  %6887 = vmatprep.subr.bf16.mxu0 %v7249_v26  ;;  %7371 = vpow2.f32 %v2806_v51  ;;  %v7255_v26 = vld [vmem:[%s8021_s27 + $0x138] sm:$0xff]   ;;  %v3190_v20 = vsub.f32 %v11132_v54, %v9645_v1  ;;  %v11135_v51 = vld [vmem:[#allocation20_spill] sm:$0xff] }
 0x296   : > { %4890 = vmatprep.mubr.bf16.mxu1 %v7360_v42  ;;  %v9698_v60 = vpop.permute.xlu1 %2856  ;;  %v3697_v12 = vunpack.c.l.bf16 %v7360_v42  ;;  %v3699_v50 = vunpack.c.h.bf16 %v7360_v42  ;;  %v9702_v29 = vpop.eup %7361  ;;  %3031 = vperm.xlu0 %7097, %v9376_v11   ;;  %7373 = vpow2.f32 %v2800_v28  ;;  %v7258_v54 = vld [vmem:[%s8021_s27 + $0x1b8] sm:$0xff]   ;;  %v11138_v28 = vld [vmem:[#allocation15_spill] sm:$0xff] }
 0x297   : > { %11131 = vst [vmem:[#allocation8_spill] sm:$0xff] %v9702_v29  ;;  %4891 = vmatmul.mubr.bf16.gmra.mrb[72].mxu1 %v7358_v21  ;;  %4421 = vperm.xlu1 %7098, %v9702_v29   ;;  %v7257_v21 = vld [vmem:[%s8021_s27 + $0x1f8] sm:$0xff]  }
 0x298   : > { %v9706_v10 = vadd.f32 %v3697_v12, %v3696_v24  ;;  %v9708_v15 = vadd.f32 %v3699_v50, %v3698_v17  ;;  %6888 = vmatpush3.bf16.msra.mxu0 %v7251_v56  ;;  %v11133_v24 = vld [vmem:[#allocation22_spill] sm:$0xff]  ;;  %v11134_v17 = vld [vmem:[#allocation17_spill] sm:$0xff]  ;;  %6952 = vmatpush3.bf16.msra.mxu1 %v7256_v13  ;;  %v11141_v13 = vld [vmem:[#allocation16_spill] sm:$0xff] }
 0x299   : > { %v9712_v42 = vpop.permute.xlu0 %2951  ;;  %6889 = vmatprep.subr.bf16.mxu0 %v7253_v52  ;;  %v3191_v12 = vsub.f32 %v11133_v24, %v9645_v1  ;;  %v11136_v52 = vld [vmem:[#allocation145_spill] sm:$0xff]  ;;  %6953 = vmatprep.subr.bf16.mxu1 %v7257_v21 }
 0x29a   : > { %v2937_v41 = vpop.permute.xlu1 %2936  ;;  %3111 = vperm.xlu0 %7097, %v9394_v18   ;;  %v2810_v18 = vmul.f32 1.442695, %v2689_v38  ;;  %v11152_v38 = vld [vmem:[#allocation26_spill] sm:$0xff] }
 0x29b   : > { %v3188_v50 = vsub.f32 %v11134_v17, %v2937_v41  ;;  %v3189_v56 = vsub.f32 %v11135_v51, %v2937_v41  ;;  %3016 = vperm.xlu1 %7098, %v11136_v52   ;;  %v11137_v17 = vld [vmem:[#allocation144_spill] sm:$0xff]  ;;  %v3156_v51 = vsub.f32 %v11138_v28, %v9698_v60 }
 0x29c   : > { %v7364_v7 = vpop.eup %7363  ;;  %6890 = vmatpush3.bf16.msra.mxu0 %v7255_v26  ;;  %v2670_v41 = vsub.f32 %v11137_v17, %v11136_v52  ;;  %v3157_v26 = vsub.f32 %v11141_v13, %v9698_v60  ;;  %v2778_v17 = vmul.f32 1.442695, %v2673_v23  ;;  %6954 = vmatpush3.bf16.msra.mxu1 %v7258_v54 }
 0x29d   : > { %v7366_v32 = vpop.eup %7365  ;;  %v3294_v2 = vpack.c.bf16 %v3190_v20, %v3188_v50  ;;  %v3295_v29 = vpack.c.bf16 %v3191_v12, %v3189_v56  ;;  %v3664_v1 = vunpack.c.l.bf16 %v7364_v7  ;;  %v3666_v24 = vunpack.c.h.bf16 %v7364_v7  ;;  %v9730_v11 = vpop.permute.xlu0 %4206  ;;  %v11142_v56 = vld [vmem:[#allocation18_spill] sm:$0xff] }
 0x29e   : > { %4697 = vmatprep.mubr.bf16.mxu0 %v7366_v32  ;;  %11139 = vst [vmem:[#allocation10_spill] sm:$0xff] %v9730_v11  ;;  %v2862_v58 = vpop.permute.xlu1 %2861  ;;  %v3665_v43 = vunpack.c.l.bf16 %v7366_v32  ;;  %v3667_v57 = vunpack.c.h.bf16 %v7366_v32  ;;  %v9732_v20 = vpop.eup %7367 }
 0x29f   : > { %11140 = vst [vmem:[#allocation11_spill] sm:$0xff] %v9732_v20  ;;  %v3403_v12 = vmul.bf16 1069105081, %v3294_v2  ;;  %v3406_v50 = vmul.bf16 1069105081, %v3295_v29  ;;  %4698 = vmatmul.mubr.bf16.gmra.mrb[72].mxu0 %v7364_v7  ;;  %v3158_v52 = vsub.f32 %v11142_v56, %v2862_v58  ;;  %v3159_v28 = vsub.f32 %v11143_v0, %v2862_v58  ;;  %4366 = vperm.xlu0 %7097, %v9732_v20   ;;  %v9746_v29 = vpop.eup %7369  ;;  %v11154_v56 = vld [vmem:[#allocation23_spill] sm:$0xff] }
 0x2a0   : > { %3096 = vperm.xlu1 %7098, %v11144_v63   ;;  %v9740_v21 = vadd.f32 %v3665_v43, %v3664_v1  ;;  %v9742_v32 = vadd.f32 %v3667_v57, %v3666_v24  ;;  %11145 = vst [vmem:[#allocation146_spill] sm:$0xff] %v9746_v29  ;;  %v9752_v7 = vpop.eup %7371  ;;  %v2772_v1 = vmul.f32 1.442695, %v2670_v41  ;;  %v11149_v57 = vld [vmem:[#allocation147_spill] sm:$0xff] }
 0x2a1   : > { %7375 = vpow.bf16 %v3403_v12  ;;  %v3278_v2 = vpack.c.bf16 %v3158_v52, %v3156_v51  ;;  %v3279_v23 = vpack.c.bf16 %v3159_v28, %v3157_v26  ;;  %v9748_v60 = vpop.permute.xlu0 %4286  ;;  %11148 = vst [vmem:[#allocation141_spill] sm:$0xff] %v9752_v7  ;;  %v2686_v24 = vsub.f32 %v11149_v57, %v11144_v63  ;;  %v9758_v54 = vpop.eup %7373  ;;  %v11153_v12 = vld [vmem:[#allocation27_spill] sm:$0xff] }
 0x2a2   : > { %7377 = vpow.bf16 %v3406_v50  ;;  %11146 = vst [vmem:[#allocation138_spill] sm:$0xff] %v9748_v60  ;;  %v9750_v0 = vpop.permute.xlu1 %4191  ;;  %11150 = vst [vmem:[#allocation21_spill] sm:$0xff] %v9758_v54  ;;  %v3162_v26 = vsub.f32 %v11152_v38, %v9696_v16  ;;  %v3163_v50 = vsub.f32 %v11153_v12, %v9696_v16  ;;  %v11158_v57 = vld [vmem:[#allocation159_spill] sm:$0xff]  ;;  %v11185_v60 = vld [vmem:[#allocation36_spill] sm:$0xff] }
 0x2a3   : > { %11147 = vst [vmem:[#allocation142_spill] sm:$0xff] %v9750_v0  ;;  %v3355_v43 = vmul.bf16 1069105081, %v3278_v2  ;;  %7379 = vpow2.f32 %v2778_v17  ;;  %v3358_v22 = vmul.bf16 1069105081, %v3279_v23  ;;  %4446 = vperm.xlu0 %7097, %v9752_v7   ;;  %v11155_v17 = vld [vmem:[#allocation24_spill] sm:$0xff] }
 0x2a4   : > { %4351 = vperm.xlu1 %7098, %v9746_v29   ;;  %v2804_v41 = vmul.f32 1.442695, %v2686_v24  ;;  %v11156_v23 = vld [vmem:[#allocation152_spill] sm:$0xff]  ;;  %v2675_v24 = vsub.f32 %v11158_v57, %v9412_v8  ;;  %v11241_v0 = vld [vmem:[#allocation57_spill] sm:$0xff] }
 0x2a5   : > { %7381 = vpow.bf16 %v3355_v43  ;;  %v9760_v51 = vpop.permute.xlu0 %2881  ;;  %v11157_v43 = vld [vmem:[#allocation150_spill] sm:$0xff] }
 0x2a6   : > { %7383 = vpow.bf16 %v3358_v22  ;;  %v9762_v58 = vpop.permute.xlu1 %4271  ;;  %v2782_v29 = vmul.f32 1.442695, %v2675_v24 }
 0x2a7   : > { %11151 = vst [vmem:[#allocation22_spill] sm:$0xff] %v9762_v58  ;;  %7385 = vpow2.f32 %v2772_v1  ;;  %3041 = vperm.xlu0 %7097, %v9412_v8   ;;  %v2672_v1 = vsub.f32 %v11157_v43, %v11156_v23 }
 0x2a8   : > { %4431 = vperm.xlu1 %7098, %v9758_v54   ;;  %7387 = vpow2.f32 %v2810_v18 }
 0x2a9   : > { %v9766_v63 = vpop.permute.xlu0 %2961  ;;  %7389 = vpow2.f32 %v2804_v41  ;;  %v2691_v41 = vsub.f32 %v9419_v40, %v9434_v25  ;;  %v11164_v40 = vld [vmem:[#allocation28_spill] sm:$0xff] }
 0x2aa   : > { %v2867_v13 = vpop.permute.xlu1 %2866 }
 0x2ab   : > { %v3160_v52 = vsub.f32 %v11154_v56, %v2867_v13  ;;  %v3161_v28 = vsub.f32 %v11155_v17, %v2867_v13  ;;  %3121 = vperm.xlu0 %7097, %v9434_v25   ;;  %v11160_v13 = vld [vmem:[#allocation29_spill] sm:$0xff] }
 0x2ac   : > { %v7376_v2 = vpop.eup %7375  ;;  %3026 = vperm.xlu1 %7098, %v11156_v23   ;;  %v3194_v17 = vsub.f32 %v11160_v13, %v9712_v42  ;;  %v11162_v23 = vld [vmem:[#allocation30_spill] sm:$0xff]  ;;  %v11165_v13 = vld [vmem:[#allocation155_spill] sm:$0xff] }
 0x2ad   : > { %v7378_v22 = vpop.eup %7377  ;;  %v3280_v18 = vpack.c.bf16 %v3162_v26, %v3160_v52  ;;  %v3281_v38 = vpack.c.bf16 %v3163_v50, %v3161_v28  ;;  %v3700_v16 = vunpack.c.l.bf16 %v7376_v2  ;;  %v3702_v12 = vunpack.c.h.bf16 %v7376_v2  ;;  %v9786_v43 = vpop.permute.xlu0 %4216  ;;  %v11163_v28 = vld [vmem:[#allocation25_spill] sm:$0xff] }
 0x2ae   : > { %v9780_v56 = vpop.eup %7379  ;;  %4898 = vmatprep.mubr.bf16.mxu1 %v7378_v22  ;;  %11161 = vst [vmem:[#allocation20_spill] sm:$0xff] %v9786_v43  ;;  %v2947_v8 = vpop.permute.xlu1 %2946  ;;  %v3701_v57 = vunpack.c.l.bf16 %v7378_v22  ;;  %v3703_v7 = vunpack.c.h.bf16 %v7378_v22  ;;  %v3195_v26 = vsub.f32 %v11162_v23, %v9712_v42 }
 0x2af   : > { %11159 = vst [vmem:[#allocation17_spill] sm:$0xff] %v9780_v56  ;;  %v3361_v50 = vmul.bf16 1069105081, %v3280_v18  ;;  %v3364_v52 = vmul.bf16 1069105081, %v3281_v38  ;;  %4899 = vmatmul.mubr.bf16.gmra.mrb[76].mxu1 %v7376_v2  ;;  %v3192_v20 = vsub.f32 %v11163_v28, %v2947_v8  ;;  %v3193_v25 = vsub.f32 %v11164_v40, %v2947_v8  ;;  %4376 = vperm.xlu0 %7097, %v9780_v56  }
 0x2b0   : > { %v7382_v54 = vpop.eup %7381  ;;  %3106 = vperm.xlu1 %7098, %v11165_v13   ;;  %v9794_v43 = vadd.f32 %v3701_v57, %v3700_v16  ;;  %v9796_v11 = vadd.f32 %v3703_v7, %v3702_v12  ;;  %v2776_v7 = vmul.f32 1.442695, %v2672_v1  ;;  %v11170_v12 = vld [vmem:[#allocation154_spill] sm:$0xff] }
 0x2b1   : > { %v7384_v22 = vpop.eup %7383  ;;  %7391 = vpow.bf16 %v3361_v50  ;;  %v3296_v42 = vpack.c.bf16 %v3194_v17, %v3192_v20  ;;  %v3668_v18 = vunpack.c.l.bf16 %v7382_v54  ;;  %v3670_v38 = vunpack.c.h.bf16 %v7382_v54  ;;  %v9800_v24 = vpop.permute.xlu0 %4296 }
 0x2b2   : > { %v9798_v2 = vpop.eup %7385  ;;  %7393 = vpow.bf16 %v3364_v52  ;;  %v3297_v23 = vpack.c.bf16 %v3195_v26, %v3193_v25  ;;  %4705 = vmatprep.mubr.bf16.mxu0 %v7384_v22  ;;  %11167 = vst [vmem:[#allocation144_spill] sm:$0xff] %v9800_v24  ;;  %v9802_v8 = vpop.permute.xlu1 %4201  ;;  %v3669_v28 = vunpack.c.l.bf16 %v7384_v22  ;;  %v3671_v40 = vunpack.c.h.bf16 %v7384_v22 }
 0x2b3   : > { %11166 = vst [vmem:[#allocation145_spill] sm:$0xff] %v9798_v2  ;;  %11168 = vst [vmem:[#allocation15_spill] sm:$0xff] %v9802_v8  ;;  %v9804_v16 = vpop.eup %7387  ;;  %v2688_v57 = vsub.f32 %v11170_v12, %v11165_v13  ;;  %v3409_v20 = vmul.bf16 1069105081, %v3296_v42  ;;  %4706 = vmatmul.mubr.bf16.gmra.mrb[76].mxu0 %v7382_v54  ;;  %7395 = vpow2.f32 %v2782_v29  ;;  %v2814_v52 = vmul.f32 1.442695, %v2691_v41 }
 0x2b4   : > { %11169 = vst [vmem:[#allocation16_spill] sm:$0xff] %v9804_v16  ;;  %v3412_v17 = vmul.bf16 1069105081, %v3297_v23  ;;  %4456 = vperm.xlu0 %7097, %v9804_v16   ;;  %4361 = vperm.xlu1 %7098, %v9798_v2   ;;  %v9810_v26 = vadd.f32 %v3669_v28, %v3668_v18  ;;  %v9812_v50 = vadd.f32 %v3671_v40, %v3670_v38  ;;  %v9814_v25 = vpop.eup %7389  ;;  %v11173_v42 = vld [vmem:[#allocation34_spill] sm:$0xff]  ;;  %v11174_v38 = vld [vmem:[#allocation35_spill] sm:$0xff] }
 0x2b5   : > { %7397 = vpow.bf16 %v3409_v20  ;;  %11171 = vst [vmem:[#allocation18_spill] sm:$0xff] %v9814_v25  ;;  %v9816_v1 = vpop.permute.xlu0 %2891  ;;  %v2808_v29 = vmul.f32 1.442695, %v2688_v57  ;;  %v2677_v54 = vsub.f32 %v9441_v36, %v9455_v49  ;;  %v3166_v18 = vsub.f32 %v11173_v42, %v9760_v51  ;;  %v11175_v28 = vld [vmem:[#allocation31_spill] sm:$0xff]  ;;  %v11177_v36 = vld [vmem:[#allocation158_spill] sm:$0xff] }
 0x2b6   : > { %7399 = vpow.bf16 %v3412_v17  ;;  %v9818_v13 = vpop.permute.xlu1 %4281  ;;  %v3167_v23 = vsub.f32 %v11174_v38, %v9760_v51  ;;  %v11179_v17 = vld [vmem:[#allocation160_spill] sm:$0xff] }
 0x2b7   : > { %11172 = vst [vmem:[#allocation19_spill] sm:$0xff] %v9818_v13  ;;  %7401 = vpow2.f32 %v2776_v7  ;;  %v11176_v7 = vld [vmem:[#allocation32_spill] sm:$0xff]  ;;  %v2786_v16 = vmul.f32 1.442695, %v2677_v54 }
 0x2b8   : > { %3051 = vperm.xlu0 %7097, %v9455_v49   ;;  %4441 = vperm.xlu1 %7098, %v9814_v25   ;;  %7403 = vpow2.f32 %v2814_v52  ;;  %v11178_v49 = vld [vmem:[#allocation157_spill] sm:$0xff]  ;;  %v2690_v52 = vsub.f32 %v11179_v17, %v9415_v59 }
 0x2b9   : > { %v9824_v22 = vpop.permute.xlu0 %2971  ;;  %7405 = vpow2.f32 %v2808_v29  ;;  %v2674_v20 = vsub.f32 %v11178_v49, %v11177_v36  ;;  %v2693_v29 = vsub.f32 %v9462_v6, %v9476_v61 }
 0x2ba   : > { %v2877_v41 = vpop.permute.xlu1 %2876 }
 0x2bb   : > { %v3164_v40 = vsub.f32 %v11175_v28, %v2877_v41  ;;  %v3165_v12 = vsub.f32 %v11176_v7, %v2877_v41  ;;  %v11181_v41 = vld [vmem:[#allocation37_spill] sm:$0xff] }
 0x2bc   : > { %v7392_v57 = vpop.eup %7391  ;;  %3131 = vperm.xlu0 %7097, %v9476_v61   ;;  %3036 = vperm.xlu1 %7098, %v11177_v36   ;;  %v3198_v7 = vsub.f32 %v11181_v41, %v9766_v63  ;;  %v11183_v36 = vld [vmem:[#allocation38_spill] sm:$0xff] }
 0x2bd   : > { %v7394_v42 = vpop.eup %7393  ;;  %v3282_v56 = vpack.c.bf16 %v3166_v18, %v3164_v40  ;;  %v3283_v51 = vpack.c.bf16 %v3167_v23, %v3165_v12  ;;  %v3672_v38 = vunpack.c.l.bf16 %v7392_v57  ;;  %v3674_v28 = vunpack.c.h.bf16 %v7392_v57  ;;  %v9844_v49 = vpop.permute.xlu0 %4226  ;;  %v11184_v12 = vld [vmem:[#allocation33_spill] sm:$0xff] }
 0x2be   : > { %v9838_v25 = vpop.eup %7395  ;;  %4713 = vmatprep.mubr.bf16.mxu0 %v7394_v42  ;;  %11182 = vst [vmem:[#allocation147_spill] sm:$0xff] %v9844_v49  ;;  %v2957_v54 = vpop.permute.xlu1 %2956  ;;  %v3673_v17 = vunpack.c.l.bf16 %v7394_v42  ;;  %v3675_v2 = vunpack.c.h.bf16 %v7394_v42  ;;  %v3199_v18 = vsub.f32 %v11183_v36, %v9766_v63 }
 0x2bf   : > { %11180 = vst [vmem:[#allocation148_spill] sm:$0xff] %v9838_v25  ;;  %v3367_v23 = vmul.bf16 1069105081, %v3282_v56  ;;  %v3370_v40 = vmul.bf16 1069105081, %v3283_v51  ;;  %4714 = vmatmul.mubr.bf16.gmra.mrb[80].mxu0 %v7392_v57  ;;  %v3196_v24 = vsub.f32 %v11184_v12, %v2957_v54  ;;  %v3197_v6 = vsub.f32 %v11185_v60, %v2957_v54 }
 0x2c0   : > { %v7398_v8 = vpop.eup %7397  ;;  %4386 = vperm.xlu0 %7097, %v9838_v25   ;;  %3116 = vperm.xlu1 %7098, %v9415_v59   ;;  %v9852_v61 = vadd.f32 %v3673_v17, %v3672_v38  ;;  %v9854_v41 = vadd.f32 %v3675_v2, %v3674_v28  ;;  %v2780_v2 = vmul.f32 1.442695, %v2674_v20  ;;  %v2812_v20 = vmul.f32 1.442695, %v2690_v52  ;;  %v11192_v52 = vld [vmem:[#allocation42_spill] sm:$0xff] }
 0x2c1   : > { %v7400_v42 = vpop.eup %7399  ;;  %7407 = vpow.bf16 %v3367_v23  ;;  %v3298_v49 = vpack.c.bf16 %v3198_v7, %v3196_v24  ;;  %v3704_v63 = vunpack.c.l.bf16 %v7398_v8  ;;  %v3706_v56 = vunpack.c.h.bf16 %v7398_v8  ;;  %v9858_v36 = vpop.permute.xlu0 %4306 }
 0x2c2   : > { %v9856_v51 = vpop.eup %7401  ;;  %7409 = vpow.bf16 %v3370_v40  ;;  %v3299_v57 = vpack.c.bf16 %v3199_v18, %v3197_v6  ;;  %4906 = vmatprep.mubr.bf16.mxu1 %v7400_v42  ;;  %11187 = vst [vmem:[#allocation27_spill] sm:$0xff] %v9858_v36  ;;  %v9860_v60 = vpop.permute.xlu1 %4211  ;;  %v3705_v54 = vunpack.c.l.bf16 %v7400_v42  ;;  %v3707_v59 = vunpack.c.h.bf16 %v7400_v42  ;;  %v11193_v42 = vld [vmem:[#allocation43_spill] sm:$0xff] }
 0x2c3   : > { %11186 = vst [vmem:[#allocation26_spill] sm:$0xff] %v9856_v51  ;;  %11188 = vst [vmem:[#allocation23_spill] sm:$0xff] %v9860_v60  ;;  %v9862_v38 = vpop.eup %7403  ;;  %7411 = vpow2.f32 %v2786_v16  ;;  %v3415_v28 = vmul.bf16 1069105081, %v3298_v49  ;;  %4907 = vmatmul.mubr.bf16.gmra.mrb[80].mxu1 %v7398_v8  ;;  %v2679_v24 = vsub.f32 %v9481_v9, %v9494_v44  ;;  %v2818_v23 = vmul.f32 1.442695, %v2693_v29 }
 0x2c4   : > { %11189 = vst [vmem:[#allocation24_spill] sm:$0xff] %v9862_v38  ;;  %v3418_v7 = vmul.bf16 1069105081, %v3299_v57  ;;  %4466 = vperm.xlu0 %7097, %v9862_v38   ;;  %4371 = vperm.xlu1 %7098, %v9856_v51   ;;  %v9868_v17 = vadd.f32 %v3705_v54, %v3704_v63  ;;  %v9870_v18 = vadd.f32 %v3707_v59, %v3706_v56  ;;  %v9872_v40 = vpop.eup %7405  ;;  %v11194_v56 = vld [vmem:[#allocation39_spill] sm:$0xff]  ;;  %v11195_v54 = vld [vmem:[#allocation40_spill] sm:$0xff]  ;;  %v11201_v38 = vld [vmem:[#allocation46_spill] sm:$0xff] }
 0x2c5   : > { %7413 = vpow.bf16 %v3415_v28  ;;  %11190 = vst [vmem:[#allocation152_spill] sm:$0xff] %v9872_v40  ;;  %v9874_v16 = vpop.permute.xlu0 %2901  ;;  %v2790_v9 = vmul.f32 1.442695, %v2679_v24  ;;  %v2695_v49 = vsub.f32 %v9502_v14, %v9515_v53  ;;  %v3170_v6 = vsub.f32 %v11192_v52, %v9816_v1 }
 0x2c6   : > { %7415 = vpow.bf16 %v3418_v7  ;;  %v9876_v8 = vpop.permute.xlu1 %4291  ;;  %v3171_v63 = vsub.f32 %v11193_v42, %v9816_v1  ;;  %v11198_v1 = vld [vmem:[#allocation162_spill] sm:$0xff]  ;;  %v3203_v25 = vsub.f32 %v11201_v38, %v9824_v22 }
 0x2c7   : > { %11191 = vst [vmem:[#allocation150_spill] sm:$0xff] %v9876_v8  ;;  %7417 = vpow2.f32 %v2780_v2  ;;  %v11196_v2 = vld [vmem:[#allocation164_spill] sm:$0xff] }
 0x2c8   : > { %3061 = vperm.xlu0 %7097, %v9494_v44   ;;  %4451 = vperm.xlu1 %7098, %v9872_v40   ;;  %7419 = vpow2.f32 %v2818_v23  ;;  %v2822_v44 = vmul.f32 1.442695, %v2695_v49  ;;  %v2676_v42 = vsub.f32 %v11198_v1, %v11196_v2 }
 0x2c9   : > { %7421 = vpow2.f32 %v2812_v20  ;;  %v9882_v29 = vpop.permute.xlu0 %2981 }
 0x2ca   : > { %v2887_v12 = vpop.permute.xlu1 %2886  ;;  %7423 = vpow2.f32 %v2790_v9 }
 0x2cb   : > { %v3168_v57 = vsub.f32 %v11194_v56, %v2887_v12  ;;  %v3169_v59 = vsub.f32 %v11195_v54, %v2887_v12  ;;  %v11199_v56 = vld [vmem:[#allocation45_spill] sm:$0xff]  ;;  %7425 = vpow2.f32 %v2822_v44 }
 0x2cc   : > { %v7408_v14 = vpop.eup %7407  ;;  %3141 = vperm.xlu0 %7097, %v9515_v53   ;;  %3046 = vperm.xlu1 %7098, %v11196_v2   ;;  %v3202_v12 = vsub.f32 %v11199_v56, %v9824_v22  ;;  %v11203_v2 = vld [vmem:[#allocation44_spill] sm:$0xff]  ;;  %v11204_v56 = vld [vmem:[#allocation167_spill] sm:$0xff] }
 0x2cd   : > { %v7410_v28 = vpop.eup %7409  ;;  %v3284_v7 = vpack.c.bf16 %v3170_v6, %v3168_v57  ;;  %v3285_v23 = vpack.c.bf16 %v3171_v63, %v3169_v59  ;;  %v3676_v20 = vunpack.c.l.bf16 %v7408_v14  ;;  %v3678_v52 = vunpack.c.h.bf16 %v7408_v14  ;;  %v9898_v9 = vpop.permute.xlu0 %4236  ;;  %v11202_v63 = vld [vmem:[#allocation41_spill] sm:$0xff] }
 0x2ce   : > { %v9892_v24 = vpop.eup %7411  ;;  %4721 = vmatprep.mubr.bf16.mxu0 %v7410_v28  ;;  %11200 = vst [vmem:[#allocation29_spill] sm:$0xff] %v9898_v9  ;;  %v2967_v49 = vpop.permute.xlu1 %2966  ;;  %v3677_v53 = vunpack.c.l.bf16 %v7410_v28  ;;  %v3679_v54 = vunpack.c.h.bf16 %v7410_v28 }
 0x2cf   : > { %11197 = vst [vmem:[#allocation159_spill] sm:$0xff] %v9892_v24  ;;  %v3373_v40 = vmul.bf16 1069105081, %v3284_v7  ;;  %v3376_v6 = vmul.bf16 1069105081, %v3285_v23  ;;  %4722 = vmatmul.mubr.bf16.gmra.mrb[84].mxu0 %v7408_v14  ;;  %v3200_v57 = vsub.f32 %v11202_v63, %v2967_v49  ;;  %v3201_v1 = vsub.f32 %v11203_v2, %v2967_v49 }
 0x2d0   : > { %v7414_v59 = vpop.eup %7413  ;;  %4396 = vperm.xlu0 %7097, %v9892_v24   ;;  %3126 = vperm.xlu1 %7098, %v11204_v56   ;;  %v9906_v51 = vadd.f32 %v3677_v53, %v3676_v20  ;;  %v9908_v9 = vadd.f32 %v3679_v54, %v3678_v52 }
 0x2d1   : > { %v7416_v28 = vpop.eup %7415  ;;  %7427 = vpow.bf16 %v3373_v40  ;;  %v3300_v22 = vpack.c.bf16 %v3202_v12, %v3200_v57  ;;  %v3708_v38 = vunpack.c.l.bf16 %v7414_v59  ;;  %v3710_v7 = vunpack.c.h.bf16 %v7414_v59  ;;  %v9912_v44 = vpop.permute.xlu0 %4316  ;;  %v11210_v40 = vld [vmem:[#allocation166_spill] sm:$0xff] }
 0x2d2   : > { %v9910_v14 = vpop.eup %7417  ;;  %7429 = vpow.bf16 %v3376_v6  ;;  %v3301_v23 = vpack.c.bf16 %v3203_v25, %v3201_v1  ;;  %4914 = vmatprep.mubr.bf16.mxu1 %v7416_v28  ;;  %11206 = vst [vmem:[#allocation25_spill] sm:$0xff] %v9912_v44  ;;  %v9914_v49 = vpop.permute.xlu1 %4221  ;;  %v3709_v63 = vunpack.c.l.bf16 %v7416_v28  ;;  %v3711_v2 = vunpack.c.h.bf16 %v7416_v28  ;;  %v11212_v28 = vld [vmem:[#allocation170_spill] sm:$0xff]  ;;  %v11221_v44 = vld [vmem:[#allocation48_spill] sm:$0xff] }
 0x2d3   : > { %11205 = vst [vmem:[#allocation30_spill] sm:$0xff] %v9910_v14  ;;  %11207 = vst [vmem:[#allocation28_spill] sm:$0xff] %v9914_v49  ;;  %v9916_v20 = vpop.eup %7419  ;;  %v3421_v52 = vmul.bf16 1069105081, %v3300_v22  ;;  %4915 = vmatmul.mubr.bf16.gmra.mrb[84].mxu1 %v7414_v59  ;;  %v2692_v12 = vsub.f32 %v11210_v40, %v11204_v56  ;;  %v2784_v57 = vmul.f32 1.442695, %v2676_v42 }
 0x2d4   : > { %11208 = vst [vmem:[#allocation155_spill] sm:$0xff] %v9916_v20  ;;  %v9918_v53 = vpop.eup %7421  ;;  %v3424_v54 = vmul.bf16 1069105081, %v3301_v23  ;;  %4476 = vperm.xlu0 %7097, %v9916_v20   ;;  %4381 = vperm.xlu1 %7098, %v9910_v14   ;;  %v9924_v25 = vadd.f32 %v3709_v63, %v3708_v38  ;;  %v9926_v6 = vadd.f32 %v3711_v2, %v3710_v7  ;;  %v11213_v59 = vld [vmem:[#allocation169_spill] sm:$0xff]  ;;  %v11216_v7 = vld [vmem:[#allocation172_spill] sm:$0xff]  ;;  %v11217_v63 = vld [vmem:[#allocation171_spill] sm:$0xff] }
 0x2d5   : > { %11209 = vst [vmem:[#allocation154_spill] sm:$0xff] %v9918_v53  ;;  %7431 = vpow.bf16 %v3421_v52  ;;  %v9928_v1 = vpop.eup %7423  ;;  %v2678_v22 = vsub.f32 %v11213_v59, %v11212_v28  ;;  %v9932_v24 = vpop.permute.xlu0 %2991  ;;  %v2816_v23 = vmul.f32 1.442695, %v2692_v12  ;;  %v2694_v2 = vsub.f32 %v11217_v63, %v11216_v7  ;;  %v11219_v20 = vld [vmem:[#allocation51_spill] sm:$0xff] }
 0x2d6   : > { %11211 = vst [vmem:[#allocation34_spill] sm:$0xff] %v9928_v1  ;;  %7433 = vpow.bf16 %v3424_v54  ;;  %v9934_v56 = vpop.permute.xlu1 %4301  ;;  %v9938_v38 = vpop.eup %7425  ;;  %v11218_v54 = vld [vmem:[#allocation50_spill] sm:$0xff]  ;;  %v3175_v12 = vsub.f32 %v11219_v20, %v9874_v16  ;;  %v11220_v14 = vld [vmem:[#allocation47_spill] sm:$0xff] }
 0x2d7   : > { %11214 = vst [vmem:[#allocation35_spill] sm:$0xff] %v9934_v56  ;;  %7435 = vpow2.f32 %v2784_v57  ;;  %11215 = vst [vmem:[#allocation31_spill] sm:$0xff] %v9938_v38  ;;  %v2788_v42 = vmul.f32 1.442695, %v2678_v22  ;;  %v3174_v59 = vsub.f32 %v11218_v54, %v9874_v16  ;;  %v2820_v54 = vmul.f32 1.442695, %v2694_v2 }
 0x2d8   : > { %4406 = vperm.xlu0 %7097, %v9928_v1   ;;  %4461 = vperm.xlu1 %7098, %v9918_v53   ;;  %7437 = vpow2.f32 %v2816_v23 }
 0x2d9   : > { %v9942_v52 = vpop.permute.xlu0 %3071  ;;  %7439 = vpow2.f32 %v2788_v42  ;;  %v11226_v42 = vld [vmem:[#allocation52_spill] sm:$0xff] }
 0x2da   : > { %v2897_v40 = vpop.permute.xlu1 %2896 }
 0x2db   : > { %v3172_v1 = vsub.f32 %v11220_v14, %v2897_v40  ;;  %v3173_v53 = vsub.f32 %v11221_v44, %v2897_v40  ;;  %v11223_v44 = vld [vmem:[#allocation53_spill] sm:$0xff] }
 0x2dc   : > { %v7428_v57 = vpop.eup %7427  ;;  %4486 = vperm.xlu0 %7097, %v9938_v38   ;;  %3056 = vperm.xlu1 %7098, %v11212_v28   ;;  %v3206_v23 = vsub.f32 %v11223_v44, %v9882_v29  ;;  %v11224_v28 = vld [vmem:[#allocation49_spill] sm:$0xff] }
 0x2dd   : > { %v7430_v22 = vpop.eup %7429  ;;  %v3286_v63 = vpack.c.bf16 %v3174_v59, %v3172_v1  ;;  %v3287_v36 = vpack.c.bf16 %v3175_v12, %v3173_v53  ;;  %v3680_v56 = vunpack.c.l.bf16 %v7428_v57  ;;  %v3682_v49 = vunpack.c.h.bf16 %v7428_v57  ;;  %v9952_v8 = vpop.permute.xlu0 %4246  ;;  %v11225_v53 = vld [vmem:[#allocation54_spill] sm:$0xff] }
 0x2de   : > { %4729 = vmatprep.mubr.bf16.mxu0 %v7430_v22  ;;  %11222 = vst [vmem:[#allocation32_spill] sm:$0xff] %v9952_v8  ;;  %v2977_v16 = vpop.permute.xlu1 %2976  ;;  %v3681_v14 = vunpack.c.l.bf16 %v7430_v22  ;;  %v3683_v20 = vunpack.c.h.bf16 %v7430_v22  ;;  %v3207_v59 = vsub.f32 %v11225_v53, %v9882_v29 }
 0x2df   : > { %v3379_v40 = vmul.bf16 1069105081, %v3286_v63  ;;  %v3382_v38 = vmul.bf16 1069105081, %v3287_v36  ;;  %4730 = vmatmul.mubr.bf16.gmra.mrb[88].mxu0 %v7428_v57  ;;  %v3204_v60 = vsub.f32 %v11224_v28, %v2977_v16  ;;  %v3205_v2 = vsub.f32 %v11226_v42, %v2977_v16 }
 0x2e0   : > { %v7432_v1 = vpop.eup %7431  ;;  %3136 = vperm.xlu1 %7098, %v11216_v7   ;;  %v9961_v12 = vadd.f32 %v3681_v14, %v3680_v56  ;;  %v9963_v8 = vadd.f32 %v3683_v20, %v3682_v49 }
 0x2e1   : > { %v7434_v22 = vpop.eup %7433  ;;  %7441 = vpow.bf16 %v3379_v40  ;;  %v3302_v44 = vpack.c.bf16 %v3206_v23, %v3204_v60  ;;  %v3712_v63 = vunpack.c.l.bf16 %v7432_v1  ;;  %v3714_v36 = vunpack.c.h.bf16 %v7432_v1  ;;  %v9965_v28 = vpop.permute.xlu0 %4326 }
 0x2e2   : > { %7443 = vpow.bf16 %v3382_v38  ;;  %v3303_v57 = vpack.c.bf16 %v3207_v59, %v3205_v2  ;;  %4922 = vmatprep.mubr.bf16.mxu1 %v7434_v22  ;;  %11227 = vst [vmem:[#allocation158_spill] sm:$0xff] %v9965_v28  ;;  %v9967_v13 = vpop.permute.xlu1 %4231  ;;  %v3713_v29 = vunpack.c.l.bf16 %v7434_v22  ;;  %v3715_v16 = vunpack.c.h.bf16 %v7434_v22  ;;  %v9969_v53 = vpop.eup %7435  ;;  %v11233_v59 = vld [vmem:[#allocation58_spill] sm:$0xff]  ;;  %v11234_v2 = vld [vmem:[#allocation59_spill] sm:$0xff] }
 0x2e3   : > { %11228 = vst [vmem:[#allocation157_spill] sm:$0xff] %v9967_v13  ;;  %11229 = vst [vmem:[#allocation160_spill] sm:$0xff] %v9969_v53  ;;  %v3427_v56 = vmul.bf16 1069105081, %v3302_v44  ;;  %4923 = vmatmul.mubr.bf16.gmra.mrb[88].mxu1 %v7432_v1  ;;  %7445 = vpow2.f32 %v2820_v54  ;;  %v9976_v38 = vpop.eup %7437  ;;  %v3210_v42 = vsub.f32 %v11233_v59, %v9932_v24  ;;  %v3211_v22 = vsub.f32 %v11234_v2, %v9932_v24  ;;  %v11235_v44 = vld [vmem:[#allocation55_spill] sm:$0xff]  ;;  %v11239_v24 = vld [vmem:[#allocation61_spill] sm:$0xff] }
 0x2e4   : > { %v3430_v49 = vmul.bf16 1069105081, %v3303_v57  ;;  %4391 = vperm.xlu1 %7098, %v9969_v53   ;;  %v9972_v60 = vadd.f32 %v3713_v29, %v3712_v63  ;;  %v9974_v7 = vadd.f32 %v3715_v16, %v3714_v36  ;;  %11230 = vst [vmem:[#allocation37_spill] sm:$0xff] %v9976_v38  ;;  %v9982_v23 = vpop.eup %7439  ;;  %v11236_v36 = vld [vmem:[#allocation56_spill] sm:$0xff]  ;;  %v3242_v2 = vsub.f32 %v11239_v24, %v9942_v52 }
 0x2e5   : > { %7447 = vpow.bf16 %v3427_v56  ;;  %v9978_v14 = vpop.permute.xlu0 %3001  ;;  %11232 = vst [vmem:[#allocation33_spill] sm:$0xff] %v9982_v23 }
 0x2e6   : > { %7449 = vpow.bf16 %v3430_v49  ;;  %v9980_v20 = vpop.permute.xlu1 %4311 }
 0x2e7   : > { %11231 = vst [vmem:[#allocation38_spill] sm:$0xff] %v9980_v20 }
 0x2e8   : > { %4471 = vperm.xlu1 %7098, %v9976_v38  }
 0x2e9   : > { %v9985_v54 = vpop.permute.xlu0 %3081 }
 0x2ea   : > { %v2987_v40 = vpop.permute.xlu1 %2986 }
 0x2eb   : > { %v3208_v63 = vsub.f32 %v11235_v44, %v2987_v40  ;;  %v3209_v57 = vsub.f32 %v11236_v36, %v2987_v40  ;;  %v11240_v44 = vld [vmem:[#allocation62_spill] sm:$0xff] }
 0x2ec   : > { %v7442_v1 = vpop.eup %7441  ;;  %4401 = vperm.xlu1 %7098, %v9982_v23   ;;  %v3243_v40 = vsub.f32 %v11240_v44, %v9942_v52 }
 0x2ed   : > { %v7444_v29 = vpop.eup %7443  ;;  %v3684_v16 = vunpack.c.l.bf16 %v7442_v1  ;;  %v3686_v56 = vunpack.c.h.bf16 %v7442_v1  ;;  %v3304_v38 = vpack.c.bf16 %v3210_v42, %v3208_v63  ;;  %v3305_v53 = vpack.c.bf16 %v3211_v22, %v3209_v57  ;;  %v9996_v28 = vpop.permute.xlu0 %4336  ;;  %v11242_v42 = vld [vmem:[#allocation60_spill] sm:$0xff] }
 0x2ee   : > { %v9994_v49 = vpop.eup %7445  ;;  %4737 = vmatprep.mubr.bf16.mxu0 %v7444_v29  ;;  %11238 = vst [vmem:[#allocation42_spill] sm:$0xff] %v9996_v28  ;;  %v3685_v59 = vunpack.c.l.bf16 %v7444_v29  ;;  %v3687_v20 = vunpack.c.h.bf16 %v7444_v29  ;;  %v3067_v36 = vpop.permute.xlu1 %3066 }
 0x2ef   : > { %11237 = vst [vmem:[#allocation36_spill] sm:$0xff] %v9994_v49  ;;  %4738 = vmatmul.mubr.bf16.gmra.mrb[92].mxu0 %v7442_v1  ;;  %v3433_v13 = vmul.bf16 1069105081, %v3304_v38  ;;  %v3436_v34 = vmul.bf16 1069105081, %v3305_v53  ;;  %v3240_v35 = vsub.f32 %v11241_v0, %v3067_v36  ;;  %v3241_v22 = vsub.f32 %v11242_v42, %v3067_v36 }
 0x2f0   : > { %v7448_v23 = vpop.eup %7447  ;;  %4481 = vperm.xlu1 %7098, %v9994_v49   ;;  %v10005_v57 = vadd.f32 %v3685_v59, %v3684_v16  ;;  %v10007_v28 = vadd.f32 %v3687_v20, %v3686_v56 }
 0x2f1   : > { %v7450_v63 = vpop.eup %7449  ;;  %v3716_v29 = vunpack.c.l.bf16 %v7448_v23  ;;  %v3718_v24 = vunpack.c.h.bf16 %v7448_v23  ;;  %7451 = vpow.bf16 %v3433_v13  ;;  %v3320_v52 = vpack.c.bf16 %v3242_v2, %v3240_v35  ;;  %v10009_v44 = vpop.permute.xlu0 %4416  ;;  %v11247_v2 = vld [vmem:[#allocation67_spill] sm:$0xff] }
 0x2f2   : > { %v3321_v1 = vpack.c.bf16 %v3243_v40, %v3241_v22  ;;  %4930 = vmatprep.mubr.bf16.mxu1 %v7450_v63  ;;  %11243 = vst [vmem:[#allocation43_spill] sm:$0xff] %v10009_v44  ;;  %v3717_v53 = vunpack.c.l.bf16 %v7450_v63  ;;  %7453 = vpow.bf16 %v3436_v34  ;;  %v10011_v0 = vpop.permute.xlu1 %4241  ;;  %v3719_v38 = vunpack.c.h.bf16 %v7450_v63  ;;  %v11248_v22 = vld [vmem:[#allocation63_spill] sm:$0xff] }
 0x2f3   : > { %4931 = vmatmul.mubr.bf16.gmra.mrb[92].mxu1 %v7448_v23  ;;  %11244 = vst [vmem:[#allocation39_spill] sm:$0xff] %v10011_v0  ;;  %v3481_v36 = vmul.bf16 1069105081, %v3320_v52  ;;  %v11246_v23 = vld [vmem:[#allocation66_spill] sm:$0xff]  ;;  %v3215_v40 = vsub.f32 %v11247_v2, %v9978_v14 }
 0x2f4   : > { %v3484_v42 = vmul.bf16 1069105081, %v3321_v1  ;;  %v10013_v16 = vadd.f32 %v3717_v53, %v3716_v29  ;;  %v10015_v59 = vadd.f32 %v3719_v38, %v3718_v24  ;;  %v3214_v56 = vsub.f32 %v11246_v23, %v9978_v14  ;;  %v11249_v29 = vld [vmem:[#allocation64_spill] sm:$0xff]  ;;  %v11251_v14 = vld [vmem:[#allocation69_spill] sm:$0xff] }
 0x2f5   : > { %7455 = vpow.bf16 %v3481_v36  ;;  %v10017_v20 = vpop.permute.xlu0 %3011  ;;  %v3246_v2 = vsub.f32 %v11251_v14, %v9985_v54 }
 0x2f6   : > { %7457 = vpow.bf16 %v3484_v42  ;;  %v10019_v35 = vpop.permute.xlu1 %4321 }
 0x2f7   : > { %11245 = vst [vmem:[#allocation40_spill] sm:$0xff] %v10019_v35 }
 0x2f9   : > { %v10021_v13 = vpop.permute.xlu0 %3091 }
 0x2fa   : > { %v2997_v34 = vpop.permute.xlu1 %2996 }
 0x2fb   : > { %3788 = vadd.xlane.f32.xlu0 %v9605_v27  ;;  %v3212_v63 = vsub.f32 %v11248_v22, %v2997_v34  ;;  %v3213_v24 = vsub.f32 %v11249_v29, %v2997_v34  ;;  %v11252_v34 = vld [vmem:[#allocation65_spill] sm:$0xff] }
 0x2fc   : > { %v7452_v52 = vpop.eup %7451 }
 0x2fd   : > { %v7454_v1 = vpop.eup %7453  ;;  %v3306_v53 = vpack.c.bf16 %v3214_v56, %v3212_v63  ;;  %v3307_v38 = vpack.c.bf16 %v3215_v40, %v3213_v24  ;;  %v3720_v36 = vunpack.c.l.bf16 %v7452_v52  ;;  %v3722_v42 = vunpack.c.h.bf16 %v7452_v52  ;;  %v10030_v49 = vpop.permute.xlu0 %4346  ;;  %v11253_v40 = vld [vmem:[#allocation70_spill] sm:$0xff]  ;;  %v11254_v24 = vld [vmem:[#allocation68_spill] sm:$0xff] }
 0x2fe   : > { %5067 = vmatprep.mubr.bf16.mxu0 %v7454_v1  ;;  %11250 = vst [vmem:[#allocation164_spill] sm:$0xff] %v10030_v49  ;;  %v3077_v27 = vpop.permute.xlu1 %3076  ;;  %v3721_v23 = vunpack.c.l.bf16 %v7454_v1  ;;  %v3723_v44 = vunpack.c.h.bf16 %v7454_v1  ;;  %v3247_v63 = vsub.f32 %v11253_v40, %v9985_v54  ;;  %v11261_v40 = vld [vmem:[#allocation72_spill] sm:$0xff] }
 0x2ff   : > { %3833 = vadd.xlane.f32.xlu0 %v9593_v48  ;;  %v3439_v22 = vmul.bf16 1069105081, %v3306_v53  ;;  %v3442_v35 = vmul.bf16 1069105081, %v3307_v38  ;;  %5068 = vmatmul.mubr.bf16.vlgmr.msra.gmra.mrb[96].mxu0 %v7452_v52  ;;  %v3244_v29 = vsub.f32 %v11252_v34, %v3077_v27  ;;  %v3245_v0 = vsub.f32 %v11254_v24, %v3077_v27 }
 0x300   : > { %v7456_v56 = vpop.eup %7455  ;;  %v10039_v49 = vadd.f32 %v3721_v23, %v3720_v36  ;;  %v10041_v48 = vadd.f32 %v3723_v44, %v3722_v42 }
 0x301   : > { %v7458_v58 = vpop.eup %7457  ;;  %7459 = vpow.bf16 %v3439_v22  ;;  %v3322_v1 = vpack.c.bf16 %v3246_v2, %v3244_v29  ;;  %v3752_v4 = vunpack.c.l.bf16 %v7456_v56  ;;  %v3754_v14 = vunpack.c.h.bf16 %v7456_v56  ;;  %v10043_v52 = vpop.permute.xlu0 %4426  ;;  %v11258_v2 = vld [vmem:[#allocation74_spill] sm:$0xff]  ;;  %v11260_v29 = vld [vmem:[#allocation71_spill] sm:$0xff] }
 0x302   : > { %7461 = vpow.bf16 %v3442_v35  ;;  %v3323_v53 = vpack.c.bf16 %v3247_v63, %v3245_v0  ;;  %5260 = vmatprep.mubr.bf16.mxu1 %v7458_v58  ;;  %11255 = vst [vmem:[#allocation162_spill] sm:$0xff] %v10043_v52  ;;  %v10046_v38 = vpop.permute.xlu1 %4331  ;;  %v3753_v54 = vunpack.c.l.bf16 %v7458_v58  ;;  %v3755_v27 = vunpack.c.h.bf16 %v7458_v58 }
 0x303   : > { %3791 = vadd.xlane.f32.xlu0 %v9658_v5  ;;  %11256 = vst [vmem:[#allocation45_spill] sm:$0xff] %v10046_v38  ;;  %v3487_v36 = vmul.bf16 1069105081, %v3322_v1  ;;  %5261 = vmatmul.mubr.bf16.vlgmr.msra.gmra.mrb[96].mxu1 %v7456_v56  ;;  %v3218_v22 = vsub.f32 %v11258_v2, %v10017_v20 }
 0x304   : > { %v3490_v44 = vmul.bf16 1069105081, %v3323_v53  ;;  %v10048_v42 = vadd.f32 %v3753_v54, %v3752_v4  ;;  %v10050_v23 = vadd.f32 %v3755_v27, %v3754_v14  ;;  %v11259_v4 = vld [vmem:[#allocation75_spill] sm:$0xff] }
 0x305   : > { %7463 = vpow.bf16 %v3487_v36  ;;  %v10052_v35 = vpop.permute.xlu0 %3021  ;;  %v3219_v34 = vsub.f32 %v11259_v4, %v10017_v20  ;;  %v11263_v20 = vld [vmem:[#allocation77_spill] sm:$0xff] }
 0x306   : > { %7465 = vpow.bf16 %v3490_v44  ;;  %v10055_v0 = vpop.permute.xlu1 %4411  ;;  %v3250_v2 = vsub.f32 %v11263_v20, %v10021_v13 }
 0x307   : > { %3839 = vadd.xlane.f32.xlu0 %v9639_v19  ;;  %11257 = vst [vmem:[#allocation46_spill] sm:$0xff] %v10055_v0 }
 0x309   : > { %v10057_v5 = vpop.permute.xlu0 %3101 }
 0x30a   : > { %v3007_v58 = vpop.permute.xlu1 %3006 }
 0x30b   : > { %3797 = vadd.xlane.f32.xlu0 %v9740_v21  ;;  %v3216_v56 = vsub.f32 %v11260_v29, %v3007_v58  ;;  %v3217_v63 = vsub.f32 %v11261_v40, %v3007_v58  ;;  %v11264_v58 = vld [vmem:[#allocation73_spill] sm:$0xff] }
 0x30c   : > { %v7460_v24 = vpop.eup %7459 }
 0x30d   : > { %v7462_v1 = vpop.eup %7461  ;;  %v3308_v19 = vpack.c.bf16 %v3218_v22, %v3216_v56  ;;  %v3309_v14 = vpack.c.bf16 %v3219_v34, %v3217_v63  ;;  %v3724_v53 = vunpack.c.l.bf16 %v7460_v24  ;;  %v3726_v54 = vunpack.c.h.bf16 %v7460_v24  ;;  %v10066_v27 = vpop.permute.xlu0 %4356  ;;  %v11265_v34 = vld [vmem:[#allocation78_spill] sm:$0xff]  ;;  %v11266_v63 = vld [vmem:[#allocation76_spill] sm:$0xff] }
 0x30e   : > { %5075 = vmatprep.mubr.bf16.mxu0 %v7462_v1  ;;  %11262 = vst [vmem:[#allocation41_spill] sm:$0xff] %v10066_v27  ;;  %v3087_v21 = vpop.permute.xlu1 %3086  ;;  %v3725_v36 = vunpack.c.l.bf16 %v7462_v1  ;;  %v3727_v44 = vunpack.c.h.bf16 %v7462_v1  ;;  %v3251_v56 = vsub.f32 %v11265_v34, %v10021_v13 }
 0x30f   : > { %3845 = vadd.xlane.f32.xlu0 %v9706_v10  ;;  %v3445_v4 = vmul.bf16 1069105081, %v3308_v19  ;;  %v3448_v29 = vmul.bf16 1069105081, %v3309_v14  ;;  %5076 = vmatmul.mubr.bf16.gmra.mrb[100].mxu0 %v7460_v24  ;;  %v3248_v40 = vsub.f32 %v11264_v58, %v3087_v21  ;;  %v3249_v52 = vsub.f32 %v11266_v63, %v3087_v21  ;;  %v11269_v58 = vld [vmem:[#allocation79_spill] sm:$0xff] }
 0x310   : > { %v7464_v22 = vpop.eup %7463  ;;  %v10075_v27 = vadd.f32 %v3725_v36, %v3724_v53  ;;  %v10077_v10 = vadd.f32 %v3727_v44, %v3726_v54 }
 0x311   : > { %v7466_v0 = vpop.eup %7465  ;;  %7467 = vpow.bf16 %v3445_v4  ;;  %v3324_v1 = vpack.c.bf16 %v3250_v2, %v3248_v40  ;;  %v3756_v38 = vunpack.c.l.bf16 %v7464_v22  ;;  %v3758_v20 = vunpack.c.h.bf16 %v7464_v22  ;;  %v10079_v24 = vpop.permute.xlu0 %4436  ;;  %v11268_v4 = vld [vmem:[#allocation83_spill] sm:$0xff] }
 0x312   : > { %7469 = vpow.bf16 %v3448_v29  ;;  %v3325_v19 = vpack.c.bf16 %v3251_v56, %v3249_v52  ;;  %5268 = vmatprep.mubr.bf16.mxu1 %v7466_v0  ;;  %v10082_v14 = vpop.permute.xlu1 %4341  ;;  %v3757_v13 = vunpack.c.l.bf16 %v7466_v0  ;;  %v3759_v21 = vunpack.c.h.bf16 %v7466_v0 }
 0x313   : > { %3803 = vadd.xlane.f32.xlu0 %v9810_v26  ;;  %v3493_v53 = vmul.bf16 1069105081, %v3324_v1  ;;  %5269 = vmatmul.mubr.bf16.gmra.mrb[100].mxu1 %v7464_v22  ;;  %v3223_v29 = vsub.f32 %v11268_v4, %v10052_v35  ;;  %v11270_v22 = vld [vmem:[#allocation80_spill] sm:$0xff]  ;;  %v11273_v4 = vld [vmem:[#allocation86_spill] sm:$0xff] }
 0x314   : > { %3785 = vadd.xlane.f32.xlu1 %v9607_v33  ;;  %v3496_v54 = vmul.bf16 1069105081, %v3325_v19  ;;  %v10085_v36 = vadd.f32 %v3757_v13, %v3756_v38  ;;  %v10087_v44 = vadd.f32 %v3759_v21, %v3758_v20  ;;  %v11267_v38 = vld [vmem:[#allocation82_spill] sm:$0xff]  ;;  %v11271_v21 = vld [vmem:[#allocation85_spill] sm:$0xff] }
 0x315   : > { %7471 = vpow.bf16 %v3493_v53  ;;  %v10089_v52 = vpop.permute.xlu0 %3031  ;;  %v3222_v2 = vsub.f32 %v11267_v38, %v10052_v35  ;;  %v3254_v53 = vsub.f32 %v11271_v21, %v10057_v5 }
 0x316   : > { %7473 = vpow.bf16 %v3496_v54  ;;  %v10092_v26 = vpop.permute.xlu1 %4421 }
 0x317   : > { %3851 = vadd.xlane.f32.xlu0 %v9794_v43 }
 0x318   : > { %3836 = vadd.xlane.f32.xlu1 %v9609_v37 }
 0x319   : > { %v10095_v0 = vpop.permute.xlu0 %3111 }
 0x31a   : > { %v3017_v33 = vpop.permute.xlu1 %3016 }
 0x31b   : > { %3809 = vadd.xlane.f32.xlu0 %v9852_v61  ;;  %v3220_v40 = vsub.f32 %v11269_v58, %v3017_v33  ;;  %v3221_v34 = vsub.f32 %v11270_v22, %v3017_v33  ;;  %v11274_v58 = vld [vmem:[#allocation84_spill] sm:$0xff] }
 0x31c   : > { %3794 = vadd.xlane.f32.xlu1 %v9660_v30  ;;  %v7468_v43 = vpop.eup %7467  ;;  %v11272_v30 = vld [vmem:[#allocation81_spill] sm:$0xff] }
 0x31d   : > { %v7470_v56 = vpop.eup %7469  ;;  %v3310_v37 = vpack.c.bf16 %v3222_v2, %v3220_v40  ;;  %v3311_v63 = vpack.c.bf16 %v3223_v29, %v3221_v34  ;;  %v3728_v1 = vunpack.c.l.bf16 %v7468_v43  ;;  %v3730_v20 = vunpack.c.h.bf16 %v7468_v43 }
 0x31e   : > { %5083 = vmatprep.mubr.bf16.mxu0 %v7470_v56  ;;  %v10105_v61 = vpop.permute.xlu0 %4366  ;;  %v3729_v13 = vunpack.c.l.bf16 %v7470_v56  ;;  %v3731_v35 = vunpack.c.h.bf16 %v7470_v56  ;;  %v3255_v29 = vsub.f32 %v11273_v4, %v10057_v5  ;;  %v11277_v4 = vld [vmem:[#allocation87_spill] sm:$0xff] }
 0x31f   : > { %3857 = vadd.xlane.f32.xlu0 %v9868_v17  ;;  %v3097_v19 = vpop.permute.xlu1 %3096  ;;  %v3451_v54 = vmul.bf16 1069105081, %v3310_v37  ;;  %v3454_v33 = vmul.bf16 1069105081, %v3311_v63  ;;  %5084 = vmatmul.mubr.bf16.gmra.mrb[104].mxu0 %v7468_v43 }
 0x320   : > { %v3252_v38 = vsub.f32 %v11272_v30, %v3097_v19  ;;  %3842 = vadd.xlane.f32.xlu1 %v9641_v62  ;;  %v7472_v2 = vpop.eup %7471  ;;  %v3253_v40 = vsub.f32 %v11274_v58, %v3097_v19  ;;  %v10115_v17 = vadd.f32 %v3729_v13, %v3728_v1  ;;  %v10117_v22 = vadd.f32 %v3731_v35, %v3730_v20  ;;  %v11278_v58 = vld [vmem:[#allocation88_spill] sm:$0xff] }
 0x321   : > { %v7474_v34 = vpop.eup %7473  ;;  %7475 = vpow.bf16 %v3451_v54  ;;  %v3760_v37 = vunpack.c.l.bf16 %v7472_v2  ;;  %v3762_v63 = vunpack.c.h.bf16 %v7472_v2 }
 0x322   : > { %v3326_v56 = vpack.c.bf16 %v3254_v53, %v3252_v38  ;;  %7477 = vpow.bf16 %v3454_v33  ;;  %v3327_v43 = vpack.c.bf16 %v3255_v29, %v3253_v40  ;;  %5276 = vmatprep.mubr.bf16.mxu1 %v7474_v34  ;;  %v10119_v21 = vpop.permute.xlu0 %4446  ;;  %v3761_v5 = vunpack.c.l.bf16 %v7474_v34  ;;  %v11275_v33 = vld [vmem:[#allocation90_spill] sm:$0xff]  ;;  %v11276_v38 = vld [vmem:[#allocation91_spill] sm:$0xff] }
 0x323   : > { %3815 = vadd.xlane.f32.xlu0 %v9906_v51  ;;  %v10122_v62 = vpop.permute.xlu1 %4351  ;;  %v3763_v19 = vunpack.c.h.bf16 %v7474_v34  ;;  %5277 = vmatmul.mubr.bf16.gmra.mrb[104].mxu1 %v7472_v2  ;;  %v3226_v30 = vsub.f32 %v11275_v33, %v10089_v52  ;;  %v3227_v2 = vsub.f32 %v11276_v38, %v10089_v52  ;;  %v11279_v52 = vld [vmem:[#allocation93_spill] sm:$0xff] }
 0x324   : > { %v3499_v1 = vmul.bf16 1069105081, %v3326_v56  ;;  %3800 = vadd.xlane.f32.xlu1 %v9742_v32  ;;  %v3502_v20 = vmul.bf16 1069105081, %v3327_v43  ;;  %v10125_v13 = vadd.f32 %v3761_v5, %v3760_v37 }
 0x325   : > { %v10127_v35 = vadd.f32 %v3763_v19, %v3762_v63  ;;  %v3258_v19 = vsub.f32 %v11279_v52, %v10095_v0 }
 0x326   : > { %7479 = vpow.bf16 %v3499_v1  ;;  %v10129_v53 = vpop.permute.xlu0 %3041 }
 0x327   : > { %7481 = vpow.bf16 %v3502_v20  ;;  %3863 = vadd.xlane.f32.xlu0 %v9924_v25  ;;  %v10132_v51 = vpop.permute.xlu1 %4431 }
 0x328   : > { %3848 = vadd.xlane.f32.xlu1 %v9708_v15 }
 0x32a   : > { %v10135_v54 = vpop.permute.xlu0 %3121 }
 0x32b   : > { %3821 = vadd.xlane.f32.xlu0 %v9961_v12  ;;  %v3027_v32 = vpop.permute.xlu1 %3026 }
 0x32c   : > { %v3224_v29 = vsub.f32 %v11277_v4, %v3027_v32  ;;  %v3225_v40 = vsub.f32 %v11278_v58, %v3027_v32  ;;  %3806 = vadd.xlane.f32.xlu1 %v9812_v50  ;;  %v7476_v25 = vpop.eup %7475  ;;  %v11280_v32 = vld [vmem:[#allocation89_spill] sm:$0xff] }
 0x32d   : > { %v7478_v34 = vpop.eup %7477  ;;  %v3732_v37 = vunpack.c.l.bf16 %v7476_v25  ;;  %v3734_v63 = vunpack.c.h.bf16 %v7476_v25 }
 0x32e   : > { %v3312_v15 = vpack.c.bf16 %v3226_v30, %v3224_v29  ;;  %v3313_v56 = vpack.c.bf16 %v3227_v2, %v3225_v40  ;;  %5091 = vmatprep.mubr.bf16.mxu0 %v7478_v34  ;;  %v3733_v43 = vunpack.c.l.bf16 %v7478_v34  ;;  %v3735_v5 = vunpack.c.h.bf16 %v7478_v34  ;;  %v11281_v30 = vld [vmem:[#allocation94_spill] sm:$0xff]  ;;  %v10152_v2 = vpop.permute.xlu0 %4376 }
 0x32f   : > { %3869 = vadd.xlane.f32.xlu0 %v9972_v60  ;;  %v3107_v12 = vpop.permute.xlu1 %3106  ;;  %5092 = vmatmul.mubr.bf16.gmra.mrb[108].mxu0 %v7476_v25  ;;  %v3259_v38 = vsub.f32 %v11281_v30, %v10095_v0  ;;  %v11282_v60 = vld [vmem:[#allocation92_spill] sm:$0xff] }
 0x330   : > { %v3457_v1 = vmul.bf16 1069105081, %v3312_v15  ;;  %v3460_v20 = vmul.bf16 1069105081, %v3313_v56  ;;  %v3256_v50 = vsub.f32 %v11280_v32, %v3107_v12  ;;  %3854 = vadd.xlane.f32.xlu1 %v9796_v11  ;;  %v3257_v4 = vsub.f32 %v11282_v60, %v3107_v12  ;;  %v11286_v30 = vld [vmem:[#allocation96_spill] sm:$0xff] }
 0x331   : > { %v7480_v33 = vpop.eup %7479  ;;  %v10155_v29 = vadd.f32 %v3733_v43, %v3732_v37  ;;  %v10157_v58 = vadd.f32 %v3735_v5, %v3734_v63 }
 0x332   : > { %v7482_v40 = vpop.eup %7481  ;;  %7483 = vpow.bf16 %v3457_v1  ;;  %v3328_v34 = vpack.c.bf16 %v3258_v19, %v3256_v50  ;;  %v3764_v25 = vunpack.c.l.bf16 %v7480_v33  ;;  %v3766_v15 = vunpack.c.h.bf16 %v7480_v33  ;;  %v11284_v1 = vld [vmem:[#allocation99_spill] sm:$0xff] }
 0x333   : > { %7485 = vpow.bf16 %v3460_v20  ;;  %v3329_v56 = vpack.c.bf16 %v3259_v38, %v3257_v4  ;;  %5284 = vmatprep.mubr.bf16.mxu1 %v7482_v40  ;;  %3827 = vadd.xlane.f32.xlu0 %v10005_v57  ;;  %v10160_v11 = vpop.permute.xlu1 %4361  ;;  %v3765_v0 = vunpack.c.l.bf16 %v7482_v40  ;;  %v3767_v52 = vunpack.c.h.bf16 %v7482_v40  ;;  %v10167_v43 = vpop.permute.xlu0 %4456  ;;  %v11285_v50 = vld [vmem:[#allocation95_spill] sm:$0xff] }
 0x334   : > { %v3505_v32 = vmul.bf16 1069105081, %v3328_v34  ;;  %5285 = vmatmul.mubr.bf16.gmra.mrb[108].mxu1 %v7480_v33  ;;  %3812 = vadd.xlane.f32.xlu1 %v9854_v41  ;;  %v11283_v41 = vld [vmem:[#allocation98_spill] sm:$0xff]  ;;  %v3231_v20 = vsub.f32 %v11284_v1, %v10129_v53  ;;  %v11290_v1 = vld [vmem:[#allocation100_spill] sm:$0xff] }
 0x335   : > { %v3508_v37 = vmul.bf16 1069105081, %v3329_v56  ;;  %v10163_v63 = vadd.f32 %v3765_v0, %v3764_v25  ;;  %v10165_v12 = vadd.f32 %v3767_v52, %v3766_v15  ;;  %v3230_v19 = vsub.f32 %v11283_v41, %v10129_v53  ;;  %v11287_v53 = vld [vmem:[#allocation101_spill] sm:$0xff]  ;;  %v11289_v41 = vld [vmem:[#allocation102_spill] sm:$0xff] }
 0x336   : > { %7487 = vpow.bf16 %v3505_v32  ;;  %v3262_v0 = vsub.f32 %v11287_v53, %v10135_v54 }
 0x337   : > { %7489 = vpow.bf16 %v3508_v37  ;;  %3875 = vadd.xlane.f32.xlu0 %v10013_v16  ;;  %v10170_v57 = vpop.permute.xlu1 %4441  ;;  %v3052_v60 = vpop.permute.xlu0 %3051 }
 0x338   : > { %3860 = vadd.xlane.f32.xlu1 %v9870_v18 }
 0x33b   : > { %3881 = vadd.xlane.f32.xlu0 %v10039_v49  ;;  %v3037_v5 = vpop.permute.xlu1 %3036 }
 0x33c   : > { %v3228_v33 = vsub.f32 %v11285_v50, %v3037_v5  ;;  %v3229_v38 = vsub.f32 %v11286_v30, %v3037_v5  ;;  %3818 = vadd.xlane.f32.xlu1 %v9908_v9  ;;  %v11288_v9 = vld [vmem:[#allocation97_spill] sm:$0xff] }
 0x33d   : > { %v7484_v16 = vpop.eup %7483 }
 0x33e   : > { %v7486_v4 = vpop.eup %7485  ;;  %v3314_v40 = vpack.c.bf16 %v3230_v19, %v3228_v33  ;;  %v3315_v18 = vpack.c.bf16 %v3231_v20, %v3229_v38  ;;  %v3736_v34 = vunpack.c.l.bf16 %v7484_v16  ;;  %v3738_v49 = vunpack.c.h.bf16 %v7484_v16 }
 0x33f   : > { %5099 = vmatprep.mubr.bf16.mxu0 %v7486_v4  ;;  %3929 = vadd.xlane.f32.xlu0 %v10048_v42  ;;  %v3117_v25 = vpop.permute.xlu1 %3116  ;;  %v3737_v15 = vunpack.c.l.bf16 %v7486_v4  ;;  %v3739_v56 = vunpack.c.h.bf16 %v7486_v4  ;;  %v3263_v19 = vsub.f32 %v11289_v41, %v10135_v54  ;;  %v11294_v41 = vld [vmem:[#allocation104_spill] sm:$0xff] }
 0x340   : > { %v3463_v52 = vmul.bf16 1069105081, %v3314_v40  ;;  %v3466_v32 = vmul.bf16 1069105081, %v3315_v18  ;;  %5100 = vmatmul.mubr.bf16.gmra.mrb[112].mxu0 %v7484_v16  ;;  %v3260_v37 = vsub.f32 %v11288_v9, %v3117_v25  ;;  %3866 = vadd.xlane.f32.xlu1 %v9926_v6  ;;  %v3261_v20 = vsub.f32 %v11290_v1, %v3117_v25  ;;  %v10193_v16 = vpop.permute.xlu0 %3131 }
 0x341   : > { %v7488_v5 = vpop.eup %7487  ;;  %v10189_v42 = vadd.f32 %v3737_v15, %v3736_v34  ;;  %v10191_v50 = vadd.f32 %v3739_v56, %v3738_v49 }
 0x342   : > { %v7490_v33 = vpop.eup %7489  ;;  %7491 = vpow.bf16 %v3463_v52  ;;  %v3330_v30 = vpack.c.bf16 %v3262_v0, %v3260_v37  ;;  %v3768_v38 = vunpack.c.l.bf16 %v7488_v5  ;;  %v3770_v4 = vunpack.c.h.bf16 %v7488_v5  ;;  %v4121_v0 = vld [vmem:[#allocation4 + $0x80] sm:$0xff]  ;;  %v11293_v37 = vld [vmem:[#allocation103_spill] sm:$0xff] }
 0x343   : > { %7493 = vpow.bf16 %v3466_v32  ;;  %v3331_v40 = vpack.c.bf16 %v3263_v19, %v3261_v20  ;;  %5292 = vmatprep.mubr.bf16.mxu1 %v7490_v33  ;;  %3887 = vadd.xlane.f32.xlu0 %v10075_v27  ;;  %v10196_v6 = vpop.permute.xlu1 %4371  ;;  %v3769_v54 = vunpack.c.l.bf16 %v7490_v33  ;;  %v3771_v18 = vunpack.c.h.bf16 %v7490_v33  ;;  %v11292_v32 = vld [vmem:[#allocation107_spill] sm:$0xff] }
 0x344   : > { %v3511_v34 = vmul.bf16 1069105081, %v3330_v30  ;;  %5293 = vmatmul.mubr.bf16.gmra.mrb[112].mxu1 %v7488_v5  ;;  %3824 = vadd.xlane.f32.xlu1 %v9963_v8  ;;  %v10207_v27 = vpop.permute.xlu0 %4386  ;;  %v11291_v8 = vld [vmem:[#allocation106_spill] sm:$0xff]  ;;  %v3235_v9 = vsub.f32 %v11292_v32, %v3052_v60 }
 0x345   : > { %v3514_v49 = vmul.bf16 1069105081, %v3331_v40  ;;  %v10199_v25 = vadd.f32 %v3769_v54, %v3768_v38  ;;  %v10201_v15 = vadd.f32 %v3771_v18, %v3770_v4  ;;  %v3234_v52 = vsub.f32 %v11291_v8, %v3052_v60  ;;  %v4105_v54 = vld [vmem:[#allocation4] sm:$0xff]  ;;  %v11296_v18 = vld [vmem:[#allocation109_spill] sm:$0xff] }
 0x346   : > { %7495 = vpow.bf16 %v3511_v34 }
 0x347   : > { %7497 = vpow.bf16 %v3514_v49  ;;  %3935 = vadd.xlane.f32.xlu0 %v10085_v36  ;;  %v10204_v56 = vpop.permute.xlu1 %4451 }
 0x348   : > { %3872 = vadd.xlane.f32.xlu1 %v9974_v7  ;;  %v10216_v38 = vpop.permute.xlu0 %4466 }
 0x349   : > { %11295 = vst [vmem:[#allocation44_spill] sm:$0xff] %v10216_v38 }
 0x34b   : > { %3893 = vadd.xlane.f32.xlu0 %v10115_v17  ;;  %v3047_v53 = vpop.permute.xlu1 %3046  ;;  %v4505_v17 = vmul.f32 %v9580_v39, %v4121_v0  ;;  %v11298_v0 = vld [vmem:[#allocation110_spill] sm:$0xff] }
 0x34c   : > { %v3232_v5 = vsub.f32 %v11293_v37, %v3047_v53  ;;  %v3233_v19 = vsub.f32 %v11294_v41, %v3047_v53  ;;  %3830 = vadd.xlane.f32.xlu1 %v10007_v28  ;;  %v3266_v28 = vsub.f32 %v11296_v18, %v10193_v16  ;;  %v11297_v53 = vld [vmem:[#allocation105_spill] sm:$0xff]  ;;  %v3267_v32 = vsub.f32 %v11298_v0, %v10193_v16 }
 0x34d   : > { %v7492_v36 = vpop.eup %7491 }
 0x34e   : > { %v7494_v1 = vpop.eup %7493  ;;  %v3316_v20 = vpack.c.bf16 %v3234_v52, %v3232_v5  ;;  %v3317_v7 = vpack.c.bf16 %v3235_v9, %v3233_v19  ;;  %v3740_v33 = vunpack.c.l.bf16 %v7492_v36  ;;  %v3742_v30 = vunpack.c.h.bf16 %v7492_v36 }
 0x34f   : > { %5107 = vmatprep.mubr.bf16.mxu0 %v7494_v1  ;;  %3941 = vadd.xlane.f32.xlu0 %v10125_v13  ;;  %v3127_v60 = vpop.permute.xlu1 %3126  ;;  %v3741_v4 = vunpack.c.l.bf16 %v7494_v1  ;;  %v3743_v40 = vunpack.c.h.bf16 %v7494_v1  ;;  %v6827_v52 = vpop.f32.mrb[64].mxu1  ;;  %v11299_v13 = vld [vmem:[#allocation108_spill] sm:$0xff]  ;;  %v4122_v1 = vld [vmem:[#allocation4 + $0x88] sm:$0xff] }
 0x350   : > { %v3469_v34 = vmul.bf16 1069105081, %v3316_v20  ;;  %v3472_v49 = vmul.bf16 1069105081, %v3317_v7  ;;  %5108 = vmatmul.mubr.bf16.gmra.mrb[116].mxu0 %v7492_v36  ;;  %v3264_v8 = vsub.f32 %v11297_v53, %v3127_v60  ;;  %3878 = vadd.xlane.f32.xlu1 %v10015_v59  ;;  %v3265_v9 = vsub.f32 %v11299_v13, %v3127_v60  ;;  %v6828_v37 = vpop.f32.mrb[65].mxu1  ;;  %v4106_v60 = vld [vmem:[#allocation4 + $0x8] sm:$0xff] }
 0x351   : > { %v7496_v39 = vpop.eup %7495  ;;  %v10226_v5 = vadd.f32 %v3741_v4, %v3740_v33  ;;  %v10228_v41 = vadd.f32 %v3743_v40, %v3742_v30  ;;  %v6829_v20 = vadd.f32 %v6828_v37, %v6827_v52  ;;  %v6763_v7 = vpop.f32.mrb[64].mxu0  ;;  %v4489_v59 = vmul.f32 %v9570_v55, %v4105_v54 }
 0x352   : > { %v7498_v19 = vpop.eup %7497  ;;  %7499 = vpow.bf16 %v3469_v34  ;;  %v3332_v36 = vpack.c.bf16 %v3266_v28, %v3264_v8  ;;  %v6830_v18 = vpop.f32.mrb[66].mxu1  ;;  %v3772_v53 = vunpack.c.l.bf16 %v7496_v39  ;;  %v3333_v38 = vpack.c.bf16 %v3267_v32, %v3265_v9 }
 0x353   : > { %7501 = vpow.bf16 %v3472_v49  ;;  %5300 = vmatprep.mubr.bf16.mxu1 %v7498_v19  ;;  %v6764_v16 = vpop.f32.mrb[65].mxu0  ;;  %3899 = vadd.xlane.f32.xlu0 %v10155_v29  ;;  %v3773_v33 = vunpack.c.l.bf16 %v7498_v19  ;;  %v5341_v4 = vadd.f32 %v6829_v20, %v4505_v17  ;;  %v6831_v0 = vpop.f32.mrb[67].mxu1  ;;  %v3774_v34 = vunpack.c.h.bf16 %v7496_v39  ;;  %v4123_v20 = vld [vmem:[#allocation4 + $0x90] sm:$0xff] }
 0x354   : > { %v3517_v30 = vmul.bf16 1069105081, %v3332_v36  ;;  %v6765_v40 = vadd.f32 %v6764_v16, %v6763_v7  ;;  %5301 = vmatmul.mubr.bf16.gmra.mrb[116].mxu1 %v7496_v39  ;;  %v10232_v28 = vpop.permute.xlu1 %4381  ;;  %3884 = vadd.xlane.f32.xlu1 %v10041_v48  ;;  %v4506_v55 = vmul.f32 %v9578_v45, %v4122_v1  ;;  %v3062_v54 = vpop.permute.xlu0 %3061  ;;  %v3520_v49 = vmul.bf16 1069105081, %v3333_v38  ;;  %v4108_v45 = vld [vmem:[#allocation4 + $0x18] sm:$0xff]  ;;  %v4107_v36 = vld [vmem:[#allocation4 + $0x10] sm:$0xff] }
 0x355   : > { %v6832_v8 = vadd.f32 %v6831_v0, %v6830_v18  ;;  %v6766_v52 = vpop.f32.mrb[66].mxu0  ;;  %v10236_v32 = vadd.f32 %v3773_v33, %v3772_v53  ;;  %5405 = vst.msk [vmem:[#allocation4 + $0x80] sm:$0xff] %vm706_vm0, %v5341_v4  ;;  %v3775_v13 = vunpack.c.h.bf16 %v7498_v19  ;;  %v4490_v9 = vmul.f32 %v9634_v3, %v4106_v60  ;;  %v4124_v1 = vld [vmem:[#allocation4 + $0x98] sm:$0xff]  ;;  %v11302_v0 = vld [vmem:[#allocation115_spill] sm:$0xff] }
 0x356   : > { %7503 = vpow.bf16 %v3517_v30  ;;  %v5325_v29 = vadd.f32 %v6765_v40, %v4489_v59  ;;  %v6767_v17 = vpop.f32.mrb[67].mxu0  ;;  %v4492_v7 = vmul.f32 %v9614_v46, %v4108_v45  ;;  %v4508_v53 = vmul.f32 %v9632_v31, %v4124_v1  ;;  %v11300_v59 = vld [vmem:[#allocation7_spill] sm:$0xff]  ;;  %v11301_v40 = vld [vmem:[#allocation114_spill] sm:$0xff] }
 0x357   : > { %7505 = vpow.bf16 %v3520_v49  ;;  %v5342_v37 = vadd.f32 %v6832_v8, %v4506_v55  ;;  %v6768_v48 = vadd.f32 %v6767_v17, %v6766_v52  ;;  %3947 = vadd.xlane.f32.xlu0 %v10163_v63  ;;  %v10245_v39 = vadd.f32 %v3775_v13, %v3774_v34  ;;  %v11303_v55 = vld [vmem:[#allocation111_spill] sm:$0xff]  ;;  %v11304_v8 = vld [vmem:[#allocation112_spill] sm:$0xff] }
 0x358   : > { %5389 = vst.msk [vmem:[#allocation4] sm:$0xff] %vm706_vm0, %v5325_v29  ;;  %v10242_v38 = vpop.permute.xlu1 %4461  ;;  %3932 = vadd.xlane.f32.xlu1 %v10050_v23  ;;  %v3142_v18 = vpop.permute.xlu0 %3141  ;;  %v4491_v23 = vmul.f32 %v9669_v47, %v4107_v36  ;;  %v4507_v16 = vmul.f32 %v11300_v59, %v4123_v20  ;;  %v3238_v46 = vsub.f32 %v11301_v40, %v3062_v54  ;;  %v11305_v29 = vld [vmem:[#allocation117_spill] sm:$0xff] }
 0x359   : > { %5406 = vst.msk [vmem:[#allocation4 + $0x88] sm:$0xff] %vm706_vm0, %v5342_v37  ;;  %v5326_v3 = vadd.f32 %v6768_v48, %v4490_v9  ;;  %v6833_v19 = vpop.f32.mrb[68].mxu1  ;;  %v3239_v34 = vsub.f32 %v11302_v0, %v3062_v54  ;;  %v3270_v47 = vsub.f32 %v11305_v29, %v3142_v18  ;;  %v11306_v48 = vld [vmem:[#allocation118_spill] sm:$0xff] }
 0x35a   : > { %v6834_v63 = vpop.f32.mrb[69].mxu1  ;;  %v3271_v45 = vsub.f32 %v11306_v48, %v3142_v18  ;;  %v11309_v48 = vld [vmem:[#allocation22_spill] sm:$0xff] }
 0x35b   : > { %5390 = vst.msk [vmem:[#allocation4 + $0x8] sm:$0xff] %vm706_vm0, %v5326_v3  ;;  %3905 = vadd.xlane.f32.xlu0 %v10189_v42  ;;  %v6835_v33 = vadd.f32 %v6834_v63, %v6833_v19  ;;  %v6836_v30 = vpop.f32.mrb[70].mxu1 }
 0x35c   : > { %v3057_v60 = vpop.permute.xlu1 %3056  ;;  %3890 = vadd.xlane.f32.xlu1 %v10077_v10  ;;  %v6837_v52 = vpop.f32.mrb[71].mxu1 }
 0x35d   : > { %v7500_v4 = vpop.eup %7499  ;;  %v3236_v49 = vsub.f32 %v11303_v55, %v3057_v60  ;;  %v3237_v42 = vsub.f32 %v11304_v8, %v3057_v60  ;;  %v5343_v17 = vadd.f32 %v6835_v33, %v4507_v16  ;;  %v6838_v13 = vadd.f32 %v6837_v52, %v6836_v30  ;;  %v6769_v9 = vpop.f32.mrb[68].mxu0  ;;  %v11307_v30 = vld [vmem:[#allocation113_spill] sm:$0xff] }
 0x35e   : > { %v7502_v31 = vpop.eup %7501  ;;  %v3744_v37 = vunpack.c.l.bf16 %v7500_v4  ;;  %v6770_v36 = vpop.f32.mrb[69].mxu0  ;;  %v3746_v59 = vunpack.c.h.bf16 %v7500_v4 }
 0x35f   : > { %v3318_v10 = vpack.c.bf16 %v3238_v46, %v3236_v49  ;;  %v3319_v1 = vpack.c.bf16 %v3239_v34, %v3237_v42  ;;  %5115 = vmatprep.mubr.bf16.mxu0 %v7502_v31  ;;  %3953 = vadd.xlane.f32.xlu0 %v10199_v25  ;;  %v3745_v54 = vunpack.c.l.bf16 %v7502_v31  ;;  %5407 = vst.msk [vmem:[#allocation4 + $0x90] sm:$0xff] %vm706_vm0, %v5343_v17  ;;  %v6772_v63 = vpop.f32.mrb[70].mxu0  ;;  %v3747_v16 = vunpack.c.h.bf16 %v7502_v31  ;;  %v11308_v46 = vld [vmem:[#allocation116_spill] sm:$0xff] }
 0x360   : > { %v5344_v20 = vadd.f32 %v6838_v13, %v4508_v53  ;;  %v6771_v3 = vadd.f32 %v6770_v36, %v6769_v9  ;;  %5116 = vmatmul.mubr.bf16.gmra.mrb[120].mxu0 %v7500_v4  ;;  %v3137_v19 = vpop.permute.xlu1 %3136  ;;  %3938 = vadd.xlane.f32.xlu1 %v10087_v44  ;;  %v6773_v25 = vpop.f32.mrb[71].mxu0 }
 0x361   : > { %v7504_v33 = vpop.eup %7503  ;;  %v3475_v18 = vmul.bf16 1069105081, %v3318_v10  ;;  %v3478_v60 = vmul.bf16 1069105081, %v3319_v1  ;;  %v3268_v40 = vsub.f32 %v11307_v30, %v3137_v19  ;;  %v3269_v0 = vsub.f32 %v11308_v46, %v3137_v19  ;;  %v4110_v30 = vld [vmem:[#allocation4 + $0x28] sm:$0xff] }
 0x362   : > { %v7506_v34 = vpop.eup %7505  ;;  %5408 = vst.msk [vmem:[#allocation4 + $0x98] sm:$0xff] %vm706_vm0, %v5344_v20  ;;  %v5327_v53 = vadd.f32 %v6771_v3, %v4491_v23  ;;  %v6774_v55 = vadd.f32 %v6773_v25, %v6772_v63  ;;  %v3916_v49 = vadd.f32 %v3745_v54, %v3744_v37  ;;  %v3776_v8 = vunpack.c.l.bf16 %v7504_v33  ;;  %v11310_v20 = vld [vmem:[#allocation135_spill] sm:$0xff] }
 0x363   : > { %7507 = vpow.bf16 %v3475_v18  ;;  %v3334_v42 = vpack.c.bf16 %v3270_v47, %v3268_v40  ;;  %v3335_v44 = vpack.c.bf16 %v3271_v45, %v3269_v0  ;;  %5308 = vmatprep.mubr.bf16.mxu1 %v7506_v34  ;;  %3911 = vadd.xlane.f32.xlu0 %v10226_v5  ;;  %v3777_v4 = vunpack.c.l.bf16 %v7506_v34  ;;  %v10282_v40 = vpop.permute.xlu0 %4396 }
 0x364   : > { %7509 = vpow.bf16 %v3478_v60  ;;  %5391 = vst.msk [vmem:[#allocation4 + $0x10] sm:$0xff] %vm706_vm0, %v5327_v53  ;;  %v5328_v52 = vadd.f32 %v6774_v55, %v4492_v7  ;;  %5309 = vmatmul.mubr.bf16.gmra.mrb[120].mxu1 %v7504_v33  ;;  %3896 = vadd.xlane.f32.xlu1 %v10117_v22  ;;  %v10270_v31 = vadd.f32 %v3747_v16, %v3746_v59  ;;  %v3778_v23 = vunpack.c.h.bf16 %v7504_v33  ;;  %v4125_v7 = vld [vmem:[#allocation4 + $0xa0] sm:$0xff]  ;;  %v4126_v22 = vld [vmem:[#allocation4 + $0xa8] sm:$0xff] }
 0x365   : > { %v3523_v29 = vmul.bf16 1069105081, %v3334_v42  ;;  %v3526_v17 = vmul.bf16 1069105081, %v3335_v44  ;;  %v3964_v13 = vadd.f32 %v3777_v4, %v3776_v8  ;;  %v3779_v47 = vunpack.c.h.bf16 %v7506_v34  ;;  %v4109_v60 = vld [vmem:[#allocation4 + $0x20] sm:$0xff] }
 0x366   : > { %5392 = vst.msk [vmem:[#allocation4 + $0x18] sm:$0xff] %vm706_vm0, %v5328_v52  ;;  %v4509_v45 = vmul.f32 %v11309_v48, %v4125_v7  ;;  %v11311_v8 = vld [vmem:[#allocation142_spill] sm:$0xff] }
 0x367   : > { %7511 = vpow.bf16 %v3523_v29  ;;  %3959 = vadd.xlane.f32.xlu0 %v10236_v32  ;;  %v10275_v5 = vadd.f32 %v3779_v47, %v3778_v23  ;;  %v4510_v32 = vmul.f32 %v11310_v20, %v4126_v22  ;;  %v11312_v23 = vld [vmem:[#allocation14_spill] sm:$0xff]  ;;  %v10290_v22 = vpop.permute.xlu0 %4476 }
 0x368   : > { %7513 = vpow.bf16 %v3526_v17  ;;  %3944 = vadd.xlane.f32.xlu1 %v10127_v35  ;;  %v4494_v29 = vmul.f32 %v11312_v23, %v4110_v30  ;;  %v11316_v30 = vld [vmem:[#allocation15_spill] sm:$0xff]  ;;  %v11318_v23 = vld [vmem:[#allocation121_spill] sm:$0xff] }
 0x36a   : > { %v6839_v9 = vpop.f32.mrb[72].mxu1 }
 0x36b   : > { %v6840_v37 = vpop.f32.mrb[73].mxu1  ;;  %3917 = vadd.xlane.f32.xlu0 %v3916_v49  ;;  %v10296_v48 = vpop.permute.xlu0 %4406 }
 0x36c   : > { %v6841_v10 = vadd.f32 %v6840_v37, %v6839_v9  ;;  %v6842_v1 = vpop.f32.mrb[74].mxu1  ;;  %3902 = vadd.xlane.f32.xlu1 %v10157_v58 }
 0x36d   : > { %v6843_v36 = vpop.f32.mrb[75].mxu1 }
 0x36e   : > { %v7508_v54 = vpop.eup %7507  ;;  %v5345_v3 = vadd.f32 %v6841_v10, %v4509_v45  ;;  %v6844_v19 = vadd.f32 %v6843_v36, %v6842_v1  ;;  %v4128_v10 = vld [vmem:[#allocation4 + $0xb8] sm:$0xff]  ;;  %v11313_v36 = vld [vmem:[#allocation19_spill] sm:$0xff] }
 0x36f   : > { %v7510_v35 = vpop.eup %7509  ;;  %3965 = vadd.xlane.f32.xlu0 %v3964_v13  ;;  %v3748_v63 = vunpack.c.l.bf16 %v7508_v54  ;;  %v3750_v59 = vunpack.c.h.bf16 %v7508_v54  ;;  %v10300_v20 = vpop.permute.xlu0 %4486 }
 0x370   : > { %5409 = vst.msk [vmem:[#allocation4 + $0xa0] sm:$0xff] %vm706_vm0, %v5345_v3  ;;  %v5346_v16 = vadd.f32 %v6844_v19, %v4510_v32  ;;  %5123 = vmatprep.mubr.bf16.mxu0 %v7510_v35  ;;  %3950 = vadd.xlane.f32.xlu1 %v10165_v12  ;;  %v3749_v33 = vunpack.c.l.bf16 %v7510_v35  ;;  %v3751_v18 = vunpack.c.h.bf16 %v7510_v35  ;;  %v4493_v12 = vmul.f32 %v11311_v8, %v4109_v60  ;;  %v3529_v19 = vld [vmem:[#allocation3 + $0x8] sm:$0xff] }
 0x371   : > { %5124 = vmatmul.mubr.bf16.gmra.mrb[124].mxu0 %v7508_v54  ;;  %v11315_v60 = vld [vmem:[#allocation123_spill] sm:$0xff] }
 0x372   : > { %v7512_v58 = vpop.eup %7511  ;;  %5410 = vst.msk [vmem:[#allocation4 + $0xa8] sm:$0xff] %vm706_vm0, %v5346_v16  ;;  %v6775_v46 = vpop.f32.mrb[72].mxu0  ;;  %v3922_v0 = vadd.f32 %v3749_v33, %v3748_v63  ;;  %v10285_v25 = vadd.f32 %v3751_v18, %v3750_v59 }
 0x373   : > { %v7514_v34 = vpop.eup %7513  ;;  %v6776_v53 = vpop.f32.mrb[73].mxu0  ;;  %v3780_v55 = vunpack.c.l.bf16 %v7512_v58  ;;  %v3782_v49 = vunpack.c.h.bf16 %v7512_v58 }
 0x374   : > { %5316 = vmatprep.mubr.bf16.mxu1 %v7514_v34  ;;  %v6777_v42 = vadd.f32 %v6776_v53, %v6775_v46  ;;  %3923 = vadd.xlane.f32.xlu0 %v3922_v0  ;;  %v6778_v44 = vpop.f32.mrb[74].mxu0  ;;  %v3781_v4 = vunpack.c.l.bf16 %v7514_v34  ;;  %v3783_v52 = vunpack.c.h.bf16 %v7514_v34 }
 0x375   : > { %5317 = vmatmul.mubr.bf16.gmra.mrb[124].mxu1 %v7512_v58  ;;  %3908 = vadd.xlane.f32.xlu1 %v10191_v50  ;;  %v6779_v17 = vpop.f32.mrb[75].mxu0  ;;  %v4127_v50 = vld [vmem:[#allocation4 + $0xb0] sm:$0xff]  ;;  %v3593_v58 = vmul.f32 %v11315_v60, %v3529_v19  ;;  %v11320_v19 = vld [vmem:[#allocation127_spill] sm:$0xff] }
 0x376   : > { %v5329_v13 = vadd.f32 %v6777_v42, %v4493_v12  ;;  %v6780_v47 = vadd.f32 %v6779_v17, %v6778_v44  ;;  %v3970_v7 = vadd.f32 %v3781_v4, %v3780_v55  ;;  %v3973_v9 = vadd.f32 %v3783_v52, %v3782_v49  ;;  %v3544_v49 = vld [vmem:[#allocation3 + $0x80] sm:$0xff]  ;;  %v10310_v52 = vpop.permute.xlu1 %4391 }
 0x377   : > { %v4511_v54 = vmul.f32 %v11313_v36, %v4127_v50  ;;  %v11317_v12 = vld [vmem:[#allocation10_spill] sm:$0xff] }
 0x378   : > { %5393 = vst.msk [vmem:[#allocation4 + $0x20] sm:$0xff] %vm706_vm0, %v5329_v13  ;;  %v5330_v37 = vadd.f32 %v6780_v47, %v4494_v29  ;;  %3971 = vadd.xlane.f32.xlu0 %v3970_v7  ;;  %v3608_v29 = vmul.f32 %v11318_v23, %v3544_v49  ;;  %v3530_v47 = vld [vmem:[#allocation3 + $0x10] sm:$0xff]  ;;  %v11323_v49 = vld [vmem:[#allocation130_spill] sm:$0xff] }
 0x379   : > { %3956 = vadd.xlane.f32.xlu1 %v10201_v15  ;;  %v4111_v15 = vld [vmem:[#allocation4 + $0x30] sm:$0xff] }
 0x37a   : > { %5394 = vst.msk [vmem:[#allocation4 + $0x28] sm:$0xff] %vm706_vm0, %v5330_v37  ;;  %v4495_v46 = vmul.f32 %v11316_v30, %v4111_v15 }
 0x37d   : > { %3914 = vadd.xlane.f32.xlu1 %v10228_v41  ;;  %v11314_v41 = vld [vmem:[#allocation138_spill] sm:$0xff] }
 0x37e   : > { %v4512_v63 = vmul.f32 %v11314_v41, %v4128_v10  ;;  %v4113_v10 = vld [vmem:[#allocation4 + $0x40] sm:$0xff] }
 0x381   : > { %3962 = vadd.xlane.f32.xlu1 %v10245_v39  ;;  %v4112_v39 = vld [vmem:[#allocation4 + $0x38] sm:$0xff] }
 0x382   : > { %v6845_v45 = vpop.f32.mrb[76].mxu1  ;;  %v4496_v42 = vmul.f32 %v11317_v12, %v4112_v39  ;;  %v4129_v39 = vld [vmem:[#allocation4 + $0xc0] sm:$0xff] }
 0x383   : > { %v6846_v1 = vpop.f32.mrb[77].mxu1 }
 0x384   : > { %v6847_v32 = vadd.f32 %v6846_v1, %v6845_v45  ;;  %v6848_v3 = vpop.f32.mrb[78].mxu1  ;;  %v3546_v45 = vld [vmem:[#allocation3 + $0x90] sm:$0xff]  ;;  %v10319_v1 = vpop.permute.xlu1 %4471 }
 0x385   : > { %3920 = vadd.xlane.f32.xlu1 %v10270_v31  ;;  %v6849_v35 = vpop.f32.mrb[79].mxu1  ;;  %v3610_v15 = vmul.f32 %v11320_v19, %v3546_v45  ;;  %v3528_v19 = vld [vmem:[#allocation3] sm:$0xff] }
 0x386   : > { %v5347_v59 = vadd.f32 %v6847_v32, %v4511_v54  ;;  %v6850_v16 = vadd.f32 %v6849_v35, %v6848_v3  ;;  %v6781_v33 = vpop.f32.mrb[76].mxu0  ;;  %v4114_v3 = vld [vmem:[#allocation4 + $0x48] sm:$0xff] }
 0x387   : > { %v6782_v18 = vpop.f32.mrb[77].mxu0  ;;  %v11321_v35 = vld [vmem:[#allocation23_spill] sm:$0xff] }
 0x388   : > { %5411 = vst.msk [vmem:[#allocation4 + $0xb0] sm:$0xff] %vm706_vm0, %v5347_v59  ;;  %v5348_v0 = vadd.f32 %v6850_v16, %v4512_v63  ;;  %v6783_v34 = vadd.f32 %v6782_v18, %v6781_v33  ;;  %v3789_v53 = vpop.xlane.xlu0 %3788  ;;  %v6784_v55 = vpop.f32.mrb[78].mxu0  ;;  %v4497_v41 = vmul.f32 %v11321_v35, %v4113_v10  ;;  %v3532_v33 = vld [vmem:[#allocation3 + $0x20] sm:$0xff] }
 0x389   : > { %v3977_v31 = vadd.f32 %v3789_v53, %v3593_v58  ;;  %3968 = vadd.xlane.f32.xlu1 %v10275_v5  ;;  %v6785_v8 = vpop.f32.mrb[79].mxu0  ;;  %v11319_v5 = vld [vmem:[#allocation125_spill] sm:$0xff]  ;;  %v11322_v58 = vld [vmem:[#allocation20_spill] sm:$0xff]  ;;  %v10325_v53 = vpop.permute.xlu1 %4401 }
 0x38a   : > { %5412 = vst.msk [vmem:[#allocation4 + $0xb8] sm:$0xff] %vm706_vm0, %v5348_v0  ;;  %v5331_v44 = vadd.f32 %v6783_v34, %v4495_v46  ;;  %v6786_v4 = vadd.f32 %v6785_v8, %v6784_v55  ;;  %v3594_v37 = vmul.f32 %v11319_v5, %v3530_v47  ;;  %v4130_v34 = vld [vmem:[#allocation4 + $0xc8] sm:$0xff]  ;;  %v11324_v8 = vld [vmem:[#allocation150_spill] sm:$0xff]  ;;  %v11325_v47 = vld [vmem:[#allocation144_spill] sm:$0xff] }
 0x38b   : > { %4042 = vst.msk [vmem:[#allocation3 + $0x8] sm:$0xff] %vm577_vm1, %v3977_v31  ;;  %v3596_v31 = vmul.f32 %v11323_v49, %v3532_v33  ;;  %v4513_v12 = vmul.f32 %v11324_v8, %v4129_v39  ;;  %v4115_v33 = vld [vmem:[#allocation4 + $0x50] sm:$0xff] }
 0x38c   : > { %5395 = vst.msk [vmem:[#allocation4 + $0x30] sm:$0xff] %vm706_vm0, %v5331_v44  ;;  %v5332_v17 = vadd.f32 %v6786_v4, %v4496_v42  ;;  %v3834_v13 = vpop.xlane.xlu0 %3833 }
 0x38d   : > { %v3992_v7 = vadd.f32 %v3834_v13, %v3608_v29  ;;  %3926 = vadd.xlane.f32.xlu1 %v10285_v25  ;;  %v3548_v29 = vld [vmem:[#allocation3 + $0xa0] sm:$0xff] }
 0x38e   : > { %5396 = vst.msk [vmem:[#allocation4 + $0x38] sm:$0xff] %vm706_vm0, %v5332_v17 }
 0x38f   : > { %4057 = vst.msk [vmem:[#allocation3 + $0x80] sm:$0xff] %vm577_vm1, %v3992_v7  ;;  %v4514_v7 = vmul.f32 %v11325_v47, %v4130_v34  ;;  %v3531_v47 = vld [vmem:[#allocation3 + $0x18] sm:$0xff] }
 0x390   : > { %v3792_v50 = vpop.xlane.xlu0 %3791 }
 0x391   : > { %v3978_v36 = vadd.f32 %v3792_v50, %v3594_v37  ;;  %3974 = vadd.xlane.f32.xlu1 %v3973_v9  ;;  %v4498_v9 = vmul.f32 %v11322_v58, %v4114_v3  ;;  %v11326_v50 = vld [vmem:[#allocation132_spill] sm:$0xff]  ;;  %v10336_v3 = vpop.permute.xlu1 %4481 }
 0x392   : > { %v5521_v54 = vld [vmem:[#allocation3 + $0x8] sm:$0xff]  ;;  %v6787_v32 = vpop.f32.mrb[80].mxu0  ;;  %v3612_v45 = vmul.f32 %v11326_v50, %v3548_v29 }
 0x393   : > { %7515 = vrcp.f32 %v5521_v54  ;;  %4043 = vst.msk [vmem:[#allocation3 + $0x10] sm:$0xff] %vm577_vm1, %v3978_v36  ;;  %v6788_v25 = vpop.f32.mrb[81].mxu0  ;;  %v3534_v54 = vld [vmem:[#allocation3 + $0x30] sm:$0xff] }
 0x394   : > { %v6789_v63 = vadd.f32 %v6788_v25, %v6787_v32  ;;  %v3840_v59 = vpop.xlane.xlu0 %3839  ;;  %v6790_v16 = vpop.f32.mrb[82].mxu0 }
 0x395   : > { %v3994_v18 = vadd.f32 %v3840_v59, %v3610_v15  ;;  %v6791_v60 = vpop.f32.mrb[83].mxu0  ;;  %v11327_v15 = vld [vmem:[#allocation139_spill] sm:$0xff] }
 0x396   : > { %v5333_v30 = vadd.f32 %v6789_v63, %v4497_v41  ;;  %v6792_v46 = vadd.f32 %v6791_v60, %v6790_v16  ;;  %v6851_v0 = vpop.f32.mrb[80].mxu1  ;;  %v3598_v35 = vmul.f32 %v11327_v15, %v3534_v54  ;;  %v11328_v63 = vld [vmem:[#allocation119_spill] sm:$0xff]  ;;  %v3550_v16 = vld [vmem:[#allocation3 + $0xb0] sm:$0xff] }
 0x397   : > { %4059 = vst.msk [vmem:[#allocation3 + $0x90] sm:$0xff] %vm577_vm1, %v3994_v18  ;;  %v6852_v55 = vpop.f32.mrb[81].mxu1  ;;  %v3592_v59 = vmul.f32 %v11328_v63, %v3528_v19  ;;  %v3545_v60 = vld [vmem:[#allocation3 + $0x88] sm:$0xff] }
 0x398   : > { %5397 = vst.msk [vmem:[#allocation4 + $0x40] sm:$0xff] %vm706_vm0, %v5333_v30  ;;  %v5334_v42 = vadd.f32 %v6792_v46, %v4498_v9  ;;  %v6853_v44 = vadd.f32 %v6852_v55, %v6851_v0  ;;  %v3798_v4 = vpop.xlane.xlu0 %3797  ;;  %v6854_v23 = vpop.f32.mrb[82].mxu1  ;;  %v4116_v30 = vld [vmem:[#allocation4 + $0x58] sm:$0xff]  ;;  %v11329_v0 = vld [vmem:[#allocation143_spill] sm:$0xff]  ;;  %v11330_v55 = vld [vmem:[#allocation28_spill] sm:$0xff] }
 0x399   : > { %v3980_v17 = vadd.f32 %v3798_v4, %v3596_v31  ;;  %v6855_v13 = vpop.f32.mrb[83].mxu1  ;;  %v3614_v34 = vmul.f32 %v11329_v0, %v3550_v16  ;;  %v4499_v49 = vmul.f32 %v11330_v55, %v4115_v33  ;;  %v3536_v4 = vld [vmem:[#allocation3 + $0x40] sm:$0xff]  ;;  %v11334_v19 = vld [vmem:[#allocation35_spill] sm:$0xff] }
 0x39a   : > { %5398 = vst.msk [vmem:[#allocation4 + $0x48] sm:$0xff] %vm706_vm0, %v5334_v42  ;;  %v5349_v5 = vadd.f32 %v6853_v44, %v4513_v12  ;;  %v6856_v37 = vadd.f32 %v6855_v13, %v6854_v23  ;;  %v11331_v42 = vld [vmem:[#allocation120_spill] sm:$0xff]  ;;  %v11335_v16 = vld [vmem:[#allocation122_spill] sm:$0xff] }
 0x39b   : > { %4045 = vst.msk [vmem:[#allocation3 + $0x20] sm:$0xff] %vm577_vm1, %v3980_v17  ;;  %v3609_v44 = vmul.f32 %v11331_v42, %v3545_v60  ;;  %v4131_v23 = vld [vmem:[#allocation4 + $0xd0] sm:$0xff]  ;;  %v3595_v33 = vmul.f32 %v11335_v16, %v3531_v47  ;;  %v3533_v47 = vld [vmem:[#allocation3 + $0x28] sm:$0xff] }
 0x39c   : > { %5413 = vst.msk [vmem:[#allocation4 + $0xc0] sm:$0xff] %vm706_vm0, %v5349_v5  ;;  %v5350_v10 = vadd.f32 %v6856_v37, %v4514_v7  ;;  %v3846_v36 = vpop.xlane.xlu0 %3845  ;;  %v11332_v7 = vld [vmem:[#allocation147_spill] sm:$0xff]  ;;  %v4515_v15 = vmul.f32 %v11334_v19, %v4131_v23 }
 0x39d   : > { %v7516_v32 = vpop.eup %7515  ;;  %v3996_v25 = vadd.f32 %v3846_v36, %v3612_v45  ;;  %v4500_v5 = vmul.f32 %v11332_v7, %v4116_v30  ;;  %v4132_v36 = vld [vmem:[#allocation4 + $0xd8] sm:$0xff]  ;;  %v11336_v30 = vld [vmem:[#allocation27_spill] sm:$0xff] }
 0x39e   : > { %5414 = vst.msk [vmem:[#allocation4 + $0xc8] sm:$0xff] %vm706_vm0, %v5350_v10  ;;  %5719 = vperm.xlu0 %7097, %v7516_v32   ;;  %v11333_v32 = vld [vmem:[#allocation151_spill] sm:$0xff] }
 0x39f   : > { %4061 = vst.msk [vmem:[#allocation3 + $0xa0] sm:$0xff] %vm577_vm1, %v3996_v25  ;;  %v3600_v25 = vmul.f32 %v11333_v32, %v3536_v4  ;;  %v11338_v4 = vld [vmem:[#allocation124_spill] sm:$0xff] }
 0x3a0   : > { %v3804_v41 = vpop.xlane.xlu0 %3803  ;;  %v3554_v32 = vld [vmem:[#allocation3 + $0xd0] sm:$0xff] }
 0x3a1   : > { %v3982_v39 = vadd.f32 %v3804_v41, %v3598_v35  ;;  %v3786_v18 = vpop.xlane.xlu1 %3785 }
 0x3a2   : > { %v3976_v58 = vadd.f32 %v3786_v18, %v3592_v59  ;;  %v6793_v9 = vpop.f32.mrb[84].mxu0 }
 0x3a3   : > { %4047 = vst.msk [vmem:[#allocation3 + $0x30] sm:$0xff] %vm577_vm1, %v3982_v39  ;;  %v6794_v46 = vpop.f32.mrb[85].mxu0  ;;  %v3552_v39 = vld [vmem:[#allocation3 + $0xc0] sm:$0xff] }
 0x3a4   : > { %4041 = vst.msk [vmem:[#allocation3] sm:$0xff] %vm577_vm1, %v3976_v58  ;;  %v6795_v31 = vadd.f32 %v6794_v46, %v6793_v9  ;;  %v3852_v8 = vpop.xlane.xlu0 %3851  ;;  %v6796_v12 = vpop.f32.mrb[86].mxu0  ;;  %v3547_v9 = vld [vmem:[#allocation3 + $0x98] sm:$0xff]  ;;  %v4516_v46 = vmul.f32 %v11336_v30, %v4132_v36  ;;  %v11340_v36 = vld [vmem:[#allocation126_spill] sm:$0xff] }
 0x3a5   : > { %v3998_v29 = vadd.f32 %v3852_v8, %v3614_v34  ;;  %v6797_v17 = vpop.f32.mrb[87].mxu0  ;;  %v3837_v13 = vpop.xlane.xlu1 %3836  ;;  %v3611_v23 = vmul.f32 %v11338_v4, %v3547_v9  ;;  %v5538_v9 = vld [vmem:[#allocation3 + $0x90] sm:$0xff] }
 0x3a6   : > { %v5335_v37 = vadd.f32 %v6795_v31, %v4499_v49  ;;  %v6798_v50 = vadd.f32 %v6797_v17, %v6796_v12  ;;  %v3993_v45 = vadd.f32 %v3837_v13, %v3609_v44  ;;  %v6857_v10 = vpop.f32.mrb[84].mxu1  ;;  %v11337_v31 = vld [vmem:[#allocation156_spill] sm:$0xff]  ;;  %v5536_v12 = vld [vmem:[#allocation3 + $0x80] sm:$0xff] }
 0x3a7   : > { %4063 = vst.msk [vmem:[#allocation3 + $0xb0] sm:$0xff] %vm577_vm1, %v3998_v29  ;;  %v6858_v54 = vpop.f32.mrb[85].mxu1  ;;  %v3616_v8 = vmul.f32 %v11337_v31, %v3552_v39  ;;  %v3538_v29 = vld [vmem:[#allocation3 + $0x50] sm:$0xff]  ;;  %v3535_v31 = vld [vmem:[#allocation3 + $0x38] sm:$0xff] }
 0x3a8   : > { %5399 = vst.msk [vmem:[#allocation4 + $0x50] sm:$0xff] %vm706_vm0, %v5335_v37  ;;  %v5336_v35 = vadd.f32 %v6798_v50, %v4500_v5  ;;  %v6859_v41 = vadd.f32 %v6858_v54, %v6857_v10  ;;  %v3810_v63 = vpop.xlane.xlu0 %3809  ;;  %v6860_v59 = vpop.f32.mrb[86].mxu1  ;;  %v11339_v37 = vld [vmem:[#allocation163_spill] sm:$0xff]  ;;  %v3597_v54 = vmul.f32 %v11340_v36, %v3533_v47  ;;  %v11341_v39 = vld [vmem:[#allocation168_spill] sm:$0xff]  ;;  %v11346_v36 = vld [vmem:[#allocation129_spill] sm:$0xff] }
 0x3a9   : > { %4058 = vst.msk [vmem:[#allocation3 + $0x88] sm:$0xff] %vm577_vm1, %v3993_v45  ;;  %v3984_v18 = vadd.f32 %v3810_v63, %v3600_v25  ;;  %v6861_v60 = vpop.f32.mrb[87].mxu1  ;;  %v3795_v58 = vpop.xlane.xlu1 %3794  ;;  %v3602_v50 = vmul.f32 %v11339_v37, %v3538_v29  ;;  %v5522_v45 = vld [vmem:[#allocation3 + $0x10] sm:$0xff]  ;;  %v4117_v25 = vld [vmem:[#allocation4 + $0x60] sm:$0xff] }
 0x3aa   : > { %5400 = vst.msk [vmem:[#allocation4 + $0x58] sm:$0xff] %vm706_vm0, %v5336_v35  ;;  %v5351_v0 = vadd.f32 %v6859_v41, %v4515_v15  ;;  %v6862_v34 = vadd.f32 %v6861_v60, %v6860_v59  ;;  %v3979_v55 = vadd.f32 %v3795_v58, %v3595_v33  ;;  %v3549_v35 = vld [vmem:[#allocation3 + $0xa8] sm:$0xff]  ;;  %v11342_v60 = vld [vmem:[#allocation157_spill] sm:$0xff] }
 0x3ab   : > { %v5520_v49 = vld [vmem:[#allocation3] sm:$0xff]  ;;  %4049 = vst.msk [vmem:[#allocation3 + $0x40] sm:$0xff] %vm577_vm1, %v3984_v18  ;;  %v4118_v59 = vld [vmem:[#allocation4 + $0x68] sm:$0xff]  ;;  %v3618_v18 = vmul.f32 %v11341_v39, %v3554_v32  ;;  %v4501_v58 = vmul.f32 %v11342_v60, %v4117_v25  ;;  %v3551_v60 = vld [vmem:[#allocation3 + $0xb8] sm:$0xff] }
 0x3ac   : > { %7517 = vrcp.f32 %v5520_v49  ;;  %5415 = vst.msk [vmem:[#allocation4 + $0xd0] sm:$0xff] %vm706_vm0, %v5351_v0  ;;  %v5352_v42 = vadd.f32 %v6862_v34, %v4516_v46  ;;  %v3858_v44 = vpop.xlane.xlu0 %3857  ;;  %v11343_v34 = vld [vmem:[#allocation128_spill] sm:$0xff]  ;;  %v3540_v49 = vld [vmem:[#allocation3 + $0x60] sm:$0xff] }
 0x3ad   : > { %4044 = vst.msk [vmem:[#allocation3 + $0x18] sm:$0xff] %vm577_vm1, %v3979_v55  ;;  %v4000_v17 = vadd.f32 %v3858_v44, %v3616_v8  ;;  %v3843_v13 = vpop.xlane.xlu1 %3842  ;;  %7519 = vrcp.f32 %v5536_v12  ;;  %v3613_v55 = vmul.f32 %v11343_v34, %v3549_v35  ;;  %v4133_v8 = vld [vmem:[#allocation4 + $0xe0] sm:$0xff] }
 0x3ae   : > { %5416 = vst.msk [vmem:[#allocation4 + $0xd8] sm:$0xff] %vm706_vm0, %v5352_v42  ;;  %v3995_v7 = vadd.f32 %v3843_v13, %v3611_v23  ;;  %v11344_v23 = vld [vmem:[#allocation29_spill] sm:$0xff]  ;;  %v11347_v32 = vld [vmem:[#allocation38_spill] sm:$0xff] }
 0x3af   : > { %4065 = vst.msk [vmem:[#allocation3 + $0xc0] sm:$0xff] %vm577_vm1, %v4000_v17  ;;  %v4502_v29 = vmul.f32 %v11344_v23, %v4118_v59  ;;  %v4517_v25 = vmul.f32 %v11347_v32, %v4133_v8  ;;  %v3556_v59 = vld [vmem:[#allocation3 + $0xe0] sm:$0xff]  ;;  %v3542_v23 = vld [vmem:[#allocation3 + $0x70] sm:$0xff] }
 0x3b0   : > { %v5537_v5 = vld [vmem:[#allocation3 + $0x88] sm:$0xff]  ;;  %4060 = vst.msk [vmem:[#allocation3 + $0x98] sm:$0xff] %vm577_vm1, %v3995_v7  ;;  %v3816_v10 = vpop.xlane.xlu0 %3815  ;;  %v5540_v8 = vld [vmem:[#allocation3 + $0xa0] sm:$0xff] }
 0x3b1   : > { %7521 = vrcp.f32 %v5537_v5  ;;  %v3986_v19 = vadd.f32 %v3816_v10, %v3602_v50  ;;  %v3801_v15 = vpop.xlane.xlu1 %3800  ;;  %v4134_v5 = vld [vmem:[#allocation4 + $0xe8] sm:$0xff] }
 0x3b2   : > { %v3981_v41 = vadd.f32 %v3801_v15, %v3597_v54  ;;  %v6799_v63 = vpop.f32.mrb[88].mxu0  ;;  %7523 = vrcp.f32 %v5522_v45  ;;  %v11345_v45 = vld [vmem:[#allocation174_spill] sm:$0xff]  ;;  %v3599_v54 = vmul.f32 %v11346_v36, %v3535_v31 }
 0x3b3   : > { %4051 = vst.msk [vmem:[#allocation3 + $0x50] sm:$0xff] %vm577_vm1, %v3986_v19  ;;  %v6800_v33 = vpop.f32.mrb[89].mxu0  ;;  %v3604_v10 = vmul.f32 %v11345_v45, %v3540_v49  ;;  %v5524_v19 = vld [vmem:[#allocation3 + $0x20] sm:$0xff]  ;;  %v11349_v49 = vld [vmem:[#allocation176_spill] sm:$0xff] }
 0x3b4   : > { %v5523_v16 = vld [vmem:[#allocation3 + $0x18] sm:$0xff]  ;;  %4046 = vst.msk [vmem:[#allocation3 + $0x28] sm:$0xff] %vm577_vm1, %v3981_v41  ;;  %v6801_v30 = vadd.f32 %v6800_v33, %v6799_v63  ;;  %v3864_v46 = vpop.xlane.xlu0 %3863  ;;  %v6802_v0 = vpop.f32.mrb[90].mxu0  ;;  %v3620_v31 = vmul.f32 %v11349_v49, %v3556_v59 }
 0x3b5   : > { %7525 = vrcp.f32 %v5523_v16  ;;  %v4002_v12 = vadd.f32 %v3864_v46, %v3618_v18  ;;  %v6803_v42 = vpop.f32.mrb[91].mxu0  ;;  %v3849_v44 = vpop.xlane.xlu1 %3848 }
 0x3b6   : > { %v7518_v4 = vpop.eup %7517  ;;  %v5337_v17 = vadd.f32 %v6801_v30, %v4501_v58  ;;  %v6804_v13 = vadd.f32 %v6803_v42, %v6802_v0  ;;  %v3997_v47 = vadd.f32 %v3849_v44, %v3613_v55  ;;  %v6863_v7 = vpop.f32.mrb[88].mxu1  ;;  %7527 = vrcp.f32 %v5538_v9  ;;  %v11348_v9 = vld [vmem:[#allocation25_spill] sm:$0xff]  ;;  %v11350_v44 = vld [vmem:[#allocation131_spill] sm:$0xff] }
 0x3b7   : > { %v5539_v37 = vld [vmem:[#allocation3 + $0x98] sm:$0xff]  ;;  %4067 = vst.msk [vmem:[#allocation3 + $0xd0] sm:$0xff] %vm577_vm1, %v4002_v12  ;;  %v6864_v50 = vpop.f32.mrb[89].mxu1  ;;  %5714 = vperm.xlu1 %7098, %v7518_v4   ;;  %v7520_v16 = vpop.eup %7519  ;;  %v4518_v30 = vmul.f32 %v11348_v9, %v4134_v5  ;;  %v3615_v4 = vmul.f32 %v11350_v44, %v3551_v60 }
 0x3b8   : > { %7529 = vrcp.f32 %v5539_v37  ;;  %5401 = vst.msk [vmem:[#allocation4 + $0x60] sm:$0xff] %vm706_vm0, %v5337_v17  ;;  %v5338_v15 = vadd.f32 %v6804_v13, %v4502_v29  ;;  %v6865_v35 = vadd.f32 %v6864_v50, %v6863_v7  ;;  %v3822_v41 = vpop.xlane.xlu0 %3821  ;;  %v6866_v63 = vpop.f32.mrb[90].mxu1  ;;  %v11351_v50 = vld [vmem:[#allocation178_spill] sm:$0xff] }
 0x3b9   : > { %4062 = vst.msk [vmem:[#allocation3 + $0xa8] sm:$0xff] %vm577_vm1, %v3997_v47  ;;  %v3988_v33 = vadd.f32 %v3822_v41, %v3604_v10  ;;  %v6867_v39 = vpop.f32.mrb[91].mxu1  ;;  %v3807_v18 = vpop.xlane.xlu1 %3806  ;;  %7531 = vrcp.f32 %v5524_v19  ;;  %v3537_v47 = vld [vmem:[#allocation3 + $0x48] sm:$0xff]  ;;  %v3606_v45 = vmul.f32 %v11351_v50, %v3542_v23  ;;  %v5526_v10 = vld [vmem:[#allocation3 + $0x30] sm:$0xff] }
 0x3ba   : > { %5402 = vst.msk [vmem:[#allocation4 + $0x68] sm:$0xff] %vm706_vm0, %v5338_v15  ;;  %v5353_v46 = vadd.f32 %v6865_v35, %v4517_v25  ;;  %v6868_v0 = vadd.f32 %v6867_v39, %v6866_v63  ;;  %v3983_v34 = vadd.f32 %v3807_v18, %v3599_v54  ;;  %v11352_v54 = vld [vmem:[#allocation137_spill] sm:$0xff]  ;;  %v3558_v25 = vld [vmem:[#allocation3 + $0xf0] sm:$0xff]  ;;  %v3553_v63 = vld [vmem:[#allocation3 + $0xc8] sm:$0xff] }
 0x3bb   : > { %v7522_v58 = vpop.eup %7521  ;;  %v5525_v55 = vld [vmem:[#allocation3 + $0x28] sm:$0xff]  ;;  %4053 = vst.msk [vmem:[#allocation3 + $0x60] sm:$0xff] %vm577_vm1, %v3988_v33  ;;  %5794 = vperm.xlu1 %7098, %v7520_v16   ;;  %v3601_v32 = vmul.f32 %v11352_v54, %v3537_v47  ;;  %v4119_v15 = vld [vmem:[#allocation4 + $0x70] sm:$0xff]  ;;  %v4120_v39 = vld [vmem:[#allocation4 + $0x78] sm:$0xff] }
 0x3bc   : > { %5799 = vperm.xlu0 %7097, %v7522_v58   ;;  %7533 = vrcp.f32 %v5525_v55  ;;  %5417 = vst.msk [vmem:[#allocation4 + $0xe0] sm:$0xff] %vm706_vm0, %v5353_v46  ;;  %v5354_v12 = vadd.f32 %v6868_v0, %v4518_v30  ;;  %v3870_v42 = vpop.xlane.xlu0 %3869  ;;  %v7524_v29 = vpop.eup %7523  ;;  %v11353_v58 = vld [vmem:[#allocation180_spill] sm:$0xff]  ;;  %v11354_v30 = vld [vmem:[#allocation39_spill] sm:$0xff] }
 0x3bd   : > { %4048 = vst.msk [vmem:[#allocation3 + $0x38] sm:$0xff] %vm577_vm1, %v3983_v34  ;;  %v4004_v17 = vadd.f32 %v3870_v42, %v3620_v31  ;;  %v3855_v13 = vpop.xlane.xlu1 %3854  ;;  %7535 = vrcp.f32 %v5540_v8  ;;  %v3622_v9 = vmul.f32 %v11353_v58, %v3558_v25  ;;  %v4503_v46 = vmul.f32 %v11354_v30, %v4119_v15  ;;  %v5542_v0 = vld [vmem:[#allocation3 + $0xb0] sm:$0xff]  ;;  %v3539_v42 = vld [vmem:[#allocation3 + $0x58] sm:$0xff] }
 0x3be   : > { %5418 = vst.msk [vmem:[#allocation4 + $0xe8] sm:$0xff] %vm706_vm0, %v5354_v12  ;;  %v3999_v5 = vadd.f32 %v3855_v13, %v3615_v4  ;;  %v11355_v31 = vld [vmem:[#allocation140_spill] sm:$0xff]  ;;  %v3560_v12 = vld [vmem:[#allocation3 + $0x100] sm:$0xff] }
 0x3bf   : > { %v7526_v7 = vpop.eup %7525  ;;  %4069 = vst.msk [vmem:[#allocation3 + $0xe0] sm:$0xff] %vm577_vm1, %v4004_v17  ;;  %5724 = vperm.xlu1 %7098, %v7524_v29   ;;  %v3617_v8 = vmul.f32 %v11355_v31, %v3553_v63  ;;  %v4135_v4 = vld [vmem:[#allocation4 + $0xf0] sm:$0xff]  ;;  %v5528_v63 = vld [vmem:[#allocation3 + $0x40] sm:$0xff] }
 0x3c0   : > { %v5541_v37 = vld [vmem:[#allocation3 + $0xa8] sm:$0xff]  ;;  %5729 = vperm.xlu0 %7097, %v7526_v7   ;;  %4064 = vst.msk [vmem:[#allocation3 + $0xb8] sm:$0xff] %vm577_vm1, %v3999_v5  ;;  %v3828_v36 = vpop.xlane.xlu0 %3827  ;;  %v7528_v19 = vpop.eup %7527  ;;  %v11356_v47 = vld [vmem:[#allocation32_spill] sm:$0xff] }
 0x3c1   : > { %7537 = vrcp.f32 %v5541_v37  ;;  %v3990_v35 = vadd.f32 %v3828_v36, %v3606_v45  ;;  %v3813_v41 = vpop.xlane.xlu1 %3812  ;;  %v4504_v7 = vmul.f32 %v11356_v47, %v4120_v39  ;;  %v3562_v47 = vld [vmem:[#allocation3 + $0x110] sm:$0xff] }
 0x3c2   : > { %v7530_v59 = vpop.eup %7529  ;;  %v3985_v16 = vadd.f32 %v3813_v41, %v3601_v32  ;;  %v6805_v33 = vpop.f32.mrb[92].mxu0  ;;  %7539 = vrcp.f32 %v5526_v10  ;;  %v4136_v10 = vld [vmem:[#allocation4 + $0xf8] sm:$0xff]  ;;  %v11357_v32 = vld [vmem:[#allocation134_spill] sm:$0xff] }
 0x3c3   : > { %4055 = vst.msk [vmem:[#allocation3 + $0x70] sm:$0xff] %vm577_vm1, %v3990_v35  ;;  %v6806_v60 = vpop.f32.mrb[93].mxu0  ;;  %5804 = vperm.xlu1 %7098, %v7528_v19   ;;  %v7532_v44 = vpop.eup %7531  ;;  %v3624_v25 = vmul.f32 %v11357_v32, %v3560_v12  ;;  %v11358_v19 = vld [vmem:[#allocation149_spill] sm:$0xff]  ;;  %v11359_v35 = vld [vmem:[#allocation40_spill] sm:$0xff] }
 0x3c4   : > { %v5527_v18 = vld [vmem:[#allocation3 + $0x38] sm:$0xff]  ;;  %5809 = vperm.xlu0 %7097, %v7530_v59   ;;  %4050 = vst.msk [vmem:[#allocation3 + $0x48] sm:$0xff] %vm577_vm1, %v3985_v16  ;;  %v6807_v34 = vadd.f32 %v6806_v60, %v6805_v33  ;;  %v6808_v55 = vpop.f32.mrb[94].mxu0  ;;  %v3876_v49 = vpop.xlane.xlu0 %3875  ;;  %v3603_v15 = vmul.f32 %v11358_v19, %v3539_v42  ;;  %v4519_v41 = vmul.f32 %v11359_v35, %v4135_v4  ;;  %v11361_v42 = vld [vmem:[#allocation136_spill] sm:$0xff]  ;;  %v5544_v4 = vld [vmem:[#allocation3 + $0xc0] sm:$0xff] }
 0x3c5   : > { %7541 = vrcp.f32 %v5527_v18  ;;  %v4006_v23 = vadd.f32 %v3876_v49, %v3622_v9  ;;  %v6809_v29 = vpop.f32.mrb[95].mxu0  ;;  %v3861_v17 = vpop.xlane.xlu1 %3860  ;;  %v3576_v18 = vld [vmem:[#allocation3 + $0x180] sm:$0xff] }
 0x3c6   : > { %v7534_v13 = vpop.eup %7533  ;;  %v5339_v5 = vadd.f32 %v6807_v34, %v4503_v46  ;;  %v6810_v37 = vadd.f32 %v6809_v29, %v6808_v55  ;;  %v4001_v50 = vadd.f32 %v3861_v17, %v3617_v8  ;;  %v6869_v45 = vpop.f32.mrb[92].mxu1  ;;  %7543 = vrcp.f32 %v5542_v0  ;;  %v3555_v46 = vld [vmem:[#allocation3 + $0xd8] sm:$0xff]  ;;  %v11360_v34 = vld [vmem:[#allocation158_spill] sm:$0xff] }
 0x3c7   : > { %v5543_v36 = vld [vmem:[#allocation3 + $0xb8] sm:$0xff]  ;;  %4071 = vst.msk [vmem:[#allocation3 + $0xf0] sm:$0xff] %vm577_vm1, %v4006_v23  ;;  %v6870_v54 = vpop.f32.mrb[93].mxu1  ;;  %5734 = vperm.xlu1 %7098, %v7532_v44   ;;  %v7536_v60 = vpop.eup %7535  ;;  %v4520_v55 = vmul.f32 %v11360_v34, %v4136_v10  ;;  %v3640_v44 = vmul.f32 %v11361_v42, %v3576_v18  ;;  %v4137_v18 = vld [vmem:[#allocation4 + $0x100] sm:$0xff]  ;;  %v4138_v34 = vld [vmem:[#allocation4 + $0x108] sm:$0xff] }
 0x3c8   : > { %5739 = vperm.xlu0 %7097, %v7534_v13   ;;  %7545 = vrcp.f32 %v5543_v36  ;;  %5403 = vst.msk [vmem:[#allocation4 + $0x70] sm:$0xff] %vm706_vm0, %v5339_v5  ;;  %v5340_v59 = vadd.f32 %v6810_v37, %v4504_v7  ;;  %v6871_v16 = vadd.f32 %v6870_v54, %v6869_v45  ;;  %v6872_v33 = vpop.f32.mrb[94].mxu1  ;;  %v3882_v39 = vpop.xlane.xlu0 %3881  ;;  %v11362_v17 = vld [vmem:[#allocation153_spill] sm:$0xff] }
 0x3c9   : > { %4066 = vst.msk [vmem:[#allocation3 + $0xc8] sm:$0xff] %vm577_vm1, %v4001_v50  ;;  %v4008_v58 = vadd.f32 %v3882_v39, %v3624_v25  ;;  %v6873_v9 = vpop.f32.mrb[95].mxu1  ;;  %v3819_v30 = vpop.xlane.xlu1 %3818  ;;  %7547 = vrcp.f32 %v5528_v63  ;;  %v3619_v13 = vmul.f32 %v11362_v17, %v3555_v46  ;;  %v3541_v50 = vld [vmem:[#allocation3 + $0x68] sm:$0xff]  ;;  %v11363_v54 = vld [vmem:[#allocation9_spill] sm:$0xff]  ;;  %v5530_v25 = vld [vmem:[#allocation3 + $0x50] sm:$0xff] }
 0x3ca   : > { %5404 = vst.msk [vmem:[#allocation4 + $0x78] sm:$0xff] %vm706_vm0, %v5340_v59  ;;  %v5355_v49 = vadd.f32 %v6871_v16, %v4519_v41  ;;  %v6874_v31 = vadd.f32 %v6873_v9, %v6872_v33  ;;  %v3987_v8 = vadd.f32 %v3819_v30, %v3603_v15  ;;  %v3626_v32 = vmul.f32 %v11363_v54, %v3562_v47  ;;  %v11364_v15 = vld [vmem:[#allocation161_spill] sm:$0xff]  ;;  %v3578_v41 = vld [vmem:[#allocation3 + $0x190] sm:$0xff]  ;;  %v3557_v33 = vld [vmem:[#allocation3 + $0xe8] sm:$0xff] }
 0x3cb   : > { %v7538_v0 = vpop.eup %7537  ;;  %v5529_v12 = vld [vmem:[#allocation3 + $0x48] sm:$0xff]  ;;  %4073 = vst.msk [vmem:[#allocation3 + $0x100] sm:$0xff] %vm577_vm1, %v4008_v58  ;;  %5814 = vperm.xlu1 %7098, %v7536_v60   ;;  %v3605_v35 = vmul.f32 %v11364_v15, %v3541_v50  ;;  %v11365_v30 = vld [vmem:[#allocation8_spill] sm:$0xff]  ;;  %v3543_v47 = vld [vmem:[#allocation3 + $0x78] sm:$0xff] }
 0x3cc   : > { %5819 = vperm.xlu0 %7097, %v7538_v0   ;;  %7549 = vrcp.f32 %v5529_v12  ;;  %5419 = vst.msk [vmem:[#allocation4 + $0xf0] sm:$0xff] %vm706_vm0, %v5355_v49  ;;  %v5356_v23 = vadd.f32 %v6874_v31, %v4520_v55  ;;  %v3930_v29 = vpop.xlane.xlu0 %3929  ;;  %v7540_v7 = vpop.eup %7539  ;;  %v3642_v46 = vmul.f32 %v11365_v30, %v3578_v41  ;;  %v3564_v0 = vld [vmem:[#allocation3 + $0x120] sm:$0xff]  ;;  %v5546_v55 = vld [vmem:[#allocation3 + $0xd0] sm:$0xff]  ;;  %v4154_v41 = vld [vmem:[#allocation4 + $0x188] sm:$0xff] }
 0x3cd   : > { %4052 = vst.msk [vmem:[#allocation3 + $0x58] sm:$0xff] %vm577_vm1, %v3987_v8  ;;  %v4024_v5 = vadd.f32 %v3930_v29, %v3640_v44  ;;  %v3867_v37 = vpop.xlane.xlu1 %3866  ;;  %7551 = vrcp.f32 %v5544_v4  ;;  %v11366_v8 = vld [vmem:[#allocation165_spill] sm:$0xff] }
 0x3ce   : > { %5420 = vst.msk [vmem:[#allocation4 + $0xf8] sm:$0xff] %vm706_vm0, %v5356_v23  ;;  %v4003_v10 = vadd.f32 %v3867_v37, %v3619_v13  ;;  %v3621_v12 = vmul.f32 %v11366_v8, %v3557_v33  ;;  %v11367_v44 = vld [vmem:[#allocation45_spill] sm:$0xff] }
 0x3cf   : > { %v7542_v45 = vpop.eup %7541  ;;  %4089 = vst.msk [vmem:[#allocation3 + $0x180] sm:$0xff] %vm577_vm1, %v4024_v5  ;;  %5744 = vperm.xlu1 %7098, %v7540_v7   ;;  %v4521_v4 = vmul.f32 %v11367_v44, %v4137_v18  ;;  %v4153_v5 = vld [vmem:[#allocation4 + $0x180] sm:$0xff]  ;;  %v11370_v33 = vld [vmem:[#allocation173_spill] sm:$0xff]  ;;  %v11373_v44 = vld [vmem:[#allocation43_spill] sm:$0xff] }
 0x3d0   : > { %v5545_v36 = vld [vmem:[#allocation3 + $0xc8] sm:$0xff]  ;;  %5749 = vperm.xlu0 %7097, %v7542_v45   ;;  %4068 = vst.msk [vmem:[#allocation3 + $0xd8] sm:$0xff] %vm577_vm1, %v4003_v10  ;;  %v3888_v19 = vpop.xlane.xlu0 %3887  ;;  %v7544_v63 = vpop.eup %7543  ;;  %v11368_v45 = vld [vmem:[#allocation146_spill] sm:$0xff] }
 0x3d1   : > { %7553 = vrcp.f32 %v5545_v36  ;;  %v4010_v59 = vadd.f32 %v3888_v19, %v3626_v32  ;;  %v3825_v16 = vpop.xlane.xlu1 %3824  ;;  %v3628_v10 = vmul.f32 %v11368_v45, %v3564_v0  ;;  %v11369_v36 = vld [vmem:[#allocation42_spill] sm:$0xff] }
 0x3d2   : > { %v7546_v39 = vpop.eup %7545  ;;  %v3989_v60 = vadd.f32 %v3825_v16, %v3605_v35  ;;  %7555 = vrcp.f32 %v5530_v25  ;;  %v6891_v9 = vpop.f32.mrb[96].mxu0  ;;  %v4522_v54 = vmul.f32 %v11369_v36, %v4138_v34  ;;  %v3580_v35 = vld [vmem:[#allocation3 + $0x1a0] sm:$0xff] }
 0x3d3   : > { %4075 = vst.msk [vmem:[#allocation3 + $0x110] sm:$0xff] %vm577_vm1, %v4010_v59  ;;  %5824 = vperm.xlu1 %7098, %v7544_v63   ;;  %v6892_v49 = vpop.f32.mrb[97].mxu0  ;;  %v7548_v42 = vpop.eup %7547  ;;  %v5532_v63 = vld [vmem:[#allocation3 + $0x60] sm:$0xff] }
 0x3d4   : > { %v5531_v58 = vld [vmem:[#allocation3 + $0x58] sm:$0xff]  ;;  %5829 = vperm.xlu0 %7097, %v7546_v39   ;;  %4054 = vst.msk [vmem:[#allocation3 + $0x68] sm:$0xff] %vm577_vm1, %v3989_v60  ;;  %v3936_v31 = vpop.xlane.xlu0 %3935  ;;  %v6893_v23 = vadd.f32 %v6892_v49, %v6891_v9  ;;  %v6894_v29 = vpop.f32.mrb[98].mxu0  ;;  %v3607_v39 = vmul.f32 %v11370_v33, %v3543_v47  ;;  %v11371_v60 = vld [vmem:[#allocation46_spill] sm:$0xff]  ;;  %v3582_v33 = vld [vmem:[#allocation3 + $0x1b0] sm:$0xff] }
 0x3d5   : > { %7557 = vrcp.f32 %v5531_v58  ;;  %v4026_v17 = vadd.f32 %v3936_v31, %v3642_v46  ;;  %v3873_v13 = vpop.xlane.xlu1 %3872  ;;  %v6895_v37 = vpop.f32.mrb[99].mxu0  ;;  %v4537_v58 = vmul.f32 %v11371_v60, %v4153_v5 }
 0x3d6   : > { %v7550_v7 = vpop.eup %7549  ;;  %v4005_v50 = vadd.f32 %v3873_v13, %v3621_v12  ;;  %7559 = vrcp.f32 %v5546_v55  ;;  %v5357_v25 = vadd.f32 %v6893_v23, %v4521_v4  ;;  %v6896_v19 = vadd.f32 %v6895_v37, %v6894_v29  ;;  %v6955_v15 = vpop.f32.mrb[96].mxu1  ;;  %v3559_v55 = vld [vmem:[#allocation3 + $0xf8] sm:$0xff]  ;;  %v5548_v13 = vld [vmem:[#allocation3 + $0xe0] sm:$0xff]  ;;  %v3566_v37 = vld [vmem:[#allocation3 + $0x130] sm:$0xff] }
 0x3d7   : > { %v5547_v32 = vld [vmem:[#allocation3 + $0xd8] sm:$0xff]  ;;  %4091 = vst.msk [vmem:[#allocation3 + $0x190] sm:$0xff] %vm577_vm1, %v4026_v17  ;;  %5754 = vperm.xlu1 %7098, %v7548_v42   ;;  %v6956_v59 = vpop.f32.mrb[97].mxu1  ;;  %v7552_v18 = vpop.eup %7551  ;;  %v4538_v4 = vmul.f32 %v11373_v44, %v4154_v41  ;;  %v5534_v41 = vld [vmem:[#allocation3 + $0x70] sm:$0xff] }
 0x3d8   : > { %5759 = vperm.xlu0 %7097, %v7550_v7   ;;  %7561 = vrcp.f32 %v5547_v32  ;;  %4070 = vst.msk [vmem:[#allocation3 + $0xe8] sm:$0xff] %vm577_vm1, %v4005_v50  ;;  %v3894_v16 = vpop.xlane.xlu0 %3893  ;;  %v5358_v9 = vadd.f32 %v6896_v19, %v4522_v54  ;;  %v6957_v30 = vadd.f32 %v6956_v59, %v6955_v15  ;;  %v6958_v46 = vpop.f32.mrb[98].mxu1  ;;  %v11372_v12 = vld [vmem:[#allocation21_spill] sm:$0xff]  ;;  %v11374_v7 = vld [vmem:[#allocation175_spill] sm:$0xff] }
 0x3d9   : > { %5421 = vst.msk [vmem:[#allocation4 + $0x100] sm:$0xff] %vm706_vm0, %v5357_v25  ;;  %v4012_v0 = vadd.f32 %v3894_v16, %v3628_v10  ;;  %v3831_v34 = vpop.xlane.xlu1 %3830  ;;  %v6959_v31 = vpop.f32.mrb[99].mxu1  ;;  %v3644_v42 = vmul.f32 %v11372_v12, %v3580_v35  ;;  %7563 = vrcp.f32 %v5532_v63  ;;  %v3623_v5 = vmul.f32 %v11374_v7, %v3559_v55  ;;  %v3561_v54 = vld [vmem:[#allocation3 + $0x108] sm:$0xff]  ;;  %v11375_v15 = vld [vmem:[#allocation145_spill] sm:$0xff]  ;;  %v11377_v55 = vld [vmem:[#allocation18_spill] sm:$0xff] }
 0x3da   : > { %v3991_v8 = vadd.f32 %v3831_v34, %v3607_v39  ;;  %5422 = vst.msk [vmem:[#allocation4 + $0x108] sm:$0xff] %vm706_vm0, %v5358_v9  ;;  %v5373_v29 = vadd.f32 %v6957_v30, %v4537_v58  ;;  %v6960_v17 = vadd.f32 %v6959_v31, %v6958_v46  ;;  %v3630_v35 = vmul.f32 %v11375_v15, %v3566_v37  ;;  %v11376_v59 = vld [vmem:[#allocation177_spill] sm:$0xff]  ;;  %v3577_v58 = vld [vmem:[#allocation3 + $0x188] sm:$0xff]  ;;  %v4139_v30 = vld [vmem:[#allocation4 + $0x110] sm:$0xff] }
 0x3db   : > { %v7554_v49 = vpop.eup %7553  ;;  %v5533_v23 = vld [vmem:[#allocation3 + $0x68] sm:$0xff]  ;;  %4077 = vst.msk [vmem:[#allocation3 + $0x120] sm:$0xff] %vm577_vm1, %v4012_v0  ;;  %5834 = vperm.xlu1 %7098, %v7552_v18   ;;  %v3625_v16 = vmul.f32 %v11376_v59, %v3561_v54  ;;  %v3568_v31 = vld [vmem:[#allocation3 + $0x140] sm:$0xff]  ;;  %v5550_v12 = vld [vmem:[#allocation3 + $0xf0] sm:$0xff] }
 0x3dc   : > { %5839 = vperm.xlu0 %7097, %v7554_v49   ;;  %7565 = vrcp.f32 %v5533_v23  ;;  %4056 = vst.msk [vmem:[#allocation3 + $0x78] sm:$0xff] %vm577_vm1, %v3991_v8  ;;  %v3942_v47 = vpop.xlane.xlu0 %3941  ;;  %v7556_v50 = vpop.eup %7555  ;;  %v5374_v45 = vadd.f32 %v6960_v17, %v4538_v4  ;;  %v3646_v49 = vmul.f32 %v11377_v55, %v3582_v33  ;;  %v4140_v8 = vld [vmem:[#allocation4 + $0x118] sm:$0xff]  ;;  %v11378_v4 = vld [vmem:[#allocation179_spill] sm:$0xff]  ;;  %v4523_v17 = vmul.f32 %v10082_v14, %v4139_v30  ;;  %v11379_v54 = vld [vmem:[#allocation26_spill] sm:$0xff] }
 0x3dd   : > { %5437 = vst.msk [vmem:[#allocation4 + $0x180] sm:$0xff] %vm706_vm0, %v5373_v29  ;;  %v4028_v10 = vadd.f32 %v3942_v47, %v3644_v42  ;;  %v3879_v36 = vpop.xlane.xlu1 %3878  ;;  %7567 = vrcp.f32 %v5548_v13  ;;  %v3641_v23 = vmul.f32 %v11378_v4, %v3577_v58  ;;  %v3563_v37 = vld [vmem:[#allocation3 + $0x118] sm:$0xff]  ;;  %v11383_v4 = vld [vmem:[#allocation162_spill] sm:$0xff] }
 0x3de   : > { %v4007_v25 = vadd.f32 %v3879_v36, %v3623_v5  ;;  %5438 = vst.msk [vmem:[#allocation4 + $0x188] sm:$0xff] %vm706_vm0, %v5374_v45  ;;  %v4155_v45 = vld [vmem:[#allocation4 + $0x190] sm:$0xff]  ;;  %v4156_v59 = vld [vmem:[#allocation4 + $0x198] sm:$0xff] }
 0x3df   : > { %v7558_v32 = vpop.eup %7557  ;;  %v5549_v19 = vld [vmem:[#allocation3 + $0xe8] sm:$0xff]  ;;  %4093 = vst.msk [vmem:[#allocation3 + $0x1a0] sm:$0xff] %vm577_vm1, %v4028_v10  ;;  %5764 = vperm.xlu1 %7098, %v7556_v50  }
 0x3e0   : > { %5769 = vperm.xlu0 %7097, %v7558_v32   ;;  %7569 = vrcp.f32 %v5549_v19  ;;  %4072 = vst.msk [vmem:[#allocation3 + $0xf8] sm:$0xff] %vm577_vm1, %v4007_v25  ;;  %v3900_v63 = vpop.xlane.xlu0 %3899  ;;  %v7560_v39 = vpop.eup %7559  ;;  %v3632_v32 = vmul.f32 %v11379_v54, %v3568_v31  ;;  %v11380_v25 = vld [vmem:[#allocation164_spill] sm:$0xff]  ;;  %v3565_v54 = vld [vmem:[#allocation3 + $0x128] sm:$0xff] }
 0x3e1   : > { %v4014_v18 = vadd.f32 %v3900_v63, %v3630_v35  ;;  %v3885_v60 = vpop.xlane.xlu1 %3884  ;;  %7571 = vrcp.f32 %v5534_v41  ;;  %v4524_v19 = vmul.f32 %v11380_v25, %v4140_v8  ;;  %v3584_v63 = vld [vmem:[#allocation3 + $0x1c0] sm:$0xff] }
 0x3e2   : > { %v7562_v9 = vpop.eup %7561  ;;  %v4009_v46 = vadd.f32 %v3885_v60, %v3625_v16  ;;  %v6897_v34 = vpop.f32.mrb[100].mxu0  ;;  %v5552_v16 = vld [vmem:[#allocation3 + $0x100] sm:$0xff] }
 0x3e3   : > { %v5535_v0 = vld [vmem:[#allocation3 + $0x78] sm:$0xff]  ;;  %4079 = vst.msk [vmem:[#allocation3 + $0x130] sm:$0xff] %vm577_vm1, %v4014_v18  ;;  %5844 = vperm.xlu1 %7098, %v7560_v39   ;;  %v6898_v42 = vpop.f32.mrb[101].mxu0  ;;  %v7564_v29 = vpop.eup %7563  ;;  %v11381_v18 = vld [vmem:[#allocation6_spill] sm:$0xff] }
 0x3e4   : > { %5849 = vperm.xlu0 %7097, %v7562_v9   ;;  %7573 = vrcp.f32 %v5535_v0  ;;  %4074 = vst.msk [vmem:[#allocation3 + $0x108] sm:$0xff] %vm577_vm1, %v4009_v46  ;;  %v3948_v44 = vpop.xlane.xlu0 %3947  ;;  %v6899_v13 = vadd.f32 %v6898_v42, %v6897_v34  ;;  %v6900_v47 = vpop.f32.mrb[102].mxu0  ;;  %v3627_v60 = vmul.f32 %v11381_v18, %v3563_v37  ;;  %v4539_v9 = vmul.f32 %v10092_v26, %v4155_v45  ;;  %v11382_v42 = vld [vmem:[#allocation152_spill] sm:$0xff] }
 0x3e5   : > { %v4030_v7 = vadd.f32 %v3948_v44, %v3646_v49  ;;  %v3933_v5 = vpop.xlane.xlu1 %3932  ;;  %v6901_v10 = vpop.f32.mrb[103].mxu0  ;;  %7575 = vrcp.f32 %v5550_v12  ;;  %v3579_v49 = vld [vmem:[#allocation3 + $0x198] sm:$0xff]  ;;  %v3648_v44 = vmul.f32 %v11382_v42, %v3584_v63  ;;  %v3570_v37 = vld [vmem:[#allocation3 + $0x150] sm:$0xff] }
 0x3e6   : > { %v7566_v50 = vpop.eup %7565  ;;  %v4025_v36 = vadd.f32 %v3933_v5, %v3641_v23  ;;  %v5359_v35 = vadd.f32 %v6899_v13, %v4523_v17  ;;  %v6902_v41 = vadd.f32 %v6901_v10, %v6900_v47  ;;  %v6961_v14 = vpop.f32.mrb[100].mxu1  ;;  %v4540_v23 = vmul.f32 %v11383_v4, %v4156_v59  ;;  %v5568_v13 = vld [vmem:[#allocation3 + $0x180] sm:$0xff]  ;;  %v11386_v63 = vld [vmem:[#allocation13_spill] sm:$0xff] }
 0x3e7   : > { %v5551_v15 = vld [vmem:[#allocation3 + $0xf8] sm:$0xff]  ;;  %4095 = vst.msk [vmem:[#allocation3 + $0x1b0] sm:$0xff] %vm577_vm1, %v4030_v7  ;;  %5774 = vperm.xlu1 %7098, %v7564_v29   ;;  %v6962_v33 = vpop.f32.mrb[101].mxu1  ;;  %v7568_v58 = vpop.eup %7567  ;;  %v3629_v59 = vmul.f32 %v11386_v63, %v3565_v54 }
 0x3e8   : > { %5779 = vperm.xlu0 %7097, %v7566_v50   ;;  %7577 = vrcp.f32 %v5551_v15  ;;  %4090 = vst.msk [vmem:[#allocation3 + $0x188] sm:$0xff] %vm577_vm1, %v4025_v36  ;;  %v3906_v39 = vpop.xlane.xlu0 %3905  ;;  %v5360_v30 = vadd.f32 %v6902_v41, %v4524_v19  ;;  %v6963_v46 = vadd.f32 %v6962_v33, %v6961_v14  ;;  %v6964_v0 = vpop.f32.mrb[102].mxu1  ;;  %v11384_v7 = vld [vmem:[#allocation133_spill] sm:$0xff]  ;;  %v11385_v15 = vld [vmem:[#allocation30_spill] sm:$0xff]  ;;  %v5554_v41 = vld [vmem:[#allocation3 + $0x110] sm:$0xff] }
 0x3e9   : > { %5423 = vst.msk [vmem:[#allocation4 + $0x110] sm:$0xff] %vm706_vm0, %v5359_v35  ;;  %v4016_v34 = vadd.f32 %v3906_v39, %v3632_v32  ;;  %v3891_v55 = vpop.xlane.xlu1 %3890  ;;  %v6965_v8 = vpop.f32.mrb[103].mxu1  ;;  %7579 = vrcp.f32 %v5552_v16  ;;  %v3643_v5 = vmul.f32 %v11384_v7, %v3579_v49  ;;  %v3634_v35 = vmul.f32 %v11385_v15, %v3570_v37  ;;  %v3586_v16 = vld [vmem:[#allocation3 + $0x1d0] sm:$0xff]  ;;  %v3572_v49 = vld [vmem:[#allocation3 + $0x160] sm:$0xff]  ;;  %v3567_v7 = vld [vmem:[#allocation3 + $0x138] sm:$0xff] }
 0x3ea   : > { %v7570_v31 = vpop.eup %7569  ;;  %v4011_v12 = vadd.f32 %v3891_v55, %v3627_v60  ;;  %5424 = vst.msk [vmem:[#allocation4 + $0x118] sm:$0xff] %vm706_vm0, %v5360_v30  ;;  %v5375_v26 = vadd.f32 %v6963_v46, %v4539_v9  ;;  %v6966_v17 = vadd.f32 %v6965_v8, %v6964_v0  ;;  %v3581_v60 = vld [vmem:[#allocation3 + $0x1a8] sm:$0xff]  ;;  %v4141_v9 = vld [vmem:[#allocation4 + $0x120] sm:$0xff]  ;;  %v5570_v8 = vld [vmem:[#allocation3 + $0x190] sm:$0xff] }
 0x3eb   : > { %v5553_v29 = vld [vmem:[#allocation3 + $0x108] sm:$0xff]  ;;  %4081 = vst.msk [vmem:[#allocation3 + $0x140] sm:$0xff] %vm577_vm1, %v4016_v34  ;;  %5854 = vperm.xlu1 %7098, %v7568_v58   ;;  %v7572_v50 = vpop.eup %7571  ;;  %v11387_v34 = vld [vmem:[#allocation154_spill] sm:$0xff]  ;;  %v11390_v54 = vld [vmem:[#allocation41_spill] sm:$0xff] }
 0x3ec   : > { %5859 = vperm.xlu0 %7097, %v7570_v31   ;;  %7581 = vrcp.f32 %v5553_v29  ;;  %4076 = vst.msk [vmem:[#allocation3 + $0x118] sm:$0xff] %vm577_vm1, %v4011_v12  ;;  %v3954_v47 = vpop.xlane.xlu0 %3953  ;;  %v5376_v45 = vadd.f32 %v6966_v17, %v4540_v23  ;;  %v3650_v55 = vmul.f32 %v11387_v34, %v3586_v16  ;;  %v4142_v31 = vld [vmem:[#allocation4 + $0x128] sm:$0xff]  ;;  %v4525_v29 = vmul.f32 %v10122_v62, %v4141_v9  ;;  %v4157_v37 = vld [vmem:[#allocation4 + $0x1a0] sm:$0xff] }
 0x3ed   : > { %5439 = vst.msk [vmem:[#allocation4 + $0x190] sm:$0xff] %vm706_vm0, %v5375_v26  ;;  %v4032_v10 = vadd.f32 %v3954_v47, %v3648_v44  ;;  %v3939_v36 = vpop.xlane.xlu1 %3938  ;;  %7583 = vrcp.f32 %v5568_v13  ;;  %v11388_v44 = vld [vmem:[#allocation12_spill] sm:$0xff]  ;;  %v11391_v16 = vld [vmem:[#allocation11_spill] sm:$0xff] }
 0x3ee   : > { %v7574_v32 = vpop.eup %7573  ;;  %v4027_v25 = vadd.f32 %v3939_v36, %v3643_v5  ;;  %5440 = vst.msk [vmem:[#allocation4 + $0x198] sm:$0xff] %vm706_vm0, %v5376_v45  ;;  %v3645_v4 = vmul.f32 %v11388_v44, %v3581_v60 }
 0x3ef   : > { %v5569_v19 = vld [vmem:[#allocation3 + $0x188] sm:$0xff]  ;;  %4097 = vst.msk [vmem:[#allocation3 + $0x1c0] sm:$0xff] %vm577_vm1, %v4032_v10  ;;  %5784 = vperm.xlu1 %7098, %v7572_v50   ;;  %v7576_v33 = vpop.eup %7575  ;;  %v11389_v10 = vld [vmem:[#allocation160_spill] sm:$0xff] }
 0x3f0   : > { %5789 = vperm.xlu0 %7097, %v7574_v32   ;;  %7585 = vrcp.f32 %v5569_v19  ;;  %4092 = vst.msk [vmem:[#allocation3 + $0x198] sm:$0xff] %vm577_vm1, %v4027_v25  ;;  %v3912_v14 = vpop.xlane.xlu0 %3911  ;;  %v3636_v36 = vmul.f32 %v11389_v10, %v3572_v49  ;;  %v4526_v32 = vmul.f32 %v11390_v54, %v4142_v31  ;;  %v11392_v31 = vld [vmem:[#allocation37_spill] sm:$0xff]  ;;  %v5558_v10 = vld [vmem:[#allocation3 + $0x130] sm:$0xff] }
 0x3f1   : > { %v4018_v39 = vadd.f32 %v3912_v14, %v3634_v35  ;;  %v3897_v18 = vpop.xlane.xlu1 %3896  ;;  %7587 = vrcp.f32 %v5554_v41  ;;  %v3588_v35 = vld [vmem:[#allocation3 + $0x1e0] sm:$0xff]  ;;  %v4158_v41 = vld [vmem:[#allocation4 + $0x1a8] sm:$0xff] }
 0x3f2   : > { %v7578_v58 = vpop.eup %7577  ;;  %v4013_v30 = vadd.f32 %v3897_v18, %v3629_v59  ;;  %v6903_v0 = vpop.f32.mrb[104].mxu0  ;;  %v5556_v14 = vld [vmem:[#allocation3 + $0x120] sm:$0xff]  ;;  %v4541_v18 = vmul.f32 %v10132_v51, %v4157_v37 }
 0x3f3   : > { %v5555_v46 = vld [vmem:[#allocation3 + $0x118] sm:$0xff]  ;;  %4083 = vst.msk [vmem:[#allocation3 + $0x150] sm:$0xff] %vm577_vm1, %v4018_v39  ;;  %5864 = vperm.xlu1 %7098, %v7576_v33   ;;  %v6904_v12 = vpop.f32.mrb[105].mxu0  ;;  %v7580_v23 = vpop.eup %7579  ;;  %v3631_v33 = vmul.f32 %v11391_v16, %v3567_v7  ;;  %v3574_v7 = vld [vmem:[#allocation3 + $0x170] sm:$0xff] }
 0x3f4   : > { %5869 = vperm.xlu0 %7097, %v7578_v58   ;;  %7589 = vrcp.f32 %v5555_v46  ;;  %4078 = vst.msk [vmem:[#allocation3 + $0x128] sm:$0xff] %vm577_vm1, %v4013_v30  ;;  %v3960_v42 = vpop.xlane.xlu0 %3959  ;;  %v6905_v26 = vadd.f32 %v6904_v12, %v6903_v0  ;;  %v6906_v17 = vpop.f32.mrb[106].mxu0  ;;  %v3583_v0 = vld [vmem:[#allocation3 + $0x1b8] sm:$0xff]  ;;  %v4542_v12 = vmul.f32 %v10079_v24, %v4158_v41  ;;  %v4143_v41 = vld [vmem:[#allocation4 + $0x130] sm:$0xff] }
 0x3f5   : > { %v4034_v13 = vadd.f32 %v3960_v42, %v3650_v55  ;;  %v3945_v47 = vpop.xlane.xlu1 %3944  ;;  %v6907_v50 = vpop.f32.mrb[107].mxu0  ;;  %7591 = vrcp.f32 %v5570_v8  ;;  %v3652_v8 = vmul.f32 %v11392_v31, %v3588_v35  ;;  %v4144_v16 = vld [vmem:[#allocation4 + $0x138] sm:$0xff]  ;;  %v11397_v31 = vld [vmem:[#allocation16_spill] sm:$0xff] }
 0x3f6   : > { %v7582_v5 = vpop.eup %7581  ;;  %v4029_v45 = vadd.f32 %v3945_v47, %v3645_v4  ;;  %v5361_v19 = vadd.f32 %v6905_v26, %v4525_v29  ;;  %v6908_v15 = vadd.f32 %v6907_v50, %v6906_v17  ;;  %v6967_v62 = vpop.f32.mrb[104].mxu1  ;;  %v5572_v4 = vld [vmem:[#allocation3 + $0x1a0] sm:$0xff]  ;;  %v11393_v29 = vld [vmem:[#allocation141_spill] sm:$0xff]  ;;  %v3569_v50 = vld [vmem:[#allocation3 + $0x148] sm:$0xff] }
 0x3f7   : > { %v5571_v25 = vld [vmem:[#allocation3 + $0x198] sm:$0xff]  ;;  %4099 = vst.msk [vmem:[#allocation3 + $0x1d0] sm:$0xff] %vm577_vm1, %v4034_v13  ;;  %5874 = vperm.xlu1 %7098, %v7580_v23   ;;  %v6968_v63 = vpop.f32.mrb[105].mxu1  ;;  %v7584_v39 = vpop.eup %7583  ;;  %v3647_v26 = vmul.f32 %v11393_v29, %v3583_v0  ;;  %v4527_v0 = vmul.f32 %v10160_v11, %v4143_v41 }
 0x3f8   : > { %5879 = vperm.xlu0 %7097, %v7582_v5   ;;  %7593 = vrcp.f32 %v5571_v25  ;;  %4094 = vst.msk [vmem:[#allocation3 + $0x1a8] sm:$0xff] %vm577_vm1, %v4029_v45  ;;  %v3918_v59 = vpop.xlane.xlu0 %3917  ;;  %v5362_v60 = vadd.f32 %v6908_v15, %v4526_v32  ;;  %v6969_v58 = vadd.f32 %v6968_v63, %v6967_v62  ;;  %v6970_v9 = vpop.f32.mrb[106].mxu1  ;;  %v3590_v62 = vld [vmem:[#allocation3 + $0x1f0] sm:$0xff]  ;;  %v3571_v29 = vld [vmem:[#allocation3 + $0x158] sm:$0xff] }
 0x3f9   : > { %5425 = vst.msk [vmem:[#allocation4 + $0x120] sm:$0xff] %vm706_vm0, %v5361_v19  ;;  %v4020_v30 = vadd.f32 %v3918_v59, %v3636_v36  ;;  %v3903_v46 = vpop.xlane.xlu1 %3902  ;;  %v6971_v55 = vpop.f32.mrb[107].mxu1  ;;  %7595 = vrcp.f32 %v5556_v14  ;;  %v11394_v36 = vld [vmem:[#allocation33_spill] sm:$0xff]  ;;  %v3585_v59 = vld [vmem:[#allocation3 + $0x1c8] sm:$0xff] }
 0x3fa   : > { %v7586_v34 = vpop.eup %7585  ;;  %v4015_v49 = vadd.f32 %v3903_v46, %v3631_v33  ;;  %5426 = vst.msk [vmem:[#allocation4 + $0x128] sm:$0xff] %vm706_vm0, %v5362_v60  ;;  %v5377_v51 = vadd.f32 %v6969_v58, %v4541_v18  ;;  %v6972_v44 = vadd.f32 %v6971_v55, %v6970_v9  ;;  %v3638_v54 = vmul.f32 %v11394_v36, %v3574_v7  ;;  %v11395_v19 = vld [vmem:[#allocation17_spill] sm:$0xff]  ;;  %v5574_v60 = vld [vmem:[#allocation3 + $0x1b0] sm:$0xff] }
 0x3fb   : > { %v5557_v42 = vld [vmem:[#allocation3 + $0x128] sm:$0xff]  ;;  %4085 = vst.msk [vmem:[#allocation3 + $0x160] sm:$0xff] %vm577_vm1, %v4020_v30  ;;  %5954 = vperm.xlu1 %7098, %v7584_v39   ;;  %v7588_v17 = vpop.eup %7587  ;;  %v3633_v15 = vmul.f32 %v11395_v19, %v3569_v50  ;;  %v11396_v9 = vld [vmem:[#allocation36_spill] sm:$0xff] }
 0x3fc   : > { %5959 = vperm.xlu0 %7097, %v7586_v34   ;;  %7597 = vrcp.f32 %v5557_v42  ;;  %4080 = vst.msk [vmem:[#allocation3 + $0x138] sm:$0xff] %vm577_vm1, %v4015_v49  ;;  %v3966_v23 = vpop.xlane.xlu0 %3965  ;;  %v5378_v24 = vadd.f32 %v6972_v44, %v4542_v12  ;;  %v3654_v30 = vmul.f32 %v11396_v9, %v3590_v62  ;;  %v4528_v42 = vmul.f32 %v10105_v61, %v4144_v16  ;;  %v11398_v36 = vld [vmem:[#allocation148_spill] sm:$0xff]  ;;  %v3587_v62 = vld [vmem:[#allocation3 + $0x1d8] sm:$0xff] }
 0x3fd   : > { %5441 = vst.msk [vmem:[#allocation4 + $0x1a0] sm:$0xff] %vm706_vm0, %v5377_v51  ;;  %v4036_v13 = vadd.f32 %v3966_v23, %v3652_v8  ;;  %v3951_v47 = vpop.xlane.xlu1 %3950  ;;  %7599 = vrcp.f32 %v5572_v4  ;;  %v3649_v8 = vmul.f32 %v11397_v31, %v3585_v59  ;;  %v4159_v51 = vld [vmem:[#allocation4 + $0x1b0] sm:$0xff]  ;;  %v5576_v59 = vld [vmem:[#allocation3 + $0x1c0] sm:$0xff] }
 0x3fe   : > { %v7590_v5 = vpop.eup %7589  ;;  %v4031_v37 = vadd.f32 %v3951_v47, %v3647_v26  ;;  %5442 = vst.msk [vmem:[#allocation4 + $0x1a8] sm:$0xff] %vm706_vm0, %v5378_v24  ;;  %v4160_v26 = vld [vmem:[#allocation4 + $0x1b8] sm:$0xff]  ;;  %v4543_v61 = vmul.f32 %v10170_v57, %v4159_v51  ;;  %v4146_v51 = vld [vmem:[#allocation4 + $0x148] sm:$0xff] }
 0x3ff   : > { %v5573_v45 = vld [vmem:[#allocation3 + $0x1a8] sm:$0xff]  ;;  %4101 = vst.msk [vmem:[#allocation3 + $0x1e0] sm:$0xff] %vm577_vm1, %v4036_v13  ;;  %5884 = vperm.xlu1 %7098, %v7588_v17   ;;  %v7592_v32 = vpop.eup %7591 }
 0x400   : > { %5889 = vperm.xlu0 %7097, %v7590_v5   ;;  %7601 = vrcp.f32 %v5573_v45  ;;  %4096 = vst.msk [vmem:[#allocation3 + $0x1b8] sm:$0xff] %vm577_vm1, %v4031_v37  ;;  %v5560_v37 = vld [vmem:[#allocation3 + $0x140] sm:$0xff] }
 0x401   : > { %v3924_v25 = vpop.xlane.xlu0 %3923  ;;  %7603 = vrcp.f32 %v5558_v10 }
 0x402   : > { %v7594_v35 = vpop.eup %7593  ;;  %v4022_v14 = vadd.f32 %v3924_v25, %v3638_v54  ;;  %v3909_v63 = vpop.xlane.xlu1 %3908  ;;  %v3635_v54 = vmul.f32 %v11398_v36, %v3571_v29  ;;  %v4544_v25 = vmul.f32 %v10119_v21, %v4160_v26  ;;  %v11399_v21 = vld [vmem:[#allocation24_spill] sm:$0xff] }
 0x403   : > { %v5559_v33 = vld [vmem:[#allocation3 + $0x138] sm:$0xff]  ;;  %v4017_v39 = vadd.f32 %v3909_v63, %v3633_v15  ;;  %v6909_v18 = vpop.f32.mrb[108].mxu0  ;;  %5964 = vperm.xlu1 %7098, %v7592_v32   ;;  %v7596_v46 = vpop.eup %7595  ;;  %v5578_v29 = vld [vmem:[#allocation3 + $0x1d0] sm:$0xff] }
 0x404   : > { %5969 = vperm.xlu0 %7097, %v7594_v35   ;;  %7605 = vrcp.f32 %v5559_v33  ;;  %4087 = vst.msk [vmem:[#allocation3 + $0x170] sm:$0xff] %vm577_vm1, %v4022_v14  ;;  %v6910_v58 = vpop.f32.mrb[109].mxu0  ;;  %v3651_v33 = vmul.f32 %v11399_v21, %v3587_v62 }
 0x405   : > { %4082 = vst.msk [vmem:[#allocation3 + $0x148] sm:$0xff] %vm577_vm1, %v4017_v39  ;;  %v6911_v34 = vadd.f32 %v6910_v58, %v6909_v18  ;;  %v6912_v55 = vpop.f32.mrb[110].mxu0  ;;  %v3972_v49 = vpop.xlane.xlu0 %3971  ;;  %7607 = vrcp.f32 %v5574_v60  ;;  %v3573_v60 = vld [vmem:[#allocation3 + $0x168] sm:$0xff] }
 0x406   : > { %v7598_v12 = vpop.eup %7597  ;;  %v4038_v44 = vadd.f32 %v3972_v49, %v3654_v30  ;;  %v6913_v4 = vpop.f32.mrb[111].mxu0  ;;  %v4145_v49 = vld [vmem:[#allocation4 + $0x140] sm:$0xff] }
 0x407   : > { %v3957_v23 = vpop.xlane.xlu1 %3956  ;;  %v5575_v17 = vld [vmem:[#allocation3 + $0x1b8] sm:$0xff]  ;;  %v5363_v24 = vadd.f32 %v6911_v34, %v4527_v0  ;;  %v6914_v11 = vadd.f32 %v6913_v4, %v6912_v55  ;;  %v6973_v47 = vpop.f32.mrb[108].mxu1  ;;  %5894 = vperm.xlu1 %7098, %v7596_v46   ;;  %v5562_v46 = vld [vmem:[#allocation3 + $0x150] sm:$0xff]  ;;  %v11400_v0 = vld [vmem:[#allocation159_spill] sm:$0xff] }
 0x408   : > { %v4033_v13 = vadd.f32 %v3957_v23, %v3649_v8  ;;  %5899 = vperm.xlu0 %7097, %v7598_v12   ;;  %7609 = vrcp.f32 %v5575_v17  ;;  %4103 = vst.msk [vmem:[#allocation3 + $0x1f0] sm:$0xff] %vm577_vm1, %v4038_v44  ;;  %v6974_v7 = vpop.f32.mrb[109].mxu1  ;;  %v7600_v5 = vpop.eup %7599  ;;  %v3637_v34 = vmul.f32 %v11400_v0, %v3573_v60  ;;  %v3589_v8 = vld [vmem:[#allocation3 + $0x1e8] sm:$0xff]  ;;  %v4529_v23 = vmul.f32 %v10196_v6, %v4145_v49 }
 0x409   : > { %5427 = vst.msk [vmem:[#allocation4 + $0x130] sm:$0xff] %vm706_vm0, %v5363_v24  ;;  %v5364_v50 = vadd.f32 %v6914_v11, %v4528_v42  ;;  %v6975_v45 = vadd.f32 %v6974_v7, %v6973_v47  ;;  %v6976_v10 = vpop.f32.mrb[110].mxu1  ;;  %7611 = vrcp.f32 %v5560_v37  ;;  %v11401_v24 = vld [vmem:[#allocation155_spill] sm:$0xff]  ;;  %v4161_v7 = vld [vmem:[#allocation4 + $0x1c0] sm:$0xff] }
 0x40a   : > { %4098 = vst.msk [vmem:[#allocation3 + $0x1c8] sm:$0xff] %vm577_vm1, %v4033_v13  ;;  %v7602_v32 = vpop.eup %7601  ;;  %v6977_v19 = vpop.f32.mrb[111].mxu1  ;;  %v3653_v11 = vmul.f32 %v11401_v24, %v3589_v8  ;;  %v3575_v13 = vld [vmem:[#allocation3 + $0x178] sm:$0xff]  ;;  %v4545_v62 = vmul.f32 %v10204_v56, %v4161_v7 }
 0x40b   : > { %v3915_v15 = vpop.xlane.xlu1 %3914  ;;  %5428 = vst.msk [vmem:[#allocation4 + $0x138] sm:$0xff] %vm706_vm0, %v5364_v50  ;;  %v5379_v35 = vadd.f32 %v6975_v45, %v4543_v61  ;;  %v6978_v57 = vadd.f32 %v6977_v19, %v6976_v10  ;;  %5974 = vperm.xlu1 %7098, %v7600_v5   ;;  %v7604_v63 = vpop.eup %7603  ;;  %v4530_v50 = vmul.f32 %v10152_v2, %v4146_v51  ;;  %v11402_v19 = vld [vmem:[#allocation34_spill] sm:$0xff] }
 0x40c   : > { %v4019_v41 = vadd.f32 %v3915_v15, %v3635_v54  ;;  %5979 = vperm.xlu0 %7097, %v7602_v32   ;;  %v5561_v14 = vld [vmem:[#allocation3 + $0x148] sm:$0xff]  ;;  %v3639_v15 = vmul.f32 %v11402_v19, %v3575_v13  ;;  %v4163_v13 = vld [vmem:[#allocation4 + $0x1d0] sm:$0xff] }
 0x40d   : > { %7613 = vrcp.f32 %v5561_v14  ;;  %5443 = vst.msk [vmem:[#allocation4 + $0x1b0] sm:$0xff] %vm706_vm0, %v5379_v35  ;;  %v5380_v16 = vadd.f32 %v6978_v57, %v4544_v25  ;;  %v4162_v54 = vld [vmem:[#allocation4 + $0x1c8] sm:$0xff]  ;;  %v5564_v35 = vld [vmem:[#allocation3 + $0x160] sm:$0xff] }
 0x40e   : > { %4084 = vst.msk [vmem:[#allocation3 + $0x158] sm:$0xff] %vm577_vm1, %v4019_v41  ;;  %v7606_v39 = vpop.eup %7605  ;;  %7615 = vrcp.f32 %v5576_v59 }
 0x40f   : > { %v3963_v18 = vpop.xlane.xlu1 %3962  ;;  %5444 = vst.msk [vmem:[#allocation4 + $0x1b8] sm:$0xff] %vm706_vm0, %v5380_v16  ;;  %5904 = vperm.xlu1 %7098, %v7604_v63   ;;  %v7608_v30 = vpop.eup %7607  ;;  %v3591_v16 = vld [vmem:[#allocation3 + $0x1f8] sm:$0xff] }
 0x410   : > { %v4035_v58 = vadd.f32 %v3963_v18, %v3651_v33  ;;  %5909 = vperm.xlu0 %7097, %v7606_v39   ;;  %v4546_v33 = vmul.f32 %v10167_v43, %v4162_v54 }
 0x411   : > { %v5577_v9 = vld [vmem:[#allocation3 + $0x1c8] sm:$0xff] }
 0x412   : > { %7617 = vrcp.f32 %v5577_v9  ;;  %4100 = vst.msk [vmem:[#allocation3 + $0x1d8] sm:$0xff] %vm577_vm1, %v4035_v58  ;;  %v7610_v55 = vpop.eup %7609  ;;  %v5580_v58 = vld [vmem:[#allocation3 + $0x1e0] sm:$0xff] }
 0x413   : > { %v3921_v31 = vpop.xlane.xlu1 %3920  ;;  %v6915_v42 = vpop.f32.mrb[112].mxu0  ;;  %5984 = vperm.xlu1 %7098, %v7608_v30   ;;  %7619 = vrcp.f32 %v5562_v46  ;;  %v11403_v30 = vld [vmem:[#allocation31_spill] sm:$0xff] }
 0x414   : > { %v4021_v12 = vadd.f32 %v3921_v31, %v3637_v34  ;;  %5989 = vperm.xlu0 %7097, %v7610_v55   ;;  %v6916_v4 = vpop.f32.mrb[113].mxu0  ;;  %v7612_v47 = vpop.eup %7611  ;;  %v3655_v46 = vmul.f32 %v11403_v30, %v3591_v16  ;;  %v5566_v31 = vld [vmem:[#allocation3 + $0x170] sm:$0xff]  ;;  %v4150_v16 = vld [vmem:[#allocation4 + $0x168] sm:$0xff] }
 0x415   : > { %v5563_v44 = vld [vmem:[#allocation3 + $0x158] sm:$0xff]  ;;  %v6917_v26 = vadd.f32 %v6916_v4, %v6915_v42  ;;  %v6918_v17 = vpop.f32.mrb[114].mxu0  ;;  %v5649_v30 = vld [vmem:[#allocation4 + $0x8] sm:$0xff] }
 0x416   : > { %7621 = vrcp.f32 %v5563_v44  ;;  %4086 = vst.msk [vmem:[#allocation3 + $0x168] sm:$0xff] %vm577_vm1, %v4021_v12  ;;  %v6919_v5 = vpop.f32.mrb[115].mxu0  ;;  %v4147_v12 = vld [vmem:[#allocation4 + $0x150] sm:$0xff]  ;;  %v4148_v44 = vld [vmem:[#allocation4 + $0x158] sm:$0xff] }
 0x417   : > { %v3969_v61 = vpop.xlane.xlu1 %3968  ;;  %v7614_v37 = vpop.eup %7613  ;;  %v5365_v45 = vadd.f32 %v6917_v26, %v4529_v23  ;;  %v6920_v10 = vadd.f32 %v6919_v5, %v6918_v17  ;;  %5914 = vperm.xlu1 %7098, %v7612_v47   ;;  %7623 = vrcp.f32 %v5578_v29  ;;  %v4531_v29 = vmul.f32 %v10232_v28, %v4147_v12  ;;  %v5582_v26 = vld [vmem:[#allocation3 + $0x1f0] sm:$0xff]  ;;  %v4166_v12 = vld [vmem:[#allocation4 + $0x1e8] sm:$0xff] }
 0x418   : > { %v4037_v36 = vadd.f32 %v3969_v61, %v3653_v11  ;;  %v6979_v6 = vpop.f32.mrb[112].mxu1  ;;  %5919 = vperm.xlu0 %7097, %v7614_v37   ;;  %v7616_v14 = vpop.eup %7615  ;;  %v4532_v5 = vmul.f32 %v10207_v27, %v4148_v44  ;;  %v4547_v28 = vmul.f32 %v10242_v38, %v4163_v13 }
 0x419   : > { %v5579_v32 = vld [vmem:[#allocation3 + $0x1d8] sm:$0xff]  ;;  %v6980_v25 = vpop.f32.mrb[113].mxu1  ;;  %5429 = vst.msk [vmem:[#allocation4 + $0x140] sm:$0xff] %vm706_vm0, %v5365_v45  ;;  %v5366_v57 = vadd.f32 %v6920_v10, %v4530_v50 }
 0x41a   : > { %7625 = vrcp.f32 %v5579_v32  ;;  %4102 = vst.msk [vmem:[#allocation3 + $0x1e8] sm:$0xff] %vm577_vm1, %v4037_v36  ;;  %v6981_v2 = vadd.f32 %v6980_v25, %v6979_v6  ;;  %v6982_v41 = vpop.f32.mrb[114].mxu1  ;;  %v4164_v45 = vld [vmem:[#allocation4 + $0x1d8] sm:$0xff] }
 0x41b   : > { %v6983_v63 = vpop.f32.mrb[115].mxu1  ;;  %v3927_v59 = vpop.xlane.xlu1 %3926  ;;  %5430 = vst.msk [vmem:[#allocation4 + $0x148] sm:$0xff] %vm706_vm0, %v5366_v57  ;;  %5994 = vperm.xlu1 %7098, %v7616_v14   ;;  %7627 = vrcp.f32 %v5564_v35 }
 0x41c   : > { %v7618_v21 = vpop.eup %7617  ;;  %v5381_v39 = vadd.f32 %v6981_v2, %v4545_v62  ;;  %v6984_v56 = vadd.f32 %v6983_v63, %v6982_v41  ;;  %v4023_v18 = vadd.f32 %v3927_v59, %v3639_v15  ;;  %v11404_v15 = vld [vmem:[#allocation44_spill] sm:$0xff]  ;;  %v4149_v63 = vld [vmem:[#allocation4 + $0x160] sm:$0xff] }
 0x41d   : > { %v5565_v60 = vld [vmem:[#allocation3 + $0x168] sm:$0xff]  ;;  %5999 = vperm.xlu0 %7097, %v7618_v21   ;;  %v7620_v0 = vpop.eup %7619  ;;  %v4548_v62 = vmul.f32 %v11404_v15, %v4164_v45 }
 0x41e   : > { %7629 = vrcp.f32 %v5565_v60  ;;  %5445 = vst.msk [vmem:[#allocation4 + $0x1c0] sm:$0xff] %vm706_vm0, %v5381_v39  ;;  %v5382_v9 = vadd.f32 %v6984_v56, %v4546_v33  ;;  %v5720_v33 = vpop.permute.xlu0 %5719  ;;  %v4533_v56 = vmul.f32 %v10310_v52, %v4149_v63  ;;  %v5653_v63 = vld [vmem:[#allocation4 + $0x28] sm:$0xff] }
 0x41f   : > { %4088 = vst.msk [vmem:[#allocation3 + $0x178] sm:$0xff] %vm577_vm1, %v4023_v18  ;;  %v3975_v43 = vpop.xlane.xlu1 %3974  ;;  %5924 = vperm.xlu1 %7098, %v7620_v0   ;;  %7631 = vrcp.f32 %v5580_v58  ;;  %v4534_v58 = vmul.f32 %v10282_v40, %v4150_v16  ;;  %v5648_v0 = vld [vmem:[#allocation4] sm:$0xff]  ;;  %v4167_v16 = vld [vmem:[#allocation4 + $0x1f0] sm:$0xff] }
 0x420   : > { %v7622_v34 = vpop.eup %7621  ;;  %5446 = vst.msk [vmem:[#allocation4 + $0x1c8] sm:$0xff] %vm706_vm0, %v5382_v9  ;;  %v4039_v55 = vadd.f32 %v3975_v43, %v3655_v46  ;;  %v4165_v9 = vld [vmem:[#allocation4 + $0x1e0] sm:$0xff] }
 0x421   : > { %v5581_v49 = vld [vmem:[#allocation3 + $0x1e8] sm:$0xff]  ;;  %5929 = vperm.xlu0 %7097, %v7622_v34   ;;  %v7624_v8 = vpop.eup %7623  ;;  %v10530_v34 = vmul.f32 %v5720_v33, %v5649_v30  ;;  %v4549_v52 = vmul.f32 %v10319_v1, %v4165_v9 }
 0x422   : > { %7633 = vrcp.f32 %v5581_v49  ;;  %4104 = vst.msk [vmem:[#allocation3 + $0x1f8] sm:$0xff] %vm577_vm1, %v4039_v55 }
 0x423   : > { %v6921_v51 = vpop.f32.mrb[116].mxu0  ;;  %6004 = vperm.xlu1 %7098, %v7624_v8   ;;  %7635 = vrcp.f32 %v5566_v31 }
 0x424   : > { %v7626_v42 = vpop.eup %7625  ;;  %v6922_v23 = vpop.f32.mrb[117].mxu0 }
 0x425   : > { %6009 = vperm.xlu0 %7097, %v7626_v42   ;;  %v6923_v17 = vadd.f32 %v6922_v23, %v6921_v51  ;;  %v6924_v24 = vpop.f32.mrb[118].mxu0  ;;  %v7628_v11 = vpop.eup %7627 }
 0x426   : > { %v5567_v4 = vld [vmem:[#allocation3 + $0x178] sm:$0xff]  ;;  %v6925_v47 = vpop.f32.mrb[119].mxu0 }
 0x427   : > { %7637 = vrcp.f32 %v5567_v4  ;;  %v5367_v61 = vadd.f32 %v6923_v17, %v4531_v29  ;;  %v6926_v37 = vadd.f32 %v6925_v47, %v6924_v24  ;;  %v6985_v50 = vpop.f32.mrb[116].mxu1  ;;  %5934 = vperm.xlu1 %7098, %v7628_v11   ;;  %v5665_v29 = vld [vmem:[#allocation4 + $0x88] sm:$0xff]  ;;  %v4550_v17 = vmul.f32 %v10290_v22, %v4166_v12  ;;  %v5664_v47 = vld [vmem:[#allocation4 + $0x80] sm:$0xff] }
 0x428   : > { %v7630_v7 = vpop.eup %7629  ;;  %7639 = vrcp.f32 %v5582_v26  ;;  %v6986_v36 = vpop.f32.mrb[117].mxu1 }
 0x429   : > { %v5583_v10 = vld [vmem:[#allocation3 + $0x1f8] sm:$0xff]  ;;  %5939 = vperm.xlu0 %7097, %v7630_v7   ;;  %5431 = vst.msk [vmem:[#allocation4 + $0x150] sm:$0xff] %vm706_vm0, %v5367_v61  ;;  %v5368_v6 = vadd.f32 %v6926_v37, %v4532_v5  ;;  %v6987_v54 = vadd.f32 %v6986_v36, %v6985_v50  ;;  %v6988_v32 = vpop.f32.mrb[118].mxu1  ;;  %v7632_v25 = vpop.eup %7631 }
 0x42a   : > { %7641 = vrcp.f32 %v5583_v10  ;;  %v6989_v19 = vpop.f32.mrb[119].mxu1  ;;  %v5651_v37 = vld [vmem:[#allocation4 + $0x18] sm:$0xff]  ;;  %v5650_v10 = vld [vmem:[#allocation4 + $0x10] sm:$0xff] }
 0x42b   : > { %5432 = vst.msk [vmem:[#allocation4 + $0x158] sm:$0xff] %vm706_vm0, %v5368_v6  ;;  %v5383_v35 = vadd.f32 %v6987_v54, %v4547_v28  ;;  %v6990_v57 = vadd.f32 %v6989_v19, %v6988_v32  ;;  %6014 = vperm.xlu1 %7098, %v7632_v25   ;;  %v5667_v6 = vld [vmem:[#allocation4 + $0x98] sm:$0xff]  ;;  %v4151_v32 = vld [vmem:[#allocation4 + $0x170] sm:$0xff] }
 0x42c   : > { %v7634_v27 = vpop.eup %7633  ;;  %v5666_v19 = vld [vmem:[#allocation4 + $0x90] sm:$0xff] }
 0x42d   : > { %6019 = vperm.xlu0 %7097, %v7634_v27   ;;  %5447 = vst.msk [vmem:[#allocation4 + $0x1d0] sm:$0xff] %vm706_vm0, %v5383_v35  ;;  %v5384_v38 = vadd.f32 %v6990_v57, %v4548_v62  ;;  %v7636_v2 = vpop.eup %7635  ;;  %v4152_v35 = vld [vmem:[#allocation4 + $0x178] sm:$0xff] }
 0x42f   : > { %5448 = vst.msk [vmem:[#allocation4 + $0x1d8] sm:$0xff] %vm706_vm0, %v5384_v38  ;;  %5944 = vperm.xlu1 %7098, %v7636_v2   ;;  %v4535_v38 = vmul.f32 %v10325_v53, %v4151_v32  ;;  %v4168_v53 = vld [vmem:[#allocation4 + $0x1f8] sm:$0xff] }
 0x431   : > { %v7638_v41 = vpop.eup %7637 }
 0x432   : > { %5949 = vperm.xlu0 %7097, %v7638_v41   ;;  %v7640_v14 = vpop.eup %7639 }
 0x433   : > { %v6927_v21 = vpop.f32.mrb[120].mxu0  ;;  %6024 = vperm.xlu1 %7098, %v7640_v14  }
 0x434   : > { %v7642_v59 = vpop.eup %7641  ;;  %v6928_v39 = vpop.f32.mrb[121].mxu0 }
 0x435   : > { %v6929_v18 = vadd.f32 %v6928_v39, %v6927_v21  ;;  %v6930_v60 = vpop.f32.mrb[122].mxu0  ;;  %v5652_v39 = vld [vmem:[#allocation4 + $0x20] sm:$0xff] }
 0x436   : > { %6029 = vperm.xlu0 %7097, %v7642_v59   ;;  %v6931_v46 = vpop.f32.mrb[123].mxu0  ;;  %v5715_v43 = vpop.permute.xlu1 %5714 }
 0x437   : > { %v5369_v55 = vadd.f32 %v6929_v18, %v4533_v56  ;;  %v6932_v49 = vadd.f32 %v6931_v46, %v6930_v60  ;;  %v6991_v31 = vpop.f32.mrb[120].mxu1  ;;  %v10532_v8 = vmul.f32 %v5715_v43, %v5648_v0  ;;  %v4536_v18 = vmul.f32 %v10296_v48, %v4152_v35  ;;  %v5669_v48 = vld [vmem:[#allocation4 + $0xa8] sm:$0xff] }
 0x438   : > { %v6992_v42 = vpop.f32.mrb[121].mxu1  ;;  %v4551_v0 = vmul.f32 %v10336_v3, %v4167_v16  ;;  %v5673_v35 = vld [vmem:[#allocation4 + $0xc8] sm:$0xff] }
 0x439   : > { %5433 = vst.msk [vmem:[#allocation4 + $0x160] sm:$0xff] %vm706_vm0, %v5369_v55  ;;  %v5370_v51 = vadd.f32 %v6932_v49, %v4534_v58  ;;  %v6096_v40 = vpack.c.bf16 %v10530_v34, %v10532_v8  ;;  %v6993_v44 = vadd.f32 %v6992_v42, %v6991_v31  ;;  %v6994_v4 = vpop.f32.mrb[122].mxu1 }
 0x43a   : > { %v6995_v23 = vpop.f32.mrb[123].mxu1  ;;  %v5795_v1 = vpop.permute.xlu1 %5794 }
 0x43b   : > { %v5800_v26 = vpop.permute.xlu0 %5799  ;;  %5434 = vst.msk [vmem:[#allocation4 + $0x168] sm:$0xff] %vm706_vm0, %v5370_v51  ;;  %v5385_v24 = vadd.f32 %v6993_v44, %v4549_v52  ;;  %v6996_v11 = vadd.f32 %v6995_v23, %v6994_v4  ;;  %v6048_v7 = vmul.f32 %v5795_v1, %v5664_v47  ;;  %v5668_v51 = vld [vmem:[#allocation4 + $0xa0] sm:$0xff]  ;;  %v4552_v4 = vmul.f32 %v10300_v20, %v4168_v53  ;;  %v5654_v47 = vld [vmem:[#allocation4 + $0x30] sm:$0xff] }
 0x43c   : > { %v6049_v13 = vmul.f32 %v5800_v26, %v5665_v29 }
 0x43d   : > { %5449 = vst.msk [vmem:[#allocation4 + $0x1e0] sm:$0xff] %vm706_vm0, %v5385_v24  ;;  %v5386_v5 = vadd.f32 %v6996_v11, %v4550_v17  ;;  %v5655_v24 = vld [vmem:[#allocation4 + $0x38] sm:$0xff] }
 0x43e   : > { %v6104_v61 = vpack.c.bf16 %v6049_v13, %v6048_v7  ;;  %v5725_v22 = vpop.permute.xlu1 %5724 }
 0x43f   : > { %v5730_v50 = vpop.permute.xlu0 %5729  ;;  %5450 = vst.msk [vmem:[#allocation4 + $0x1e8] sm:$0xff] %vm706_vm0, %v5386_v5  ;;  %v10544_v36 = vmul.f32 %v5725_v22, %v5650_v10  ;;  %v5671_v5 = vld [vmem:[#allocation4 + $0xb8] sm:$0xff] }
 0x440   : > { %v10542_v45 = vmul.f32 %v5730_v50, %v5651_v37  ;;  %6136 = vrot.lane.b32.xlu1 %v6104_v61, %s7702_s28  ;;  %v5670_v50 = vld [vmem:[#allocation4 + $0xb0] sm:$0xff] }
 0x442   : > { %v6097_v28 = vpack.c.bf16 %v10542_v45, %v10544_v36  ;;  %v5805_v27 = vpop.permute.xlu1 %5804 }
 0x443   : > { %v5810_v54 = vpop.permute.xlu0 %5809  ;;  %v6050_v62 = vmul.f32 %v5805_v27, %v5666_v19  ;;  %v5656_v19 = vld [vmem:[#allocation4 + $0x40] sm:$0xff] }
 0x444   : > { %v6051_v25 = vmul.f32 %v5810_v54, %v5667_v6  ;;  %v6933_v15 = vpop.f32.mrb[124].mxu0  ;;  %v5657_v54 = vld [vmem:[#allocation4 + $0x48] sm:$0xff] }
 0x445   : > { %v6934_v57 = vpop.f32.mrb[125].mxu0 }
 0x446   : > { %v6105_v2 = vpack.c.bf16 %v6051_v25, %v6050_v62  ;;  %v6935_v41 = vadd.f32 %v6934_v57, %v6933_v15  ;;  %v6936_v14 = vpop.f32.mrb[126].mxu0  ;;  %v5735_v56 = vpop.permute.xlu1 %5734 }
 0x447   : > { %v5740_v59 = vpop.permute.xlu0 %5739  ;;  %v6937_v21 = vpop.f32.mrb[127].mxu0  ;;  %v10553_v30 = vmul.f32 %v5735_v56, %v5652_v39  ;;  %v5658_v39 = vld [vmem:[#allocation4 + $0x50] sm:$0xff] }
 0x448   : > { %v10550_v33 = vmul.f32 %v5740_v59, %v5653_v63  ;;  %v5371_v60 = vadd.f32 %v6935_v41, %v4535_v38  ;;  %v6938_v58 = vadd.f32 %v6937_v21, %v6936_v14  ;;  %v6997_v9 = vpop.f32.mrb[124].mxu1  ;;  %6138 = vrot.lane.b32.xlu0 %v6105_v2, %s7702_s28  ;;  %v5672_v2 = vld [vmem:[#allocation4 + $0xc0] sm:$0xff]  ;;  %v5659_v59 = vld [vmem:[#allocation4 + $0x58] sm:$0xff] }
 0x449   : > { %v6998_v46 = vpop.f32.mrb[125].mxu1 }
 0x44a   : > { %5435 = vst.msk [vmem:[#allocation4 + $0x170] sm:$0xff] %vm706_vm0, %v5371_v60  ;;  %v5372_v43 = vadd.f32 %v6938_v58, %v4536_v18  ;;  %v6098_v55 = vpack.c.bf16 %v10550_v33, %v10553_v30  ;;  %v6999_v49 = vadd.f32 %v6998_v46, %v6997_v9  ;;  %v7000_v31 = vpop.f32.mrb[126].mxu1  ;;  %v5815_v44 = vpop.permute.xlu1 %5814  ;;  %v5675_v58 = vld [vmem:[#allocation4 + $0xd8] sm:$0xff]  ;;  %v5674_v46 = vld [vmem:[#allocation4 + $0xd0] sm:$0xff] }
 0x44b   : > { %v5820_v12 = vpop.permute.xlu0 %5819  ;;  %v7001_v42 = vpop.f32.mrb[127].mxu1  ;;  %v6052_v29 = vmul.f32 %v5815_v44, %v5668_v51 }
 0x44c   : > { %v6053_v52 = vmul.f32 %v5820_v12, %v5669_v48  ;;  %5436 = vst.msk [vmem:[#allocation4 + $0x178] sm:$0xff] %vm706_vm0, %v5372_v43  ;;  %v5387_v23 = vadd.f32 %v6999_v49, %v4551_v0  ;;  %v7002_v3 = vadd.f32 %v7001_v42, %v7000_v31  ;;  %v5661_v31 = vld [vmem:[#allocation4 + $0x68] sm:$0xff]  ;;  %v5660_v42 = vld [vmem:[#allocation4 + $0x60] sm:$0xff] }
 0x44e   : > { %5451 = vst.msk [vmem:[#allocation4 + $0x1f0] sm:$0xff] %vm706_vm0, %v5387_v23  ;;  %v5388_v26 = vadd.f32 %v7002_v3, %v4552_v4  ;;  %v6106_v17 = vpack.c.bf16 %v6053_v52, %v6052_v29  ;;  %v5745_v1 = vpop.permute.xlu1 %5744  ;;  %v5677_v4 = vld [vmem:[#allocation4 + $0xe8] sm:$0xff]  ;;  %v5676_v29 = vld [vmem:[#allocation4 + $0xe0] sm:$0xff] }
 0x44f   : > { %v5750_v11 = vpop.permute.xlu0 %5749  ;;  %v10566_v7 = vmul.f32 %v5745_v1, %v5654_v47 }
 0x450   : > { %v10563_v13 = vmul.f32 %v5750_v11, %v5655_v24  ;;  %5452 = vst.msk [vmem:[#allocation4 + $0x1f8] sm:$0xff] %vm706_vm0, %v5388_v26  ;;  %6140 = vrot.lane.b32.xlu1 %v6106_v17, %s7702_s28  ;;  %v5663_v11 = vld [vmem:[#allocation4 + $0x78] sm:$0xff] }
 0x452   : > { %v6099_v20 = vpack.c.bf16 %v10563_v13, %v10566_v7  ;;  %v5825_v10 = vpop.permute.xlu1 %5824 }
 0x453   : > { %v5830_v61 = vpop.permute.xlu0 %5829  ;;  %v6054_v22 = vmul.f32 %v5825_v10, %v5670_v50  ;;  %v5679_v10 = vld [vmem:[#allocation4 + $0xf8] sm:$0xff] }
 0x454   : > { %v6055_v37 = vmul.f32 %v5830_v61, %v5671_v5  ;;  %v5662_v5 = vld [vmem:[#allocation4 + $0x70] sm:$0xff] }
 0x456   : > { %v6107_v6 = vpack.c.bf16 %v6055_v37, %v6054_v22  ;;  %v5755_v27 = vpop.permute.xlu1 %5754 }
 0x457   : > { %v5760_v32 = vpop.permute.xlu0 %5759  ;;  %v10573_v15 = vmul.f32 %v5755_v27, %v5656_v19 }
 0x458   : > { %v10571_v25 = vmul.f32 %v5760_v32, %v5657_v54  ;;  %6142 = vrot.lane.b32.xlu0 %v6107_v6, %s7702_s28  ;;  %v5678_v54 = vld [vmem:[#allocation4 + $0xf0] sm:$0xff] }
 0x45a   : > { %v6100_v62 = vpack.c.bf16 %v10571_v25, %v10573_v15  ;;  %v5835_v41 = vpop.permute.xlu1 %5834 }
 0x45b   : > { %v5840_v57 = vpop.permute.xlu0 %5839  ;;  %v6056_v14 = vmul.f32 %v5835_v41, %v5672_v2  ;;  %v5680_v2 = vld [vmem:[#allocation4 + $0x100] sm:$0xff] }
 0x45c   : > { %v6057_v38 = vmul.f32 %v5840_v57, %v5673_v35  ;;  %v5681_v35 = vld [vmem:[#allocation4 + $0x108] sm:$0xff] }
 0x45e   : > { %v6108_v63 = vpack.c.bf16 %v6057_v38, %v6056_v14  ;;  %v5765_v56 = vpop.permute.xlu1 %5764 }
 0x45f   : > { %v5770_v16 = vpop.permute.xlu0 %5769  ;;  %v10580_v18 = vmul.f32 %v5765_v56, %v5658_v39  ;;  %v5696_v56 = vld [vmem:[#allocation4 + $0x180] sm:$0xff] }
 0x460   : > { %v10578_v21 = vmul.f32 %v5770_v16, %v5659_v59  ;;  %6144 = vrot.lane.b32.xlu1 %v6108_v63, %s7702_s28  ;;  %v5697_v59 = vld [vmem:[#allocation4 + $0x188] sm:$0xff] }
 0x462   : > { %v6101_v60 = vpack.c.bf16 %v10578_v21, %v10580_v18  ;;  %v5845_v0 = vpop.permute.xlu1 %5844 }
 0x463   : > { %v5850_v9 = vpop.permute.xlu0 %5849  ;;  %v6058_v43 = vmul.f32 %v5845_v0, %v5674_v46  ;;  %v5683_v46 = vld [vmem:[#allocation4 + $0x118] sm:$0xff] }
 0x464   : > { %v6059_v53 = vmul.f32 %v5850_v9, %v5675_v58 }
 0x466   : > { %v6109_v49 = vpack.c.bf16 %v6059_v53, %v6058_v43  ;;  %v5775_v52 = vpop.permute.xlu1 %5774 }
 0x467   : > { %v5780_v48 = vpop.permute.xlu0 %5779  ;;  %v10587_v51 = vmul.f32 %v5775_v52, %v5660_v42  ;;  %v5699_v52 = vld [vmem:[#allocation4 + $0x198] sm:$0xff] }
 0x468   : > { %v10585_v12 = vmul.f32 %v5780_v48, %v5661_v31  ;;  %6146 = vrot.lane.b32.xlu0 %v6109_v49, %s7702_s28  ;;  %v5682_v49 = vld [vmem:[#allocation4 + $0x110] sm:$0xff] }
 0x46a   : > { %v6102_v44 = vpack.c.bf16 %v10585_v12, %v10587_v51  ;;  %v5855_v26 = vpop.permute.xlu1 %5854 }
 0x46b   : > { %v5860_v23 = vpop.permute.xlu0 %5859  ;;  %v6060_v17 = vmul.f32 %v5855_v26, %v5676_v29 }
 0x46c   : > { %v6061_v3 = vmul.f32 %v5860_v23, %v5677_v4 }
 0x46e   : > { %v6110_v24 = vpack.c.bf16 %v6061_v3, %v6060_v17  ;;  %v5785_v61 = vpop.permute.xlu1 %5784  ;;  %v5698_v3 = vld [vmem:[#allocation4 + $0x190] sm:$0xff] }
 0x46f   : > { %v5790_v47 = vpop.permute.xlu0 %5789  ;;  %v10594_v37 = vmul.f32 %v5785_v61, %v5662_v5  ;;  %v5684_v5 = vld [vmem:[#allocation4 + $0x120] sm:$0xff] }
 0x470   : > { %v10592_v1 = vmul.f32 %v5790_v47, %v5663_v11  ;;  %6148 = vrot.lane.b32.xlu1 %v6110_v24, %s7702_s28  ;;  %v5685_v24 = vld [vmem:[#allocation4 + $0x128] sm:$0xff] }
 0x472   : > { %v6103_v50 = vpack.c.bf16 %v10592_v1, %v10594_v37  ;;  %v5865_v32 = vpop.permute.xlu1 %5864 }
 0x473   : > { %v5870_v22 = vpop.permute.xlu0 %5869  ;;  %v6062_v19 = vmul.f32 %v5865_v32, %v5678_v54 }
 0x474   : > { %v6063_v6 = vmul.f32 %v5870_v22, %v5679_v10 }
 0x476   : > { %v6111_v27 = vpack.c.bf16 %v6063_v6, %v6062_v19  ;;  %v5875_v41 = vpop.permute.xlu1 %5874  ;;  %v5701_v6 = vld [vmem:[#allocation4 + $0x1a8] sm:$0xff]  ;;  %v5700_v19 = vld [vmem:[#allocation4 + $0x1a0] sm:$0xff] }
 0x477   : > { %v5880_v57 = vpop.permute.xlu0 %5879  ;;  %v6064_v14 = vmul.f32 %v5875_v41, %v5680_v2 }
 0x478   : > { %v6065_v38 = vmul.f32 %v5880_v57, %v5681_v35  ;;  %6150 = vrot.lane.b32.xlu0 %v6111_v27, %s7702_s28 }
 0x47a   : > { %v6112_v63 = vpack.c.bf16 %v6065_v38, %v6064_v14  ;;  %v5955_v58 = vpop.permute.xlu1 %5954  ;;  %v5687_v38 = vld [vmem:[#allocation4 + $0x138] sm:$0xff]  ;;  %v5686_v14 = vld [vmem:[#allocation4 + $0x130] sm:$0xff] }
 0x47b   : > { %v5960_v16 = vpop.permute.xlu0 %5959  ;;  %v6080_v9 = vmul.f32 %v5955_v58, %v5696_v56 }
 0x47c   : > { %v6081_v39 = vmul.f32 %v5960_v16, %v5697_v59  ;;  %6160 = vrot.lane.b32.xlu1 %v6112_v63, %s7703_s29 }
 0x47e   : > { %v6120_v53 = vpack.c.bf16 %v6081_v39, %v6080_v9  ;;  %v5885_v31 = vpop.permute.xlu1 %5884  ;;  %v5703_v39 = vld [vmem:[#allocation4 + $0x1b8] sm:$0xff]  ;;  %v5702_v9 = vld [vmem:[#allocation4 + $0x1b0] sm:$0xff] }
 0x47f   : > { %v5890_v0 = vpop.permute.xlu0 %5889  ;;  %v6066_v48 = vmul.f32 %v5885_v31, %v5682_v49  ;;  %v5688_v31 = vld [vmem:[#allocation4 + $0x140] sm:$0xff] }
 0x480   : > { %v6067_v43 = vmul.f32 %v5890_v0, %v5683_v46  ;;  %6184 = vrot.lane.b32.xlu1 %v6120_v53, %s7704_s30 }
 0x482   : > { %v6113_v42 = vpack.c.bf16 %v6067_v43, %v6066_v48  ;;  %v5965_v29 = vpop.permute.xlu1 %5964  ;;  %v5689_v43 = vld [vmem:[#allocation4 + $0x148] sm:$0xff] }
 0x483   : > { %v5970_v4 = vpop.permute.xlu0 %5969  ;;  %v6082_v26 = vmul.f32 %v5965_v29, %v5698_v3  ;;  %v5704_v29 = vld [vmem:[#allocation4 + $0x1c0] sm:$0xff] }
 0x484   : > { %v6083_v23 = vmul.f32 %v5970_v4, %v5699_v52  ;;  %6162 = vrot.lane.b32.xlu0 %v6113_v42, %s7703_s29 }
 0x486   : > { %v6121_v17 = vpack.c.bf16 %v6083_v23, %v6082_v26  ;;  %v5895_v61 = vpop.permute.xlu1 %5894  ;;  %v5705_v23 = vld [vmem:[#allocation4 + $0x1c8] sm:$0xff] }
 0x487   : > { %v5900_v11 = vpop.permute.xlu0 %5899  ;;  %v6068_v10 = vmul.f32 %v5895_v61, %v5684_v5  ;;  %v5690_v61 = vld [vmem:[#allocation4 + $0x150] sm:$0xff] }
 0x488   : > { %v6069_v47 = vmul.f32 %v5900_v11, %v5685_v24  ;;  %6186 = vrot.lane.b32.xlu0 %v6121_v17, %s7704_s30 }
 0x48a   : > { %v6114_v22 = vpack.c.bf16 %v6069_v47, %v6068_v10  ;;  %v5975_v27 = vpop.permute.xlu1 %5974  ;;  %v5691_v47 = vld [vmem:[#allocation4 + $0x158] sm:$0xff] }
 0x48b   : > { %v5980_v54 = vpop.permute.xlu0 %5979  ;;  %v6084_v35 = vmul.f32 %v5975_v27, %v5700_v19  ;;  %v5706_v27 = vld [vmem:[#allocation4 + $0x1d0] sm:$0xff] }
 0x48c   : > { %v6085_v32 = vmul.f32 %v5980_v54, %v5701_v6  ;;  %6164 = vrot.lane.b32.xlu1 %v6114_v22, %s7703_s29 }
 0x48e   : > { %v6122_v57 = vpack.c.bf16 %v6085_v32, %v6084_v35  ;;  %v5905_v63 = vpop.permute.xlu1 %5904  ;;  %v5707_v32 = vld [vmem:[#allocation4 + $0x1d8] sm:$0xff] }
 0x48f   : > { %v5910_v2 = vpop.permute.xlu0 %5909  ;;  %v6070_v59 = vmul.f32 %v5905_v63, %v5686_v14  ;;  %v5692_v63 = vld [vmem:[#allocation4 + $0x160] sm:$0xff] }
 0x490   : > { %v6071_v41 = vmul.f32 %v5910_v2, %v5687_v38  ;;  %6188 = vrot.lane.b32.xlu1 %v6122_v57, %s7704_s30 }
 0x492   : > { %v6115_v16 = vpack.c.bf16 %v6071_v41, %v6070_v59  ;;  %v5985_v53 = vpop.permute.xlu1 %5984  ;;  %v5693_v41 = vld [vmem:[#allocation4 + $0x168] sm:$0xff] }
 0x493   : > { %v5990_v56 = vpop.permute.xlu0 %5989  ;;  %v6086_v46 = vmul.f32 %v5985_v53, %v5702_v9  ;;  %v5708_v53 = vld [vmem:[#allocation4 + $0x1e0] sm:$0xff] }
 0x494   : > { %v6087_v58 = vmul.f32 %v5990_v56, %v5703_v39  ;;  %6166 = vrot.lane.b32.xlu0 %v6115_v16, %s7703_s29 }
 0x496   : > { %v6123_v0 = vpack.c.bf16 %v6087_v58, %v6086_v46  ;;  %v5915_v48 = vpop.permute.xlu1 %5914  ;;  %v5709_v58 = vld [vmem:[#allocation4 + $0x1e8] sm:$0xff] }
 0x497   : > { %v5920_v49 = vpop.permute.xlu0 %5919  ;;  %v6072_v52 = vmul.f32 %v5915_v48, %v5688_v31  ;;  %v5695_v31 = vld [vmem:[#allocation4 + $0x178] sm:$0xff] }
 0x498   : > { %v6073_v42 = vmul.f32 %v5920_v49, %v5689_v43  ;;  %6190 = vrot.lane.b32.xlu0 %v6123_v0, %s7704_s30 }
 0x49a   : > { %v6116_v4 = vpack.c.bf16 %v6073_v42, %v6072_v52  ;;  %v5995_v26 = vpop.permute.xlu1 %5994  ;;  %v5694_v42 = vld [vmem:[#allocation4 + $0x170] sm:$0xff] }
 0x49b   : > { %v6088_v24 = vmul.f32 %v5995_v26, %v5704_v29  ;;  %v5711_v29 = vld [vmem:[#allocation4 + $0x1f8] sm:$0xff] }
 0x49c   : > { %v6000_v3 = vpop.permute.xlu0 %5999  ;;  %6168 = vrot.lane.b32.xlu1 %v6116_v4, %s7703_s29 }
 0x49d   : > { %v6089_v17 = vmul.f32 %v6000_v3, %v5705_v23 }
 0x49e   : > { %v5925_v10 = vpop.permute.xlu1 %5924 }
 0x49f   : > { %v6124_v11 = vpack.c.bf16 %v6089_v17, %v6088_v24  ;;  %v6074_v6 = vmul.f32 %v5925_v10, %v5690_v61  ;;  %v5710_v17 = vld [vmem:[#allocation4 + $0x1f0] sm:$0xff] }
 0x4a0   : > { %v5930_v5 = vpop.permute.xlu0 %5929 }
 0x4a1   : > { %v6075_v22 = vmul.f32 %v5930_v5, %v5691_v47  ;;  %6192 = vrot.lane.b32.xlu1 %v6124_v11, %s7704_s30 }
 0x4a2   : > { %v6005_v35 = vpop.permute.xlu1 %6004 }
 0x4a3   : > { %v6117_v54 = vpack.c.bf16 %v6075_v22, %v6074_v6  ;;  %v6090_v38 = vmul.f32 %v6005_v35, %v5706_v27 }
 0x4a4   : > { %v6010_v19 = vpop.permute.xlu0 %6009 }
 0x4a5   : > { %v6091_v57 = vmul.f32 %v6010_v19, %v5707_v32  ;;  %6170 = vrot.lane.b32.xlu0 %v6117_v54, %s7703_s29 }
 0x4a6   : > { %v5935_v59 = vpop.permute.xlu1 %5934 }
 0x4a7   : > { %v6125_v2 = vpack.c.bf16 %v6091_v57, %v6090_v38  ;;  %v6076_v39 = vmul.f32 %v5935_v59, %v5692_v63 }
 0x4a8   : > { %v5940_v14 = vpop.permute.xlu0 %5939 }
 0x4a9   : > { %v6077_v16 = vmul.f32 %v5940_v14, %v5693_v41  ;;  %6194 = vrot.lane.b32.xlu0 %v6125_v2, %s7704_s30 }
 0x4aa   : > { %v6015_v46 = vpop.permute.xlu1 %6014 }
 0x4ab   : > { %v6118_v56 = vpack.c.bf16 %v6077_v16, %v6076_v39  ;;  %v6092_v43 = vmul.f32 %v6015_v46, %v5708_v53 }
 0x4ac   : > { %v6020_v9 = vpop.permute.xlu0 %6019 }
 0x4ad   : > { %v6093_v0 = vmul.f32 %v6020_v9, %v5709_v58  ;;  %6172 = vrot.lane.b32.xlu1 %v6118_v56, %s7703_s29 }
 0x4ae   : > { %v5945_v52 = vpop.permute.xlu1 %5944 }
 0x4af   : > { %v6126_v49 = vpack.c.bf16 %v6093_v0, %v6092_v43  ;;  %v6078_v23 = vmul.f32 %v5945_v52, %v5694_v42 }
 0x4b1   : > { %v5950_v48 = vpop.permute.xlu0 %5949  ;;  %6196 = vrot.lane.b32.xlu1 %v6126_v49, %s7704_s30 }
 0x4b2   : > { %v6079_v4 = vmul.f32 %v5950_v48, %v5695_v31  ;;  %v6025_v24 = vpop.permute.xlu1 %6024 }
 0x4b3   : > { %v6094_v47 = vmul.f32 %v6025_v24, %v5710_v17 }
 0x4b4   : > { %v6119_v3 = vpack.c.bf16 %v6079_v4, %v6078_v23 }
 0x4b5   : > { %v6030_v26 = vpop.permute.xlu0 %6029 }
 0x4b6   : > { %v6095_v11 = vmul.f32 %v6030_v26, %v5711_v29  ;;  %6174 = vrot.lane.b32.xlu0 %v6119_v3, %s7703_s29  ;;  %v6137_v61 = vpop.permute.xlu1 %6136 }
 0x4b7   : > { %v6202_v35 = vsel %vm706_vm0, %v6096_v40, %v6137_v61 }
 0x4b8   : > { %v6127_v5 = vpack.c.bf16 %v6095_v11, %v6094_v47 }
 0x4ba   : > { %6198 = vrot.lane.b32.xlu0 %v6127_v5, %s7704_s30  ;;  %v6139_v22 = vpop.permute.xlu0 %6138 }
 0x4bb   : > { %v6205_v34 = vsel %vm706_vm0, %v6097_v28, %v6139_v22 }
 0x4c2   : > { %v6141_v10 = vpop.permute.xlu1 %6140 }
 0x4c3   : > { %v6208_v16 = vsel %vm706_vm0, %v6098_v55, %v6141_v10 }
 0x4ca   : > { %v6143_v54 = vpop.permute.xlu0 %6142 }
 0x4cb   : > { %v6211_v28 = vsel %vm706_vm0, %v6099_v20, %v6143_v54 }
 0x4d2   : > { %v6145_v6 = vpop.permute.xlu1 %6144 }
 0x4d3   : > { %v6214_v55 = vsel %vm706_vm0, %v6100_v62, %v6145_v6 }
 0x4da   : > { %v6147_v19 = vpop.permute.xlu0 %6146 }
 0x4db   : > { %v6217_v20 = vsel %vm706_vm0, %v6101_v60, %v6147_v19 }
 0x4e2   : > { %v6149_v32 = vpop.permute.xlu1 %6148 }
 0x4e3   : > { %v6220_v62 = vsel %vm706_vm0, %v6102_v44, %v6149_v32 }
 0x4ea   : > { %v6151_v57 = vpop.permute.xlu0 %6150 }
 0x4eb   : > { %v6223_v60 = vsel %vm706_vm0, %v6103_v50, %v6151_v57 }
 0x4ee   : > { %v6161_v27 = vpop.permute.xlu1 %6160 }
 0x4ef   : > { %v6226_v38 = vsel %vm6224_vm2, %v6202_v35, %v6161_v27 }
 0x4f2   : > { %v6185_v2 = vpop.permute.xlu1 %6184 }
 0x4f3   : > { %v6243_v41 = vsel %vm6241_vm3, %v6226_v38, %v6185_v2 }
 0x4f4   : > { %6266 = vst [vmem:[%s10625_s9] sm:$0xff] %v6243_v41 }
 0x4f6   : > { %v6163_v14 = vpop.permute.xlu0 %6162 }
 0x4f7   : > { %v6228_v8 = vsel %vm6224_vm2, %v6205_v34, %v6163_v14 }
 0x4fa   : > { %v6187_v40 = vpop.permute.xlu0 %6186 }
 0x4fb   : > { %v6246_v63 = vsel %vm6241_vm3, %v6228_v8, %v6187_v40 }
 0x4fc   : > { %6267 = vst [vmem:[%s10625_s9 + $0x8] sm:$0xff] %v6246_v63 }
 0x4fe   : > { %v6165_v59 = vpop.permute.xlu1 %6164 }
 0x4ff   : > { %v6230_v39 = vsel %vm6224_vm2, %v6208_v16, %v6165_v59 }
 0x502   : > { %v6189_v56 = vpop.permute.xlu1 %6188 }
 0x503   : > { %v6249_v45 = vsel %vm6241_vm3, %v6230_v39, %v6189_v56 }
 0x504   : > { %6268 = vst [vmem:[%s10625_s9 + $0x10] sm:$0xff] %v6249_v45 }
 0x506   : > { %v6167_v36 = vpop.permute.xlu0 %6166 }
 0x507   : > { %v6232_v58 = vsel %vm6224_vm2, %v6211_v28, %v6167_v36 }
 0x50a   : > { %v6191_v9 = vpop.permute.xlu0 %6190 }
 0x50b   : > { %v6252_v33 = vsel %vm6241_vm3, %v6232_v58, %v6191_v9 }
 0x50c   : > { %6269 = vst [vmem:[%s10625_s9 + $0x18] sm:$0xff] %v6252_v33 }
 0x50e   : > { %v6169_v30 = vpop.permute.xlu1 %6168 }
 0x50f   : > { %v6234_v53 = vsel %vm6224_vm2, %v6214_v55, %v6169_v30 }
 0x513   : > { %v6193_v46 = vpop.permute.xlu1 %6192 }
 0x514   : > { %v6255_v13 = vsel %vm6241_vm3, %v6234_v53, %v6193_v46 }
 0x515   : > { %6270 = vst [vmem:[%s10625_s9 + $0x20] sm:$0xff] %v6255_v13 }
 0x517   : > { %v6171_v7 = vpop.permute.xlu0 %6170 }
 0x518   : > { %v6236_v0 = vsel %vm6224_vm2, %v6217_v20, %v6171_v7 }
 0x51b   : > { %v6195_v43 = vpop.permute.xlu0 %6194 }
 0x51c   : > { %v6258_v25 = vsel %vm6241_vm3, %v6236_v0, %v6195_v43 }
 0x51d   : > { %6271 = vst [vmem:[%s10625_s9 + $0x28] sm:$0xff] %v6258_v25 }
 0x51f   : > { %v6173_v15 = vpop.permute.xlu1 %6172 }
 0x520   : > { %v6238_v49 = vsel %vm6224_vm2, %v6220_v62, %v6173_v15 }
 0x523   : > { %v6197_v31 = vpop.permute.xlu1 %6196 }
 0x524   : > { %v6261_v21 = vsel %vm6241_vm3, %v6238_v49, %v6197_v31 }
 0x525   : > { %6272 = vst [vmem:[%s10625_s9 + $0x30] sm:$0xff] %v6261_v21 }
 0x528   : > { %v6175_v18 = vpop.permute.xlu0 %6174 }
 0x529   : > { %v6240_v48 = vsel %vm6224_vm2, %v6223_v60, %v6175_v18 }
 0x52c   : > { %v6199_v42 = vpop.permute.xlu0 %6198 }
 0x52d   : > { %v6264_v52 = vsel %vm6241_vm3, %v6240_v48, %v6199_v42 }
 0x52e   : > { %6273 = vst [vmem:[%s10625_s9 + $0x38] sm:$0xff] %v6264_v52 }
 0x52f PF: > { %s13_s18 = sadd.s32 1, %s7697_s18   ;;  %s11405_s12 = smov %s7677_s13 }
 0x530   : > { %p10_p12 = scmp.ge.s32.totalorder %s13_s18, 6   ;;  %s11406_s13 = smov %s7776_s25 }
 0x531   : > { %s11407_s14 = smov %s7689_s16  ;;  %s11408_s15 = smov %s7693_s17 }
 0x532   : > { %s11409_s16 = smov %s11412_s19  ;;  %s11410_s17 = smov %s11416_s20 }
 0x533   :  { %12 = sbr.rel (!%p10_p12) target bundleno = 4 (0x4), region = 122 }

</bundles_post_ra>
